<compile_context>
chip_gen: v7x
topology: tpu7x:2x2x1
jax: 0.10.0
libtpu: 0.0.40
codegen_flags: <defaults>
</compile_context>

<pallas_src>
import jax
import jax.numpy as jnp
from jax import lax
from jax.experimental import pallas as pl
from jax.experimental.pallas import tpu as pltpu


def _round_up(v, m):
    return ((v + m - 1) // m) * m


def double_conv_kernel(xpad_ref, w1_ref, t1_ref, w2_ref, t2_ref, out_ref, mid_ref):
    # xpad_ref: (1, H+2, W+2, Cin_p)   bf16  spatially + channel zero-padded input
    # w1_ref:   (9, Cin_p, Cout_p)     bf16  conv1 weights (BN1 scale folded in)
    # t1_ref:   (1, Cout_p)            f32   folded BN1 shift (includes conv1 bias)
    # w2_ref:   (9, Cout_p, Cout_p)    bf16  conv2 weights (BN2 scale folded in)
    # t2_ref:   (1, Cout_p)            f32   folded BN2 shift (includes conv2 bias)
    # out_ref:  (1, H, W, Cout_p)      f32
    # mid_ref:  VMEM (H+2, W+2, Cout_p) bf16 scratch: zero-padded intermediate activation
    H, W, Cout_p = out_ref.shape[1], out_ref.shape[2], out_ref.shape[3]
    Cin_p = xpad_ref.shape[3]

    # ---- conv1 (+ folded BN1 scale) -> shift -> ReLU : 9 MXU matmuls ------------------
    acc = jnp.zeros((H * W, Cout_p), jnp.float32)
    for ky in range(3):
        for kx in range(3):
            patch = xpad_ref[0, ky:ky + H, kx:kx + W, :]          # (H, W, Cin_p) bf16
            acc = acc + jnp.dot(patch.reshape(H * W, Cin_p),
                                w1_ref[ky * 3 + kx],
                                preferred_element_type=jnp.float32)
    y = jnp.maximum(acc + t1_ref[...], 0.0)                        # (H*W, Cout_p) f32

    # Stash ReLU output into the interior of the padded scratch; zero only the 1-px border
    # (interior is fully overwritten every grid step, border must stay zero).
    mid_ref[1:1 + H, 1:1 + W, :] = y.reshape(H, W, Cout_p).astype(mid_ref.dtype)
    zrow = jnp.zeros((1, W + 2, Cout_p), mid_ref.dtype)
    mid_ref[0:1, :, :] = zrow
    mid_ref[H + 1:H + 2, :, :] = zrow
    zcol = jnp.zeros((H + 2, 1, Cout_p), mid_ref.dtype)
    mid_ref[:, 0:1, :] = zcol
    mid_ref[:, W + 1:W + 2, :] = zcol

    # ---- conv2 (+ folded BN2 scale) -> shift -> ReLU : 9 MXU matmuls ------------------
    acc2 = jnp.zeros((H * W, Cout_p), jnp.float32)
    for ky in range(3):
        for kx in range(3):
            patch = mid_ref[ky:ky + H, kx:kx + W, :]               # (H, W, Cout_p) bf16
            acc2 = acc2 + jnp.dot(patch.reshape(H * W, Cout_p),
                                  w2_ref[ky * 3 + kx],
                                  preferred_element_type=jnp.float32)
    z = jnp.maximum(acc2 + t2_ref[...], 0.0)
    out_ref[0] = z.reshape(H, W, Cout_p)


def double_conv(x_nchw,
                w1_oihw, b1, g1, beta1, m1, v1,
                w2_oihw, b2, g2, beta2, m2, v2,
                eps=1e-5):
    """Pallas DoubleConv forward. x_nchw: (N, Cin, H, W) float32 -> (N, Cout, H, W) float32.

    Implements the default DoubleConv configuration: kernel=(3, 3), padding=1, eval-mode BN.
    """
    N, Cin, H, W = x_nchw.shape
    Cout = w1_oihw.shape[0]
    assert w1_oihw.shape[2] == 3 and w1_oihw.shape[3] == 3, "kernel expects 3x3 convs"
    assert w2_oihw.shape[2] == 3 and w2_oihw.shape[3] == 3, "kernel expects 3x3 convs"

    Cin_p = _round_up(Cin, 128)    # lane-pad channels -> dense vregs / MXU-friendly N,K
    Cout_p = _round_up(Cout, 128)

    # ---- glue: layout conversion, BN folding, channel/spatial padding (plain JAX) ------
    x = jnp.transpose(x_nchw, (0, 2, 3, 1)).astype(jnp.float32)              # NHWC
    xpad = jnp.pad(x, ((0, 0), (1, 1), (1, 1), (0, Cin_p - Cin))).astype(jnp.bfloat16)

    s1 = (g1 / jnp.sqrt(v1 + eps)).astype(jnp.float32)
    t1 = (beta1 + (b1 - m1) * s1).astype(jnp.float32)       # BN(conv + b1) = conv*s1 + t1
    s2 = (g2 / jnp.sqrt(v2 + eps)).astype(jnp.float32)
    t2 = (beta2 + (b2 - m2) * s2).astype(jnp.float32)

    # HWIO weights with BN scale folded into the output-channel axis, zero-padded channels.
    w1_hwio = jnp.transpose(w1_oihw, (2, 3, 1, 0)).astype(jnp.float32) * s1
    w2_hwio = jnp.transpose(w2_oihw, (2, 3, 1, 0)).astype(jnp.float32) * s2
    w1_p = jnp.zeros((3, 3, Cin_p, Cout_p), jnp.float32).at[:, :, :Cin, :Cout].set(w1_hwio)
    w2_p = jnp.zeros((3, 3, Cout_p, Cout_p), jnp.float32).at[:, :, :Cout, :Cout].set(w2_hwio)
    w1_k = w1_p.reshape(9, Cin_p, Cout_p).astype(jnp.bfloat16)
    w2_k = w2_p.reshape(9, Cout_p, Cout_p).astype(jnp.bfloat16)

    t1_p = jnp.zeros((1, Cout_p), jnp.float32).at[0, :Cout].set(t1)
    t2_p = jnp.zeros((1, Cout_p), jnp.float32).at[0, :Cout].set(t2)

    Hp, Wp = H + 2, W + 2
    out_nhwc = pl.pallas_call(
        double_conv_kernel,
        out_shape=jax.ShapeDtypeStruct((N, H, W, Cout_p), jnp.float32),
        grid=(N,),
        in_specs=[
            pl.BlockSpec((1, Hp, Wp, Cin_p), lambda n: (n, 0, 0, 0)),
            pl.BlockSpec((9, Cin_p, Cout_p), lambda n: (0, 0, 0)),
            pl.BlockSpec((1, Cout_p), lambda n: (0, 0)),
            pl.BlockSpec((9, Cout_p, Cout_p), lambda n: (0, 0, 0)),
            pl.BlockSpec((1, Cout_p), lambda n: (0, 0)),
        ],
        out_specs=pl.BlockSpec((1, H, W, Cout_p), lambda n: (n, 0, 0, 0)),
        scratch_shapes=[pltpu.VMEM((Hp, Wp, Cout_p), jnp.bfloat16)],
        compiler_params=pltpu.CompilerParams(dimension_semantics=("parallel",)),
    )(xpad, w1_k, t1_p, w2_k, t2_p)

    out = out_nhwc[:, :, :, :Cout]                        # drop channel padding
    return jnp.transpose(out, (0, 3, 1, 2))               # back to NCHW


# ---------------- pure-JAX reference (mirrors bf16 compute, f32 accumulation) ----------------
def _ref_double_conv(x_nchw, w1, b1, g1, beta1, m1, v1, w2, b2, g2, beta2, m2, v2, eps=1e-5):
    x = jnp.transpose(x_nchw, (0, 2, 3, 1)).astype(jnp.float32)
    s1 = g1 / jnp.sqrt(v1 + eps)
    t1 = beta1 + (b1 - m1) * s1
    s2 = g2 / jnp.sqrt(v2 + eps)
    t2 = beta2 + (b2 - m2) * s2
    w1h = (jnp.transpose(w1, (2, 3, 1, 0)).astype(jnp.float32) * s1).astype(jnp.bfloat16)
    w2h = (jnp.transpose(w2, (2, 3, 1, 0)).astype(jnp.float32) * s2).astype(jnp.bfloat16)

    y = lax.conv_general_dilated(x.astype(jnp.bfloat16), w1h, (1, 1), ((1, 1), (1, 1)),
                                 dimension_numbers=("NHWC", "HWIO", "NHWC"),
                                 preferred_element_type=jnp.float32)
    y = jnp.maximum(y + t1, 0.0).astype(jnp.bfloat16)
    z = lax.conv_general_dilated(y, w2h, (1, 1), ((1, 1), (1, 1)),
                                 dimension_numbers=("NHWC", "HWIO", "NHWC"),
                                 preferred_element_type=jnp.float32)
    z = jnp.maximum(z + t2, 0.0)
    return jnp.transpose(z, (0, 3, 1, 2))


if __name__ == "__main__":
    key = jax.random.PRNGKey(0)
    ks = jax.random.split(key, 14)
    N, Cin, Cout, H, W = 2, 4, 8, 16, 16

    x = jax.random.normal(ks[0], (N, Cin, H, W), jnp.float32)

    # conv1 / BN1 params (PyTorch shapes: weight OIHW, per-channel BN vectors)
    w1 = 0.2 * jax.random.normal(ks[1], (Cout, Cin, 3, 3), jnp.float32)
    b1 = 0.1 * jax.random.normal(ks[2], (Cout,), jnp.float32)
    g1 = 1.0 + 0.1 * jax.random.normal(ks[3], (Cout,), jnp.float32)
    beta1 = 0.1 * jax.random.normal(ks[4], (Cout,), jnp.float32)
    m1 = 0.05 * jax.random.normal(ks[5], (Cout,), jnp.float32)
    v1 = 0.5 + 0.5 * jnp.abs(jax.random.normal(ks[6], (Cout,), jnp.float32))

    # conv2 / BN2 params
    w2 = 0.2 * jax.random.normal(ks[7], (Cout, Cout, 3, 3), jnp.float32)
    b2 = 0.1 * jax.random.normal(ks[8], (Cout,), jnp.float32)
    g2 = 1.0 + 0.1 * jax.random.normal(ks[9], (Cout,), jnp.float32)
    beta2 = 0.1 * jax.random.normal(ks[10], (Cout,), jnp.float32)
    m2 = 0.05 * jax.random.normal(ks[11], (Cout,), jnp.float32)
    v2 = 0.5 + 0.5 * jnp.abs(jax.random.normal(ks[12], (Cout,), jnp.float32))

    out = double_conv(x, w1, b1, g1, beta1, m1, v1, w2, b2, g2, beta2, m2, v2)
    out = jax.block_until_ready(out)

    ref = _ref_double_conv(x, w1, b1, g1, beta1, m1, v1, w2, b2, g2, beta2, m2, v2)

    assert out.shape == (N, Cout, H, W), out.shape
    err = float(jnp.max(jnp.abs(out - ref)))
    assert jnp.allclose(out, ref, atol=3e-2, rtol=3e-2), err
    print("KERNEL_OK")
</pallas_src>

<mosaic_0001>
module attributes {stable_mosaic.version = 11 : i64} {
  func.func @double_conv_kernel(%arg0: i32, %arg1: memref<1x18x18x128xbf16, #tpu.memory_space<vmem>>, %arg2: memref<9x128x128xbf16, #tpu.memory_space<vmem>>, %arg3: memref<1x128xf32, #tpu.memory_space<vmem>>, %arg4: memref<9x128x128xbf16, #tpu.memory_space<vmem>>, %arg5: memref<1x128xf32, #tpu.memory_space<vmem>>, %arg6: memref<1x16x16x128xf32, #tpu.memory_space<vmem>>, %arg7: memref<18x18x128xbf16, #tpu.memory_space<vmem>>) attributes {dimension_semantics = [#tpu.dimension_semantics<parallel>], iteration_bounds = array<i64: 2>, scalar_prefetch = 0 : i64, scratch_operands = 1 : i64, tpu.core_type = #tpu.core_type<tc>, window_params = [{transform_indices = @transform_0, window_bounds = array<i64: 1, 18, 18, 128>}, {pipeline_mode = #tpu.pipeline_mode<synchronous>, transform_indices = @transform_1, window_bounds = array<i64: 9, 128, 128>}, {pipeline_mode = #tpu.pipeline_mode<synchronous>, transform_indices = @transform_2, window_bounds = array<i64: 1, 128>}, {pipeline_mode = #tpu.pipeline_mode<synchronous>, transform_indices = @transform_3, window_bounds = array<i64: 9, 128, 128>}, {pipeline_mode = #tpu.pipeline_mode<synchronous>, transform_indices = @transform_4, window_bounds = array<i64: 1, 128>}, {transform_indices = @transform_5, window_bounds = array<i64: 1, 16, 16, 128>}]} {
    %cst = arith.constant 0.000000e+00 : f32
    %0 = vector.broadcast %cst : f32 to vector<256x128xf32>
    %c0 = arith.constant 0 : index
    %c0_0 = arith.constant 0 : index
    %c0_1 = arith.constant 0 : index
    %c0_2 = arith.constant 0 : index
    %1 = vector.load %arg1[%c0, %c0_0, %c0_1, %c0_2] : memref<1x18x18x128xbf16, #tpu.memory_space<vmem>>, vector<1x16x16x128xbf16>
    %2 = vector.shape_cast %1 : vector<1x16x16x128xbf16> to vector<16x16x128xbf16>
    %3 = vector.shape_cast %2 : vector<16x16x128xbf16> to vector<256x128xbf16>
    %c0_3 = arith.constant 0 : index
    %c0_4 = arith.constant 0 : index
    %c0_5 = arith.constant 0 : index
    %4 = vector.load %arg2[%c0_3, %c0_4, %c0_5] : memref<9x128x128xbf16, #tpu.memory_space<vmem>>, vector<1x128x128xbf16>
    %5 = vector.shape_cast %4 : vector<1x128x128xbf16> to vector<128x128xbf16>
    %cst_6 = arith.constant dense<0.000000e+00> : vector<256x128xf32>
    %6 = tpu.matmul %3, %5, %cst_6 {dimension_numbers = #tpu.dot_dimension_numbers<[1], [0], [0], [1], [0, 0, 1, 1], [], []>} : vector<256x128xbf16>, vector<128x128xbf16>, vector<256x128xf32> -> vector<256x128xf32>
    %7 = arith.addf %0, %6 : vector<256x128xf32>
    %c0_7 = arith.constant 0 : index
    %c0_8 = arith.constant 0 : index
    %c1 = arith.constant 1 : index
    %c0_9 = arith.constant 0 : index
    %8 = vector.load %arg1[%c0_7, %c0_8, %c1, %c0_9] : memref<1x18x18x128xbf16, #tpu.memory_space<vmem>>, vector<1x16x16x128xbf16>
    %9 = vector.shape_cast %8 : vector<1x16x16x128xbf16> to vector<16x16x128xbf16>
    %10 = vector.shape_cast %9 : vector<16x16x128xbf16> to vector<256x128xbf16>
    %c1_10 = arith.constant 1 : index
    %c0_11 = arith.constant 0 : index
    %c0_12 = arith.constant 0 : index
    %11 = vector.load %arg2[%c1_10, %c0_11, %c0_12] : memref<9x128x128xbf16, #tpu.memory_space<vmem>>, vector<1x128x128xbf16>
    %12 = vector.shape_cast %11 : vector<1x128x128xbf16> to vector<128x128xbf16>
    %cst_13 = arith.constant dense<0.000000e+00> : vector<256x128xf32>
    %13 = tpu.matmul %10, %12, %cst_13 {dimension_numbers = #tpu.dot_dimension_numbers<[1], [0], [0], [1], [0, 0, 1, 1], [], []>} : vector<256x128xbf16>, vector<128x128xbf16>, vector<256x128xf32> -> vector<256x128xf32>
    %14 = arith.addf %7, %13 : vector<256x128xf32>
    %c0_14 = arith.constant 0 : index
    %c0_15 = arith.constant 0 : index
    %c2 = arith.constant 2 : index
    %c0_16 = arith.constant 0 : index
    %15 = vector.load %arg1[%c0_14, %c0_15, %c2, %c0_16] : memref<1x18x18x128xbf16, #tpu.memory_space<vmem>>, vector<1x16x16x128xbf16>
    %16 = vector.shape_cast %15 : vector<1x16x16x128xbf16> to vector<16x16x128xbf16>
    %17 = vector.shape_cast %16 : vector<16x16x128xbf16> to vector<256x128xbf16>
    %c2_17 = arith.constant 2 : index
    %c0_18 = arith.constant 0 : index
    %c0_19 = arith.constant 0 : index
    %18 = vector.load %arg2[%c2_17, %c0_18, %c0_19] : memref<9x128x128xbf16, #tpu.memory_space<vmem>>, vector<1x128x128xbf16>
    %19 = vector.shape_cast %18 : vector<1x128x128xbf16> to vector<128x128xbf16>
    %cst_20 = arith.constant dense<0.000000e+00> : vector<256x128xf32>
    %20 = tpu.matmul %17, %19, %cst_20 {dimension_numbers = #tpu.dot_dimension_numbers<[1], [0], [0], [1], [0, 0, 1, 1], [], []>} : vector<256x128xbf16>, vector<128x128xbf16>, vector<256x128xf32> -> vector<256x128xf32>
    %21 = arith.addf %14, %20 : vector<256x128xf32>
    %c0_21 = arith.constant 0 : index
    %c1_22 = arith.constant 1 : index
    %c0_23 = arith.constant 0 : index
    %c0_24 = arith.constant 0 : index
    %22 = vector.load %arg1[%c0_21, %c1_22, %c0_23, %c0_24] : memref<1x18x18x128xbf16, #tpu.memory_space<vmem>>, vector<1x16x16x128xbf16>
    %23 = vector.shape_cast %22 : vector<1x16x16x128xbf16> to vector<16x16x128xbf16>
    %24 = vector.shape_cast %23 : vector<16x16x128xbf16> to vector<256x128xbf16>
    %c3 = arith.constant 3 : index
    %c0_25 = arith.constant 0 : index
    %c0_26 = arith.constant 0 : index
    %25 = vector.load %arg2[%c3, %c0_25, %c0_26] : memref<9x128x128xbf16, #tpu.memory_space<vmem>>, vector<1x128x128xbf16>
    %26 = vector.shape_cast %25 : vector<1x128x128xbf16> to vector<128x128xbf16>
    %cst_27 = arith.constant dense<0.000000e+00> : vector<256x128xf32>
    %27 = tpu.matmul %24, %26, %cst_27 {dimension_numbers = #tpu.dot_dimension_numbers<[1], [0], [0], [1], [0, 0, 1, 1], [], []>} : vector<256x128xbf16>, vector<128x128xbf16>, vector<256x128xf32> -> vector<256x128xf32>
    %28 = arith.addf %21, %27 : vector<256x128xf32>
    %c0_28 = arith.constant 0 : index
    %c1_29 = arith.constant 1 : index
    %c1_30 = arith.constant 1 : index
    %c0_31 = arith.constant 0 : index
    %29 = vector.load %arg1[%c0_28, %c1_29, %c1_30, %c0_31] : memref<1x18x18x128xbf16, #tpu.memory_space<vmem>>, vector<1x16x16x128xbf16>
    %30 = vector.shape_cast %29 : vector<1x16x16x128xbf16> to vector<16x16x128xbf16>
    %31 = vector.shape_cast %30 : vector<16x16x128xbf16> to vector<256x128xbf16>
    %c4 = arith.constant 4 : index
    %c0_32 = arith.constant 0 : index
    %c0_33 = arith.constant 0 : index
    %32 = vector.load %arg2[%c4, %c0_32, %c0_33] : memref<9x128x128xbf16, #tpu.memory_space<vmem>>, vector<1x128x128xbf16>
    %33 = vector.shape_cast %32 : vector<1x128x128xbf16> to vector<128x128xbf16>
    %cst_34 = arith.constant dense<0.000000e+00> : vector<256x128xf32>
    %34 = tpu.matmul %31, %33, %cst_34 {dimension_numbers = #tpu.dot_dimension_numbers<[1], [0], [0], [1], [0, 0, 1, 1], [], []>} : vector<256x128xbf16>, vector<128x128xbf16>, vector<256x128xf32> -> vector<256x128xf32>
    %35 = arith.addf %28, %34 : vector<256x128xf32>
    %c0_35 = arith.constant 0 : index
    %c1_36 = arith.constant 1 : index
    %c2_37 = arith.constant 2 : index
    %c0_38 = arith.constant 0 : index
    %36 = vector.load %arg1[%c0_35, %c1_36, %c2_37, %c0_38] : memref<1x18x18x128xbf16, #tpu.memory_space<vmem>>, vector<1x16x16x128xbf16>
    %37 = vector.shape_cast %36 : vector<1x16x16x128xbf16> to vector<16x16x128xbf16>
    %38 = vector.shape_cast %37 : vector<16x16x128xbf16> to vector<256x128xbf16>
    %c5 = arith.constant 5 : index
    %c0_39 = arith.constant 0 : index
    %c0_40 = arith.constant 0 : index
    %39 = vector.load %arg2[%c5, %c0_39, %c0_40] : memref<9x128x128xbf16, #tpu.memory_space<vmem>>, vector<1x128x128xbf16>
    %40 = vector.shape_cast %39 : vector<1x128x128xbf16> to vector<128x128xbf16>
    %cst_41 = arith.constant dense<0.000000e+00> : vector<256x128xf32>
    %41 = tpu.matmul %38, %40, %cst_41 {dimension_numbers = #tpu.dot_dimension_numbers<[1], [0], [0], [1], [0, 0, 1, 1], [], []>} : vector<256x128xbf16>, vector<128x128xbf16>, vector<256x128xf32> -> vector<256x128xf32>
    %42 = arith.addf %35, %41 : vector<256x128xf32>
    %c0_42 = arith.constant 0 : index
    %c2_43 = arith.constant 2 : index
    %c0_44 = arith.constant 0 : index
    %c0_45 = arith.constant 0 : index
    %43 = vector.load %arg1[%c0_42, %c2_43, %c0_44, %c0_45] : memref<1x18x18x128xbf16, #tpu.memory_space<vmem>>, vector<1x16x16x128xbf16>
    %44 = vector.shape_cast %43 : vector<1x16x16x128xbf16> to vector<16x16x128xbf16>
    %45 = vector.shape_cast %44 : vector<16x16x128xbf16> to vector<256x128xbf16>
    %c6 = arith.constant 6 : index
    %c0_46 = arith.constant 0 : index
    %c0_47 = arith.constant 0 : index
    %46 = vector.load %arg2[%c6, %c0_46, %c0_47] : memref<9x128x128xbf16, #tpu.memory_space<vmem>>, vector<1x128x128xbf16>
    %47 = vector.shape_cast %46 : vector<1x128x128xbf16> to vector<128x128xbf16>
    %cst_48 = arith.constant dense<0.000000e+00> : vector<256x128xf32>
    %48 = tpu.matmul %45, %47, %cst_48 {dimension_numbers = #tpu.dot_dimension_numbers<[1], [0], [0], [1], [0, 0, 1, 1], [], []>} : vector<256x128xbf16>, vector<128x128xbf16>, vector<256x128xf32> -> vector<256x128xf32>
    %49 = arith.addf %42, %48 : vector<256x128xf32>
    %c0_49 = arith.constant 0 : index
    %c2_50 = arith.constant 2 : index
    %c1_51 = arith.constant 1 : index
    %c0_52 = arith.constant 0 : index
    %50 = vector.load %arg1[%c0_49, %c2_50, %c1_51, %c0_52] : memref<1x18x18x128xbf16, #tpu.memory_space<vmem>>, vector<1x16x16x128xbf16>
    %51 = vector.shape_cast %50 : vector<1x16x16x128xbf16> to vector<16x16x128xbf16>
    %52 = vector.shape_cast %51 : vector<16x16x128xbf16> to vector<256x128xbf16>
    %c7 = arith.constant 7 : index
    %c0_53 = arith.constant 0 : index
    %c0_54 = arith.constant 0 : index
    %53 = vector.load %arg2[%c7, %c0_53, %c0_54] : memref<9x128x128xbf16, #tpu.memory_space<vmem>>, vector<1x128x128xbf16>
    %54 = vector.shape_cast %53 : vector<1x128x128xbf16> to vector<128x128xbf16>
    %cst_55 = arith.constant dense<0.000000e+00> : vector<256x128xf32>
    %55 = tpu.matmul %52, %54, %cst_55 {dimension_numbers = #tpu.dot_dimension_numbers<[1], [0], [0], [1], [0, 0, 1, 1], [], []>} : vector<256x128xbf16>, vector<128x128xbf16>, vector<256x128xf32> -> vector<256x128xf32>
    %56 = arith.addf %49, %55 : vector<256x128xf32>
    %c0_56 = arith.constant 0 : index
    %c2_57 = arith.constant 2 : index
    %c2_58 = arith.constant 2 : index
    %c0_59 = arith.constant 0 : index
    %57 = vector.load %arg1[%c0_56, %c2_57, %c2_58, %c0_59] : memref<1x18x18x128xbf16, #tpu.memory_space<vmem>>, vector<1x16x16x128xbf16>
    %58 = vector.shape_cast %57 : vector<1x16x16x128xbf16> to vector<16x16x128xbf16>
    %59 = vector.shape_cast %58 : vector<16x16x128xbf16> to vector<256x128xbf16>
    %c8 = arith.constant 8 : index
    %c0_60 = arith.constant 0 : index
    %c0_61 = arith.constant 0 : index
    %60 = vector.load %arg2[%c8, %c0_60, %c0_61] : memref<9x128x128xbf16, #tpu.memory_space<vmem>>, vector<1x128x128xbf16>
    %61 = vector.shape_cast %60 : vector<1x128x128xbf16> to vector<128x128xbf16>
    %cst_62 = arith.constant dense<0.000000e+00> : vector<256x128xf32>
    %62 = tpu.matmul %59, %61, %cst_62 {dimension_numbers = #tpu.dot_dimension_numbers<[1], [0], [0], [1], [0, 0, 1, 1], [], []>} : vector<256x128xbf16>, vector<128x128xbf16>, vector<256x128xf32> -> vector<256x128xf32>
    %63 = arith.addf %56, %62 : vector<256x128xf32>
    %c0_63 = arith.constant 0 : index
    %c0_64 = arith.constant 0 : index
    %64 = vector.load %arg3[%c0_63, %c0_64] : memref<1x128xf32, #tpu.memory_space<vmem>>, vector<1x128xf32>
    %65 = vector.broadcast %64 : vector<1x128xf32> to vector<256x128xf32>
    %66 = arith.addf %63, %65 : vector<256x128xf32>
    %cst_65 = arith.constant 0.000000e+00 : f32
    %67 = vector.broadcast %cst_65 : f32 to vector<256x128xf32>
    %68 = arith.maximumf %66, %67 : vector<256x128xf32>
    %69 = vector.shape_cast %68 : vector<256x128xf32> to vector<16x16x128xf32>
    %70 = arith.truncf %69 : vector<16x16x128xf32> to vector<16x16x128xbf16>
    %c1_66 = arith.constant 1 : index
    %c1_67 = arith.constant 1 : index
    %c0_68 = arith.constant 0 : index
    %71 = vector.load %arg7[%c1_66, %c1_67, %c0_68] : memref<18x18x128xbf16, #tpu.memory_space<vmem>>, vector<16x16x128xbf16>
    tpu.vector_store %arg7[%c1_66, %c1_67, %c0_68], %70 {strides = array<i32>} : memref<18x18x128xbf16, #tpu.memory_space<vmem>>, vector<16x16x128xbf16>,
    %cst_69 = arith.constant 0.000000e+00 : bf16
    %72 = vector.broadcast %cst_69 : bf16 to vector<1x18x128xbf16>
    %c0_70 = arith.constant 0 : index
    %c0_71 = arith.constant 0 : index
    %c0_72 = arith.constant 0 : index
    %73 = vector.load %arg7[%c0_70, %c0_71, %c0_72] : memref<18x18x128xbf16, #tpu.memory_space<vmem>>, vector<1x18x128xbf16>
    tpu.vector_store %arg7[%c0_70, %c0_71, %c0_72], %72 {strides = array<i32>} : memref<18x18x128xbf16, #tpu.memory_space<vmem>>, vector<1x18x128xbf16>,
    %c17 = arith.constant 17 : index
    %c0_73 = arith.constant 0 : index
    %c0_74 = arith.constant 0 : index
    %74 = vector.load %arg7[%c17, %c0_73, %c0_74] : memref<18x18x128xbf16, #tpu.memory_space<vmem>>, vector<1x18x128xbf16>
    tpu.vector_store %arg7[%c17, %c0_73, %c0_74], %72 {strides = array<i32>} : memref<18x18x128xbf16, #tpu.memory_space<vmem>>, vector<1x18x128xbf16>,
    %cst_75 = arith.constant 0.000000e+00 : bf16
    %75 = vector.broadcast %cst_75 : bf16 to vector<18x1x128xbf16>
    %c0_76 = arith.constant 0 : index
    %c0_77 = arith.constant 0 : index
    %c0_78 = arith.constant 0 : index
    %76 = vector.load %arg7[%c0_76, %c0_77, %c0_78] : memref<18x18x128xbf16, #tpu.memory_space<vmem>>, vector<18x1x128xbf16>
    tpu.vector_store %arg7[%c0_76, %c0_77, %c0_78], %75 {strides = array<i32>} : memref<18x18x128xbf16, #tpu.memory_space<vmem>>, vector<18x1x128xbf16>,
    %c0_79 = arith.constant 0 : index
    %c17_80 = arith.constant 17 : index
    %c0_81 = arith.constant 0 : index
    %77 = vector.load %arg7[%c0_79, %c17_80, %c0_81] : memref<18x18x128xbf16, #tpu.memory_space<vmem>>, vector<18x1x128xbf16>
    tpu.vector_store %arg7[%c0_79, %c17_80, %c0_81], %75 {strides = array<i32>} : memref<18x18x128xbf16, #tpu.memory_space<vmem>>, vector<18x1x128xbf16>,
    %cst_82 = arith.constant 0.000000e+00 : f32
    %78 = vector.broadcast %cst_82 : f32 to vector<256x128xf32>
    %c0_83 = arith.constant 0 : index
    %c0_84 = arith.constant 0 : index
    %c0_85 = arith.constant 0 : index
    %79 = vector.load %arg7[%c0_83, %c0_84, %c0_85] : memref<18x18x128xbf16, #tpu.memory_space<vmem>>, vector<16x16x128xbf16>
    %80 = vector.shape_cast %79 : vector<16x16x128xbf16> to vector<256x128xbf16>
    %c0_86 = arith.constant 0 : index
    %c0_87 = arith.constant 0 : index
    %c0_88 = arith.constant 0 : index
    %81 = vector.load %arg4[%c0_86, %c0_87, %c0_88] : memref<9x128x128xbf16, #tpu.memory_space<vmem>>, vector<1x128x128xbf16>
    %82 = vector.shape_cast %81 : vector<1x128x128xbf16> to vector<128x128xbf16>
    %cst_89 = arith.constant dense<0.000000e+00> : vector<256x128xf32>
    %83 = tpu.matmul %80, %82, %cst_89 {dimension_numbers = #tpu.dot_dimension_numbers<[1], [0], [0], [1], [0, 0, 1, 1], [], []>} : vector<256x128xbf16>, vector<128x128xbf16>, vector<256x128xf32> -> vector<256x128xf32>
    %84 = arith.addf %78, %83 : vector<256x128xf32>
    %c0_90 = arith.constant 0 : index
    %c1_91 = arith.constant 1 : index
    %c0_92 = arith.constant 0 : index
    %85 = vector.load %arg7[%c0_90, %c1_91, %c0_92] : memref<18x18x128xbf16, #tpu.memory_space<vmem>>, vector<16x16x128xbf16>
    %86 = vector.shape_cast %85 : vector<16x16x128xbf16> to vector<256x128xbf16>
    %c1_93 = arith.constant 1 : index
    %c0_94 = arith.constant 0 : index
    %c0_95 = arith.constant 0 : index
    %87 = vector.load %arg4[%c1_93, %c0_94, %c0_95] : memref<9x128x128xbf16, #tpu.memory_space<vmem>>, vector<1x128x128xbf16>
    %88 = vector.shape_cast %87 : vector<1x128x128xbf16> to vector<128x128xbf16>
    %cst_96 = arith.constant dense<0.000000e+00> : vector<256x128xf32>
    %89 = tpu.matmul %86, %88, %cst_96 {dimension_numbers = #tpu.dot_dimension_numbers<[1], [0], [0], [1], [0, 0, 1, 1], [], []>} : vector<256x128xbf16>, vector<128x128xbf16>, vector<256x128xf32> -> vector<256x128xf32>
    %90 = arith.addf %84, %89 : vector<256x128xf32>
    %c0_97 = arith.constant 0 : index
    %c2_98 = arith.constant 2 : index
    %c0_99 = arith.constant 0 : index
    %91 = vector.load %arg7[%c0_97, %c2_98, %c0_99] : memref<18x18x128xbf16, #tpu.memory_space<vmem>>, vector<16x16x128xbf16>
    %92 = vector.shape_cast %91 : vector<16x16x128xbf16> to vector<256x128xbf16>
    %c2_100 = arith.constant 2 : index
    %c0_101 = arith.constant 0 : index
    %c0_102 = arith.constant 0 : index
    %93 = vector.load %arg4[%c2_100, %c0_101, %c0_102] : memref<9x128x128xbf16, #tpu.memory_space<vmem>>, vector<1x128x128xbf16>
    %94 = vector.shape_cast %93 : vector<1x128x128xbf16> to vector<128x128xbf16>
    %cst_103 = arith.constant dense<0.000000e+00> : vector<256x128xf32>
    %95 = tpu.matmul %92, %94, %cst_103 {dimension_numbers = #tpu.dot_dimension_numbers<[1], [0], [0], [1], [0, 0, 1, 1], [], []>} : vector<256x128xbf16>, vector<128x128xbf16>, vector<256x128xf32> -> vector<256x128xf32>
    %96 = arith.addf %90, %95 : vector<256x128xf32>
    %c1_104 = arith.constant 1 : index
    %c0_105 = arith.constant 0 : index
    %c0_106 = arith.constant 0 : index
    %97 = vector.load %arg7[%c1_104, %c0_105, %c0_106] : memref<18x18x128xbf16, #tpu.memory_space<vmem>>, vector<16x16x128xbf16>
    %98 = vector.shape_cast %97 : vector<16x16x128xbf16> to vector<256x128xbf16>
    %c3_107 = arith.constant 3 : index
    %c0_108 = arith.constant 0 : index
    %c0_109 = arith.constant 0 : index
    %99 = vector.load %arg4[%c3_107, %c0_108, %c0_109] : memref<9x128x128xbf16, #tpu.memory_space<vmem>>, vector<1x128x128xbf16>
    %100 = vector.shape_cast %99 : vector<1x128x128xbf16> to vector<128x128xbf16>
    %cst_110 = arith.constant dense<0.000000e+00> : vector<256x128xf32>
    %101 = tpu.matmul %98, %100, %cst_110 {dimension_numbers = #tpu.dot_dimension_numbers<[1], [0], [0], [1], [0, 0, 1, 1], [], []>} : vector<256x128xbf16>, vector<128x128xbf16>, vector<256x128xf32> -> vector<256x128xf32>
    %102 = arith.addf %96, %101 : vector<256x128xf32>
    %c1_111 = arith.constant 1 : index
    %c1_112 = arith.constant 1 : index
    %c0_113 = arith.constant 0 : index
    %103 = vector.load %arg7[%c1_111, %c1_112, %c0_113] : memref<18x18x128xbf16, #tpu.memory_space<vmem>>, vector<16x16x128xbf16>
    %104 = vector.shape_cast %103 : vector<16x16x128xbf16> to vector<256x128xbf16>
    %c4_114 = arith.constant 4 : index
    %c0_115 = arith.constant 0 : index
    %c0_116 = arith.constant 0 : index
    %105 = vector.load %arg4[%c4_114, %c0_115, %c0_116] : memref<9x128x128xbf16, #tpu.memory_space<vmem>>, vector<1x128x128xbf16>
    %106 = vector.shape_cast %105 : vector<1x128x128xbf16> to vector<128x128xbf16>
    %cst_117 = arith.constant dense<0.000000e+00> : vector<256x128xf32>
    %107 = tpu.matmul %104, %106, %cst_117 {dimension_numbers = #tpu.dot_dimension_numbers<[1], [0], [0], [1], [0, 0, 1, 1], [], []>} : vector<256x128xbf16>, vector<128x128xbf16>, vector<256x128xf32> -> vector<256x128xf32>
    %108 = arith.addf %102, %107 : vector<256x128xf32>
    %c1_118 = arith.constant 1 : index
    %c2_119 = arith.constant 2 : index
    %c0_120 = arith.constant 0 : index
    %109 = vector.load %arg7[%c1_118, %c2_119, %c0_120] : memref<18x18x128xbf16, #tpu.memory_space<vmem>>, vector<16x16x128xbf16>
    %110 = vector.shape_cast %109 : vector<16x16x128xbf16> to vector<256x128xbf16>
    %c5_121 = arith.constant 5 : index
    %c0_122 = arith.constant 0 : index
    %c0_123 = arith.constant 0 : index
    %111 = vector.load %arg4[%c5_121, %c0_122, %c0_123] : memref<9x128x128xbf16, #tpu.memory_space<vmem>>, vector<1x128x128xbf16>
    %112 = vector.shape_cast %111 : vector<1x128x128xbf16> to vector<128x128xbf16>
    %cst_124 = arith.constant dense<0.000000e+00> : vector<256x128xf32>
    %113 = tpu.matmul %110, %112, %cst_124 {dimension_numbers = #tpu.dot_dimension_numbers<[1], [0], [0], [1], [0, 0, 1, 1], [], []>} : vector<256x128xbf16>, vector<128x128xbf16>, vector<256x128xf32> -> vector<256x128xf32>
    %114 = arith.addf %108, %113 : vector<256x128xf32>
    %c2_125 = arith.constant 2 : index
    %c0_126 = arith.constant 0 : index
    %c0_127 = arith.constant 0 : index
    %115 = vector.load %arg7[%c2_125, %c0_126, %c0_127] : memref<18x18x128xbf16, #tpu.memory_space<vmem>>, vector<16x16x128xbf16>
    %116 = vector.shape_cast %115 : vector<16x16x128xbf16> to vector<256x128xbf16>
    %c6_128 = arith.constant 6 : index
    %c0_129 = arith.constant 0 : index
    %c0_130 = arith.constant 0 : index
    %117 = vector.load %arg4[%c6_128, %c0_129, %c0_130] : memref<9x128x128xbf16, #tpu.memory_space<vmem>>, vector<1x128x128xbf16>
    %118 = vector.shape_cast %117 : vector<1x128x128xbf16> to vector<128x128xbf16>
    %cst_131 = arith.constant dense<0.000000e+00> : vector<256x128xf32>
    %119 = tpu.matmul %116, %118, %cst_131 {dimension_numbers = #tpu.dot_dimension_numbers<[1], [0], [0], [1], [0, 0, 1, 1], [], []>} : vector<256x128xbf16>, vector<128x128xbf16>, vector<256x128xf32> -> vector<256x128xf32>
    %120 = arith.addf %114, %119 : vector<256x128xf32>
    %c2_132 = arith.constant 2 : index
    %c1_133 = arith.constant 1 : index
    %c0_134 = arith.constant 0 : index
    %121 = vector.load %arg7[%c2_132, %c1_133, %c0_134] : memref<18x18x128xbf16, #tpu.memory_space<vmem>>, vector<16x16x128xbf16>
    %122 = vector.shape_cast %121 : vector<16x16x128xbf16> to vector<256x128xbf16>
    %c7_135 = arith.constant 7 : index
    %c0_136 = arith.constant 0 : index
    %c0_137 = arith.constant 0 : index
    %123 = vector.load %arg4[%c7_135, %c0_136, %c0_137] : memref<9x128x128xbf16, #tpu.memory_space<vmem>>, vector<1x128x128xbf16>
    %124 = vector.shape_cast %123 : vector<1x128x128xbf16> to vector<128x128xbf16>
    %cst_138 = arith.constant dense<0.000000e+00> : vector<256x128xf32>
    %125 = tpu.matmul %122, %124, %cst_138 {dimension_numbers = #tpu.dot_dimension_numbers<[1], [0], [0], [1], [0, 0, 1, 1], [], []>} : vector<256x128xbf16>, vector<128x128xbf16>, vector<256x128xf32> -> vector<256x128xf32>
    %126 = arith.addf %120, %125 : vector<256x128xf32>
    %c2_139 = arith.constant 2 : index
    %c2_140 = arith.constant 2 : index
    %c0_141 = arith.constant 0 : index
    %127 = vector.load %arg7[%c2_139, %c2_140, %c0_141] : memref<18x18x128xbf16, #tpu.memory_space<vmem>>, vector<16x16x128xbf16>
    %128 = vector.shape_cast %127 : vector<16x16x128xbf16> to vector<256x128xbf16>
    %c8_142 = arith.constant 8 : index
    %c0_143 = arith.constant 0 : index
    %c0_144 = arith.constant 0 : index
    %129 = vector.load %arg4[%c8_142, %c0_143, %c0_144] : memref<9x128x128xbf16, #tpu.memory_space<vmem>>, vector<1x128x128xbf16>
    %130 = vector.shape_cast %129 : vector<1x128x128xbf16> to vector<128x128xbf16>
    %cst_145 = arith.constant dense<0.000000e+00> : vector<256x128xf32>
    %131 = tpu.matmul %128, %130, %cst_145 {dimension_numbers = #tpu.dot_dimension_numbers<[1], [0], [0], [1], [0, 0, 1, 1], [], []>} : vector<256x128xbf16>, vector<128x128xbf16>, vector<256x128xf32> -> vector<256x128xf32>
    %132 = arith.addf %126, %131 : vector<256x128xf32>
    %c0_146 = arith.constant 0 : index
    %c0_147 = arith.constant 0 : index
    %133 = vector.load %arg5[%c0_146, %c0_147] : memref<1x128xf32, #tpu.memory_space<vmem>>, vector<1x128xf32>
    %134 = vector.broadcast %133 : vector<1x128xf32> to vector<256x128xf32>
    %135 = arith.addf %132, %134 : vector<256x128xf32>
    %cst_148 = arith.constant 0.000000e+00 : f32
    %136 = vector.broadcast %cst_148 : f32 to vector<256x128xf32>
    %137 = arith.maximumf %135, %136 : vector<256x128xf32>
    %138 = vector.shape_cast %137 : vector<256x128xf32> to vector<16x16x128xf32>
    %c0_149 = arith.constant 0 : index
    %c0_150 = arith.constant 0 : index
    %c0_151 = arith.constant 0 : index
    %c0_152 = arith.constant 0 : index
    %139 = vector.load %arg6[%c0_149, %c0_150, %c0_151, %c0_152] : memref<1x16x16x128xf32, #tpu.memory_space<vmem>>, vector<1x16x16x128xf32>
    %140 = vector.shape_cast %139 : vector<1x16x16x128xf32> to vector<16x16x128xf32>
    %141 = vector.shape_cast %138 : vector<16x16x128xf32> to vector<1x16x16x128xf32>
    tpu.vector_store %arg6[%c0_149, %c0_150, %c0_151, %c0_152], %141 {strides = array<i32>} : memref<1x16x16x128xf32, #tpu.memory_space<vmem>>, vector<1x16x16x128xf32>,
    return
  }
  func.func @transform_0(%arg0: i32) -> (i32, i32, i32, i32) {
    %c0_i32 = arith.constant 0 : i32
    %c0_i32_0 = arith.constant 0 : i32
    %c0_i32_1 = arith.constant 0 : i32
    %c0_i32_2 = arith.constant 0 : i32
    return %arg0, %c0_i32, %c0_i32_0, %c0_i32_1 : i32, i32, i32, i32
  }
  func.func @transform_1(%arg0: i32) -> (i32, i32, i32) {
    %c0_i32 = arith.constant 0 : i32
    %c0_i32_0 = arith.constant 0 : i32
    %c0_i32_1 = arith.constant 0 : i32
    %c0_i32_2 = arith.constant 0 : i32
    return %c0_i32, %c0_i32_0, %c0_i32_1 : i32, i32, i32
  }
  func.func @transform_2(%arg0: i32) -> (i32, i32) {
    %c0_i32 = arith.constant 0 : i32
    %c0_i32_0 = arith.constant 0 : i32
    %c0_i32_1 = arith.constant 0 : i32
    return %c0_i32, %c0_i32_0 : i32, i32
  }
  func.func @transform_3(%arg0: i32) -> (i32, i32, i32) {
    %c0_i32 = arith.constant 0 : i32
    %c0_i32_0 = arith.constant 0 : i32
    %c0_i32_1 = arith.constant 0 : i32
    %c0_i32_2 = arith.constant 0 : i32
    return %c0_i32, %c0_i32_0, %c0_i32_1 : i32, i32, i32
  }
  func.func @transform_4(%arg0: i32) -> (i32, i32) {
    %c0_i32 = arith.constant 0 : i32
    %c0_i32_0 = arith.constant 0 : i32
    %c0_i32_1 = arith.constant 0 : i32
    return %c0_i32, %c0_i32_0 : i32, i32
  }
  func.func @transform_5(%arg0: i32) -> (i32, i32, i32, i32) {
    %c0_i32 = arith.constant 0 : i32
    %c0_i32_0 = arith.constant 0 : i32
    %c0_i32_1 = arith.constant 0 : i32
    %c0_i32_2 = arith.constant 0 : i32
    return %arg0, %c0_i32, %c0_i32_0, %c0_i32_1 : i32, i32, i32, i32
  }
}

</mosaic_0001>

<bundles_post_ra>
// kernel: tpu_custom_call.1
= control target key start
LH: loop header
LB: loop body
LE: loop exit
PB: predicated region body
PF: predicated region fallthrough
CT: control target
= control target key end

     0   :  { %10 = vsyncpa [#allocation4], 0  ;;  %s17699_s0 = inlined_call_operand.vmem [shape: bf16[2,18,18,128], index: 0, kind: input, shape index: {}]   ;;  %s17700_s1 = inlined_call_operand.vmem [shape: bf16[9,128,128], index: 1, kind: input, shape index: {}]   ;;  %s17701_s2 = inlined_call_operand.vmem [shape: f32[1,128], index: 2, kind: input, shape index: {}]   ;;  %s17702_s3 = inlined_call_operand.hbm [shape: bf16[9,128,128], index: 3, kind: input, shape index: {}]   ;;  %s17703_s4 = inlined_call_operand.vmem [shape: f32[1,128], index: 4, kind: input, shape index: {}]   ;;  %s17704_s5 = inlined_call_operand.hbm [shape: f32[2,16,16,128], index: 5, kind: output, shape index: {}]  }
   0x1   :  { %11 = vsyncpa [#allocation5], 0 }
   0x2   :  { %13 = vsyncpa [#allocation5 + $0x1], 0  ;;  %s13987_s18 = smov 0   ;;  %s13989_s19 = smov 0  }
   0x3   :  { %s13991_s20 = smov 0   ;;  %s13993_s21 = smov 0  }
   0x4 LB: > { %s14008_s22 = sadd.s32 4294967295, %s13948_s21   ;;  %s10765_s23 = sadd.s32 4294967294, %s13948_s21   ;;  %s13948_s21 = sphi %s13993_s21, %s18125_s21   ;;  %s13944_s20 = sphi %s13991_s20, %s18124_s20   ;;  %s13940_s19 = sphi %s13989_s19, %s18123_s19   ;;  %s13936_s18 = sphi %s13987_s18, %s18122_s18  }
   0x5   : > { %s14012_s24 = sadd.s32 1, %s13948_s21   ;;  %s136_s25 = sadd.s32 1, %s13944_s20 }
   0x6   : > { %s133_s26 = ssub.s32 %s13948_s21, %s14012_s24  ;;  %p146_p0 = scmp.ne.s32.totalorder %s13944_s20, %s13940_s19 }
   0x7   : > { %p134_p1 = scmp.eq.s32.totalorder %s133_s26, 0  ;;  %p147_p2 = scmp.eq.s32.totalorder %s14008_s22, 1 }
   0x8   : > { %p152_p3 = scmp.ne.s32.totalorder %s13940_s19, %s13936_s18  ;;  %p153_p4 = scmp.eq.s32.totalorder %s10765_s23, 1 }
   0x9   : > { %s14023_s27 = scalar_select %p134_p1, %s13944_s20, %s136_s25  }
   0xa   : > { %p14025_p5 = por %p147_p2, %p146_p0  ;;  %p14029_p6 = por %p153_p4, %p152_p3 }
   0xb   : > { %p10766_p7 = scmp.ge.s32.totalorder %s13948_s21, 1  ;;  %p160_p8 = scmp.lt.s32.totalorder %s13948_s21, 3 }
   0xc   : > { %s17811_s28 = scalar_select %p14025_p5, 1, 0 }
   0xd   : > { %s17812_s29 = scalar_select %p14029_p6, 1, 0 }
   0xe   : > { %p17705_p9 = scmp.eq.s32.totalorder %s14008_s22, 0  ;;  %p14036_p10 = pnand %p10766_p7, %p160_p8 }
   0xf   : > { %s13950_s6 = smov [#allocation3]   ;;  %s13854_s11 = scalar_lea.hbm %s17702_s3, 9216 }
  0x10   : > { %s17813_s30 = scalar_select %p14036_p10, 1, 0 }
  0x11   : > { %s178_s7 = sshll.u32 %s13950_s6, 4  ;;  %p13508_p11 = pneg %p14036_p10  ;;  %s179_s7 = int_to_ptr.vmem [resolvable:$true] %s178_s7 }
  0x12   : > { %p13855_p13 = scmp.ne.s32.totalorder %s17702_s3, %s13854_s11  ;;  %p13861_p3 = scmp.lt.u32.totalorder %s13854_s11, %s17702_s3 }
  0x13   : > { %p14044_p12 = pnand %p17705_p9, %p13508_p11 }
  0x15   : > { %p13856_p0 = pneg %p14044_p12 }
  0x17   : > { %p13857_p1 = pnand %p13856_p0, %p13855_p13 }
  0x19   : > { %p13858_p2 = pneg %p13857_p1 }
  0x1b   : > { %p13863_p4 = pnand %p13861_p3, %p13858_p2 }
  0x1d   : > { %13866 = shalt.err (!%p13863_p4)
}
  0x1e   : > { %s13867_s16 = scalar_lea.vmem %s179_s7, 9216  ;;  %p13875_p9 = scmp.lt.s32.totalorder %s179_s7, %s179_s7 }
  0x1f   : > { %p13868_p7 = scmp.ne.s32.totalorder %s179_s7, %s13867_s16  ;;  %p13876_p6 = scmp.lt.s32.totalorder %s13867_s16, %s13867_s16 }
  0x21   : > { %p13870_p8 = pnand %p13868_p7, %p13856_p0  ;;  %p13877_p5 = por %p13876_p6, %p13875_p9 }
  0x23   : > { %p13871_p11 = pneg %p13870_p8 }
  0x25   : > { %p13878_p10 = pnand %p13877_p5, %p13871_p11 }
  0x27   : > { %13881 = shalt.err (!%p13878_p10)
}
  0x28   : > { %s13951_s17 = smov 64   ;;  %s13952_s23 = smov 4  }
  0x29   : > { %13511 = dma.hbm_to_vmem [thread:$0]  (!%p14044_p12), %s17702_s3, 9216, %s179_s7, [#allocation4], %s13951_s17, %s13951_s17, %s13952_s23  }
  0x2a   : > { %p17815_p13 = scmp.ne.s32.totalorder %s17813_s30, 0 }
  0x2c   : > { %205 = sbr.rel (%p17815_p13) target bundleno = 1722 (0x6ba), region = 40 }
  0x33   : > { %p17816_p1 = scmp.eq.s32.totalorder %s14008_s22, 0 }
  0x35   : > { %13927 = dma.done.wait (%p17816_p1), [#allocation4], 9216   ;;  %p17817_p0 = pmov %p17816_p1 }
  0x36   : > { %p233_p5 = scmp.lt.s32.totalorder %s14008_s22, 1  ;;  %v13557_v0 = vld [vmem:[%s17700_s1 + $0x40] sm:$0xff]   ;;  %v13558_v1 = vld [vmem:[%s17700_s1 + $0x48] sm:$0xff]   ;;  %v13559_v2 = vld [vmem:[%s17700_s1 + $0x50] sm:$0xff]   ;;  %vm303_vm0 = vsmask.f32 3328 }
  0x37   : > { %13929 = vsyncadd (%p17817_p0), [#allocation4], 4294958080  ;;  %12125 = vmatprep.subr.bf16.mxu0 %v13557_v0  ;;  %vm304_vm1 = vsmask.f32 7440  ;;  %v13560_v3 = vld [vmem:[%s17700_s1 + $0x58] sm:$0xff]   ;;  %v13561_v12 = vld [vmem:[%s17700_s1 + $0x60] sm:$0xff]  }
  0x38   : > { %s234_s6 = scalar_select %p233_p5, %s14008_s22, 1  ;;  %12126 = vmatpush3.bf16.msra.mxu0 %v13557_v0  ;;  %vm14119_vm2 = vmor %vm303_vm0, %vm304_vm1  ;;  %v17818_v29 = vmov 0  ;;  %v13562_v38 = vld [vmem:[%s17700_s1 + $0x68] sm:$0xff]   ;;  %v13563_v58 = vld [vmem:[%s17700_s1 + $0x70] sm:$0xff]   ;;  %vm1333_vm3 = vcmask 1042432   ;;  %vm1334_vm4 = vcmask 1046532  }
  0x39   : > { %12127 = vmatprep.subr.bf16.mxu0 %v13558_v1  ;;  %v17819_v29 = vsel %vm14119_vm2, 4294967295, %v17818_v29  ;;  %vm14449_vm5 = vmor %vm1333_vm3, %vm1334_vm4  ;;  %vm5215_vm6 = vsmask.f32 256  ;;  %vm5546_vm7 = vcmask 1040384   ;;  %vm5540_vm9 = vsmask.f32 7938 }
  0x3a   : > { %s13501_s30 = smul.u32 216, %s234_s6  ;;  %17820 = vst [vmem:[#allocation9_spill] sm:$0xff] %v17819_v29  ;;  %vm15965_vm8 = vmand %vm5546_vm7, %vm5215_vm6  ;;  %vm5539_vm11 = vcmask 1043456   ;;  %vm5216_vm12 = vsmask.f32 4368  ;;  %s230_s9 = sand.u32 1, %s13940_s19  }
  0x3b   : > { %vm15972_vm10 = vmand %vm5546_vm7, %vm5540_vm9  ;;  %s10771_s11 = sshll.u32 %s230_s9, 8  ;;  %s11692_s7 = sshll.u32 %s14008_s22, 12 }
  0x3c   : > { %s14084_s15 = scalar_lea.vmem %s17699_s0, %s13501_s30  ;;  %12128 = vmatpush3.bf16.msra.mxu0 %v13558_v1  ;;  %vm15996_vm13 = vmand %vm5539_vm11, %vm5540_vm9  ;;  %s17585_s30 = scalar_lea.vmem [#allocation6], %s10771_s11 }
  0x3d   : > { %12129 = vmatprep.subr.bf16.mxu0 %v13559_v2  ;;  %v14090_v4 = vld [vmem:[%s14084_s15] sm:$0xf]  ;;  %v14093_v5 = vld [vmem:[%s14084_s15 + $0x4] sm:$0xf]  ;;  %v287_v6 = vld [vmem:[%s14084_s15 + $0x8] sm:$0x1]  ;;  %s17649_s16 = scalar_lea.hbm %s17704_s5, %s11692_s7 }
  0x3e   : > { %v307_v7 = vshrl.u32 %v14090_v4, 16  ;;  %v310_v8 = vshll.u32 %v14090_v4, 16  ;;  %v316_v9 = vshll.u32 %v14093_v5, 16  ;;  %v320_v10 = vshrl.u32 %v14093_v5, 16  ;;  %v14101_v11 = vld [vmem:[%s14084_s15 + $0xc] sm:$0xf]  ;;  %vm16003_vm14 = vmor %vm5215_vm6, %vm5216_vm12 }
  0x3f   : > { %v326_v13 = vshll.u32 %v287_v6, 16  ;;  %v14107_v14 = vld [vmem:[%s14084_s15 + $0x10] sm:$0xf]  ;;  %v288_v15 = vld [vmem:[%s14084_s15 + $0x14] sm:$0x1]  ;;  %v331_v21 = vshrl.u32 %v14101_v11, 16 }
  0x40   : > { %12130 = vmatpush3.bf16.msra.mxu0 %v13559_v2  ;;  %v309_v16 = vrot.slane %v307_v7, 4  ;;  %v312_v17 = vrot.slane %v310_v8, 5  ;;  %v318_v18 = vrot.slane %v316_v9, 5  ;;  %v322_v19 = vrot.slane %v320_v10, 4  ;;  %v14115_v28 = vld [vmem:[%s14084_s15 + $0x18] sm:$0xf] }
  0x41   : > { %12131 = vmatprep.subr.bf16.mxu0 %v13560_v3  ;;  %v328_v20 = vrot.slane %v326_v13, 5  ;;  %v334_v22 = vshll.u32 %v14101_v11, 16  ;;  %v340_v23 = vshll.u32 %v14107_v14, 16  ;;  %v344_v26 = vshrl.u32 %v14107_v14, 16  ;;  %v14124_v33 = vld [vmem:[%s14084_s15 + $0x1c] sm:$0xf] }
  0x42   : > { %v313_v24 = vor.u32 %v312_v17, %v309_v16  ;;  %v323_v25 = vor.u32 %v322_v19, %v318_v18  ;;  %v350_v27 = vshll.u32 %v288_v15, 16  ;;  %v333_v30 = vrot.slane %v331_v21, 4  ;;  %v289_v40 = vld [vmem:[%s14084_s15 + $0x20] sm:$0x1]  ;;  %v14139_v48 = vld [vmem:[%s14084_s15 + $0x24] sm:$0xf] }
  0x43   : > { %v336_v31 = vrot.slane %v334_v22, 5  ;;  %v342_v32 = vrot.slane %v340_v23, 5  ;;  %v346_v36 = vrot.slane %v344_v26, 4  ;;  %v355_v41 = vshrl.u32 %v14115_v28, 16  ;;  %v14142_v49 = vld [vmem:[%s14084_s15 + $0x28] sm:$0xf] }
  0x44   : > { %12132 = vmatpush3.bf16.msra.mxu0 %v13560_v3  ;;  %v314_v34 = vrot.slane %v313_v24, 4  ;;  %v324_v35 = vrot.slane %v323_v25, 4  ;;  %v352_v37 = vrot.slane %v350_v27, 5  ;;  %v358_v42 = vshll.u32 %v14115_v28, 16  ;;  %v14150_v61 = vld [vmem:[%s14084_s15 + $0x2c] sm:$0x1] }
  0x45   : > { %12133 = vmatprep.subr.bf16.mxu0 %v13561_v12  ;;  %v337_v39 = vor.u32 %v336_v31, %v333_v30  ;;  %v364_v43 = vshll.u32 %v14124_v33, 16  ;;  %v347_v46 = vor.u32 %v346_v36, %v342_v32  ;;  %v368_v47 = vshrl.u32 %v14124_v33, 16  ;;  %v14158_v6 = vld [vmem:[%s14084_s15 + $0x30] sm:$0xf]  ;;  %v13564_v7 = vld [vmem:[%s17700_s1 + $0x78] sm:$0xff]   ;;  %s10691_s12 = sshll.u32 %s17585_s30, 4  ;;  %s17651_s12 = int_to_ptr.vmem [resolvable:$true] %s10691_s12 }
  0x46   : > { %v319_v44 = vsel %vm14119_vm2, %v314_v34, %v318_v18  ;;  %v329_v45 = vsel %vm14119_vm2, %v324_v35, %v328_v20  ;;  %v357_v52 = vrot.slane %v355_v41, 4  ;;  %v360_v53 = vrot.slane %v358_v42, 5  ;;  %v14166_v13 = vld [vmem:[%s14084_s15 + $0x34] sm:$0xf]  ;;  %v14171_v19 = vld [vmem:[%s14084_s15 + $0x38] sm:$0x1] }
  0x47   : > { %v10789_v50 = vcombine.low %v319_v44, %v329_v45  ;;  %v338_v51 = vrot.slane %v337_v39, 4  ;;  %v348_v54 = vrot.slane %v347_v46, 4  ;;  %v366_v55 = vrot.slane %v364_v43, 5  ;;  %v14181_v30 = vld [vmem:[%s14084_s15 + $0x3c] sm:$0xf]  ;;  %v13565_v41 = vld [vmem:[%s17700_s1] sm:$0xff]  }
  0x48   : > { %12134 = vmatpush3.bf16.msra.mxu0 %v13561_v12  ;;  %v370_v56 = vrot.slane %v368_v47, 4  ;;  %v374_v57 = vshll.u32 %v289_v40, 16  ;;  %v361_v60 = vor.u32 %v360_v53, %v357_v52  ;;  %v379_v62 = vshrl.u32 %v14139_v48, 16  ;;  %v14184_v36 = vld [vmem:[%s14084_s15 + $0x40] sm:$0xf]  ;;  %s17658_s22 = scalar_lea.sflag [#allocation5], %s230_s9 }
  0x49   : > { %12135 = vmatprep.subr.bf16.mxu0 %v13562_v38  ;;  %12141 = vmatprep.mubr.bf16.mxu0 %v10789_v50  ;;  %v343_v59 = vsel %vm14119_vm2, %v338_v51, %v342_v32  ;;  %v382_v63 = vshll.u32 %v14139_v48, 16  ;;  %v353_v0 = vsel %vm14119_vm2, %v348_v54, %v352_v37  ;;  %v388_v3 = vshll.u32 %v14142_v49, 16  ;;  %v14194_v44 = vld [vmem:[%s14084_s15 + $0x44] sm:$0x1]  ;;  %v14200_v53 = vld [vmem:[%s14084_s15 + $0x48] sm:$0xf] }
  0x4a   : > { %v371_v1 = vor.u32 %v370_v56, %v366_v55  ;;  %v376_v2 = vrot.slane %v374_v57, 5  ;;  %v14163_v8 = vcombine.low %v343_v59, %v353_v0  ;;  %v362_v9 = vrot.slane %v361_v60, 4  ;;  %s13882_s17 = scalar_lea.vmem %s17651_s12, 4096  ;;  %p18120_p9 = scmp.ne.s32.totalorder %s17811_s28, 0 }
  0x4b   : > { %v381_v10 = vrot.slane %v379_v62, 4  ;;  %v384_v12 = vrot.slane %v382_v63, 5  ;;  %v390_v16 = vrot.slane %v388_v3, 5  ;;  %v392_v17 = vshrl.u32 %v14142_v49, 16  ;;  %v14207_v63 = vld [vmem:[%s14084_s15 + $0x4c] sm:$0xf]  ;;  %p13883_p6 = scmp.ne.s32.totalorder %s17651_s12, %s13882_s17 }
  0x4c   : > { %12136 = vmatpush3.bf16.msra.mxu0 %v13562_v38  ;;  %v372_v15 = vrot.slane %v371_v1, 4  ;;  %v398_v18 = vshll.u32 %v14150_v61, 16  ;;  %v367_v20 = vsel %vm14119_vm2, %v362_v9, %v366_v55  ;;  %v403_v22 = vshrl.u32 %v14158_v6, 16  ;;  %v13566_v1 = vld [vmem:[%s17700_s1 + $0x8] sm:$0xff]   ;;  %v14215_v9 = vld [vmem:[%s14084_s15 + $0x50] sm:$0x1] }
  0x4d   : > { %12137 = vmatprep.subr.bf16.mxu0 %v13563_v58  ;;  %v385_v21 = vor.u32 %v384_v12, %v381_v10  ;;  %v406_v23 = vshll.u32 %v14158_v6, 16  ;;  %v394_v25 = vrot.slane %v392_v17, 4  ;;  %v412_v27 = vshll.u32 %v14166_v13, 16  ;;  %p13884_p10 = pnand %p13883_p6, %p18120_p9  ;;  %s13954_s23 = smov [#allocation6]  }
  0x4e   : > { %v377_v24 = vsel %vm14119_vm2, %v372_v15, %v376_v2  ;;  %v400_v26 = vrot.slane %v398_v18, 5  ;;  %v405_v34 = vrot.slane %v403_v22, 4  ;;  %v416_v39 = vshrl.u32 %v14166_v13, 16  ;;  %v14223_v22 = vld [vmem:[%s14084_s15 + $0x54] sm:$0xf] }
  0x4f   : > { %v10791_v31 = vcombine.low %v367_v20, %v377_v24  ;;  %v386_v32 = vrot.slane %v385_v21, 4  ;;  %v408_v35 = vrot.slane %v406_v23, 5  ;;  %v395_v37 = vor.u32 %v394_v25, %v390_v16  ;;  %v13567_v24 = vld [vmem:[%s17700_s1 + $0x10] sm:$0xff]   ;;  %p13885_p12 = pneg %p13884_p10 }
  0x50   : > { %12138 = vmatpush3.bf16.msra.mxu0 %v13563_v58  ;;  %v414_v38 = vrot.slane %v412_v27, 5  ;;  %v422_v40 = vshll.u32 %v14171_v19, 16  ;;  %v427_v45 = vshrl.u32 %v14181_v30, 16  ;;  %v430_v46 = vshll.u32 %v14181_v30, 16  ;;  %v14232_v27 = vld [vmem:[%s14084_s15 + $0x58] sm:$0xf] }
  0x51   : > { %12139 = vmatprep.subr.bf16.mxu0 %v13564_v7  ;;  %v391_v42 = vsel %vm14119_vm2, %v386_v32, %v390_v16  ;;  %v409_v43 = vor.u32 %v408_v35, %v405_v34  ;;  %v396_v47 = vrot.slane %v395_v37, 4  ;;  %v418_v50 = vrot.slane %v416_v39, 4 }
  0x52   : > { %v424_v51 = vrot.slane %v422_v40, 5  ;;  %v436_v52 = vshll.u32 %v14184_v36, 16  ;;  %v429_v55 = vrot.slane %v427_v45, 4  ;;  %v432_v56 = vrot.slane %v430_v46, 5  ;;  %v14237_v40 = vld [vmem:[%s14084_s15 + $0x5c] sm:$0x1] }
  0x53   : > { %v410_v54 = vrot.slane %v409_v43, 4  ;;  %v440_v57 = vshrl.u32 %v14184_v36, 16  ;;  %v401_v58 = vsel %vm14119_vm2, %v396_v47, %v400_v26  ;;  %v419_v59 = vor.u32 %v418_v50, %v414_v38  ;;  %v14246_v47 = vld [vmem:[%s14084_s15 + $0x60] sm:$0xf] }
  0x54   : > { %12140 = vmatpush3.bf16.msra.mxu0 %v13564_v7  ;;  %v438_v60 = vrot.slane %v436_v52, 5  ;;  %v446_v62 = vshll.u32 %v14194_v44, 16  ;;  %v10792_v0 = vcombine.low %v391_v42, %v401_v58  ;;  %v433_v3 = vor.u32 %v432_v56, %v429_v55  ;;  %v13568_v55 = vld [vmem:[%s17700_s1 + $0x18] sm:$0xff]   ;;  %v14252_v56 = vld [vmem:[%s14084_s15 + $0x64] sm:$0xf] }
  0x55   : > { %12173 = vmatprep.subr.bf16.mxu0 %v13565_v41  ;;  %v415_v2 = vsel %vm14119_vm2, %v410_v54, %v414_v38  ;;  %v442_v7 = vrot.slane %v440_v57, 4  ;;  %v420_v10 = vrot.slane %v419_v59, 4  ;;  %v451_v15 = vshrl.u32 %v14200_v53, 16 }
  0x56   : > { %v448_v12 = vrot.slane %v446_v62, 5  ;;  %v454_v16 = vshll.u32 %v14200_v53, 16  ;;  %v434_v17 = vrot.slane %v433_v3, 4  ;;  %v460_v20 = vshll.u32 %v14207_v63, 16  ;;  %v14256_v62 = vld [vmem:[%s14084_s15 + $0x68] sm:$0x1] }
  0x57   : > { %12142 = vmatmul.mubr.bf16.vlgmr.msra.gmra.mrb[0].mxu0 %v14163_v8  ;;  %v443_v18 = vor.u32 %v442_v7, %v438_v60  ;;  %v464_v21 = vshrl.u32 %v14207_v63, 16  ;;  %v425_v23 = vsel %vm14119_vm2, %v420_v10, %v424_v51  ;;  %v453_v25 = vrot.slane %v451_v15, 4  ;;  %17821 = vst [vmem:[#allocation10_spill] sm:$0xff] %v14256_v62  ;;  %v14263_v10 = vld [vmem:[%s14084_s15 + $0x6c] sm:$0xf] }
  0x58   : > { %12174 = vmatpush3.bf16.msra.mxu0 %v13565_v41  ;;  %12145 = vmatprep.mubr.bf16.mxu0 %v10791_v31  ;;  %v456_v8 = vrot.slane %v454_v16, 5  ;;  %v470_v26 = vshll.u32 %v14215_v9, 16  ;;  %v10793_v32 = vcombine.low %v415_v2, %v425_v23  ;;  %v439_v34 = vsel %vm14119_vm2, %v434_v17, %v438_v60 }
  0x59   : > { %12175 = vmatprep.subr.bf16.mxu0 %v13566_v1  ;;  %v444_v31 = vrot.slane %v443_v18, 4  ;;  %v462_v35 = vrot.slane %v460_v20, 5  ;;  %v466_v38 = vrot.slane %v464_v21, 4  ;;  %v475_v41 = vshrl.u32 %v14223_v22, 16 }
  0x5a   : > { %v457_v37 = vor.u32 %v456_v8, %v453_v25  ;;  %v472_v39 = vrot.slane %v470_v26, 5  ;;  %v478_v43 = vshll.u32 %v14223_v22, 16  ;;  %v484_v45 = vshll.u32 %v14232_v27, 16  ;;  %v14270_v25 = vld [vmem:[%s14084_s15 + $0x70] sm:$0xf] }
  0x5b   : > { %v449_v42 = vsel %vm14119_vm2, %v444_v31, %v448_v12  ;;  %v488_v46 = vshrl.u32 %v14232_v27, 16  ;;  %v467_v52 = vor.u32 %v466_v38, %v462_v35  ;;  %v477_v54 = vrot.slane %v475_v41, 4  ;;  %v14282_v41 = vld [vmem:[%s14084_s15 + $0x74] sm:$0x1] }
  0x5c   : > { %12176 = vmatpush3.bf16.msra.mxu0 %v13566_v1  ;;  %v10794_v50 = vcombine.low %v439_v34, %v449_v42  ;;  %v458_v51 = vrot.slane %v457_v37, 4  ;;  %v480_v57 = vrot.slane %v478_v43, 5  ;;  %v486_v58 = vrot.slane %v484_v45, 5  ;;  %17822 = vst [vmem:[#allocation11_spill] sm:$0xff] %v14282_v41  ;;  %v14287_v45 = vld [vmem:[%s14084_s15 + $0x78] sm:$0xf] }
  0x5d   : > { %12177 = vmatprep.subr.bf16.mxu0 %v13567_v24  ;;  %v490_v59 = vrot.slane %v488_v46, 4  ;;  %v494_v60 = vshll.u32 %v14237_v40, 16  ;;  %v468_v2 = vrot.slane %v467_v52, 4  ;;  %v499_v3 = vshrl.u32 %v14246_v47, 16  ;;  %v13570_v46 = vld [vmem:[%s17700_s1 + $0x28] sm:$0xff]  }
  0x5e   : > { %v463_v1 = vsel %vm14119_vm2, %v458_v51, %v462_v35  ;;  %v502_v7 = vshll.u32 %v14246_v47, 16  ;;  %v481_v12 = vor.u32 %v480_v57, %v477_v54  ;;  %v508_v17 = vshll.u32 %v14252_v56, 16 }
  0x5f   : > { %12146 = vmatmul.mubr.bf16.gmra.mrb[4].mxu0 %v10792_v0  ;;  %v491_v15 = vor.u32 %v490_v59, %v486_v58  ;;  %v496_v16 = vrot.slane %v494_v60, 5  ;;  %v473_v18 = vsel %vm14119_vm2, %v468_v2, %v472_v39  ;;  %v501_v20 = vrot.slane %v499_v3, 4 }
  0x60   : > { %12149 = vmatprep.mubr.bf16.mxu0 %v10793_v32  ;;  %12178 = vmatpush3.bf16.msra.mxu0 %v13567_v24  ;;  %v504_v21 = vrot.slane %v502_v7, 5  ;;  %v512_v23 = vshrl.u32 %v14252_v56, 16  ;;  %v10795_v8 = vcombine.low %v463_v1, %v473_v18  ;;  %v482_v0 = vrot.slane %v481_v12, 4  ;;  %v13569_v24 = vld [vmem:[%s17700_s1 + $0x20] sm:$0xff]  }
  0x61   : > { %v492_v26 = vrot.slane %v491_v15, 4  ;;  %12179 = vmatprep.subr.bf16.mxu0 %v13568_v55  ;;  %v510_v34 = vrot.slane %v508_v17, 5  ;;  %v518_v35 = vshll.u32 %v14256_v62, 16  ;;  %v523_v37 = vshrl.u32 %v14263_v10, 16  ;;  %v14300_v15 = vld [vmem:[%s14084_s15 + $0x80] sm:$0x1] }
  0x62   : > { %v505_v32 = vor.u32 %v504_v21, %v501_v20  ;;  %v514_v31 = vrot.slane %v512_v23, 4  ;;  %v487_v38 = vsel %vm14119_vm2, %v482_v0, %v486_v58  ;;  %v526_v42 = vshll.u32 %v14263_v10, 16  ;;  %v14293_v58 = vld [vmem:[%s14084_s15 + $0x7c] sm:$0xf]  ;;  %17823 = vst [vmem:[#allocation12_spill] sm:$0xff] %v14300_v15 }
  0x63   : > { %v497_v39 = vsel %vm14119_vm2, %v492_v26, %v496_v16  ;;  %v532_v43 = vshll.u32 %v14270_v25, 16  ;;  %v520_v57 = vrot.slane %v518_v35, 5  ;;  %v525_v59 = vrot.slane %v523_v37, 4  ;;  %v14306_v21 = vld [vmem:[%s14084_s15 + $0x84] sm:$0xf] }
  0x64   : > { %v10796_v51 = vcombine.low %v487_v38, %v497_v39  ;;  %12180 = vmatpush3.bf16.msra.mxu0 %v13568_v55  ;;  %v506_v52 = vrot.slane %v505_v32, 4  ;;  %v515_v54 = vor.u32 %v514_v31, %v510_v34  ;;  %v528_v60 = vrot.slane %v526_v42, 5  ;;  %v14315_v38 = vld [vmem:[%s14084_s15 + $0x88] sm:$0xf] }
  0x65   : > { %v534_v1 = vrot.slane %v532_v43, 5  ;;  %v536_v2 = vshrl.u32 %v14270_v25, 16  ;;  %12181 = vmatprep.subr.bf16.mxu0 %v13569_v24  ;;  %v542_v12 = vshll.u32 %v14282_v41, 16  ;;  %v547_v55 = vshrl.u32 %v14287_v45, 16 }
  0x66   : > { %v511_v3 = vsel %vm14119_vm2, %v506_v52, %v510_v34  ;;  %v516_v7 = vrot.slane %v515_v54, 4  ;;  %v529_v16 = vor.u32 %v528_v60, %v525_v59  ;;  %v550_v18 = vshll.u32 %v14287_v45, 16  ;;  %v13571_v34 = vld [vmem:[%s17700_s1 + $0x30] sm:$0xff]  }
  0x67   : > { %12150 = vmatmul.mubr.bf16.gmra.mrb[8].mxu0 %v10794_v50  ;;  %v538_v17 = vrot.slane %v536_v2, 4  ;;  %v556_v20 = vshll.u32 %v14293_v58, 16  ;;  %v544_v0 = vrot.slane %v542_v12, 5  ;;  %v549_v26 = vrot.slane %v547_v55, 4  ;;  %v14323_v52 = vld [vmem:[%s14084_s15 + $0x90] sm:$0xf] }
  0x68   : > { %12153 = vmatprep.mubr.bf16.mxu0 %v10795_v8  ;;  %v521_v23 = vsel %vm14119_vm2, %v516_v7, %v520_v57  ;;  %12182 = vmatpush3.bf16.msra.mxu0 %v13569_v24  ;;  %v560_v50 = vshrl.u32 %v14293_v58, 16  ;;  %v530_v31 = vrot.slane %v529_v16, 4  ;;  %v552_v37 = vrot.slane %v550_v18, 5  ;;  %v14318_v8 = vld [vmem:[%s14084_s15 + $0x8c] sm:$0x1] }
  0x69   : > { %v10797_v32 = vcombine.low %v511_v3, %v521_v23  ;;  %v539_v35 = vor.u32 %v538_v17, %v534_v1  ;;  %17824 = vst [vmem:[#allocation13_spill] sm:$0xff] %v14318_v8  ;;  %12183 = vmatprep.subr.bf16.mxu0 %v13570_v46  ;;  %v558_v39 = vrot.slane %v556_v20, 5  ;;  %v566_v24 = vshll.u32 %v14300_v15, 16  ;;  %v14329_v2 = vld [vmem:[%s14084_s15 + $0x94] sm:$0xf]  ;;  %v13572_v23 = vld [vmem:[%s17700_s1 + $0x38] sm:$0xff]  }
  0x6a   : > { %v562_v42 = vrot.slane %v560_v50, 4  ;;  %v571_v43 = vshrl.u32 %v14306_v21, 16  ;;  %v535_v54 = vsel %vm14119_vm2, %v530_v31, %v534_v1  ;;  %v553_v59 = vor.u32 %v552_v37, %v549_v26  ;;  %v14336_v20 = vld [vmem:[%s14084_s15 + $0x98] sm:$0x1] }
  0x6b   : > { %v540_v57 = vrot.slane %v539_v35, 4  ;;  %v574_v60 = vshll.u32 %v14306_v21, 16  ;;  %v568_v7 = vrot.slane %v566_v24, 5  ;;  %v580_v55 = vshll.u32 %v14315_v38, 16  ;;  %17825 = vst [vmem:[#allocation14_spill] sm:$0xff] %v14336_v20 }
  0x6c   : > { %v563_v3 = vor.u32 %v562_v42, %v558_v39  ;;  %v573_v12 = vrot.slane %v571_v43, 4  ;;  %12184 = vmatpush3.bf16.msra.mxu0 %v13570_v46  ;;  %v554_v17 = vrot.slane %v553_v59, 4  ;;  %v584_v1 = vshrl.u32 %v14315_v38, 16  ;;  %v14343_v35 = vld [vmem:[%s14084_s15 + $0x9c] sm:$0xf] }
  0x6d   : > { %v545_v16 = vsel %vm14119_vm2, %v540_v57, %v544_v0  ;;  %v576_v18 = vrot.slane %v574_v60, 5  ;;  %12185 = vmatprep.subr.bf16.mxu0 %v13571_v34  ;;  %v582_v31 = vrot.slane %v580_v55, 5  ;;  %v590_v46 = vshll.u32 %v14318_v8, 16  ;;  %v14349_v43 = vld [vmem:[%s14084_s15 + $0xa0] sm:$0xf] }
  0x6e   : > { %v10798_v26 = vcombine.low %v535_v54, %v545_v16  ;;  %v564_v50 = vrot.slane %v563_v3, 4  ;;  %v559_v0 = vsel %vm14119_vm2, %v554_v17, %v558_v39  ;;  %v586_v42 = vrot.slane %v584_v1, 4  ;;  %v14358_v39 = vld [vmem:[%s17700_s1 + $0x80] sm:$0xff]  }
  0x6f   : > { %12154 = vmatmul.mubr.bf16.gmra.mrb[12].mxu0 %v10796_v51  ;;  %v577_v37 = vor.u32 %v576_v18, %v573_v12  ;;  %v595_v24 = vshrl.u32 %v14323_v52, 16  ;;  %v592_v57 = vrot.slane %v590_v46, 5  ;;  %v598_v59 = vshll.u32 %v14323_v52, 16  ;;  %17826 = vst [vmem:[#allocation15_spill] sm:$0xff] %v14358_v39  ;;  %v14363_v18 = vld [vmem:[%s14084_s15 + $0xa4] sm:$0x1] }
  0x70   : > { %12157 = vmatprep.mubr.bf16.mxu0 %v10797_v32  ;;  %v569_v54 = vsel %vm14119_vm2, %v564_v50, %v568_v7  ;;  %v604_v51 = vshll.u32 %v14329_v2, 16  ;;  %12186 = vmatpush3.bf16.msra.mxu0 %v13571_v34  ;;  %v587_v32 = vor.u32 %v586_v42, %v582_v31  ;;  %v608_v16 = vshrl.u32 %v14329_v2, 16  ;;  %17827 = vst [vmem:[#allocation16_spill] sm:$0xff] %v14363_v18  ;;  %v14366_v34 = vld [vmem:[%s14084_s15 + $0xa8] sm:$0xf] }
  0x71   : > { %v10799_v60 = vcombine.low %v559_v0, %v569_v54  ;;  %v578_v3 = vrot.slane %v577_v37, 4  ;;  %v597_v12 = vrot.slane %v595_v24, 4  ;;  %12187 = vmatprep.subr.bf16.mxu0 %v13572_v23  ;;  %v600_v55 = vrot.slane %v598_v59, 5  ;;  %v14373_v37 = vld [vmem:[%s14084_s15 + $0xac] sm:$0xf] }
  0x72   : > { %v606_v7 = vrot.slane %v604_v51, 5  ;;  %v614_v17 = vshll.u32 %v14336_v20, 16  ;;  %v588_v50 = vrot.slane %v587_v32, 4  ;;  %v619_v46 = vshrl.u32 %v14343_v35, 16 }
  0x73   : > { %v583_v1 = vsel %vm14119_vm2, %v578_v3, %v582_v31  ;;  %v622_v0 = vshll.u32 %v14343_v35, 16  ;;  %v601_v42 = vor.u32 %v600_v55, %v597_v12  ;;  %v610_v24 = vrot.slane %v608_v16, 4  ;;  %v14381_v12 = vld [vmem:[%s14084_s15 + $0xb0] sm:$0x1] }
  0x74   : > { %v616_v54 = vrot.slane %v614_v17, 5  ;;  %v628_v59 = vshll.u32 %v14349_v43, 16  ;;  %12188 = vmatpush3.bf16.msra.mxu0 %v13572_v23  ;;  %v593_v51 = vsel %vm14119_vm2, %v588_v50, %v592_v57  ;;  %v621_v20 = vrot.slane %v619_v46, 4  ;;  %17828 = vst [vmem:[#allocation17_spill] sm:$0xff] %v14381_v12 }
  0x75   : > { %v624_v8 = vrot.slane %v622_v0, 5  ;;  %v632_v31 = vshrl.u32 %v14349_v43, 16  ;;  %12221 = vmatprep.subr.bf16.mxu0 %v14358_v39  ;;  %v10800_v3 = vcombine.low %v583_v1, %v593_v51  ;;  %v602_v32 = vrot.slane %v601_v42, 4 }
  0x76   : > { %v611_v15 = vor.u32 %v610_v24, %v606_v7  ;;  %v630_v41 = vrot.slane %v628_v59, 5  ;;  %v638_v23 = vshll.u32 %v14363_v18, 16  ;;  %v643_v57 = vshrl.u32 %v14366_v34, 16 }
  0x77   : > { %12158 = vmatmul.mubr.bf16.gmra.mrb[16].mxu0 %v10798_v26  ;;  %v625_v55 = vor.u32 %v624_v8, %v621_v20  ;;  %v634_v16 = vrot.slane %v632_v31, 4  ;;  %v607_v17 = vsel %vm14119_vm2, %v602_v32, %v606_v7  ;;  %v646_v1 = vshll.u32 %v14366_v34, 16  ;;  %v14390_v20 = vld [vmem:[%s14084_s15 + $0xb4] sm:$0xf]  ;;  %v14396_v7 = vld [vmem:[%s14084_s15 + $0xb8] sm:$0xf] }
  0x78   : > { %12161 = vmatprep.mubr.bf16.mxu0 %v10799_v60  ;;  %v612_v50 = vrot.slane %v611_v15, 4  ;;  %v652_v46 = vshll.u32 %v14373_v37, 16  ;;  %v640_v26 = vrot.slane %v638_v23, 5  ;;  %v645_v8 = vrot.slane %v643_v57, 4  ;;  %v14402_v57 = vld [vmem:[%s14084_s15 + $0xbc] sm:$0x1] }
  0x79   : > { %v626_v0 = vrot.slane %v625_v55, 4  ;;  %v635_v42 = vor.u32 %v634_v16, %v630_v41  ;;  %v648_v59 = vrot.slane %v646_v1, 5  ;;  %v656_v51 = vshrl.u32 %v14373_v37, 16  ;;  %v17839_v29 = vld [vmem:[#allocation16_spill] sm:$0xff] }
  0x7a   : > { %v617_v24 = vsel %vm14119_vm2, %v612_v50, %v616_v54  ;;  %v654_v60 = vrot.slane %v652_v46, 5  ;;  %v662_v55 = vshll.u32 %v14381_v12, 16  ;;  %v667_v18 = vshrl.u32 %v14390_v20, 16 }
  0x7b   : > { %v10801_v15 = vcombine.low %v607_v17, %v617_v24  ;;  %v631_v31 = vsel %vm14119_vm2, %v626_v0, %v630_v41  ;;  %v636_v32 = vrot.slane %v635_v42, 4  ;;  %v649_v16 = vor.u32 %v648_v59, %v645_v8 }
  0x7c   : > { %v658_v23 = vrot.slane %v656_v51, 4  ;;  %v670_v54 = vshll.u32 %v14390_v20, 16  ;;  %v664_v1 = vrot.slane %v662_v55, 5  ;;  %v676_v17 = vshll.u32 %v14396_v7, 16 }
  0x7d   : > { %v641_v50 = vsel %vm14119_vm2, %v636_v32, %v640_v26  ;;  %v680_v46 = vshrl.u32 %v14396_v7, 16  ;;  %v650_v41 = vrot.slane %v649_v16, 4  ;;  %v669_v42 = vrot.slane %v667_v18, 4  ;;  %v1300_v16 = vld [vmem:[%s14084_s15 + $0xb4] sm:$0xe] }
  0x7e   : > { %v659_v0 = vor.u32 %v658_v23, %v654_v60  ;;  %v672_v8 = vrot.slane %v670_v54, 5  ;;  %v678_v24 = vrot.slane %v676_v17, 5  ;;  %v686_v51 = vshll.u32 %v14402_v57, 16  ;;  %v1297_v17 = vld [vmem:[%s14084_s15 + $0x90] sm:$0xe] }
  0x7f   : > { %12162 = vmatmul.mubr.bf16.gmra.mrb[20].mxu0 %v10800_v3  ;;  %v682_v59 = vrot.slane %v680_v46, 4  ;;  %v10802_v12 = vcombine.low %v631_v31, %v641_v50  ;;  %v655_v39 = vsel %vm14119_vm2, %v650_v41, %v654_v60  ;;  %v10815_v41 = vcombine.low %v14115_v28, %v14124_v33  ;;  %v17832_v46 = vld [vmem:[#allocation11_spill] sm:$0xff]  ;;  %v17833_v50 = vld [vmem:[#allocation12_spill] sm:$0xff] }
  0x80   : > { %12165 = vmatprep.mubr.bf16.mxu0 %v10801_v15  ;;  %v660_v26 = vrot.slane %v659_v0, 4  ;;  %v673_v32 = vor.u32 %v672_v8, %v669_v42  ;;  %v688_v62 = vrot.slane %v686_v51, 5  ;;  %v1290_v42 = vld [vmem:[%s14084_s15 + $0x3c] sm:$0xe]  ;;  %v1376_v28 = vrot.slane %v14194_v44, 5  ;;  %v17834_v15 = vld [vmem:[#allocation15_spill] sm:$0xff] }
  0x81   : > { %v683_v55 = vor.u32 %v682_v59, %v678_v24  ;;  %v1288_v59 = vld [vmem:[%s14084_s15 + $0x24] sm:$0xe]  ;;  %v1387_v44 = vrot.slane %v14232_v27, 5  ;;  %v1411_v60 = vrot.slane %v17833_v50, 5  ;;  %v10849_v3 = vrot.slane %v1297_v17, 9 }
  0x82   : > { %v665_v18 = vsel %vm14119_vm2, %v660_v26, %v664_v1  ;;  %v674_v23 = vrot.slane %v673_v32, 4  ;;  %v10840_v32 = vrot.slane %v1288_v59, 9  ;;  %v1292_v59 = vld [vmem:[%s14084_s15 + $0x54] sm:$0xe]  ;;  %v1404_v1 = vrot.slane %v17832_v46, 5 }
  0x83   : > { %v10803_v31 = vcombine.low %v655_v39, %v665_v18  ;;  %v684_v54 = vrot.slane %v683_v55, 4  ;;  %v1359_v55 = vrot.slane %v14142_v49, 5  ;;  %v1289_v18 = vld [vmem:[%s14084_s15 + $0x30] sm:$0xe]  ;;  %v10814_v39 = vcombine.low %v14101_v11, %v14107_v14 }
  0x84   : > { %v679_v51 = vsel %vm14119_vm2, %v674_v23, %v678_v24  ;;  %v1362_v23 = vrot.slane %v14150_v61, 5  ;;  %v1408_v46 = vrot.slane %v14293_v58, 5 }
  0x85   : > { %v689_v26 = vsel %vm14119_vm2, %v684_v54, %v688_v62  ;;  %v1361_v24 = vrot.slane %v1359_v55, 4  ;;  %v10813_v62 = vcombine.low %v14090_v4, %v14093_v5  ;;  %v10841_v54 = vrot.slane %v1289_v18, 9  ;;  %v1294_v18 = vld [vmem:[%s14084_s15 + $0x6c] sm:$0xe] }
  0x86   : > { %v10804_v8 = vcombine.low %v679_v51, %v689_v26  ;;  %v1366_v26 = vrot.slane %v14166_v13, 5  ;;  %v1369_v4 = vrot.slane %v14171_v19, 5  ;;  %v10842_v5 = vrot.slane %v1290_v42, 9 }
  0x87   : > { %12166 = vmatmul.mubr.bf16.gmra.mrb[24].mxu0 %v10802_v12  ;;  %v1291_v12 = vld [vmem:[%s14084_s15 + $0x48] sm:$0xe]  ;;  %v14468_v51 = vsel %vm14449_vm5, %v1361_v24, %v1362_v23  ;;  %v1380_v42 = vrot.slane %v14207_v63, 5  ;;  %v10846_v61 = vrot.slane %v1294_v18, 9 }
  0x88   : > { %12169 = vmatprep.mubr.bf16.mxu0 %v10803_v31  ;;  %v14456_v31 = vsel %vm14449_vm5, %v10840_v32, %v1359_v55  ;;  %v1373_v32 = vrot.slane %v14184_v36, 5  ;;  %v1293_v55 = vld [vmem:[%s14084_s15 + $0x60] sm:$0xe]  ;;  %v14478_v11 = vsel %vm14449_vm5, %v10841_v54, %v1366_v26  ;;  %v1368_v14 = vrot.slane %v1366_v26, 4  ;;  %v1296_v26 = vld [vmem:[%s14084_s15 + $0x84] sm:$0xe] }
  0x89   : > { %v10843_v33 = vrot.slane %v1291_v12, 9  ;;  %v10844_v54 = vrot.slane %v1292_v59, 9  ;;  %v1390_v12 = vrot.slane %v14237_v40, 5 }
  0x8a   : > { %v14484_v24 = vsel %vm14449_vm5, %v10842_v5, %v1373_v32  ;;  %v1375_v19 = vrot.slane %v1373_v32, 4  ;;  %v14490_v23 = vsel %vm14449_vm5, %v1368_v14, %v1369_v4  ;;  %v1382_v4 = vrot.slane %v1380_v42, 4 }
  0x8b   : > { %v14509_v40 = vsel %vm14449_vm5, %v10844_v54, %v1387_v44  ;;  %v1389_v32 = vrot.slane %v1387_v44, 4  ;;  %v10845_v14 = vrot.slane %v1293_v55, 9  ;;  %v1401_v44 = vrot.slane %v14270_v25, 5  ;;  %v1298_v54 = vld [vmem:[%s14084_s15 + $0x9c] sm:$0xe] }
  0x8c   : > { %v14499_v5 = vsel %vm14449_vm5, %v1375_v19, %v1376_v28  ;;  %v13578_v28 = vld [vmem:[%s17700_s1 + $0x88] sm:$0xff]   ;;  %v1394_v19 = vrot.slane %v14252_v56, 5 }
  0x8d   : > { %v14525_v55 = vsel %vm14449_vm5, %v1389_v32, %v1390_v12  ;;  %v14539_v12 = vsel %vm14449_vm5, %v10846_v61, %v1401_v44  ;;  %v1403_v32 = vrot.slane %v1401_v44, 4  ;;  %v1299_v61 = vld [vmem:[%s14084_s15 + $0xa8] sm:$0xe]  ;;  %v13581_v44 = vld [vmem:[%s17700_s1 + $0x90] sm:$0xff]  }
  0x8e   : > { %v1396_v18 = vrot.slane %v1394_v19, 4 }
  0x8f   : > { %12170 = vmatmul.mubr.bf16.gmra.mrb[28].mxu0 %v10804_v8  ;;  %v1383_v8 = vrot.slane %v14215_v9, 5  ;;  %v14503_v9 = vsel %vm14449_vm5, %v10843_v33, %v1380_v42  ;;  %v17831_v42 = vld [vmem:[#allocation10_spill] sm:$0xff]  ;;  %v14558_v50 = vsel %vm14449_vm5, %v1403_v32, %v1404_v1  ;;  %v13584_v1 = vld [vmem:[%s17700_s1 + $0x98] sm:$0xff]  }
  0x90   : > { %12189 = vmatprep.mubr.bf16.mxu0 %v10813_v62  ;;  %v1295_v62 = vld [vmem:[%s14084_s15 + $0x78] sm:$0xe]  ;;  %v1397_v59 = vrot.slane %v17831_v42, 5  ;;  %17836 = vst [vmem:[#allocation10_spill] sm:$0xff] %v14558_v50  ;;  %v1432_v50 = vrot.slane %v17839_v29, 5  ;;  %v17841_v29 = vcombine.low %v14139_v48, %v14142_v49 }
  0x91   : > { %v14517_v33 = vsel %vm14449_vm5, %v1382_v4, %v1383_v8  ;;  %v14534_v4 = vsel %vm14449_vm5, %v10845_v14, %v1394_v19  ;;  %v10847_v42 = vrot.slane %v1295_v62, 9  ;;  %v10848_v62 = vrot.slane %v1296_v26, 9  ;;  %v17835_v19 = vld [vmem:[#allocation13_spill] sm:$0xff] }
  0x92   : > { %v14546_v14 = vsel %vm14449_vm5, %v1396_v18, %v1397_v59  ;;  %v1418_v8 = vrot.slane %v17835_v19, 5  ;;  %v1410_v26 = vrot.slane %v1408_v46, 4  ;;  %v10850_v59 = vrot.slane %v1298_v54, 9 }
  0x93   : > { %v10851_v54 = vrot.slane %v1299_v61, 9  ;;  %v1443_v61 = vrot.slane %v14396_v7, 5 }
  0x94   : > { %v14576_v32 = vsel %vm14449_vm5, %v1410_v26, %v1411_v60 }
  0x95   : > { %17837 = vst [vmem:[#allocation11_spill] sm:$0xff] %v14576_v32 }
  0x97   : > { %12190 = vmatmul.mubr.bf16.vlgmr.msra.gmra.mrb[0].mxu0 %v10814_v39  ;;  %v1415_v39 = vrot.slane %v14315_v38, 5 }
  0x98   : > { %12222 = vmatpush3.bf16.msra.mxu0 %v17834_v15  ;;  %12193 = vmatprep.mubr.bf16.mxu0 %v10815_v41  ;;  %v14562_v41 = vsel %vm14449_vm5, %v10847_v42, %v1408_v46  ;;  %v1422_v42 = vrot.slane %v14329_v2, 5  ;;  %v17838_v46 = vld [vmem:[#allocation14_spill] sm:$0xff] }
  0x99   : > { %12223 = vmatprep.subr.bf16.mxu0 %v13578_v28  ;;  %v14568_v18 = vsel %vm14449_vm5, %v10848_v62, %v1415_v39  ;;  %v1417_v19 = vrot.slane %v1415_v39, 4  ;;  %v1425_v15 = vrot.slane %v17838_v46, 5  ;;  %v1429_v39 = vrot.slane %v14349_v43, 5  ;;  %v17840_v62 = vld [vmem:[#allocation17_spill] sm:$0xff] }
  0x9a   : > { %v14592_v26 = vsel %vm14449_vm5, %v10849_v3, %v1422_v42  ;;  %v1439_v32 = vrot.slane %v17840_v62, 5  ;;  %v10852_v3 = vrot.slane %v1300_v16, 9 }
  0x9b   : > { %v14584_v17 = vsel %vm14449_vm5, %v1417_v19, %v1418_v8  ;;  %v14596_v46 = vsel %vm14449_vm5, %v10850_v59, %v1429_v39  ;;  %v1431_v8 = vrot.slane %v1429_v39, 4  ;;  %v1436_v19 = vrot.slane %v14373_v37, 5 }
  0x9c   : > { %12224 = vmatpush3.bf16.msra.mxu0 %v13578_v28  ;;  %v1424_v28 = vrot.slane %v1422_v42, 4  ;;  %v1446_v42 = vrot.slane %v14402_v57, 5  ;;  %v17842_v59 = vcombine.low %v14158_v6, %v14166_v13  ;;  %v13587_v57 = vld [vmem:[%s17700_s1 + $0xa0] sm:$0xff]   ;;  %v14629_v13 = vsel %vm14449_vm5, %v10852_v3, %v1443_v61 }
  0x9d   : > { %12225 = vmatprep.subr.bf16.mxu0 %v13581_v44  ;;  %v14616_v48 = vsel %vm14449_vm5, %v1431_v8, %v1432_v50  ;;  %v14620_v49 = vsel %vm14449_vm5, %v10851_v54, %v1436_v19  ;;  %v1438_v16 = vrot.slane %v1436_v19, 4  ;;  %v13590_v50 = vld [vmem:[%s17700_s1 + $0xa8] sm:$0xff]   ;;  %v17844_v8 = vcombine.low %v14200_v53, %v14207_v63  ;;  %v13593_v19 = vld [vmem:[%s17700_s1 + $0xb0] sm:$0xff]   ;;  %v13597_v53 = vld [vmem:[%s17700_s1 + $0xc0] sm:$0xff]  }
  0x9e   : > { %v14605_v60 = vsel %vm14449_vm5, %v1424_v28, %v1425_v15  ;;  %v10882_v6 = vcombine.low %v14596_v46, %v14616_v48  ;;  %v17847_v63 = vcombine.low %v14263_v10, %v14270_v25  ;;  %v17850_v10 = vcombine.low %v14323_v52, %v14329_v2 }
  0x9f   : > { %12194 = vmatmul.mubr.bf16.gmra.mrb[4].mxu0 %v17841_v29  ;;  %v10881_v62 = vcombine.low %v14592_v26, %v14605_v60  ;;  %v14633_v15 = vsel %vm14449_vm5, %v1438_v16, %v1439_v32  ;;  %v17843_v32 = vcombine.low %v14181_v30, %v14184_v36  ;;  %v17845_v30 = vcombine.low %v14223_v22, %v14232_v27  ;;  %v13797_v27 = vld [vmem:[%s14084_s15 + $0x4] sm:$0xf]  ;;  %v13798_v29 = vld [vmem:[%s14084_s15 + $0x8] sm:$0x1]  ;;  %v13799_v16 = vld [vmem:[%s14084_s15 + $0x10] sm:$0xf] }
  0xa0   : > { %12197 = vmatprep.mubr.bf16.mxu0 %v17842_v59  ;;  %12226 = vmatpush3.bf16.msra.mxu0 %v13581_v44  ;;  %v1445_v44 = vrot.slane %v1443_v61, 4  ;;  %v10883_v39 = vcombine.low %v14620_v49, %v14633_v15  ;;  %v17846_v36 = vcombine.low %v14246_v47, %v14252_v56  ;;  %v17848_v22 = vcombine.low %v14287_v45, %v14293_v58  ;;  %v1285_v56 = vld [vmem:[%s14084_s15] sm:$0xe]  ;;  %v1286_v58 = vld [vmem:[%s14084_s15 + $0xc] sm:$0xe] }
  0xa1   : > { %12227 = vmatprep.subr.bf16.mxu0 %v13584_v1  ;;  %v1338_v47 = vrot.slane %v13797_v27, 5  ;;  %v1341_v3 = vrot.slane %v13798_v29, 5  ;;  %v17849_v61 = vcombine.low %v14306_v21, %v14315_v38  ;;  %v10837_v25 = vrot.slane %v1285_v56, 9  ;;  %v13800_v21 = vld [vmem:[%s14084_s15 + $0x1c] sm:$0xf]  ;;  %v13605_v60 = vld [vmem:[%s14084_s15 + $0xc] sm:$0xff]  }
  0xa2   : > { %v14642_v28 = vsel %vm14449_vm5, %v1445_v44, %v1446_v42  ;;  %v17851_v45 = vcombine.low %v14343_v35, %v14349_v43  ;;  %v17852_v59 = vcombine.low %v14366_v34, %v14373_v37  ;;  %v1352_v38 = vrot.slane %v13800_v21, 5  ;;  %v1287_v44 = vld [vmem:[%s14084_s15 + $0x18] sm:$0xe]  ;;  %v13802_v37 = vld [vmem:[%s14084_s15 + $0x20] sm:$0x1] }
  0xa3   : > { %v10884_v54 = vcombine.low %v14629_v13, %v14642_v28  ;;  %v1340_v42 = vrot.slane %v1338_v47, 4  ;;  %v1339_v52 = vsel %vm14449_vm5, %v10837_v25, %v1338_v47  ;;  %v13600_v29 = vld [vmem:[%s17700_s1 + $0xd8] sm:$0xff]   ;;  %v10967_v49 = vld [vmem:[%s14084_s15 + $0x14] sm:$0x1]  ;;  %v13610_v13 = vld [vmem:[%s17700_s1 + $0x108] sm:$0xff]  }
  0xa4   : > { %12228 = vmatpush3.bf16.msra.mxu0 %v13584_v1  ;;  %v13596_v1 = vld [vmem:[%s17700_s1 + $0xb8] sm:$0xff]   ;;  %v1354_v34 = vrot.slane %v1352_v38, 4 }
  0xa5   : > { %12229 = vmatprep.subr.bf16.mxu0 %v13587_v57  ;;  %v1342_v2 = vsel %vm14449_vm5, %v1340_v42, %v1341_v3  ;;  %v17854_v3 = vcombine.low %v14456_v31, %v14468_v51  ;;  %v17856_v31 = vcombine.low %v14484_v24, %v14499_v5  ;;  %v17857_v51 = vcombine.low %v14503_v9, %v14517_v33  ;;  %v13607_v9 = vld [vmem:[%s17700_s1 + $0x100] sm:$0xff]  }
  0xa6   : > { %v10869_v43 = vcombine.low %v1339_v52, %v1342_v2  ;;  %v17858_v24 = vcombine.low %v14509_v40, %v14525_v55  ;;  %v17859_v5 = vcombine.low %v14534_v4, %v14546_v14  ;;  %v17860_v33 = vld [vmem:[#allocation10_spill] sm:$0xff]  ;;  %v17862_v40 = vld [vmem:[#allocation11_spill] sm:$0xff]  ;;  %v17864_v4 = vcombine.low %v14568_v18, %v14584_v17  ;;  %v10969_v18 = vld [vmem:[%s14084_s15 + $0x1c] sm:$0xf] }
  0xa7   : > { %12198 = vmatmul.mubr.bf16.gmra.mrb[8].mxu0 %v17843_v32  ;;  %v10838_v32 = vrot.slane %v1286_v58, 9  ;;  %v17861_v25 = vcombine.low %v14539_v12, %v17860_v33  ;;  %v17863_v55 = vcombine.low %v14562_v41, %v17862_v40  ;;  %v10965_v14 = vld [vmem:[%s14084_s15 + $0xc] sm:$0xf]  ;;  %v10966_v12 = vld [vmem:[%s14084_s15 + $0x10] sm:$0xf]  ;;  %v2239_v46 = vshll.u32 %v10969_v18, 16 }
  0xa8   : > { %12201 = vmatprep.mubr.bf16.mxu0 %v17844_v8  ;;  %12230 = vmatpush3.bf16.msra.mxu0 %v13587_v57  ;;  %v1345_v57 = vrot.slane %v13799_v16, 5  ;;  %v2206_v41 = vshrl.u32 %v10965_v14, 16  ;;  %v2209_v42 = vshll.u32 %v10965_v14, 16  ;;  %v2215_v17 = vshll.u32 %v10966_v12, 16  ;;  %v10970_v16 = vld [vmem:[%s14084_s15 + $0x20] sm:$0x1] }
  0xa9   : > { %12231 = vmatprep.subr.bf16.mxu0 %v13590_v50  ;;  %v2219_v58 = vshrl.u32 %v10966_v12, 16  ;;  %v2243_v48 = vshrl.u32 %v10969_v18, 16  ;;  %v13606_v52 = vld [vmem:[%s14084_s15 + $0x18] sm:$0xff]   ;;  %v14783_v2 = vrot.slane %v2239_v46, 5  ;;  %v2249_v28 = vshll.u32 %v10970_v16, 16  ;;  %v13622_v18 = vld [vmem:[%s17700_s1 + $0x128] sm:$0xff]  }
  0xaa   : > { %v1347_v8 = vrot.slane %v1345_v57, 4  ;;  %v2211_v15 = vrot.slane %v2209_v42, 5  ;;  %v11058_v33 = vld [vmem:[%s14084_s15 + $0x48] sm:$0xe]  ;;  %v13614_v12 = vld [vmem:[%s14084_s15 + $0x54] sm:$0xff]  }
  0xab   : > { %v11074_v14 = vrot.slane %v11058_v33, 9  ;;  %v11060_v16 = vld [vmem:[%s14084_s15 + $0x60] sm:$0xe]  ;;  %v14921_v33 = vld [vmem:[%s14084_s15 + $0x88] sm:$0xf] }
  0xac   : > { %12232 = vmatpush3.bf16.msra.mxu0 %v13590_v50  ;;  %v13801_v50 = vld [vmem:[%s14084_s15 + $0x14] sm:$0x1] }
  0xad   : > { %12233 = vmatprep.subr.bf16.mxu0 %v13593_v19  ;;  %v1348_v35 = vrot.slane %v13801_v50, 5  ;;  %v13608_v50 = vld [vmem:[%s14084_s15 + $0x24] sm:$0xff]  }
  0xaf   : > { %12202 = vmatmul.mubr.bf16.gmra.mrb[12].mxu0 %v17845_v30  ;;  %v17853_v30 = vcombine.low %v14390_v20, %v14396_v7  ;;  %v13598_v20 = vld [vmem:[%s17700_s1 + $0xc8] sm:$0xff]   ;;  %v13599_v7 = vld [vmem:[%s17700_s1 + $0xd0] sm:$0xff]  }
  0xb0   : > { %12205 = vmatprep.mubr.bf16.mxu0 %v17846_v36  ;;  %12234 = vmatpush3.bf16.msra.mxu0 %v13593_v19  ;;  %v10839_v19 = vrot.slane %v1287_v44, 9  ;;  %v1346_v36 = vsel %vm14449_vm5, %v10838_v32, %v1345_v57  ;;  %v2245_v44 = vrot.slane %v2243_v48, 4 }
  0xb1   : > { %12235 = vmatprep.subr.bf16.mxu0 %v13596_v1 }
  0xb4   : > { %12236 = vmatpush3.bf16.msra.mxu0 %v13596_v1  ;;  %v1355_v1 = vrot.slane %v13802_v37, 5  ;;  %v13613_v37 = vld [vmem:[%s17700_s1 + $0x110] sm:$0xff]  }
  0xb5   : > { %12269 = vmatprep.subr.bf16.mxu0 %v13597_v53 }
  0xb6   : > { %v1356_v27 = vsel %vm14449_vm5, %v1354_v34, %v1355_v1  ;;  %v2246_v34 = vor.u32 %v2245_v44, %v14783_v2  ;;  %v11076_v44 = vrot.slane %v11060_v16, 9  ;;  %v11064_v16 = vld [vmem:[%s14084_s15 + $0x90] sm:$0xe] }
  0xb7   : > { %12206 = vmatmul.mubr.bf16.gmra.mrb[16].mxu0 %v17847_v63  ;;  %v1349_v63 = vsel %vm14449_vm5, %v1347_v8, %v1348_v35  ;;  %v2225_v35 = vshll.u32 %v10967_v49, 16  ;;  %v14858_v49 = vld [vmem:[%s14084_s15 + $0x64] sm:$0xf] }
  0xb8   : > { %12209 = vmatprep.mubr.bf16.mxu0 %v17848_v22  ;;  %v1353_v22 = vsel %vm14449_vm5, %v10839_v19, %v1352_v38  ;;  %v10870_v47 = vcombine.low %v1346_v36, %v1349_v63  ;;  %v10971_v38 = vld [vmem:[%s14084_s15 + $0x24] sm:$0xf]  ;;  %v10972_v19 = vld [vmem:[%s14084_s15 + $0x28] sm:$0xf] }
  0xb9   : > { %v10871_v56 = vcombine.low %v1353_v22, %v1356_v27  ;;  %v14799_v36 = vrot.slane %v2225_v35, 5  ;;  %v13609_v22 = vld [vmem:[%s14084_s15 + $0x30] sm:$0xff]   ;;  %v14804_v27 = vrot.slane %v2246_v34, 4  ;;  %v14897_v34 = vld [vmem:[%s14084_s15 + $0x3c] sm:$0xf] }
  0xbf   : > { %12210 = vmatmul.mubr.bf16.gmra.mrb[20].mxu0 %v17849_v61  ;;  %v17855_v61 = vcombine.low %v14478_v11, %v14490_v23  ;;  %v13603_v11 = vld [vmem:[%s17700_s1 + $0xf0] sm:$0xff]   ;;  %v13604_v23 = vld [vmem:[%s17700_s1 + $0xf8] sm:$0xff]  }
  0xc0   : > { %12213 = vmatprep.mubr.bf16.mxu0 %v17850_v10  ;;  %v13602_v10 = vld [vmem:[%s17700_s1 + $0xe8] sm:$0xff]  }
  0xc7   : > { %12214 = vmatmul.mubr.bf16.gmra.mrb[24].mxu0 %v17851_v45  ;;  %v10968_v45 = vld [vmem:[%s14084_s15 + $0x18] sm:$0xf] }
  0xc8   : > { %12217 = vmatprep.mubr.bf16.mxu0 %v17852_v59  ;;  %v2230_v26 = vshrl.u32 %v10968_v45, 16  ;;  %v2221_v59 = vrot.slane %v2219_v58, 4 }
  0xca   : > { %v2232_v57 = vrot.slane %v2230_v26, 4 }
  0xcf   : > { %12218 = vmatmul.mubr.bf16.gmra.mrb[28].mxu0 %v17853_v30 }
  0xd0   : > { %12237 = vmatprep.mubr.bf16.mxu0 %v10869_v43 }
  0xd7   : > { %12238 = vmatmul.mubr.bf16.vlgmr.msra.gmra.mrb[0].mxu0 %v10870_v47  ;;  %v14806_v47 = vrot.slane %v2249_v28, 5  ;;  %v13628_v28 = vld [vmem:[%s17700_s1 + $0x138] sm:$0xff]  }
  0xd8   : > { %12270 = vmatpush3.bf16.msra.mxu0 %v13597_v53  ;;  %12241 = vmatprep.mubr.bf16.mxu0 %v10871_v56  ;;  %v13601_v53 = vld [vmem:[%s17700_s1 + $0xe0] sm:$0xff]   ;;  %v2257_v56 = vshll.u32 %v10971_v38, 16 }
  0xd9   : > { %12271 = vmatprep.subr.bf16.mxu0 %v13598_v20 }
  0xdc   : > { %12272 = vmatpush3.bf16.msra.mxu0 %v13598_v20  ;;  %v2263_v20 = vshll.u32 %v10972_v19, 16 }
  0xdd   : > { %12273 = vmatprep.subr.bf16.mxu0 %v13599_v7 }
  0xdf   : > { %12242 = vmatmul.mubr.bf16.gmra.mrb[4].mxu0 %v17854_v3  ;;  %v2267_v3 = vshrl.u32 %v10972_v19, 16  ;;  %v14894_v19 = vld [vmem:[%s17700_s1 + $0x140] sm:$0xff]  }
  0xe0   : > { %12245 = vmatprep.mubr.bf16.mxu0 %v17855_v61  ;;  %12274 = vmatpush3.bf16.msra.mxu0 %v13599_v7  ;;  %v13611_v7 = vld [vmem:[%s14084_s15 + $0x3c] sm:$0xff]   ;;  %v10974_v61 = vld [vmem:[%s14084_s15 + $0x30] sm:$0xf] }
  0xe1   : > { %12275 = vmatprep.subr.bf16.mxu0 %v13600_v29  ;;  %v14836_v42 = vrot.slane %v2267_v3, 4 }
  0xe4   : > { %12276 = vmatpush3.bf16.msra.mxu0 %v13600_v29 }
  0xe5   : > { %12277 = vmatprep.subr.bf16.mxu0 %v13601_v53 }
  0xe7   : > { %12246 = vmatmul.mubr.bf16.gmra.mrb[8].mxu0 %v17856_v31  ;;  %v13619_v31 = vld [vmem:[%s17700_s1 + $0x120] sm:$0xff]  }
  0xe8   : > { %12249 = vmatprep.mubr.bf16.mxu0 %v17857_v51  ;;  %12278 = vmatpush3.bf16.msra.mxu0 %v13601_v53  ;;  %v13616_v53 = vld [vmem:[%s17700_s1 + $0x118] sm:$0xff]   ;;  %v2259_v51 = vrot.slane %v2257_v56, 5 }
  0xe9   : > { %12279 = vmatprep.subr.bf16.mxu0 %v13602_v10 }
  0xec   : > { %12280 = vmatpush3.bf16.msra.mxu0 %v13602_v10  ;;  %v14814_v10 = vld [vmem:[%s14084_s15 + $0x34] sm:$0xf] }
  0xed   : > { %12281 = vmatprep.subr.bf16.mxu0 %v13603_v11 }
  0xef   : > { %12250 = vmatmul.mubr.bf16.gmra.mrb[12].mxu0 %v17858_v24  ;;  %v14823_v24 = vld [vmem:[%s14084_s15 + $0x50] sm:$0x1] }
  0xf0   : > { %12253 = vmatprep.mubr.bf16.mxu0 %v17859_v5  ;;  %12282 = vmatpush3.bf16.msra.mxu0 %v13603_v11  ;;  %v2278_v11 = vshrl.u32 %v10974_v61, 16  ;;  %v14825_v5 = vrot.slane %v2263_v20, 5  ;;  %v3015_v40 = vrot.slane %v14823_v24, 5 }
  0xf1   : > { %12283 = vmatprep.subr.bf16.mxu0 %v13604_v23 }
  0xf2   : > { %v14855_v48 = vrot.slane %v2278_v11, 4 }
  0xf4   : > { %12284 = vmatpush3.bf16.msra.mxu0 %v13604_v23  ;;  %v14820_v23 = vld [vmem:[%s14084_s15 + $0x4c] sm:$0xf] }
  0xf5   : > { %12317 = vmatprep.subr.bf16.mxu0 %v13607_v9 }
  0xf7   : > { %12254 = vmatmul.mubr.bf16.gmra.mrb[16].mxu0 %v17861_v25  ;;  %v3012_v25 = vrot.slane %v14820_v23, 5 }
  0xf8   : > { %12257 = vmatprep.mubr.bf16.mxu0 %v17863_v55  ;;  %v13612_v55 = vld [vmem:[%s14084_s15 + $0x48] sm:$0xff]  }
  0xff   : > { %12258 = vmatmul.mubr.bf16.gmra.mrb[20].mxu0 %v17864_v4  ;;  %v2287_v4 = vshll.u32 %v14814_v10, 16 }
 0x100   : > { %12261 = vmatprep.mubr.bf16.mxu0 %v10881_v62  ;;  %v2233_v62 = vshll.u32 %v10968_v45, 16  ;;  %v3014_v45 = vrot.slane %v3012_v25, 4 }
 0x102   : > { %v2235_v21 = vrot.slane %v2233_v62, 5  ;;  %v14847_v58 = vsel %vm14449_vm5, %v3014_v45, %v3015_v40  ;;  %v13625_v62 = vld [vmem:[%s17700_s1 + $0x130] sm:$0xff]   ;;  %v11063_v45 = vld [vmem:[%s14084_s15 + $0x84] sm:$0xe] }
 0x104   : > { %v2236_v8 = vor.u32 %v2235_v21, %v2232_v57  ;;  %v3026_v57 = vrot.slane %v14858_v49, 5 }
 0x106   : > { %v14801_v63 = vrot.slane %v2236_v8, 4 }
 0x107   : > { %12262 = vmatmul.mubr.bf16.gmra.mrb[24].mxu0 %v10882_v6  ;;  %v2208_v6 = vrot.slane %v2206_v41, 4  ;;  %v14834_v41 = vld [vmem:[%s14084_s15 + $0x2c] sm:$0x1] }
 0x108   : > { %12265 = vmatprep.mubr.bf16.mxu0 %v10883_v39  ;;  %v14778_v39 = vrot.slane %v2215_v17, 5  ;;  %v14843_v17 = vsel %vm14449_vm5, %v11074_v14, %v3012_v25  ;;  %v2273_v46 = vshll.u32 %v14834_v41, 16  ;;  %v14924_v25 = vld [vmem:[%s14084_s15 + $0x8c] sm:$0x1]  ;;  %v13626_v14 = vld [vmem:[%s14084_s15 + $0xb4] sm:$0xff]  }
 0x109   : > { %v2212_v43 = vor.u32 %v2211_v15, %v2208_v6  ;;  %v14861_v6 = vld [vmem:[%s14084_s15 + $0x68] sm:$0x1] }
 0x10a   : > { %v2222_v32 = vor.u32 %v2221_v59, %v14778_v39  ;;  %v14865_v59 = vrot.slane %v2287_v4, 5  ;;  %v3029_v21 = vrot.slane %v14861_v6, 5  ;;  %v14905_v56 = vrot.slane %v2273_v46, 5  ;;  %v14935_v4 = vld [vmem:[%s14084_s15 + $0x94] sm:$0xf] }
 0x10b   : > { %v14795_v1 = vrot.slane %v2212_v43, 4  ;;  %v14883_v43 = vsel %vm14449_vm5, %v11076_v44, %v3026_v57  ;;  %v11079_v46 = vrot.slane %v11063_v45, 9  ;;  %v11080_v44 = vrot.slane %v11064_v16, 9 }
 0x10c   : > { %v14797_v30 = vrot.slane %v2222_v32, 4 }
 0x10d   : > { %v2218_v20 = vsel %vm14119_vm2, %v14795_v1, %v14778_v39 }
 0x10f   : > { %12266 = vmatmul.mubr.bf16.gmra.mrb[28].mxu0 %v10884_v54  ;;  %v2254_v54 = vshrl.u32 %v10971_v38, 16  ;;  %v13615_v38 = vld [vmem:[%s14084_s15 + $0x60] sm:$0xff]  }
 0x110   : > { %12285 = vmatprep.mubr.bf16.mxu0 %v13605_v60 }
 0x111   : > { %v2256_v29 = vrot.slane %v2254_v54, 4  ;;  %v14879_v54 = vld [vmem:[%s14084_s15 + $0x38] sm:$0x1] }
 0x113   : > { %v2260_v26 = vor.u32 %v2259_v51, %v2256_v29  ;;  %v2302_v51 = vshrl.u32 %v14897_v34, 16 }
 0x115   : > { %v14873_v35 = vrot.slane %v2260_v26, 4  ;;  %v3050_v26 = vrot.slane %v14924_v25, 5  ;;  %v2304_v1 = vrot.slane %v2302_v51, 4  ;;  %v2242_v51 = vsel %vm14119_vm2, %v14801_v63, %v14783_v2 }
 0x117   : > { %12286 = vmatmul.mubr.bf16.vlgmr.msra.gmra.mrb[0].mxu0 %v13606_v52  ;;  %v2291_v52 = vshrl.u32 %v14814_v10, 16  ;;  %v2266_v2 = vsel %vm14119_vm2, %v14873_v35, %v14825_v5 }
 0x118   : > { %12318 = vmatpush3.bf16.msra.mxu0 %v13607_v9  ;;  %12289 = vmatprep.mubr.bf16.mxu0 %v13608_v50  ;;  %v2281_v9 = vshll.u32 %v10974_v61, 16  ;;  %v13617_v50 = vld [vmem:[%s14084_s15 + $0x6c] sm:$0xff]   ;;  %v13618_v61 = vld [vmem:[%s14084_s15 + $0x78] sm:$0xff]  }
 0x119   : > { %12319 = vmatprep.subr.bf16.mxu0 %v13610_v13 }
 0x11a   : > { %v14863_v15 = vrot.slane %v2281_v9, 5 }
 0x11c   : > { %12320 = vmatpush3.bf16.msra.mxu0 %v13610_v13  ;;  %v3028_v13 = vrot.slane %v3026_v57, 4  ;;  %v3054_v57 = vrot.slane %v14935_v4, 5 }
 0x11d   : > { %12321 = vmatprep.subr.bf16.mxu0 %v13613_v37 }
 0x11e   : > { %v14887_v32 = vsel %vm14449_vm5, %v3028_v13, %v3029_v21 }
 0x11f   : > { %12290 = vmatmul.mubr.bf16.gmra.mrb[4].mxu0 %v13609_v22  ;;  %17865 = vst [vmem:[#allocation12_spill] sm:$0xff] %v14887_v32  ;;  %v14903_v22 = vld [vmem:[%s14084_s15 + $0x80] sm:$0x1] }
 0x120   : > { %12293 = vmatprep.mubr.bf16.mxu0 %v13611_v7  ;;  %12322 = vmatpush3.bf16.msra.mxu0 %v13613_v37  ;;  %v14900_v37 = vld [vmem:[%s14084_s15 + $0x7c] sm:$0xf]  ;;  %v11062_v7 = vld [vmem:[%s14084_s15 + $0x78] sm:$0xe]  ;;  %v3043_v3 = vrot.slane %v14903_v22, 5 }
 0x121   : > { %12323 = vmatprep.subr.bf16.mxu0 %v13616_v53  ;;  %v3040_v29 = vrot.slane %v14900_v37, 5  ;;  %v11078_v10 = vrot.slane %v11062_v7, 9 }
 0x123   : > { %v3042_v11 = vrot.slane %v3040_v29, 4  ;;  %v14918_v9 = vsel %vm14449_vm5, %v11078_v10, %v3040_v29  ;;  %v14962_v29 = vsel %vm14449_vm5, %v11080_v44, %v3054_v57  ;;  %v11066_v44 = vld [vmem:[%s14084_s15 + $0xa8] sm:$0xe] }
 0x124   : > { %12324 = vmatpush3.bf16.msra.mxu0 %v13616_v53  ;;  %v14912_v53 = vrot.slane %v2291_v52, 4  ;;  %17866 = vst [vmem:[#allocation15_spill] sm:$0xff] %v14918_v9  ;;  %17870 = vst [vmem:[#allocation17_spill] sm:$0xff] %v14962_v29  ;;  %v13624_v10 = vld [vmem:[%s14084_s15 + $0xa8] sm:$0xff]  }
 0x125   : > { %12325 = vmatprep.subr.bf16.mxu0 %v13619_v31  ;;  %v14928_v40 = vsel %vm14449_vm5, %v3042_v11, %v3043_v3  ;;  %v14965_v3 = vld [vmem:[%s14084_s15 + $0xa0] sm:$0xf]  ;;  %v14977_v11 = vld [vmem:[%s14084_s15 + $0xac] sm:$0xf]  ;;  %v10980_v29 = vld [vmem:[%s14084_s15 + $0x48] sm:$0xf] }
 0x126   : > { %17867 = vst [vmem:[#allocation13_spill] sm:$0xff] %v14928_v40  ;;  %v3061_v16 = vrot.slane %v14965_v3, 5  ;;  %v2294_v63 = vor.u32 %v14912_v53, %v14865_v59  ;;  %v2335_v40 = vshll.u32 %v14820_v23, 16 }
 0x127   : > { %12294 = vmatmul.mubr.bf16.gmra.mrb[8].mxu0 %v13612_v55  ;;  %v14932_v55 = vld [vmem:[%s14084_s15 + $0x40] sm:$0xf] }
 0x128   : > { %12297 = vmatprep.mubr.bf16.mxu0 %v13614_v12  ;;  %12326 = vmatpush3.bf16.msra.mxu0 %v13619_v31  ;;  %v13620_v31 = vld [vmem:[%s14084_s15 + $0x84] sm:$0xff]   ;;  %v14940_v12 = vld [vmem:[%s14084_s15 + $0x98] sm:$0x1]  ;;  %v2311_v13 = vshll.u32 %v14932_v55, 16 }
 0x129   : > { %12327 = vmatprep.subr.bf16.mxu0 %v13622_v18  ;;  %v3057_v21 = vrot.slane %v14940_v12, 5 }
 0x12c   : > { %12328 = vmatpush3.bf16.msra.mxu0 %v13622_v18  ;;  %v3047_v18 = vrot.slane %v14921_v33, 5 }
 0x12d   : > { %12329 = vmatprep.subr.bf16.mxu0 %v13625_v62 }
 0x12e   : > { %v3049_v52 = vrot.slane %v3047_v18, 4 }
 0x12f   : > { %12298 = vmatmul.mubr.bf16.gmra.mrb[12].mxu0 %v13615_v38  ;;  %v13621_v38 = vld [vmem:[%s14084_s15 + $0x90] sm:$0xff]  }
 0x130   : > { %12301 = vmatprep.mubr.bf16.mxu0 %v13617_v50  ;;  %12330 = vmatpush3.bf16.msra.mxu0 %v13625_v62  ;;  %v2305_v62 = vshll.u32 %v14897_v34, 16  ;;  %v13623_v50 = vld [vmem:[%s14084_s15 + $0x9c] sm:$0xff]   ;;  %v3056_v34 = vrot.slane %v3054_v57, 4  ;;  %v14958_v7 = vsel %vm14449_vm5, %v3049_v52, %v3050_v26  ;;  %v14984_v26 = vld [vmem:[%s14084_s15 + $0xb0] sm:$0x1] }
 0x131   : > { %12331 = vmatprep.subr.bf16.mxu0 %v13628_v28  ;;  %17869 = vst [vmem:[#allocation16_spill] sm:$0xff] %v14958_v7  ;;  %v3071_v45 = vrot.slane %v14984_v26, 5  ;;  %v15073_v7 = vld [vmem:[%s14084_s15 + $0x58] sm:$0xf] }
 0x134   : > { %12332 = vmatpush3.bf16.msra.mxu0 %v13628_v28  ;;  %v14954_v28 = vsel %vm14449_vm5, %v11079_v46, %v3047_v18  ;;  %v2270_v18 = vor.u32 %v14836_v42, %v14825_v5  ;;  %v11065_v46 = vld [vmem:[%s14084_s15 + $0x9c] sm:$0xe]  ;;  %v3063_v42 = vrot.slane %v3061_v16, 4 }
 0x135   : > { %12365 = vmatprep.subr.bf16.mxu0 %v14894_v19  ;;  %17868 = vst [vmem:[#allocation14_spill] sm:$0xff] %v14954_v28  ;;  %v11081_v52 = vrot.slane %v11065_v46, 9  ;;  %v13627_v28 = vld [vmem:[%s14084_s15 + $0xc0] sm:$0xff]  }
 0x136   : > { %v14995_v8 = vrot.slane %v2270_v18, 4 }
 0x137   : > { %12302 = vmatmul.mubr.bf16.gmra.mrb[16].mxu0 %v13618_v61  ;;  %v14968_v61 = vld [vmem:[%s14084_s15 + $0xa4] sm:$0x1]  ;;  %v14999_v60 = vsel %vm14449_vm5, %v11081_v52, %v3061_v16  ;;  %v17876_v52 = vshll.u32 %v14879_v54, 16 }
 0x138   : > { %12305 = vmatprep.mubr.bf16.mxu0 %v13620_v31  ;;  %v14974_v31 = vsel %vm14449_vm5, %v3056_v34, %v3057_v21  ;;  %v3064_v57 = vrot.slane %v14968_v61, 5  ;;  %v2315_v21 = vshrl.u32 %v14932_v55, 16  ;;  %v3068_v34 = vrot.slane %v14977_v11, 5  ;;  %17872 = vst [vmem:[#allocation11_spill] sm:$0xff] %v14999_v60 }
 0x139   : > { %17871 = vst [vmem:[#allocation10_spill] sm:$0xff] %v14974_v31  ;;  %v2228_v31 = vsel %vm14119_vm2, %v14797_v30, %v14799_v36  ;;  %v15020_v39 = vrot.slane %v17876_v52, 5  ;;  %v10983_v30 = vld [vmem:[%s14084_s15 + $0x54] sm:$0xf]  ;;  %v2329_v60 = vshll.u32 %v10980_v29, 16 }
 0x13a   : > { %v15012_v18 = vsel %vm14449_vm5, %v3063_v42, %v3064_v57  ;;  %v15029_v57 = vld [vmem:[%s14084_s15 + $0x44] sm:$0x1]  ;;  %v2317_v42 = vrot.slane %v2315_v21, 4  ;;  %v11029_v52 = vcombine.low %v2218_v20, %v2228_v31  ;;  %v15049_v21 = vld [vmem:[%s14084_s15 + $0xbc] sm:$0x1]  ;;  %v2326_v20 = vshrl.u32 %v10980_v29, 16 }
 0x13b   : > { %17874 = vst [vmem:[#allocation9_spill] sm:$0xff] %v15012_v18  ;;  %v11068_v31 = vld [vmem:[%s14084_s15 + $0xc0] sm:$0xe]  ;;  %v2321_v53 = vshll.u32 %v15029_v57, 16 }
 0x13f   : > { %12306 = vmatmul.mubr.bf16.gmra.mrb[20].mxu0 %v13621_v38  ;;  %v11082_v38 = vrot.slane %v11066_v44, 9  ;;  %v2307_v44 = vrot.slane %v2305_v62, 5  ;;  %v2284_v62 = vor.u32 %v14863_v15, %v14855_v48  ;;  %v3078_v15 = vrot.slane %v15049_v21, 5 }
 0x140   : > { %12309 = vmatprep.mubr.bf16.mxu0 %v13623_v50  ;;  %v3070_v50 = vrot.slane %v3068_v34, 4 }
 0x141   : > { %v15016_v16 = vsel %vm14449_vm5, %v11082_v38, %v3068_v34  ;;  %v15031_v34 = vrot.slane %v2311_v13, 5  ;;  %v15046_v13 = vld [vmem:[%s14084_s15 + $0xb8] sm:$0xf]  ;;  %v2308_v35 = vor.u32 %v2307_v44, %v2304_v1  ;;  %v2339_v1 = vshrl.u32 %v14820_v23, 16 }
 0x142   : > { %17875 = vst [vmem:[#allocation18_spill] sm:$0xff] %v15016_v16  ;;  %v15026_v36 = vsel %vm14449_vm5, %v3070_v50, %v3071_v45  ;;  %v2252_v45 = vsel %vm14119_vm2, %v14804_v27, %v14806_v47  ;;  %v15052_v50 = vld [vmem:[%s14084_s15 + $0xc4] sm:$0xf]  ;;  %v15061_v27 = vld [vmem:[%s14084_s15 + $0xc8] sm:$0x1]  ;;  %v3075_v48 = vrot.slane %v15046_v13, 5  ;;  %v2276_v23 = vsel %vm14119_vm2, %v14995_v8, %v14905_v56 }
 0x143   : > { %17877 = vst [vmem:[#allocation19_spill] sm:$0xff] %v15026_v36  ;;  %v11067_v47 = vld [vmem:[%s14084_s15 + $0xb4] sm:$0xe]  ;;  %v3082_v38 = vrot.slane %v15052_v50, 5  ;;  %v3085_v5 = vrot.slane %v15061_v27, 5  ;;  %v11084_v16 = vrot.slane %v11068_v31, 9  ;;  %v2318_v18 = vor.u32 %v2317_v42, %v15031_v34 }
 0x144   : > { %v3077_v36 = vrot.slane %v3075_v48, 4  ;;  %v2350_v42 = vshrl.u32 %v10983_v30, 16  ;;  %v2353_v31 = vshll.u32 %v10983_v30, 16  ;;  %v15105_v30 = vrot.slane %v2294_v63, 4 }
 0x145   : > { %v15088_v29 = vsel %vm14449_vm5, %v11084_v16, %v3082_v38  ;;  %v2331_v8 = vrot.slane %v2329_v60, 5  ;;  %v15111_v56 = vrot.slane %v2335_v40, 5  ;;  %v2345_v16 = vshll.u32 %v14823_v24, 16 }
 0x146   : > { %v15084_v44 = vsel %vm14449_vm5, %v3077_v36, %v3078_v15  ;;  %17880 = vst [vmem:[#allocation22_spill] sm:$0xff] %v15088_v29  ;;  %v15100_v36 = vrot.slane %v2284_v62, 4  ;;  %v2359_v15 = vshll.u32 %v15073_v7, 16  ;;  %v2341_v62 = vrot.slane %v2339_v1, 4 }
 0x147   : > { %12310 = vmatmul.mubr.bf16.gmra.mrb[24].mxu0 %v13624_v10  ;;  %v11083_v10 = vrot.slane %v11067_v47, 9  ;;  %v3084_v47 = vrot.slane %v3082_v38, 4  ;;  %17879 = vst [vmem:[#allocation21_spill] sm:$0xff] %v15084_v44  ;;  %v15107_v38 = vrot.slane %v2321_v53, 5  ;;  %v2309_v44 = vrot.slane %v2308_v35, 4 }
 0x148   : > { %12313 = vmatprep.mubr.bf16.mxu0 %v13626_v14  ;;  %v2352_v63 = vrot.slane %v2350_v42, 4  ;;  %v11030_v53 = vcombine.low %v2242_v51, %v2252_v45  ;;  %v11031_v29 = vcombine.low %v2266_v2, %v2276_v23  ;;  %v15117_v9 = vrot.slane %v2359_v15, 5  ;;  %v15133_v42 = vld [vmem:[%s14084_s15 + $0x70] sm:$0xf] }
 0x149   : > { %v15077_v14 = vsel %vm14449_vm5, %v11083_v10, %v3075_v48  ;;  %v15094_v10 = vsel %vm14449_vm5, %v3084_v47, %v3085_v5  ;;  %v2328_v48 = vrot.slane %v2326_v20, 4  ;;  %v2363_v5 = vshrl.u32 %v15073_v7, 16  ;;  %v10986_v47 = vld [vmem:[%s14084_s15 + $0x60] sm:$0xf]  ;;  %v15115_v20 = vld [vmem:[%s14084_s15 + $0x5c] sm:$0x1] }
 0x14a   : > { %17878 = vst [vmem:[#allocation20_spill] sm:$0xff] %v15077_v14  ;;  %17881 = vst [vmem:[#allocation23_spill] sm:$0xff] %v15094_v10  ;;  %v2319_v14 = vrot.slane %v2318_v18, 4  ;;  %v2355_v10 = vrot.slane %v2353_v31, 5  ;;  %v2374_v32 = vshrl.u32 %v10986_v47, 16  ;;  %v2377_v60 = vshll.u32 %v10986_v47, 16 }
 0x14b   : > { %v2365_v35 = vrot.slane %v2363_v5, 4  ;;  %v2383_v40 = vshll.u32 %v14858_v49, 16  ;;  %v2290_v24 = vsel %vm14119_vm2, %v15100_v36, %v14865_v59  ;;  %v2300_v18 = vsel %vm14119_vm2, %v15105_v30, %v15020_v39  ;;  %v13630_v59 = vld [vmem:[%s17700_s1 + $0x148] sm:$0xff]   ;;  %v10992_v47 = vld [vmem:[%s14084_s15 + $0x78] sm:$0xf] }
 0x14c   : > { %v2332_v51 = vor.u32 %v2331_v8, %v2328_v48  ;;  %v2342_v45 = vor.u32 %v2341_v62, %v15111_v56  ;;  %v2356_v2 = vor.u32 %v2355_v10, %v2352_v63  ;;  %v2369_v1 = vshll.u32 %v15115_v20, 16 }
 0x14d   : > { %v2314_v23 = vsel %vm14119_vm2, %v2309_v44, %v15031_v34  ;;  %v2324_v39 = vsel %vm14119_vm2, %v2319_v14, %v15107_v38  ;;  %v15144_v48 = vrot.slane %v2345_v16, 5  ;;  %v2376_v10 = vrot.slane %v2374_v32, 4  ;;  %v13631_v38 = vld [vmem:[%s17700_s1 + $0x150] sm:$0xff]  }
 0x14e   : > { %v2366_v36 = vor.u32 %v2365_v35, %v15117_v9  ;;  %v2379_v15 = vrot.slane %v2377_v60, 5  ;;  %v15147_v30 = vrot.slane %v2383_v40, 5  ;;  %v2333_v8 = vrot.slane %v2332_v51, 4 }
 0x14f   : > { %12314 = vmatmul.mubr.bf16.gmra.mrb[28].mxu0 %v13627_v28  ;;  %v10989_v28 = vld [vmem:[%s14084_s15 + $0x6c] sm:$0xf]  ;;  %v2343_v62 = vrot.slane %v2342_v45, 4  ;;  %v2407_v63 = vshll.u32 %v15133_v42, 16  ;;  %v2411_v34 = vshrl.u32 %v15133_v42, 16  ;;  %v2357_v14 = vrot.slane %v2356_v2, 4 }
 0x150   : > { %12333 = vmatprep.mubr.bf16.mxu0 %v11029_v52  ;;  %v2387_v52 = vshrl.u32 %v14858_v49, 16  ;;  %v2398_v49 = vshrl.u32 %v10989_v28, 16  ;;  %v2401_v31 = vshll.u32 %v10989_v28, 16  ;;  %v2371_v44 = vrot.slane %v2369_v1, 5 }
 0x151   : > { %v2422_v28 = vshrl.u32 %v10992_v47, 16  ;;  %v2431_v35 = vshll.u32 %v14900_v37, 16  ;;  %v2435_v60 = vshrl.u32 %v14900_v37, 16  ;;  %v2367_v40 = vrot.slane %v2366_v36, 4 }
 0x152   : > { %v2389_v5 = vrot.slane %v2387_v52, 4  ;;  %v2400_v32 = vrot.slane %v2398_v49, 4  ;;  %v2403_v16 = vrot.slane %v2401_v31, 5  ;;  %v2393_v52 = vshll.u32 %v14861_v6, 16 }
 0x153   : > { %v11032_v51 = vcombine.low %v2290_v24, %v2300_v18  ;;  %v11033_v45 = vcombine.low %v2314_v23, %v2324_v39  ;;  %v15160_v2 = vrot.slane %v2407_v63, 5  ;;  %v2413_v1 = vrot.slane %v2411_v34, 4  ;;  %v10995_v24 = vld [vmem:[%s14084_s15 + $0x84] sm:$0xf]  ;;  %v13632_v18 = vld [vmem:[%s17700_s1 + $0x158] sm:$0xff]  }
 0x154   : > { %v2338_v49 = vsel %vm14119_vm2, %v2333_v8, %v15111_v56  ;;  %v2348_v37 = vsel %vm14119_vm2, %v2343_v62, %v15144_v48  ;;  %v2362_v31 = vsel %vm14119_vm2, %v2357_v14, %v15117_v9  ;;  %v2404_v6 = vor.u32 %v2403_v16, %v2400_v32 }
 0x155   : > { %v15178_v56 = vrot.slane %v2431_v35, 5  ;;  %v2437_v39 = vrot.slane %v2435_v60, 4  ;;  %v2372_v48 = vsel %vm14119_vm2, %v2367_v40, %v2371_v44  ;;  %v2395_v9 = vrot.slane %v2393_v52, 5 }
 0x156   : > { %v2446_v8 = vshrl.u32 %v10995_v24, 16  ;;  %v2449_v62 = vshll.u32 %v10995_v24, 16  ;;  %v2455_v63 = vshll.u32 %v14921_v33, 16  ;;  %v2459_v34 = vshrl.u32 %v14921_v33, 16  ;;  %v13634_v24 = vld [vmem:[%s17700_s1 + $0x168] sm:$0xff]  }
 0x157   : > { %12334 = vmatmul.mubr.bf16.vlgmr.msra.gmra.mrb[0].mxu0 %v11030_v53  ;;  %v2425_v53 = vshll.u32 %v10992_v47, 16  ;;  %v2405_v14 = vrot.slane %v2404_v6, 4  ;;  %v2438_v32 = vor.u32 %v2437_v39, %v15178_v56  ;;  %v2441_v16 = vshll.u32 %v14903_v22, 16 }
 0x158   : > { %12366 = vmatpush3.bf16.msra.mxu0 %v14894_v19  ;;  %12337 = vmatprep.mubr.bf16.mxu0 %v11031_v29  ;;  %v2380_v19 = vor.u32 %v2379_v15, %v2376_v10  ;;  %v2390_v29 = vor.u32 %v2389_v5, %v15147_v30  ;;  %v15172_v10 = vld [vmem:[%s14084_s15 + $0x74] sm:$0x1]  ;;  %v2414_v5 = vor.u32 %v2413_v1, %v15160_v2  ;;  %v2451_v52 = vrot.slane %v2449_v62, 5 }
 0x159   : > { %12367 = vmatprep.subr.bf16.mxu0 %v13630_v59  ;;  %v2427_v23 = vrot.slane %v2425_v53, 5  ;;  %v2417_v47 = vshll.u32 %v15172_v10, 16  ;;  %v10998_v53 = vld [vmem:[%s14084_s15 + $0x90] sm:$0xf]  ;;  %v11034_v35 = vcombine.low %v2338_v49, %v2348_v37  ;;  %v11035_v60 = vcombine.low %v2362_v31, %v2372_v48 }
 0x15a   : > { %v2381_v36 = vrot.slane %v2380_v19, 4  ;;  %v2391_v15 = vrot.slane %v2390_v29, 4  ;;  %v2415_v40 = vrot.slane %v2414_v5, 4  ;;  %v2448_v29 = vrot.slane %v2446_v8, 4 }
 0x15b   : > { %v2419_v19 = vrot.slane %v2417_v47, 5  ;;  %v15198_v22 = vrot.slane %v2455_v63, 5  ;;  %v2470_v1 = vshrl.u32 %v10998_v53, 16  ;;  %v2473_v6 = vshll.u32 %v10998_v53, 16 }
 0x15c   : > { %12368 = vmatpush3.bf16.msra.mxu0 %v13630_v59  ;;  %v2424_v59 = vrot.slane %v2422_v28, 4  ;;  %v13633_v28 = vld [vmem:[%s17700_s1 + $0x160] sm:$0xff]   ;;  %v2396_v33 = vsel %vm14119_vm2, %v2391_v15, %v2395_v9  ;;  %v2410_v49 = vsel %vm14119_vm2, %v2405_v14, %v15160_v2  ;;  %v2443_v31 = vrot.slane %v2441_v16, 5 }
 0x15d   : > { %12369 = vmatprep.subr.bf16.mxu0 %v13631_v38  ;;  %v2420_v48 = vsel %vm14119_vm2, %v2415_v40, %v2419_v19  ;;  %v2465_v2 = vshll.u32 %v14924_v25, 16  ;;  %v2507_v15 = vshrl.u32 %v14965_v3, 16  ;;  %v2452_v9 = vor.u32 %v2451_v52, %v2448_v29  ;;  %v13636_v19 = vld [vmem:[%s17700_s1 + $0x178] sm:$0xff]  }
 0x15e   : > { %v2428_v44 = vor.u32 %v2427_v23, %v2424_v59  ;;  %v2479_v59 = vshll.u32 %v14935_v4, 16  ;;  %v2472_v47 = vrot.slane %v2470_v1, 4  ;;  %v11007_v1 = vld [vmem:[%s14084_s15 + $0xb4] sm:$0xf] }
 0x15f   : > { %12338 = vmatmul.mubr.bf16.gmra.mrb[4].mxu0 %v11032_v51  ;;  %v11001_v51 = vld [vmem:[%s14084_s15 + $0x9c] sm:$0xf]  ;;  %v2467_v16 = vrot.slane %v2465_v2, 5  ;;  %v2509_v53 = vrot.slane %v2507_v15, 4 }
 0x160   : > { %12341 = vmatprep.mubr.bf16.mxu0 %v11033_v45  ;;  %12370 = vmatpush3.bf16.msra.mxu0 %v13631_v38  ;;  %v2386_v38 = vsel %vm14119_vm2, %v2381_v36, %v15147_v30  ;;  %v2461_v45 = vrot.slane %v2459_v34, 4  ;;  %v2429_v37 = vrot.slane %v2428_v44, 4  ;;  %v2439_v30 = vrot.slane %v2438_v32, 4 }
 0x161   : > { %12371 = vmatprep.subr.bf16.mxu0 %v13632_v18  ;;  %v2494_v23 = vshrl.u32 %v11001_v51, 16  ;;  %v2497_v39 = vshll.u32 %v11001_v51, 16  ;;  %v2503_v36 = vshll.u32 %v14965_v3, 16  ;;  %v11036_v8 = vcombine.low %v2386_v38, %v2396_v33  ;;  %v13635_v3 = vld [vmem:[%s17700_s1 + $0x170] sm:$0xff]  }
 0x162   : > { %v2462_v5 = vor.u32 %v2461_v45, %v15198_v22  ;;  %v2434_v62 = vsel %vm14119_vm2, %v2429_v37, %v15178_v56  ;;  %v2444_v25 = vsel %vm14119_vm2, %v2439_v30, %v2443_v31  ;;  %v15222_v63 = vrot.slane %v2479_v59, 5  ;;  %v11004_v56 = vld [vmem:[%s14084_s15 + $0xa8] sm:$0xf] }
 0x163   : > { %v2496_v14 = vrot.slane %v2494_v23, 4  ;;  %v2499_v44 = vrot.slane %v2497_v39, 5  ;;  %v11037_v32 = vcombine.low %v2410_v49, %v2420_v48  ;;  %v2489_v33 = vshll.u32 %v14940_v12, 16 }
 0x164   : > { %12372 = vmatpush3.bf16.msra.mxu0 %v13632_v18  ;;  %v2483_v18 = vshrl.u32 %v14935_v4, 16  ;;  %v2475_v4 = vrot.slane %v2473_v6, 5  ;;  %v11038_v40 = vcombine.low %v2434_v62, %v2444_v25  ;;  %v2513_v51 = vshll.u32 %v14968_v61, 16 }
 0x165   : > { %12373 = vmatprep.subr.bf16.mxu0 %v13633_v28  ;;  %v2500_v52 = vor.u32 %v2499_v44, %v2496_v14  ;;  %v2518_v45 = vshrl.u32 %v11004_v56, 16  ;;  %v2521_v49 = vshll.u32 %v11004_v56, 16  ;;  %v2527_v12 = vshll.u32 %v14977_v11, 16 }
 0x166   : > { %v2485_v34 = vrot.slane %v2483_v18, 4  ;;  %v2476_v38 = vor.u32 %v2475_v4, %v2472_v47  ;;  %v2531_v37 = vshrl.u32 %v14977_v11, 16  ;;  %v2491_v61 = vrot.slane %v2489_v33, 5  ;;  %v15247_v11 = vld [vmem:[%s17700_s1 + $0x180] sm:$0xff]  }
 0x167   : > { %12342 = vmatmul.mubr.bf16.gmra.mrb[8].mxu0 %v11034_v35  ;;  %v2453_v35 = vrot.slane %v2452_v9, 4  ;;  %v2542_v59 = vshrl.u32 %v11007_v1, 16  ;;  %v2545_v18 = vshll.u32 %v11007_v1, 16  ;;  %v2551_v23 = vshll.u32 %v15046_v13, 16 }
 0x168   : > { %12345 = vmatprep.mubr.bf16.mxu0 %v11035_v60  ;;  %12374 = vmatpush3.bf16.msra.mxu0 %v13633_v28  ;;  %v15224_v28 = vrot.slane %v2503_v36, 5  ;;  %v2463_v60 = vrot.slane %v2462_v5, 4  ;;  %v2486_v29 = vor.u32 %v2485_v34, %v15222_v63  ;;  %v2555_v39 = vshrl.u32 %v15046_v13, 16 }
 0x169   : > { %12375 = vmatprep.subr.bf16.mxu0 %v13634_v24  ;;  %v2458_v30 = vsel %vm14119_vm2, %v2453_v35, %v15198_v22  ;;  %v2501_v48 = vrot.slane %v2500_v52, 4  ;;  %v2515_v2 = vrot.slane %v2513_v51, 5  ;;  %v2520_v36 = vrot.slane %v2518_v45, 4 }
 0x16a   : > { %v2510_v6 = vor.u32 %v2509_v53, %v15224_v28  ;;  %v2468_v31 = vsel %vm14119_vm2, %v2463_v60, %v2467_v16  ;;  %v2487_v22 = vrot.slane %v2486_v29, 4  ;;  %v2523_v9 = vrot.slane %v2521_v49, 5 }
 0x16b   : > { %v2529_v5 = vrot.slane %v2527_v12, 5  ;;  %v2533_v47 = vrot.slane %v2531_v37, 4  ;;  %v11039_v4 = vcombine.low %v2458_v30, %v2468_v31  ;;  %v2547_v62 = vrot.slane %v2545_v18, 5 }
 0x16c   : > { %12376 = vmatpush3.bf16.msra.mxu0 %v13634_v24  ;;  %v2477_v24 = vrot.slane %v2476_v38, 4  ;;  %v2511_v15 = vrot.slane %v2510_v6, 4  ;;  %v2553_v13 = vrot.slane %v2551_v23, 5  ;;  %v2557_v25 = vrot.slane %v2555_v39, 4  ;;  %v13803_v23 = vld [vmem:[%s14084_s15 + $0x10] sm:$0xf] }
 0x16d   : > { %12377 = vmatprep.subr.bf16.mxu0 %v13635_v3  ;;  %v2492_v14 = vsel %vm14119_vm2, %v2487_v22, %v2491_v61  ;;  %v2537_v44 = vshll.u32 %v14984_v26, 16  ;;  %v2524_v53 = vor.u32 %v2523_v9, %v2520_v36  ;;  %v2534_v56 = vor.u32 %v2533_v47, %v2529_v5  ;;  %v11053_v22 = vld [vmem:[%s14084_s15 + $0xc] sm:$0xe]  ;;  %v13804_v47 = vld [vmem:[%s14084_s15 + $0x14] sm:$0x1] }
 0x16e   : > { %v2482_v34 = vsel %vm14119_vm2, %v2477_v24, %v15222_v63  ;;  %v2516_v16 = vsel %vm14119_vm2, %v2511_v15, %v2515_v2  ;;  %v2575_v63 = vshll.u32 %v15052_v50, 16  ;;  %v2579_v38 = vshrl.u32 %v15052_v50, 16 }
 0x16f   : > { %12346 = vmatmul.mubr.bf16.gmra.mrb[12].mxu0 %v11036_v8  ;;  %v2544_v8 = vrot.slane %v2542_v59, 4  ;;  %v2561_v26 = vshll.u32 %v15049_v21, 16  ;;  %v2525_v52 = vrot.slane %v2524_v53, 4  ;;  %v2539_v51 = vrot.slane %v2537_v44, 5  ;;  %v13806_v44 = vld [vmem:[%s14084_s15 + $0x28] sm:$0xf] }
 0x170   : > { %12349 = vmatprep.mubr.bf16.mxu0 %v11037_v32  ;;  %12378 = vmatpush3.bf16.msra.mxu0 %v13635_v3  ;;  %v11010_v3 = vld [vmem:[%s14084_s15 + $0xc0] sm:$0xf]  ;;  %v2506_v32 = vsel %vm14119_vm2, %v2501_v48, %v15224_v28  ;;  %v2535_v28 = vrot.slane %v2534_v56, 4  ;;  %v2577_v6 = vrot.slane %v2575_v63, 5  ;;  %v2581_v49 = vrot.slane %v2579_v38, 4 }
 0x171   : > { %12379 = vmatprep.subr.bf16.mxu0 %v13636_v19  ;;  %v2566_v35 = vshrl.u32 %v11010_v3, 16  ;;  %v2569_v60 = vshll.u32 %v11010_v3, 16  ;;  %v2548_v33 = vor.u32 %v2547_v62, %v2544_v8  ;;  %v11041_v29 = vcombine.low %v2506_v32, %v2516_v16  ;;  %v11055_v16 = vld [vmem:[%s14084_s15 + $0x24] sm:$0xe]  ;;  %v13807_v63 = vld [vmem:[%s14084_s15 + $0x20] sm:$0x1] }
 0x172   : > { %v2563_v30 = vrot.slane %v2561_v26, 5  ;;  %v2530_v50 = vsel %vm14119_vm2, %v2525_v52, %v2529_v5  ;;  %v2540_v21 = vsel %vm14119_vm2, %v2535_v28, %v2539_v51  ;;  %v2582_v24 = vor.u32 %v2581_v49, %v2577_v6  ;;  %v13808_v52 = vld [vmem:[%s14084_s15 + $0x34] sm:$0xf] }
 0x173   : > { %v2568_v45 = vrot.slane %v2566_v35, 4  ;;  %v2571_v1 = vrot.slane %v2569_v60, 5  ;;  %v2549_v12 = vrot.slane %v2548_v33, 4  ;;  %v2585_v61 = vshll.u32 %v15061_v27, 16 }
 0x174   : > { %12380 = vmatpush3.bf16.msra.mxu0 %v13636_v19  ;;  %v2558_v19 = vor.u32 %v2557_v25, %v2553_v13  ;;  %v2977_v39 = vrot.slane %v13803_v23, 5  ;;  %v11042_v48 = vcombine.low %v2530_v50, %v2540_v21  ;;  %v2583_v15 = vrot.slane %v2582_v24, 4  ;;  %v13638_v21 = vld [vmem:[%s17700_s1 + $0x188] sm:$0xff]   ;;  %v11059_v23 = vld [vmem:[%s14084_s15 + $0x54] sm:$0xe] }
 0x175   : > { %12413 = vmatprep.subr.bf16.mxu0 %v15247_v11  ;;  %v2572_v31 = vor.u32 %v2571_v1, %v2568_v45  ;;  %v2554_v59 = vsel %vm14119_vm2, %v2549_v12, %v2553_v13  ;;  %v2587_v9 = vrot.slane %v2585_v61, 5  ;;  %v11069_v5 = vrot.slane %v11053_v22, 9  ;;  %v13805_v13 = vld [vmem:[%s14084_s15 + $0x1c] sm:$0xf]  ;;  %v11056_v1 = vld [vmem:[%s14084_s15 + $0x30] sm:$0xe] }
 0x176   : > { %v2559_v37 = vrot.slane %v2558_v19, 4  ;;  %v2979_v27 = vrot.slane %v2977_v39, 4  ;;  %v2984_v25 = vrot.slane %v13805_v13, 5  ;;  %v2991_v32 = vrot.slane %v13806_v44, 5  ;;  %v13642_v13 = vld [vmem:[%s17700_s1 + $0x1a8] sm:$0xff]   ;;  %v13647_v44 = vld [vmem:[%s17700_s1 + $0x1c0] sm:$0xff]  }
 0x177   : > { %12350 = vmatmul.mubr.bf16.gmra.mrb[16].mxu0 %v11038_v40  ;;  %v11040_v40 = vcombine.low %v2482_v34, %v2492_v14  ;;  %v2573_v36 = vrot.slane %v2572_v31, 4  ;;  %v2588_v62 = vsel %vm14119_vm2, %v2583_v15, %v2587_v9  ;;  %v2978_v3 = vsel %vm14449_vm5, %v11069_v5, %v2977_v39  ;;  %v11054_v14 = vld [vmem:[%s14084_s15 + $0x18] sm:$0xe] }
 0x178   : > { %12353 = vmatprep.mubr.bf16.mxu0 %v11039_v4  ;;  %v2564_v18 = vsel %vm14119_vm2, %v2559_v37, %v2563_v30  ;;  %v2980_v4 = vrot.slane %v13804_v47, 5  ;;  %v11070_v35 = vrot.slane %v11054_v14, 9  ;;  %v2986_v60 = vrot.slane %v2984_v25, 4  ;;  %v13640_v15 = vld [vmem:[%s17700_s1 + $0x198] sm:$0xff]  }
 0x179   : > { %v11043_v2 = vcombine.low %v2554_v59, %v2564_v18  ;;  %v2578_v8 = vsel %vm14119_vm2, %v2573_v36, %v2577_v6  ;;  %v2987_v38 = vrot.slane %v13807_v63, 5  ;;  %v11071_v33 = vrot.slane %v11055_v16, 9  ;;  %v17886_v16 = vld [vmem:[#allocation13_spill] sm:$0xff]  ;;  %v17892_v63 = vld [vmem:[#allocation10_spill] sm:$0xff] }
 0x17a   : > { %v2981_v34 = vsel %vm14449_vm5, %v2979_v27, %v2980_v4  ;;  %v11044_v53 = vcombine.low %v2578_v8, %v2588_v62  ;;  %v2993_v19 = vrot.slane %v2991_v32, 4  ;;  %v2994_v26 = vrot.slane %v14834_v41, 5  ;;  %v11057_v41 = vld [vmem:[%s14084_s15 + $0x3c] sm:$0xe]  ;;  %v11061_v27 = vld [vmem:[%s14084_s15 + $0x6c] sm:$0xe] }
 0x17b   : > { %v11101_v56 = vcombine.low %v2978_v3, %v2981_v34  ;;  %v2998_v28 = vrot.slane %v13808_v52, 5  ;;  %v2992_v51 = vsel %vm14449_vm5, %v11071_v33, %v2991_v32  ;;  %v3005_v6 = vrot.slane %v14932_v55, 5  ;;  %v17885_v32 = vld [vmem:[#allocation15_spill] sm:$0xff] }
 0x17c   : > { %v2995_v45 = vsel %vm14449_vm5, %v2993_v19, %v2994_v26  ;;  %v11072_v37 = vrot.slane %v11056_v1, 9  ;;  %v3001_v50 = vrot.slane %v14879_v54, 5  ;;  %v11073_v31 = vrot.slane %v11057_v41, 9  ;;  %v17894_v33 = vld [vmem:[#allocation11_spill] sm:$0xff]  ;;  %v17895_v19 = vld [vmem:[#allocation9_spill] sm:$0xff] }
 0x17d   : > { %v11103_v12 = vcombine.low %v2992_v51, %v2995_v45  ;;  %v3000_v30 = vrot.slane %v2998_v28, 4  ;;  %v3007_v24 = vrot.slane %v3005_v6, 4  ;;  %v3008_v61 = vrot.slane %v15029_v57, 5  ;;  %v13639_v57 = vld [vmem:[%s17700_s1 + $0x190] sm:$0xff]   ;;  %v17901_v51 = vld [vmem:[#allocation21_spill] sm:$0xff]  ;;  %v17904_v41 = vld [vmem:[#allocation23_spill] sm:$0xff] }
 0x17e   : > { %v2999_v55 = vsel %vm14449_vm5, %v11072_v37, %v2998_v28  ;;  %v3006_v54 = vsel %vm14449_vm5, %v11073_v31, %v3005_v6  ;;  %v3022_v36 = vrot.slane %v15115_v20, 5  ;;  %v3033_v5 = vrot.slane %v15133_v42, 5  ;;  %v13641_v20 = vld [vmem:[%s17700_s1 + $0x1a0] sm:$0xff]   ;;  %v17900_v28 = vld [vmem:[#allocation20_spill] sm:$0xff]  ;;  %v13645_v1 = vld [vmem:[%s14084_s15 + $0x18] sm:$0xff]  }
 0x17f   : > { %12354 = vmatmul.mubr.bf16.gmra.mrb[20].mxu0 %v11040_v40  ;;  %v2985_v40 = vsel %vm14449_vm5, %v11070_v35, %v2984_v25  ;;  %v3002_v59 = vsel %vm14449_vm5, %v3000_v30, %v3001_v50  ;;  %v3009_v18 = vsel %vm14449_vm5, %v3007_v24, %v3008_v61  ;;  %v11077_v4 = vrot.slane %v11061_v27, 9  ;;  %v17889_v35 = vld [vmem:[#allocation16_spill] sm:$0xff]  ;;  %v17903_v6 = vld [vmem:[#allocation22_spill] sm:$0xff]  ;;  %v13650_v30 = vld [vmem:[%s17700_s1 + $0x1c8] sm:$0xff]  }
 0x180   : > { %12357 = vmatprep.mubr.bf16.mxu0 %v11041_v29  ;;  %v2988_v29 = vsel %vm14449_vm5, %v2986_v60, %v2987_v38  ;;  %v11104_v39 = vcombine.low %v2999_v55, %v3002_v59  ;;  %v11105_v22 = vcombine.low %v3006_v54, %v3009_v18  ;;  %v3035_v8 = vrot.slane %v3033_v5, 4  ;;  %v13648_v37 = vld [vmem:[%s14084_s15 + $0x30] sm:$0xff]   ;;  %v13651_v31 = vld [vmem:[%s14084_s15 + $0x48] sm:$0xff]   ;;  %v13656_v24 = vld [vmem:[%s17700_s1 + $0x1d8] sm:$0xff]  }
 0x181   : > { %v11102_v49 = vcombine.low %v2985_v40, %v2988_v29  ;;  %v3036_v62 = vrot.slane %v15172_v10, 5  ;;  %v17882_v25 = vcombine.low %v14843_v17, %v14847_v58  ;;  %v3034_v42 = vsel %vm14449_vm5, %v11077_v4, %v3033_v5  ;;  %v13643_v10 = vld [vmem:[%s17700_s1 + $0x1b0] sm:$0xff]   ;;  %v13644_v17 = vld [vmem:[%s17700_s1 + $0x1b8] sm:$0xff]   ;;  %v17897_v40 = vld [vmem:[#allocation18_spill] sm:$0xff] }
 0x182   : > { %v17883_v58 = vld [vmem:[#allocation12_spill] sm:$0xff]  ;;  %v17896_v26 = vcombine.low %v17894_v33, %v17895_v19  ;;  %v17898_v29 = vld [vmem:[#allocation19_spill] sm:$0xff]  ;;  %v17902_v45 = vcombine.low %v17900_v28, %v17901_v51  ;;  %v15394_v61 = vld [vmem:[%s14084_s15 + $0x58] sm:$0xf] }
 0x183   : > { %v3037_v3 = vsel %vm14449_vm5, %v3035_v8, %v3036_v62  ;;  %v17884_v14 = vcombine.low %v14883_v43, %v17883_v58  ;;  %v17891_v43 = vld [vmem:[#allocation17_spill] sm:$0xff]  ;;  %v17899_v52 = vcombine.low %v17897_v40, %v17898_v29  ;;  %v13653_v50 = vld [vmem:[%s17700_s1 + $0x1d0] sm:$0xff]   ;;  %v4651_v54 = vrot.slane %v15394_v61, 5 }
 0x184   : > { %v11109_v34 = vcombine.low %v3034_v42, %v3037_v3  ;;  %v17893_v38 = vcombine.low %v17891_v43, %v17892_v63  ;;  %v15397_v55 = vld [vmem:[%s14084_s15 + $0x5c] sm:$0x1]  ;;  %v11290_v59 = vld [vmem:[%s14084_s15 + $0x54] sm:$0xe]  ;;  %v15434_v42 = vld [vmem:[%s14084_s15 + $0x74] sm:$0x1] }
 0x185   : > { %v4654_v18 = vrot.slane %v15397_v55, 5  ;;  %v4668_v58 = vrot.slane %v15434_v42, 5  ;;  %v15448_v43 = vld [vmem:[%s14084_s15 + $0x20] sm:$0x1]  ;;  %v13657_v19 = vld [vmem:[%s14084_s15 + $0x78] sm:$0xff]  }
 0x186   : > { %v13668_v28 = vld [vmem:[%s17700_s1 + $0x1f8] sm:$0xff]   ;;  %v11203_v51 = vld [vmem:[%s14084_s15 + $0x30] sm:$0xf]  ;;  %v11298_v27 = vld [vmem:[%s14084_s15 + $0xb4] sm:$0xe] }
 0x187   : > { %12358 = vmatmul.mubr.bf16.gmra.mrb[24].mxu0 %v11042_v48  ;;  %v11075_v48 = vrot.slane %v11059_v23, 9  ;;  %v11197_v23 = vld [vmem:[%s14084_s15 + $0x18] sm:$0xf] }
 0x188   : > { %12361 = vmatprep.mubr.bf16.mxu0 %v11043_v2  ;;  %v3845_v5 = vshrl.u32 %v11197_v23, 16 }
 0x18f   : > { %12362 = vmatmul.mubr.bf16.gmra.mrb[28].mxu0 %v11044_v53  ;;  %v17887_v53 = vcombine.low %v17885_v32, %v17886_v16 }
 0x190   : > { %12381 = vmatprep.mubr.bf16.mxu0 %v11101_v56  ;;  %v17888_v56 = vld [vmem:[#allocation14_spill] sm:$0xff] }
 0x191   : > { %v17890_v60 = vcombine.low %v17888_v56, %v17889_v35 }
 0x197   : > { %12382 = vmatmul.mubr.bf16.vlgmr.msra.gmra.mrb[0].mxu0 %v11102_v49  ;;  %v17905_v49 = vcombine.low %v17903_v6, %v17904_v41  ;;  %v3864_v41 = vshll.u32 %v15448_v43, 16 }
 0x198   : > { %12414 = vmatpush3.bf16.msra.mxu0 %v15247_v11  ;;  %12385 = vmatprep.mubr.bf16.mxu0 %v11103_v12  ;;  %v3019_v11 = vrot.slane %v15073_v7, 5  ;;  %v13646_v12 = vld [vmem:[%s14084_s15 + $0x24] sm:$0xff]  }
 0x199   : > { %12415 = vmatprep.subr.bf16.mxu0 %v13638_v21 }
 0x19a   : > { %v3021_v2 = vrot.slane %v3019_v11, 4  ;;  %v3020_v7 = vsel %vm14449_vm5, %v11075_v48, %v3019_v11  ;;  %v11306_v11 = vrot.slane %v11290_v59, 9  ;;  %v15408_v48 = vld [vmem:[%s14084_s15 + $0x1c] sm:$0xf] }
 0x19b   : > { %v3854_v4 = vshll.u32 %v15408_v48, 16  ;;  %v3858_v8 = vshrl.u32 %v15408_v48, 16 }
 0x19c   : > { %12416 = vmatpush3.bf16.msra.mxu0 %v13638_v21  ;;  %v3023_v9 = vsel %vm14449_vm5, %v3021_v2, %v3022_v36  ;;  %v13649_v21 = vld [vmem:[%s14084_s15 + $0x3c] sm:$0xff]   ;;  %v15412_v2 = vsel %vm14449_vm5, %v11306_v11, %v4651_v54 }
 0x19d   : > { %12417 = vmatprep.subr.bf16.mxu0 %v13639_v57  ;;  %v11107_v47 = vcombine.low %v3020_v7, %v3023_v9  ;;  %17906 = vst [vmem:[#allocation12_spill] sm:$0xff] %v15412_v2  ;;  %v13654_v36 = vld [vmem:[%s14084_s15 + $0x60] sm:$0xff]   ;;  %v13662_v9 = vld [vmem:[%s17700_s1 + $0x1e8] sm:$0xff]   ;;  %v3860_v56 = vrot.slane %v3858_v8, 4  ;;  %v13660_v8 = vld [vmem:[%s14084_s15 + $0x90] sm:$0xff]  }
 0x19e   : > { %v13667_v2 = vld [vmem:[%s14084_s15 + $0xcc] sm:$0xff]  }
 0x19f   : > { %12386 = vmatmul.mubr.bf16.gmra.mrb[4].mxu0 %v11104_v39  ;;  %v4653_v39 = vrot.slane %v4651_v54, 4  ;;  %v15486_v54 = vld [vmem:[%s17700_s1 + $0x200] sm:$0xff]  }
 0x1a0   : > { %12389 = vmatprep.mubr.bf16.mxu0 %v11105_v22  ;;  %12418 = vmatpush3.bf16.msra.mxu0 %v13639_v57  ;;  %v13659_v57 = vld [vmem:[%s17700_s1 + $0x1e0] sm:$0xff]   ;;  %v13652_v22 = vld [vmem:[%s14084_s15 + $0x54] sm:$0xff]  }
 0x1a1   : > { %12419 = vmatprep.subr.bf16.mxu0 %v13640_v15  ;;  %v15418_v7 = vsel %vm14449_vm5, %v4653_v39, %v4654_v18  ;;  %v15489_v18 = vld [vmem:[%s14084_s15 + $0x34] sm:$0xf]  ;;  %v15495_v39 = vrot.slane %v3864_v41, 5 }
 0x1a2   : > { %17907 = vst [vmem:[#allocation15_spill] sm:$0xff] %v15418_v7  ;;  %v15689_v7 = vld [vmem:[%s14084_s15 + $0x64] sm:$0xf] }
 0x1a3   : > { %17922 = vst [vmem:[#allocation25_spill] sm:$0xff] %v15689_v7 }
 0x1a4   : > { %12420 = vmatpush3.bf16.msra.mxu0 %v13640_v15  ;;  %v11200_v15 = vld [vmem:[%s14084_s15 + $0x24] sm:$0xf] }
 0x1a5   : > { %12421 = vmatprep.subr.bf16.mxu0 %v13641_v20  ;;  %v3869_v62 = vshrl.u32 %v11200_v15, 16 }
 0x1a7   : > { %12390 = vmatmul.mubr.bf16.gmra.mrb[8].mxu0 %v17882_v25  ;;  %v15431_v25 = vld [vmem:[%s14084_s15 + $0x70] sm:$0xf]  ;;  %v3871_v63 = vrot.slane %v3869_v62, 4 }
 0x1a8   : > { %12393 = vmatprep.mubr.bf16.mxu0 %v11107_v47  ;;  %12422 = vmatpush3.bf16.msra.mxu0 %v13641_v20  ;;  %v15424_v20 = vld [vmem:[%s14084_s15 + $0x28] sm:$0xf]  ;;  %v3848_v47 = vshll.u32 %v11197_v23, 16 }
 0x1a9   : > { %12423 = vmatprep.subr.bf16.mxu0 %v13642_v13  ;;  %v3878_v3 = vshll.u32 %v15424_v20, 16 }
 0x1aa   : > { %v3850_v16 = vrot.slane %v3848_v47, 5  ;;  %v3896_v47 = vshll.u32 %v11203_v51, 16 }
 0x1ab   : > { %v15458_v40 = vrot.slane %v3878_v3, 5  ;;  %v3902_v3 = vshll.u32 %v15489_v18, 16 }
 0x1ac   : > { %12424 = vmatpush3.bf16.msra.mxu0 %v13642_v13  ;;  %v3872_v13 = vshll.u32 %v11200_v15, 16  ;;  %v13658_v15 = vld [vmem:[%s14084_s15 + $0x84] sm:$0xff]   ;;  %v3898_v41 = vrot.slane %v3896_v47, 5 }
 0x1ad   : > { %12425 = vmatprep.subr.bf16.mxu0 %v13643_v10 }
 0x1af   : > { %12394 = vmatmul.mubr.bf16.gmra.mrb[12].mxu0 %v17884_v14  ;;  %v13665_v14 = vld [vmem:[%s17700_s1 + $0x1f0] sm:$0xff]  }
 0x1b0   : > { %12397 = vmatprep.mubr.bf16.mxu0 %v11109_v34  ;;  %12426 = vmatpush3.bf16.msra.mxu0 %v13643_v10  ;;  %v3882_v10 = vshrl.u32 %v15424_v20, 16  ;;  %v11292_v34 = vld [vmem:[%s14084_s15 + $0x6c] sm:$0xe] }
 0x1b1   : > { %12427 = vmatprep.subr.bf16.mxu0 %v13644_v17  ;;  %v11308_v32 = vrot.slane %v11292_v34, 9  ;;  %v3906_v34 = vshrl.u32 %v15489_v18, 16 }
 0x1b2   : > { %v3884_v29 = vrot.slane %v3882_v10, 4 }
 0x1b4   : > { %12428 = vmatpush3.bf16.msra.mxu0 %v13644_v17  ;;  %v4665_v17 = vrot.slane %v15431_v25, 5 }
 0x1b5   : > { %12461 = vmatprep.subr.bf16.mxu0 %v13647_v44 }
 0x1b6   : > { %v4667_v35 = vrot.slane %v4665_v17, 4  ;;  %v15452_v33 = vsel %vm14449_vm5, %v11308_v32, %v4665_v17  ;;  %v15520_v17 = vld [vmem:[%s14084_s15 + $0x40] sm:$0xf]  ;;  %v15525_v32 = vld [vmem:[%s14084_s15 + $0x38] sm:$0x1] }
 0x1b7   : > { %12398 = vmatmul.mubr.bf16.gmra.mrb[16].mxu0 %v17887_v53  ;;  %v15444_v53 = vrot.slane %v3854_v4, 5  ;;  %17908 = vst [vmem:[#allocation13_spill] sm:$0xff] %v15452_v33 }
 0x1b8   : > { %12401 = vmatprep.mubr.bf16.mxu0 %v17890_v60  ;;  %v13655_v60 = vld [vmem:[%s14084_s15 + $0x6c] sm:$0xff]  }
 0x1b9   : > { %v3861_v6 = vor.u32 %v3860_v56, %v15444_v53  ;;  %v15531_v56 = vld [vmem:[%s14084_s15 + $0x98] sm:$0x1] }
 0x1bb   : > { %v15493_v23 = vrot.slane %v3861_v6, 4 }
 0x1bf   : > { %12402 = vmatmul.mubr.bf16.gmra.mrb[20].mxu0 %v17893_v38  ;;  %v3874_v38 = vrot.slane %v3872_v13, 5 }
 0x1c0   : > { %12405 = vmatprep.mubr.bf16.mxu0 %v17896_v26  ;;  %v15456_v26 = vld [vmem:[%s14084_s15 + $0x2c] sm:$0x1] }
 0x1c7   : > { %12406 = vmatmul.mubr.bf16.gmra.mrb[24].mxu0 %v17899_v52  ;;  %v15462_v52 = vsel %vm14449_vm5, %v4667_v35, %v4668_v58  ;;  %v15534_v35 = vld [vmem:[%s14084_s15 + $0xa0] sm:$0xf] }
 0x1c8   : > { %12409 = vmatprep.mubr.bf16.mxu0 %v17902_v45  ;;  %17909 = vst [vmem:[#allocation14_spill] sm:$0xff] %v15462_v52  ;;  %v11297_v45 = vld [vmem:[%s14084_s15 + $0xa8] sm:$0xe] }
 0x1cf   : > { %12410 = vmatmul.mubr.bf16.gmra.mrb[28].mxu0 %v17905_v49  ;;  %v3875_v49 = vor.u32 %v3874_v38, %v3871_v63  ;;  %v11295_v63 = vld [vmem:[%s14084_s15 + $0x90] sm:$0xe] }
 0x1d0   : > { %12429 = vmatprep.mubr.bf16.mxu0 %v13645_v1 }
 0x1d7   : > { %12430 = vmatmul.mubr.bf16.vlgmr.msra.gmra.mrb[0].mxu0 %v13646_v12  ;;  %v3888_v12 = vshll.u32 %v15456_v26, 16 }
 0x1d8   : > { %12462 = vmatpush3.bf16.msra.mxu0 %v13647_v44  ;;  %12433 = vmatprep.mubr.bf16.mxu0 %v13648_v37  ;;  %v3847_v44 = vrot.slane %v3845_v5, 4  ;;  %v15474_v37 = vld [vmem:[%s14084_s15 + $0x88] sm:$0xf] }
 0x1d9   : > { %12463 = vmatprep.subr.bf16.mxu0 %v13650_v30  ;;  %v15501_v5 = vrot.slane %v3888_v12, 5 }
 0x1da   : > { %v3851_v1 = vor.u32 %v3850_v16, %v3847_v44  ;;  %v15528_v16 = vld [vmem:[%s14084_s15 + $0x94] sm:$0xf]  ;;  %v15606_v44 = vld [vmem:[%s14084_s15 + $0xbc] sm:$0x1] }
 0x1db   : > { %v4686_v38 = vrot.slane %v15528_v16, 5 }
 0x1dc   : > { %12464 = vmatpush3.bf16.msra.mxu0 %v13650_v30  ;;  %v15477_v30 = vld [vmem:[%s14084_s15 + $0x8c] sm:$0x1]  ;;  %v15491_v11 = vrot.slane %v3851_v1, 4  ;;  %v4693_v1 = vrot.slane %v15534_v35, 5 }
 0x1dd   : > { %12465 = vmatprep.subr.bf16.mxu0 %v13653_v50  ;;  %v4682_v59 = vrot.slane %v15477_v30, 5  ;;  %v4688_v12 = vrot.slane %v4686_v38, 4 }
 0x1df   : > { %12434 = vmatmul.mubr.bf16.gmra.mrb[4].mxu0 %v13649_v21  ;;  %v3893_v21 = vshrl.u32 %v11203_v51, 16  ;;  %v11296_v51 = vld [vmem:[%s14084_s15 + $0x9c] sm:$0xe] }
 0x1e0   : > { %12437 = vmatprep.mubr.bf16.mxu0 %v13651_v31  ;;  %12466 = vmatpush3.bf16.msra.mxu0 %v13653_v50  ;;  %v3885_v50 = vor.u32 %v3884_v29, %v15458_v40  ;;  %v11294_v31 = vld [vmem:[%s14084_s15 + $0x84] sm:$0xe]  ;;  %v3926_v29 = vshll.u32 %v15520_v17, 16 }
 0x1e1   : > { %12467 = vmatprep.subr.bf16.mxu0 %v13656_v24  ;;  %v15510_v13 = vrot.slane %v3893_v21, 4  ;;  %v3908_v21 = vrot.slane %v3906_v34, 4 }
 0x1e2   : > { %v15508_v62 = vrot.slane %v3885_v50, 4  ;;  %v11312_v50 = vrot.slane %v11296_v51, 9  ;;  %v15582_v51 = vld [vmem:[%s14084_s15 + $0x4c] sm:$0xf] }
 0x1e4   : > { %12468 = vmatpush3.bf16.msra.mxu0 %v13656_v24  ;;  %v4679_v24 = vrot.slane %v15474_v37, 5 }
 0x1e5   : > { %12469 = vmatprep.subr.bf16.mxu0 %v13659_v57 }
 0x1e7   : > { %12438 = vmatmul.mubr.bf16.gmra.mrb[8].mxu0 %v13652_v22  ;;  %v11206_v22 = vld [vmem:[%s14084_s15 + $0x3c] sm:$0xf] }
 0x1e8   : > { %12441 = vmatprep.mubr.bf16.mxu0 %v13654_v36  ;;  %12470 = vmatpush3.bf16.msra.mxu0 %v13659_v57  ;;  %v11310_v57 = vrot.slane %v11294_v31, 9  ;;  %v4681_v36 = vrot.slane %v4679_v24, 4  ;;  %v3917_v58 = vshrl.u32 %v11206_v22, 16  ;;  %v15549_v31 = vld [vmem:[%s14084_s15 + $0x44] sm:$0x1] }
 0x1e9   : > { %12471 = vmatprep.subr.bf16.mxu0 %v13662_v9  ;;  %17912 = vst [vmem:[#allocation10_spill] sm:$0xff] %v15549_v31 }
 0x1ea   : > { %v15505_v4 = vsel %vm14449_vm5, %v11310_v57, %v4679_v24  ;;  %v15515_v10 = vsel %vm14449_vm5, %v4681_v36, %v4682_v59  ;;  %v11209_v24 = vld [vmem:[%s14084_s15 + $0x48] sm:$0xf]  ;;  %v4695_v57 = vrot.slane %v4693_v1, 4  ;;  %v3912_v36 = vshll.u32 %v15525_v32, 16 }
 0x1eb   : > { %17910 = vst [vmem:[#allocation16_spill] sm:$0xff] %v15505_v4  ;;  %17911 = vst [vmem:[#allocation17_spill] sm:$0xff] %v15515_v10 }
 0x1ec   : > { %12472 = vmatpush3.bf16.msra.mxu0 %v13662_v9  ;;  %v15499_v9 = vrot.slane %v3875_v49, 4  ;;  %v15546_v49 = vrot.slane %v3902_v3, 5  ;;  %v13663_v3 = vld [vmem:[%s14084_s15 + $0xa8] sm:$0xff]  }
 0x1ed   : > { %12473 = vmatprep.subr.bf16.mxu0 %v13665_v14 }
 0x1ef   : > { %12442 = vmatmul.mubr.bf16.gmra.mrb[12].mxu0 %v13655_v60  ;;  %v15537_v60 = vld [vmem:[%s14084_s15 + $0xa4] sm:$0x1] }
 0x1f0   : > { %12445 = vmatprep.mubr.bf16.mxu0 %v13657_v19  ;;  %12474 = vmatpush3.bf16.msra.mxu0 %v13665_v14  ;;  %v3920_v14 = vshll.u32 %v11206_v22, 16  ;;  %v4689_v19 = vrot.slane %v15531_v56, 5  ;;  %v4696_v6 = vrot.slane %v15537_v60, 5  ;;  %v13661_v22 = vld [vmem:[%s14084_s15 + $0x9c] sm:$0xff]  }
 0x1f1   : > { %12475 = vmatprep.subr.bf16.mxu0 %v13668_v28 }
 0x1f2   : > { %v15562_v47 = vsel %vm14449_vm5, %v4688_v12, %v4689_v19  ;;  %v15569_v34 = vrot.slane %v3920_v14, 5  ;;  %v3930_v19 = vshrl.u32 %v15520_v17, 16  ;;  %v3899_v12 = vor.u32 %v3898_v41, %v15510_v13 }
 0x1f3   : > { %17914 = vst [vmem:[#allocation9_spill] sm:$0xff] %v15562_v47  ;;  %v3867_v14 = vsel %vm14119_vm2, %v15493_v23, %v15495_v39  ;;  %v3944_v13 = vshll.u32 %v11209_v24, 16  ;;  %v11313_v41 = vrot.slane %v11297_v45, 9  ;;  %v3950_v23 = vshll.u32 %v15582_v51, 16 }
 0x1f4   : > { %12476 = vmatpush3.bf16.msra.mxu0 %v13668_v28  ;;  %v11311_v28 = vrot.slane %v11295_v63, 9  ;;  %v15571_v63 = vrot.slane %v3926_v29, 5  ;;  %v3857_v29 = vsel %vm14119_vm2, %v15491_v11, %v15444_v53  ;;  %v3954_v39 = vshrl.u32 %v15582_v51, 16 }
 0x1f5   : > { %12509 = vmatprep.subr.bf16.mxu0 %v15486_v54  ;;  %v15616_v47 = vrot.slane %v3899_v12, 4  ;;  %v3932_v4 = vrot.slane %v3930_v19, 4 }
 0x1f6   : > { %v15554_v59 = vsel %vm14449_vm5, %v11311_v28, %v4686_v38  ;;  %v15577_v38 = vsel %vm14449_vm5, %v4695_v57, %v4696_v6  ;;  %v3936_v28 = vshll.u32 %v15549_v31, 16  ;;  %v15592_v6 = vld [vmem:[%s14084_s15 + $0xac] sm:$0xf]  ;;  %v15598_v57 = vld [vmem:[%s14084_s15 + $0xb8] sm:$0xf]  ;;  %v3974_v31 = vshll.u32 %v15394_v61, 16 }
 0x1f7   : > { %12446 = vmatmul.mubr.bf16.gmra.mrb[16].mxu0 %v13658_v15  ;;  %17913 = vst [vmem:[#allocation11_spill] sm:$0xff] %v15554_v59  ;;  %v15558_v15 = vrot.slane %v3917_v58, 4  ;;  %17916 = vst [vmem:[#allocation19_spill] sm:$0xff] %v15577_v38  ;;  %v3909_v58 = vor.u32 %v3908_v21, %v15546_v49  ;;  %v4700_v53 = vrot.slane %v15592_v6, 5  ;;  %v4710_v38 = vrot.slane %v15606_v44, 5 }
 0x1f8   : > { %12449 = vmatprep.mubr.bf16.mxu0 %v13660_v8  ;;  %v15566_v8 = vsel %vm14449_vm5, %v11312_v50, %v4693_v1  ;;  %v3941_v1 = vshrl.u32 %v11209_v24, 16  ;;  %v15595_v50 = vld [vmem:[%s14084_s15 + $0xb0] sm:$0x1]  ;;  %v15618_v59 = vrot.slane %v3912_v36, 5  ;;  %v13666_v36 = vld [vmem:[%s14084_s15 + $0xc0] sm:$0xff]   ;;  %v15636_v12 = vrot.slane %v3936_v28, 5 }
 0x1f9   : > { %17915 = vst [vmem:[#allocation18_spill] sm:$0xff] %v15566_v8  ;;  %v4703_v11 = vrot.slane %v15595_v50, 5  ;;  %v4702_v21 = vrot.slane %v4700_v53, 4  ;;  %v11314_v8 = vrot.slane %v11298_v27, 9  ;;  %v15622_v45 = vsel %vm14449_vm5, %v11313_v41, %v4700_v53  ;;  %v11212_v41 = vld [vmem:[%s14084_s15 + $0x54] sm:$0xf] }
 0x1fa   : > { %17917 = vst [vmem:[#allocation20_spill] sm:$0xff] %v15622_v45  ;;  %v15625_v10 = vrot.slane %v3909_v58, 4  ;;  %v3943_v53 = vrot.slane %v3941_v1, 4  ;;  %v11261_v1 = vcombine.low %v3857_v29, %v3867_v14  ;;  %v3881_v58 = vsel %vm14119_vm2, %v15499_v9, %v15458_v40  ;;  %v15677_v14 = vld [vmem:[%s14084_s15 + $0xd4] sm:$0x1] }
 0x1fb   : > { %v15629_v52 = vsel %vm14449_vm5, %v4702_v21, %v4703_v11  ;;  %v15646_v11 = vld [vmem:[%s14084_s15 + $0x50] sm:$0x1]  ;;  %v3956_v21 = vrot.slane %v3954_v39, 4  ;;  %v15666_v39 = vld [vmem:[%s14084_s15 + $0xc8] sm:$0x1]  ;;  %v3905_v40 = vsel %vm14119_vm2, %v15616_v47, %v15546_v49  ;;  %v3933_v9 = vor.u32 %v3932_v4, %v15571_v63 }
 0x1fc   : > { %17918 = vst [vmem:[#allocation21_spill] sm:$0xff] %v15629_v52  ;;  %17921 = vst [vmem:[#allocation24_spill] sm:$0xff] %v15646_v11  ;;  %v3960_v4 = vshll.u32 %v15646_v11, 16  ;;  %v11215_v47 = vld [vmem:[%s14084_s15 + $0x60] sm:$0xf]  ;;  %v3968_v33 = vshll.u32 %v11212_v41, 16 }
 0x1ff   : > { %12450 = vmatmul.mubr.bf16.gmra.mrb[20].mxu0 %v13661_v22  ;;  %v4707_v22 = vrot.slane %v15598_v57, 5 }
 0x200   : > { %12453 = vmatprep.mubr.bf16.mxu0 %v13663_v3  ;;  %v13664_v3 = vld [vmem:[%s14084_s15 + $0xb4] sm:$0xff]  }
 0x201   : > { %v4709_v24 = vrot.slane %v4707_v22, 4  ;;  %v15633_v27 = vsel %vm14449_vm5, %v11314_v8, %v4707_v22  ;;  %v3946_v8 = vrot.slane %v3944_v13, 5  ;;  %v15648_v22 = vrot.slane %v3950_v23, 5  ;;  %v15663_v23 = vld [vmem:[%s14084_s15 + $0xc4] sm:$0xf] }
 0x202   : > { %17919 = vst [vmem:[#allocation22_spill] sm:$0xff] %v15633_v27  ;;  %v3923_v13 = vor.u32 %v15569_v34, %v15558_v15  ;;  %v4717_v15 = vrot.slane %v15666_v39, 5  ;;  %v3965_v34 = vshrl.u32 %v11212_v41, 16 }
 0x203   : > { %v15643_v19 = vsel %vm14449_vm5, %v4709_v24, %v4710_v38  ;;  %v3891_v38 = vsel %vm14119_vm2, %v15508_v62, %v15501_v5  ;;  %v15669_v24 = vld [vmem:[%s14084_s15 + $0xd0] sm:$0xf]  ;;  %v11299_v5 = vld [vmem:[%s14084_s15 + $0xc0] sm:$0xe]  ;;  %v4714_v62 = vrot.slane %v15663_v23, 5  ;;  %v3947_v49 = vor.u32 %v3946_v8, %v3943_v53 }
 0x204   : > { %17920 = vst [vmem:[#allocation23_spill] sm:$0xff] %v15643_v19  ;;  %v11315_v29 = vrot.slane %v11299_v5, 9  ;;  %v4721_v28 = vrot.slane %v15669_v24, 5  ;;  %v4724_v19 = vrot.slane %v15677_v14, 5  ;;  %v3957_v45 = vor.u32 %v3956_v21, %v15648_v22 }
 0x205   : > { %v4716_v27 = vrot.slane %v4714_v62, 4  ;;  %v3978_v53 = vshrl.u32 %v15394_v61, 16  ;;  %v3989_v21 = vshrl.u32 %v11215_v47, 16  ;;  %v3915_v61 = vsel %vm14119_vm2, %v15625_v10, %v15618_v59 }
 0x206   : > { %v4723_v5 = vrot.slane %v4721_v28, 4  ;;  %v3970_v10 = vrot.slane %v3968_v33, 5  ;;  %v15727_v59 = vrot.slane %v3974_v31, 5  ;;  %v4022_v31 = vshll.u32 %v15431_v25, 16 }
 0x207   : > { %12454 = vmatmul.mubr.bf16.gmra.mrb[24].mxu0 %v13664_v3  ;;  %v11300_v3 = vld [vmem:[%s14084_s15 + $0xcc] sm:$0xe]  ;;  %v15700_v8 = vsel %vm14449_vm5, %v4716_v27, %v4717_v15  ;;  %v15716_v27 = vrot.slane %v3923_v13, 4  ;;  %v3998_v15 = vshll.u32 %v15689_v7, 16  ;;  %v3980_v13 = vrot.slane %v3978_v53, 4 }
 0x208   : > { %12457 = vmatprep.mubr.bf16.mxu0 %v13666_v36  ;;  %v11316_v52 = vrot.slane %v11300_v3, 9  ;;  %v15693_v36 = vsel %vm14449_vm5, %v11315_v29, %v4714_v62  ;;  %17924 = vst [vmem:[#allocation27_spill] sm:$0xff] %v15700_v8  ;;  %v3992_v3 = vshll.u32 %v11215_v47, 16  ;;  %v15710_v29 = vsel %vm14449_vm5, %v4723_v5, %v4724_v19  ;;  %v11218_v5 = vld [vmem:[%s14084_s15 + $0x6c] sm:$0xf] }
 0x209   : > { %17923 = vst [vmem:[#allocation26_spill] sm:$0xff] %v15693_v36  ;;  %17926 = vst [vmem:[#allocation29_spill] sm:$0xff] %v15710_v29  ;;  %v15723_v47 = vrot.slane %v3960_v4, 5  ;;  %v3967_v62 = vrot.slane %v3965_v34, 4  ;;  %v4002_v19 = vshrl.u32 %v15689_v7, 16  ;;  %v3948_v8 = vrot.slane %v3947_v49, 4 }
 0x20a   : > { %v15704_v41 = vsel %vm14449_vm5, %v11316_v52, %v4721_v28  ;;  %v15721_v28 = vrot.slane %v3933_v9, 4  ;;  %v3958_v36 = vrot.slane %v3957_v45, 4  ;;  %v3984_v52 = vshll.u32 %v15397_v55, 16  ;;  %v15731_v34 = vld [vmem:[%s14084_s15 + $0x68] sm:$0x1] }
 0x20b   : > { %17925 = vst [vmem:[#allocation28_spill] sm:$0xff] %v15704_v41  ;;  %v3991_v9 = vrot.slane %v3989_v21, 4  ;;  %v3994_v29 = vrot.slane %v3992_v3, 5  ;;  %v11262_v4 = vcombine.low %v3881_v58, %v3891_v38  ;;  %v11263_v41 = vcombine.low %v3905_v40, %v3915_v61  ;;  %v15749_v21 = vld [vmem:[%s14084_s15 + $0x7c] sm:$0xf] }
 0x20c   : > { %v15733_v7 = vrot.slane %v3998_v15, 5  ;;  %v4013_v11 = vshrl.u32 %v11218_v5, 16  ;;  %v4004_v49 = vrot.slane %v4002_v19, 4  ;;  %v4016_v33 = vshll.u32 %v11218_v5, 16  ;;  %v11224_v5 = vld [vmem:[%s14084_s15 + $0x84] sm:$0xf] }
 0x20d   : > { %v3929_v55 = vsel %vm14119_vm2, %v15716_v27, %v15571_v63  ;;  %v3939_v45 = vsel %vm14119_vm2, %v15721_v28, %v15636_v12  ;;  %v3971_v58 = vor.u32 %v3970_v10, %v3967_v62  ;;  %v3981_v38 = vor.u32 %v3980_v13, %v15727_v59  ;;  %v13670_v63 = vld [vmem:[%s17700_s1 + $0x208] sm:$0xff]  }
 0x20e   : > { %v3995_v40 = vor.u32 %v3994_v29, %v3991_v9  ;;  %v4008_v53 = vshll.u32 %v15731_v34, 16  ;;  %v3953_v61 = vsel %vm14119_vm2, %v3948_v8, %v15648_v22  ;;  %v3963_v12 = vsel %vm14119_vm2, %v3958_v36, %v15723_v47  ;;  %v13671_v47 = vld [vmem:[%s17700_s1 + $0x210] sm:$0xff]  }
 0x20f   : > { %12458 = vmatmul.mubr.bf16.gmra.mrb[28].mxu0 %v13667_v2  ;;  %v11221_v2 = vld [vmem:[%s14084_s15 + $0x78] sm:$0xf]  ;;  %v15760_v62 = vrot.slane %v3984_v52, 5  ;;  %v4015_v29 = vrot.slane %v4013_v11, 4  ;;  %v4005_v27 = vor.u32 %v4004_v49, %v15733_v7  ;;  %v4018_v15 = vrot.slane %v4016_v33, 5 }
 0x210   : > { %12477 = vmatprep.mubr.bf16.mxu0 %v11261_v1  ;;  %v4026_v1 = vshrl.u32 %v15431_v25, 16  ;;  %v4037_v25 = vshrl.u32 %v11221_v2, 16  ;;  %v4040_v3 = vshll.u32 %v11221_v2, 16  ;;  %v15763_v28 = vrot.slane %v4022_v31, 5 }
 0x211   : > { %v3972_v10 = vrot.slane %v3971_v58, 4  ;;  %v3982_v13 = vrot.slane %v3981_v38, 4  ;;  %v4046_v9 = vshll.u32 %v15749_v21, 16  ;;  %v4050_v22 = vshrl.u32 %v15749_v21, 16 }
 0x212   : > { %v4028_v19 = vrot.slane %v4026_v1, 4  ;;  %v3996_v36 = vrot.slane %v3995_v40, 4  ;;  %v4010_v8 = vrot.slane %v4008_v53, 5  ;;  %v4039_v11 = vrot.slane %v4037_v25, 4 }
 0x213   : > { %v4042_v52 = vrot.slane %v4040_v3, 5  ;;  %v4061_v2 = vshrl.u32 %v11224_v5, 16  ;;  %v4070_v49 = vshll.u32 %v15474_v37, 16  ;;  %v4074_v33 = vshrl.u32 %v15474_v37, 16 }
 0x214   : > { %v4006_v31 = vrot.slane %v4005_v27, 4  ;;  %v4032_v1 = vshll.u32 %v15434_v42, 16  ;;  %v11264_v58 = vcombine.low %v3929_v55, %v3939_v45  ;;  %v11265_v38 = vcombine.low %v3953_v61, %v3963_v12  ;;  %v11227_v55 = vld [vmem:[%s14084_s15 + $0x90] sm:$0xf]  ;;  %v13672_v45 = vld [vmem:[%s17700_s1 + $0x218] sm:$0xff]  }
 0x215   : > { %v15776_v40 = vrot.slane %v4046_v9, 5  ;;  %v4052_v53 = vrot.slane %v4050_v22, 4  ;;  %v3977_v25 = vsel %vm14119_vm2, %v3972_v10, %v15727_v59  ;;  %v3987_v37 = vsel %vm14119_vm2, %v3982_v13, %v15760_v62 }
 0x216   : > { %v4001_v3 = vsel %vm14119_vm2, %v3996_v36, %v15733_v7  ;;  %v4043_v42 = vor.u32 %v4042_v52, %v4039_v11  ;;  %v15794_v59 = vrot.slane %v4070_v49, 5  ;;  %v4076_v12 = vrot.slane %v4074_v33, 4 }
 0x217   : > { %12478 = vmatmul.mubr.bf16.vlgmr.msra.gmra.mrb[0].mxu0 %v11262_v4  ;;  %v4064_v4 = vshll.u32 %v11224_v5, 16  ;;  %v4011_v62 = vsel %vm14119_vm2, %v4006_v31, %v4010_v8  ;;  %v4034_v7 = vrot.slane %v4032_v1, 5  ;;  %v4085_v10 = vshrl.u32 %v11227_v55, 16 }
 0x218   : > { %12510 = vmatpush3.bf16.msra.mxu0 %v15486_v54  ;;  %12481 = vmatprep.mubr.bf16.mxu0 %v11263_v41  ;;  %v4019_v54 = vor.u32 %v4018_v15, %v4015_v29  ;;  %v4029_v41 = vor.u32 %v4028_v19, %v15763_v28  ;;  %v15788_v29 = vld [vmem:[%s14084_s15 + $0x80] sm:$0x1]  ;;  %v4053_v19 = vor.u32 %v4052_v53, %v15776_v40  ;;  %v4088_v13 = vshll.u32 %v11227_v55, 16  ;;  %v13674_v55 = vld [vmem:[%s17700_s1 + $0x228] sm:$0xff]  }
 0x219   : > { %12511 = vmatprep.subr.bf16.mxu0 %v13670_v63  ;;  %v4066_v61 = vrot.slane %v4064_v4, 5  ;;  %v4056_v5 = vshll.u32 %v15788_v29, 16  ;;  %v4094_v9 = vshll.u32 %v15528_v16, 16  ;;  %v4098_v22 = vshrl.u32 %v15528_v16, 16  ;;  %v11230_v4 = vld [vmem:[%s14084_s15 + $0x9c] sm:$0xf] }
 0x21a   : > { %v4020_v27 = vrot.slane %v4019_v54, 4  ;;  %v4030_v15 = vrot.slane %v4029_v41, 4  ;;  %v4044_v36 = vrot.slane %v4043_v42, 4  ;;  %v4077_v11 = vor.u32 %v4076_v12, %v15794_v59 }
 0x21b   : > { %v4080_v52 = vshll.u32 %v15477_v30, 16  ;;  %v11266_v49 = vcombine.low %v3977_v25, %v3987_v37  ;;  %v11267_v33 = vcombine.low %v4001_v3, %v4011_v62  ;;  %v4054_v31 = vrot.slane %v4053_v19, 4 }
 0x21c   : > { %12512 = vmatpush3.bf16.msra.mxu0 %v13670_v63  ;;  %v4063_v63 = vrot.slane %v4061_v2, 4  ;;  %v13673_v2 = vld [vmem:[%s17700_s1 + $0x220] sm:$0xff]   ;;  %v4035_v16 = vsel %vm14119_vm2, %v4030_v15, %v4034_v7  ;;  %v4058_v54 = vrot.slane %v4056_v5, 5  ;;  %v4087_v41 = vrot.slane %v4085_v10, 4 }
 0x21d   : > { %12513 = vmatprep.subr.bf16.mxu0 %v13671_v47  ;;  %v4090_v1 = vrot.slane %v4088_v13, 5  ;;  %v15814_v30 = vrot.slane %v4094_v9, 5  ;;  %v4109_v53 = vshrl.u32 %v11230_v4, 16  ;;  %v4112_v42 = vshll.u32 %v11230_v4, 16 }
 0x21e   : > { %v4067_v8 = vor.u32 %v4066_v61, %v4063_v63  ;;  %v4049_v25 = vsel %vm14119_vm2, %v4044_v36, %v15776_v40  ;;  %v4082_v3 = vrot.slane %v4080_v52, 5  ;;  %v4118_v63 = vshll.u32 %v15534_v35, 16 }
 0x21f   : > { %12482 = vmatmul.mubr.bf16.gmra.mrb[4].mxu0 %v11264_v58  ;;  %v11233_v58 = vld [vmem:[%s14084_s15 + $0xa8] sm:$0xf]  ;;  %v4059_v62 = vsel %vm14119_vm2, %v4054_v31, %v4058_v54  ;;  %v4104_v40 = vshll.u32 %v15531_v56, 16  ;;  %v4146_v15 = vshrl.u32 %v15592_v6, 16  ;;  %v4091_v7 = vor.u32 %v4090_v1, %v4087_v41  ;;  %v13676_v54 = vld [vmem:[%s17700_s1 + $0x238] sm:$0xff]  }
 0x220   : > { %12485 = vmatprep.mubr.bf16.mxu0 %v11265_v38  ;;  %12514 = vmatpush3.bf16.msra.mxu0 %v13671_v47  ;;  %v4025_v47 = vsel %vm14119_vm2, %v4020_v27, %v15763_v28  ;;  %v4100_v38 = vrot.slane %v4098_v22, 4  ;;  %v4068_v37 = vrot.slane %v4067_v8, 4  ;;  %v4078_v28 = vrot.slane %v4077_v11, 4 }
 0x221   : > { %12515 = vmatprep.subr.bf16.mxu0 %v13672_v45  ;;  %v4133_v61 = vshrl.u32 %v11233_v58, 16  ;;  %v4136_v12 = vshll.u32 %v11233_v58, 16  ;;  %v4142_v27 = vshll.u32 %v15592_v6, 16  ;;  %v4111_v5 = vrot.slane %v4109_v53, 4  ;;  %v13675_v6 = vld [vmem:[%s17700_s1 + $0x230] sm:$0xff]  }
 0x222   : > { %v4101_v19 = vor.u32 %v4100_v38, %v15814_v30  ;;  %v11268_v10 = vcombine.low %v4025_v47, %v4035_v16  ;;  %v4073_v13 = vsel %vm14119_vm2, %v4068_v37, %v15794_v59  ;;  %v4083_v56 = vsel %vm14119_vm2, %v4078_v28, %v4082_v3  ;;  %v11236_v59 = vld [vmem:[%s14084_s15 + $0xb4] sm:$0xf]  ;;  %v11239_v53 = vld [vmem:[%s14084_s15 + $0xc0] sm:$0xf] }
 0x223   : > { %v15838_v9 = vrot.slane %v4118_v63, 5  ;;  %v4135_v36 = vrot.slane %v4133_v61, 4  ;;  %v4138_v8 = vrot.slane %v4136_v12, 5  ;;  %v11269_v11 = vcombine.low %v4049_v25, %v4059_v62 }
 0x224   : > { %12516 = vmatpush3.bf16.msra.mxu0 %v13672_v45  ;;  %v4122_v45 = vshrl.u32 %v15534_v35, 16  ;;  %v4114_v35 = vrot.slane %v4112_v42, 5  ;;  %v4106_v52 = vrot.slane %v4104_v40, 5  ;;  %v4148_v4 = vrot.slane %v4146_v15, 4 }
 0x225   : > { %12517 = vmatprep.subr.bf16.mxu0 %v13673_v2  ;;  %v4128_v16 = vshll.u32 %v15537_v60, 16  ;;  %v11270_v31 = vcombine.low %v4073_v13, %v4083_v56  ;;  %v4139_v1 = vor.u32 %v4138_v8, %v4135_v36  ;;  %v4152_v58 = vshll.u32 %v15595_v50, 16 }
 0x226   : > { %v4124_v22 = vrot.slane %v4122_v45, 4  ;;  %v4115_v47 = vor.u32 %v4114_v35, %v4111_v5  ;;  %v4157_v38 = vshrl.u32 %v11236_v59, 16  ;;  %v4160_v25 = vshll.u32 %v11236_v59, 16 }
 0x227   : > { %12486 = vmatmul.mubr.bf16.gmra.mrb[8].mxu0 %v11266_v49  ;;  %v4092_v49 = vrot.slane %v4091_v7, 4  ;;  %v4166_v60 = vshll.u32 %v15598_v57, 16  ;;  %v4170_v37 = vshrl.u32 %v15598_v57, 16  ;;  %v4130_v50 = vrot.slane %v4128_v16, 5 }
 0x228   : > { %12489 = vmatprep.mubr.bf16.mxu0 %v11267_v33  ;;  %12518 = vmatpush3.bf16.msra.mxu0 %v13673_v2  ;;  %v15840_v2 = vrot.slane %v4142_v27, 5  ;;  %v4102_v33 = vrot.slane %v4101_v19, 4  ;;  %v4125_v41 = vor.u32 %v4124_v22, %v15838_v9  ;;  %v4181_v63 = vshrl.u32 %v11239_v53, 16 }
 0x229   : > { %12519 = vmatprep.subr.bf16.mxu0 %v13674_v55  ;;  %v4097_v28 = vsel %vm14119_vm2, %v4092_v49, %v15814_v30  ;;  %v4184_v45 = vshll.u32 %v11239_v53, 16  ;;  %v4190_v61 = vshll.u32 %v15663_v23, 16  ;;  %v4194_v12 = vshrl.u32 %v15663_v23, 16 }
 0x22a   : > { %v4149_v42 = vor.u32 %v4148_v4, %v15840_v2  ;;  %v4107_v3 = vsel %vm14119_vm2, %v4102_v33, %v4106_v52  ;;  %v4126_v57 = vrot.slane %v4125_v41, 4  ;;  %v4140_v62 = vrot.slane %v4139_v1, 4 }
 0x22b   : > { %v4154_v40 = vrot.slane %v4152_v58, 5  ;;  %v4159_v27 = vrot.slane %v4157_v38, 4  ;;  %v4162_v30 = vrot.slane %v4160_v25, 5  ;;  %v4168_v7 = vrot.slane %v4166_v60, 5 }
 0x22c   : > { %12520 = vmatpush3.bf16.msra.mxu0 %v13674_v55  ;;  %v4116_v55 = vrot.slane %v4115_v47, 4  ;;  %v4150_v15 = vrot.slane %v4149_v42, 4  ;;  %v4172_v19 = vrot.slane %v4170_v37, 4  ;;  %v11271_v5 = vcombine.low %v4097_v28, %v4107_v3 }
 0x22d   : > { %12521 = vmatprep.subr.bf16.mxu0 %v13675_v6  ;;  %v4183_v35 = vrot.slane %v4181_v63, 4  ;;  %v4192_v13 = vrot.slane %v4190_v61, 5  ;;  %v4196_v56 = vrot.slane %v4194_v12, 4  ;;  %v4131_v22 = vsel %vm14119_vm2, %v4126_v57, %v4130_v50  ;;  %v11285_v61 = vld [vmem:[%s14084_s15 + $0x18] sm:$0xe] }
 0x22e   : > { %v4121_v23 = vsel %vm14119_vm2, %v4116_v55, %v15838_v9  ;;  %v4176_v36 = vshll.u32 %v15606_v44, 16  ;;  %v4145_v8 = vsel %vm14119_vm2, %v4140_v62, %v15840_v2  ;;  %v4163_v52 = vor.u32 %v4162_v30, %v4159_v27 }
 0x22f   : > { %12490 = vmatmul.mubr.bf16.gmra.mrb[12].mxu0 %v11268_v10  ;;  %v4186_v10 = vrot.slane %v4184_v45, 5  ;;  %v4173_v4 = vor.u32 %v4172_v19, %v4168_v7  ;;  %v4214_v9 = vshll.u32 %v15669_v24, 16  ;;  %v4218_v33 = vshrl.u32 %v15669_v24, 16 }
 0x230   : > { %12493 = vmatprep.mubr.bf16.mxu0 %v11269_v11  ;;  %12522 = vmatpush3.bf16.msra.mxu0 %v13675_v6  ;;  %v11242_v6 = vld [vmem:[%s14084_s15 + $0xcc] sm:$0xf]  ;;  %v4155_v11 = vsel %vm14119_vm2, %v4150_v15, %v4154_v40  ;;  %v4197_v16 = vor.u32 %v4196_v56, %v4192_v13  ;;  %v4200_v44 = vshll.u32 %v15666_v39, 16  ;;  %v4164_v41 = vrot.slane %v4163_v52, 4 }
 0x231   : > { %12523 = vmatprep.subr.bf16.mxu0 %v13676_v54  ;;  %v4205_v59 = vshrl.u32 %v11242_v6, 16  ;;  %v4208_v49 = vshll.u32 %v11242_v6, 16  ;;  %v4187_v47 = vor.u32 %v4186_v10, %v4183_v35  ;;  %v4174_v2 = vrot.slane %v4173_v4, 4  ;;  %v11286_v10 = vld [vmem:[%s14084_s15 + $0x24] sm:$0xe] }
 0x232   : > { %v4178_v1 = vrot.slane %v4176_v36, 5  ;;  %v4216_v53 = vrot.slane %v4214_v9, 5  ;;  %v4220_v42 = vrot.slane %v4218_v33, 4  ;;  %v4198_v60 = vrot.slane %v4197_v16, 4 }
 0x233   : > { %v4207_v58 = vrot.slane %v4205_v59, 4  ;;  %v4210_v38 = vrot.slane %v4208_v49, 5  ;;  %v4188_v25 = vrot.slane %v4187_v47, 4  ;;  %v4202_v37 = vrot.slane %v4200_v44, 5  ;;  %v11288_v49 = vld [vmem:[%s14084_s15 + $0x3c] sm:$0xe] }
 0x234   : > { %12524 = vmatpush3.bf16.msra.mxu0 %v13676_v54  ;;  %v11273_v54 = vcombine.low %v4145_v8, %v4155_v11  ;;  %v4169_v24 = vsel %vm14119_vm2, %v4164_v41, %v4168_v7  ;;  %v4179_v39 = vsel %vm14119_vm2, %v4174_v2, %v4178_v1  ;;  %v4221_v3 = vor.u32 %v4220_v42, %v4216_v53  ;;  %v17929_v42 = vld [vmem:[#allocation25_spill] sm:$0xff] }
 0x235   : > { %v4211_v28 = vor.u32 %v4210_v38, %v4207_v58  ;;  %v4224_v55 = vshll.u32 %v15677_v14, 16  ;;  %v4193_v50 = vsel %vm14119_vm2, %v4188_v25, %v4192_v13  ;;  %v4203_v63 = vsel %vm14119_vm2, %v4198_v60, %v4202_v37  ;;  %v11291_v60 = vld [vmem:[%s14084_s15 + $0x60] sm:$0xe] }
 0x236   : > { %v4616_v45 = vrot.slane %v15408_v48, 5  ;;  %v11274_v12 = vcombine.low %v4169_v24, %v4179_v39  ;;  %v11275_v57 = vcombine.low %v4193_v50, %v4203_v63  ;;  %v4222_v40 = vrot.slane %v4221_v3, 4 }
 0x237   : > { %12494 = vmatmul.mubr.bf16.gmra.mrb[16].mxu0 %v11270_v31  ;;  %v11272_v31 = vcombine.low %v4121_v23, %v4131_v22  ;;  %v4212_v62 = vrot.slane %v4211_v28, 4  ;;  %v4226_v27 = vrot.slane %v4224_v55, 5  ;;  %v11301_v15 = vrot.slane %v11285_v61, 9 }
 0x238   : > { %12497 = vmatprep.mubr.bf16.mxu0 %v11271_v5  ;;  %v4618_v30 = vrot.slane %v4616_v45, 4  ;;  %v4619_v14 = vrot.slane %v15448_v43, 5  ;;  %v4623_v19 = vrot.slane %v15424_v20, 5  ;;  %v4630_v13 = vrot.slane %v15489_v18, 5  ;;  %v11287_v43 = vld [vmem:[%s14084_s15 + $0x30] sm:$0xe] }
 0x239   : > { %v4217_v7 = vsel %vm14119_vm2, %v4212_v62, %v4216_v53  ;;  %v4227_v48 = vsel %vm14119_vm2, %v4222_v40, %v4226_v27  ;;  %v4617_v5 = vsel %vm14449_vm5, %v11301_v15, %v4616_v45  ;;  %v11302_v23 = vrot.slane %v11286_v10, 9  ;;  %v11293_v45 = vld [vmem:[%s14084_s15 + $0x78] sm:$0xe]  ;;  %v17930_v40 = vld [vmem:[#allocation12_spill] sm:$0xff]  ;;  %v17931_v27 = vld [vmem:[#allocation15_spill] sm:$0xff] }
 0x23a   : > { %v4620_v35 = vsel %vm14449_vm5, %v4618_v30, %v4619_v14  ;;  %v11276_v56 = vcombine.low %v4217_v7, %v4227_v48  ;;  %v4625_v22 = vrot.slane %v4623_v19, 4  ;;  %v4626_v36 = vrot.slane %v15456_v26, 5  ;;  %v17933_v7 = vld [vmem:[#allocation13_spill] sm:$0xff] }
 0x23b   : > { %v11333_v6 = vcombine.low %v4617_v5, %v4620_v35  ;;  %v11303_v8 = vrot.slane %v11287_v43, 9  ;;  %v4632_v20 = vrot.slane %v4630_v13, 4  ;;  %v4633_v11 = vrot.slane %v15525_v32, 5  ;;  %v11289_v32 = vld [vmem:[%s14084_s15 + $0x48] sm:$0xe]  ;;  %v17937_v5 = vld [vmem:[#allocation17_spill] sm:$0xff] }
 0x23c   : > { %v4624_v52 = vsel %vm14449_vm5, %v11302_v23, %v4623_v19  ;;  %v4627_v18 = vsel %vm14449_vm5, %v4625_v22, %v4626_v36  ;;  %v4637_v4 = vrot.slane %v15520_v17, 5  ;;  %v4644_v9 = vrot.slane %v15582_v51, 5  ;;  %v17928_v17 = vld [vmem:[#allocation24_spill] sm:$0xff]  ;;  %v17939_v35 = vld [vmem:[#allocation11_spill] sm:$0xff]  ;;  %v17940_v10 = vld [vmem:[#allocation9_spill] sm:$0xff]  ;;  %s13886_s15 = sshll.u32 %s13954_s23, 4  ;;  %s13887_s15 = int_to_ptr.vmem [resolvable:$false] %s13886_s15 }
 0x23d   : > { %v4631_v59 = vsel %vm14449_vm5, %v11303_v8, %v4630_v13  ;;  %v4634_v26 = vsel %vm14449_vm5, %v4632_v20, %v4633_v11  ;;  %v11334_v33 = vcombine.low %v4624_v52, %v4627_v18  ;;  %v11304_v16 = vrot.slane %v11288_v49, 9  ;;  %v17936_v19 = vld [vmem:[#allocation16_spill] sm:$0xff]  ;;  %v17942_v43 = vld [vmem:[#allocation18_spill] sm:$0xff]  ;;  %v17946_v22 = vld [vmem:[#allocation21_spill] sm:$0xff]  ;;  %s13888_s25 = scalar_lea.vmem %s13887_s15, 8192  ;;  %p13889_p2 = scmp.lt.s32.totalorder %s17651_s12, %s13887_s15 }
 0x23e   : > { %v11335_v47 = vcombine.low %v4631_v59, %v4634_v26  ;;  %v4639_v44 = vrot.slane %v4637_v4, 4  ;;  %v11305_v41 = vrot.slane %v11289_v32, 9  ;;  %v4646_v2 = vrot.slane %v4644_v9, 4  ;;  %v17945_v23 = vld [vmem:[#allocation20_spill] sm:$0xff]  ;;  %v17948_v8 = vld [vmem:[#allocation22_spill] sm:$0xff]  ;;  %v17949_v20 = vld [vmem:[#allocation23_spill] sm:$0xff]  ;;  %p13890_p3 = scmp.lt.s32.totalorder %s13888_s25, %s13882_s17 }
 0x23f   : > { %12498 = vmatmul.mubr.bf16.gmra.mrb[20].mxu0 %v11272_v31  ;;  %v17927_v31 = vld [vmem:[#allocation10_spill] sm:$0xff]  ;;  %v4647_v1 = vrot.slane %v17928_v17, 5  ;;  %v4638_v58 = vsel %vm14449_vm5, %v11304_v16, %v4637_v4  ;;  %v4658_v25 = vrot.slane %v17929_v42, 5  ;;  %v11307_v39 = vrot.slane %v11291_v60, 9  ;;  %v17952_v18 = vld [vmem:[#allocation27_spill] sm:$0xff]  ;;  %v17954_v59 = vld [vmem:[#allocation28_spill] sm:$0xff] }
 0x240   : > { %12501 = vmatprep.mubr.bf16.mxu0 %v11273_v54  ;;  %v4640_v54 = vrot.slane %v17927_v31, 5  ;;  %v4645_v38 = vsel %vm14449_vm5, %v11305_v41, %v4644_v9  ;;  %v4661_v3 = vrot.slane %v15731_v34, 5  ;;  %v4672_v63 = vrot.slane %v15749_v21, 5  ;;  %v17934_v21 = vld [vmem:[#allocation14_spill] sm:$0xff]  ;;  %v17955_v26 = vld [vmem:[#allocation29_spill] sm:$0xff]  ;;  %v13680_v16 = vld [vmem:[#allocation3 + $0x58] sm:$0xff]   ;;  %p13891_p4 = por %p13890_p3, %p13889_p2 }
 0x241   : > { %v4648_v53 = vsel %vm14449_vm5, %v4646_v2, %v4647_v1  ;;  %v4660_v28 = vrot.slane %v4658_v25, 4  ;;  %v4659_v55 = vsel %vm14449_vm5, %v11307_v39, %v4658_v25  ;;  %v4675_v62 = vrot.slane %v15788_v29, 5  ;;  %v17951_v52 = vld [vmem:[#allocation26_spill] sm:$0xff]  ;;  %v13677_v9 = vld [vmem:[#allocation3 + $0x40] sm:$0xff]  }
 0x242   : > { %v4641_v51 = vsel %vm14449_vm5, %v4639_v44, %v4640_v54  ;;  %v11337_v24 = vcombine.low %v4645_v38, %v4648_v53  ;;  %v17932_v15 = vcombine.low %v17930_v40, %v17931_v27  ;;  %v17935_v48 = vcombine.low %v17933_v7, %v17934_v21  ;;  %12557 = vmatprep.subr.bf16.mxu1 %v13677_v9  ;;  %v13678_v32 = vld [vmem:[#allocation3 + $0x48] sm:$0xff]   ;;  %v13681_v31 = vld [vmem:[#allocation3 + $0x60] sm:$0xff]   ;;  %v13683_v53 = vld [vmem:[#allocation3 + $0x70] sm:$0xff]   ;;  %p13892_p7 = pnand %p13891_p4, %p13885_p12 }
 0x243   : > { %v11336_v37 = vcombine.low %v4638_v58, %v4641_v51  ;;  %v4662_v50 = vsel %vm14449_vm5, %v4660_v28, %v4661_v3  ;;  %v17938_v29 = vcombine.low %v17936_v19, %v17937_v5  ;;  %v17941_v13 = vcombine.low %v17939_v35, %v17940_v10  ;;  %12558 = vmatpush3.bf16.msra.mxu1 %v13677_v9  ;;  %v13682_v17 = vld [vmem:[#allocation3 + $0x68] sm:$0xff]  }
 0x244   : > { %v11339_v61 = vcombine.low %v4659_v55, %v4662_v50  ;;  %v17947_v36 = vcombine.low %v17945_v23, %v17946_v22  ;;  %v17950_v11 = vcombine.low %v17948_v8, %v17949_v20  ;;  %v17953_v4 = vcombine.low %v17951_v52, %v17952_v18  ;;  %12559 = vmatprep.subr.bf16.mxu1 %v13678_v32  ;;  %v13684_v50 = vld [vmem:[#allocation3 + $0x78] sm:$0xff]  }
 0x245   : > { %v17956_v49 = vcombine.low %v17954_v59, %v17955_v26  ;;  %v17959_v2 = vmov 0 }
 0x246   : > { %v17960_v2 = vsel %vm15972_vm10, 4294967295, %v17959_v2 }
 0x247   : > { %12502 = vmatmul.mubr.bf16.gmra.mrb[24].mxu0 %v11274_v12  ;;  %v11309_v12 = vrot.slane %v11293_v45, 9  ;;  %12560 = vmatpush3.bf16.msra.mxu1 %v13678_v32  ;;  %17961 = vst [vmem:[#allocation10_spill] sm:$0xff] %v17960_v2 }
 0x248   : > { %12505 = vmatprep.mubr.bf16.mxu0 %v11275_v57  ;;  %v4674_v57 = vrot.slane %v4672_v63, 4 }
 0x249   : > { %v4673_v34 = vsel %vm14449_vm5, %v11309_v12, %v4672_v63 }
 0x24a   : > { %v4676_v30 = vsel %vm14449_vm5, %v4674_v57, %v4675_v62 }
 0x24b   : > { %v11341_v14 = vcombine.low %v4673_v34, %v4676_v30  ;;  %v15982_v34 = vld [vmem:[#allocation3] sm:$0xff]   ;;  %v15988_v30 = vld [vmem:[%s17701_s2] ss:$0 sm:$0xff] }
 0x24f   : > { %12506 = vmatmul.mubr.bf16.gmra.mrb[28].mxu0 %v11276_v56  ;;  %v17943_v56 = vld [vmem:[#allocation19_spill] sm:$0xff] }
 0x250   : > { %12525 = vmatprep.mubr.bf16.mxu0 %v11333_v6  ;;  %v17944_v6 = vcombine.low %v17942_v43, %v17943_v56 }
 0x257   : > { %12526 = vmatmul.mubr.bf16.vlgmr.msra.gmra.mrb[0].mxu0 %v11334_v33  ;;  %v13679_v33 = vld [vmem:[#allocation3 + $0x50] sm:$0xff]  }
 0x258   : > { %12529 = vmatprep.mubr.bf16.mxu0 %v11335_v47  ;;  %12561 = vmatprep.subr.bf16.mxu1 %v13679_v33  ;;  %v13953_v47 = vmov 0  }
 0x259   : > { %12562 = vmatpush3.bf16.msra.mxu1 %v13679_v33  ;;  %5656 = vst [vmem:[#allocation2] sm:$0xf] %v13953_v47  ;;  %5657 = vst [vmem:[#allocation2 + $0x4] sm:$0xf] %v13953_v47  ;;  %v5551_v33 = vld [vmem:[#allocation2 + $0x18] sm:$0xf] }
 0x25a   : > { %5658 = vst [vmem:[#allocation2 + $0x8] sm:$0x1] %v13953_v47  ;;  %5660 = vst [vmem:[#allocation2 + $0xcc] sm:$0xf] %v13953_v47  ;;  %12563 = vmatprep.subr.bf16.mxu1 %v13680_v16 }
 0x25b   : > { %5661 = vst [vmem:[#allocation2 + $0xd0] sm:$0xf] %v13953_v47  ;;  %5662 = vst [vmem:[#allocation2 + $0xd4] sm:$0x1] %v13953_v47 }
 0x25d   : > { %12564 = vmatpush3.bf16.msra.mxu1 %v13680_v16 }
 0x25e   : > { %12565 = vmatprep.subr.bf16.mxu1 %v13681_v31 }
 0x25f   : > { %12530 = vmatmul.mubr.bf16.gmra.mrb[4].mxu0 %v11336_v37 }
 0x260   : > { %12533 = vmatprep.mubr.bf16.mxu0 %v11337_v24  ;;  %v5663_v54 = vld [vmem:[#allocation2] sm:$0x1]  ;;  %v5773_v38 = vld [vmem:[#allocation2 + $0x4] sm:$0xf] }
 0x261   : > { %v5664_v41 = vsel %vm15965_vm8, 0, %v5663_v54  ;;  %12566 = vmatpush3.bf16.msra.mxu1 %v13681_v31  ;;  %v5718_v1 = vld [vmem:[#allocation2 + $0x8] sm:$0x1]  ;;  %v5846_v60 = vshll.u32 %v5773_v38, 16  ;;  %v5850_v37 = vshrl.u32 %v5773_v38, 16 }
 0x262   : > { %5665 = vst [vmem:[#allocation2] sm:$0x1] %v5664_v41  ;;  %v5719_v58 = vsel %vm15972_vm10, 0, %v5718_v1  ;;  %12567 = vmatprep.subr.bf16.mxu1 %v13682_v17 }
 0x263   : > { %5720 = vst [vmem:[#allocation2 + $0x8] sm:$0x1] %v5719_v58  ;;  %v5848_v28 = vrot.slane %v5846_v60, 5  ;;  %v5852_v55 = vrot.slane %v5850_v37, 4  ;;  %v5542_v58 = vld [vmem:[#allocation2 + $0xc] sm:$0xf] }
 0x264   : > { %v5555_v37 = vld [vmem:[#allocation2 + $0x20] sm:$0x1] }
 0x265   : > { %12568 = vmatpush3.bf16.msra.mxu1 %v13682_v17 }
 0x266   : > { %12569 = vmatprep.subr.bf16.mxu1 %v13683_v53 }
 0x267   : > { %12534 = vmatmul.mubr.bf16.gmra.mrb[8].mxu0 %v17932_v15 }
 0x268   : > { %12537 = vmatprep.mubr.bf16.mxu0 %v11339_v61  ;;  %v5853_v61 = vor.u32 %v5852_v55, %v5848_v28 }
 0x269   : > { %v5772_v51 = vld [vmem:[#allocation2] sm:$0xf]  ;;  %12570 = vmatpush3.bf16.msra.mxu1 %v13683_v53 }
 0x26a   : > { %v5837_v42 = vshrl.u32 %v5772_v51, 16  ;;  %v5840_v25 = vshll.u32 %v5772_v51, 16  ;;  %v5820_v3 = vld [vmem:[#allocation2 + $0x8] sm:$0x1]  ;;  %12571 = vmatprep.subr.bf16.mxu1 %v13684_v50  ;;  %v5854_v62 = vrot.slane %v5853_v61, 4 }
 0x26b   : > { %v5856_v45 = vshll.u32 %v5820_v3, 16 }
 0x26c   : > { %v5839_v24 = vrot.slane %v5837_v42, 4  ;;  %v5842_v39 = vrot.slane %v5840_v25, 5 }
 0x26d   : > { %v5858_v57 = vrot.slane %v5856_v45, 5  ;;  %12572 = vmatpush3.bf16.msra.mxu1 %v13684_v50  ;;  %v5548_v50 = vld [vmem:[#allocation2 + $0x14] sm:$0x1] }
 0x26e   : > { %v5843_v63 = vor.u32 %v5842_v39, %v5839_v24  ;;  %12605 = vmatprep.subr.bf16.mxu1 %v15982_v34 }
 0x26f   : > { %12538 = vmatmul.mubr.bf16.gmra.mrb[12].mxu0 %v17935_v48  ;;  %v5859_v27 = vsel %vm14119_vm2, %v5854_v62, %v5858_v57 }
 0x270   : > { %12541 = vmatprep.mubr.bf16.mxu0 %v11341_v14  ;;  %v5844_v12 = vrot.slane %v5843_v63, 4 }
 0x272   : > { %v5849_v40 = vsel %vm14119_vm2, %v5844_v12, %v5848_v28 }
 0x273   : > { %v11390_v15 = vcombine.low %v5849_v40, %v5859_v27 }
 0x275   : > { %12573 = vmatprep.mubr.bf16.mxu1 %v11390_v15 }
 0x277   : > { %12542 = vmatmul.mubr.bf16.gmra.mrb[16].mxu0 %v17938_v29 }
 0x278   : > { %12545 = vmatprep.mubr.bf16.mxu0 %v17941_v13 }
 0x27f   : > { %12546 = vmatmul.mubr.bf16.gmra.mrb[20].mxu0 %v17944_v6 }
 0x280   : > { %12549 = vmatprep.mubr.bf16.mxu0 %v17947_v36 }
 0x287   : > { %12550 = vmatmul.mubr.bf16.gmra.mrb[24].mxu0 %v17950_v11 }
 0x288   : > { %12553 = vmatprep.mubr.bf16.mxu0 %v17953_v4 }
 0x28f   : > { %12554 = vmatmul.mubr.bf16.gmra.mrb[28].mxu0 %v17956_v49 }
 0x32a   : > { %v12527_v14 = vpop.f32.mrb[0].mxu0 }
 0x32b   : > { %v5057_v7 = vadd.f32 %v12527_v14, %v15988_v30  ;;  %v4889_v21 = vpop.f32.mrb[1].mxu0 }
 0x32c   : > { %v5055_v48 = vadd.f32 %v15988_v30, %v4889_v21  ;;  %v12528_v19 = vpop.f32.mrb[2].mxu0 }
 0x32d   : > { %v5089_v5 = vmax.f32 %v5057_v7, 0.0  ;;  %v5058_v29 = vadd.f32 %v12528_v19, %v15988_v30  ;;  %v4892_v35 = vpop.f32.mrb[3].mxu0 }
 0x32e   : > { %v5087_v10 = vmax.f32 %v5055_v48, 0.0  ;;  %v5056_v13 = vadd.f32 %v15988_v30, %v4892_v35 }
 0x32f   : > { %v11662_v43 = vpack.c.bf16 %v5089_v5, %v5089_v5  ;;  %v5090_v56 = vmax.f32 %v5058_v29, 0.0 }
 0x330   : > { %v11660_v6 = vpack.c.bf16 %v5087_v10, %v5087_v10  ;;  %v5088_v23 = vmax.f32 %v5056_v13, 0.0  ;;  %v5565_v13 = vld [vmem:[#allocation2 + $0x30] sm:$0xf] }
 0x331   : > { %v5236_v22 = vshrl.u32 %v11662_v43, 16  ;;  %v11663_v36 = vpack.c.bf16 %v5090_v56, %v5090_v56  ;;  %v5239_v8 = vshll.u32 %v11662_v43, 16 }
 0x332   : > { %v5219_v20 = vshrl.u32 %v11660_v6, 16  ;;  %v5222_v11 = vshll.u32 %v11660_v6, 16  ;;  %v11661_v52 = vpack.c.bf16 %v5088_v23, %v5088_v23  ;;  %v12531_v18 = vpop.f32.mrb[4].mxu0 }
 0x333   : > { %v5238_v4 = vrot.slane %v5236_v22, 7  ;;  %v5244_v59 = vshrl.u32 %v11663_v36, 16  ;;  %v5247_v26 = vshll.u32 %v11663_v36, 16  ;;  %v5061_v49 = vadd.f32 %v12531_v18, %v15988_v30  ;;  %v4905_v9 = vpop.f32.mrb[5].mxu0 }
 0x334   : > { %v5221_v47 = vrot.slane %v5219_v20, 7  ;;  %v5227_v16 = vshrl.u32 %v11661_v52, 16  ;;  %v5230_v31 = vshll.u32 %v11661_v52, 16  ;;  %v5059_v54 = vadd.f32 %v15988_v30, %v4905_v9  ;;  %v12532_v41 = vpop.f32.mrb[6].mxu0 }
 0x335   : > { %v5241_v17 = vor.u32 %v5239_v8, %v5238_v4  ;;  %v5242_v1 = vrot.slane %v5238_v4, 4  ;;  %v5246_v51 = vrot.slane %v5244_v59, 7  ;;  %v5093_v38 = vmax.f32 %v5061_v49, 0.0  ;;  %v4908_v53 = vpop.f32.mrb[7].mxu0  ;;  %v5558_v8 = vld [vmem:[#allocation2 + $0x24] sm:$0xf] }
 0x336   : > { %v5224_v42 = vor.u32 %v5222_v11, %v5221_v47  ;;  %v5225_v25 = vrot.slane %v5221_v47, 4  ;;  %v5229_v24 = vrot.slane %v5227_v16, 7  ;;  %v5091_v39 = vmax.f32 %v5059_v54, 0.0 }
 0x337   : > { %v5552_v28 = vsel %vm15996_vm13, %v5241_v17, %v5551_v33  ;;  %v5249_v3 = vor.u32 %v5247_v26, %v5246_v51  ;;  %v5251_v55 = vrot.slane %v5246_v51, 4  ;;  %v11666_v63 = vpack.c.bf16 %v5093_v38, %v5093_v38 }
 0x338   : > { %5553 = vst [vmem:[#allocation2 + $0x18] sm:$0xf] %v5552_v28  ;;  %v5543_v45 = vsel %vm15996_vm13, %v5224_v42, %v5542_v58  ;;  %v5232_v61 = vor.u32 %v5230_v31, %v5229_v24  ;;  %v5234_v12 = vrot.slane %v5229_v24, 4  ;;  %v11664_v57 = vpack.c.bf16 %v5091_v39, %v5091_v39  ;;  %v5569_v24 = vld [vmem:[#allocation2 + $0x38] sm:$0x1] }
 0x339   : > { %5544 = vst [vmem:[#allocation2 + $0xc] sm:$0xf] %v5543_v45  ;;  %v5250_v62 = vsel %vm16003_vm14, %v5242_v1, %v5249_v3  ;;  %v5556_v40 = vsel %vm15965_vm8, %v5251_v55, %v5555_v37  ;;  %v5270_v27 = vshrl.u32 %v11666_v63, 16  ;;  %v5273_v7 = vshll.u32 %v11666_v63, 16 }
 0x33a   : > { %5554 = vst [vmem:[#allocation2 + $0x1c] sm:$0xf] %v5250_v62  ;;  %5557 = vst [vmem:[#allocation2 + $0x20] sm:$0x1] %v5556_v40  ;;  %v5233_v15 = vsel %vm16003_vm14, %v5225_v25, %v5232_v61  ;;  %v5549_v14 = vsel %vm15965_vm8, %v5234_v12, %v5548_v50  ;;  %v5253_v21 = vshrl.u32 %v11664_v57, 16  ;;  %v12535_v48 = vpop.f32.mrb[8].mxu0  ;;  %v5062_v5 = vadd.f32 %v12532_v41, %v15988_v30 }
 0x33b   : > { %5545 = vst [vmem:[#allocation2 + $0x10] sm:$0xf] %v5233_v15  ;;  %5550 = vst [vmem:[#allocation2 + $0x14] sm:$0x1] %v5549_v14  ;;  %v16019_v19 = vrot.slane %v5270_v27, 7  ;;  %v5060_v29 = vadd.f32 %v15988_v30, %v4908_v53  ;;  %v5065_v35 = vadd.f32 %v12535_v48, %v15988_v30  ;;  %v4921_v10 = vpop.f32.mrb[9].mxu0 }
 0x33c   : > { %v16024_v43 = vrot.slane %v5253_v21, 7  ;;  %v5256_v56 = vshll.u32 %v11664_v57, 16  ;;  %v5063_v6 = vadd.f32 %v15988_v30, %v4921_v10  ;;  %v12536_v23 = vpop.f32.mrb[10].mxu0  ;;  %v5094_v20 = vmax.f32 %v5062_v5, 0.0  ;;  %v5562_v12 = vld [vmem:[#allocation2 + $0x2c] sm:$0x1] }
 0x33d   : > { %v5275_v22 = vor.u32 %v5273_v7, %v16019_v19  ;;  %v5276_v36 = vrot.slane %v16019_v19, 4  ;;  %v5092_v11 = vmax.f32 %v5060_v29, 0.0  ;;  %v4924_v52 = vpop.f32.mrb[11].mxu0  ;;  %v5097_v59 = vmax.f32 %v5065_v35, 0.0  ;;  %v5579_v19 = vld [vmem:[#allocation2 + $0x48] sm:$0xf] }
 0x33e   : > { %v5258_v18 = vor.u32 %v5256_v56, %v16024_v43  ;;  %v5259_v4 = vrot.slane %v16024_v43, 4  ;;  %v5095_v26 = vmax.f32 %v5063_v6, 0.0  ;;  %v11667_v33 = vpack.c.bf16 %v5094_v20, %v5094_v20 }
 0x33f   : > { %v5669_v49 = vld [vmem:[#allocation2 + $0x18] sm:$0x1]  ;;  %v5566_v9 = vsel %vm15996_vm13, %v5275_v22, %v5565_v13  ;;  %v11665_v47 = vpack.c.bf16 %v5092_v11, %v5092_v11  ;;  %v5066_v16 = vadd.f32 %v12536_v23, %v15988_v30  ;;  %v11670_v17 = vpack.c.bf16 %v5097_v59, %v5097_v59  ;;  %v5572_v13 = vld [vmem:[#allocation2 + $0x3c] sm:$0xf] }
 0x340   : > { %v5670_v31 = vsel %vm15965_vm8, 0, %v5669_v49  ;;  %v5666_v54 = vld [vmem:[#allocation2 + $0xc] sm:$0x1]  ;;  %5567 = vst [vmem:[#allocation2 + $0x30] sm:$0xf] %v5566_v9  ;;  %v5559_v41 = vsel %vm15996_vm13, %v5258_v18, %v5558_v8  ;;  %v11668_v1 = vpack.c.bf16 %v5095_v26, %v5095_v26  ;;  %v5278_v38 = vshrl.u32 %v11667_v33, 16 }
 0x341   : > { %5671 = vst [vmem:[#allocation2 + $0x18] sm:$0x1] %v5670_v31  ;;  %v5667_v58 = vsel %vm15965_vm8, 0, %v5666_v54  ;;  %v5724_v51 = vld [vmem:[#allocation2 + $0x20] sm:$0x1]  ;;  %v5281_v53 = vshll.u32 %v11667_v33, 16  ;;  %v5064_v27 = vadd.f32 %v15988_v30, %v4924_v52 }
 0x342   : > { %5560 = vst [vmem:[#allocation2 + $0x24] sm:$0xf] %v5559_v41  ;;  %v5261_v42 = vshrl.u32 %v11665_v47, 16  ;;  %5668 = vst [vmem:[#allocation2 + $0xc] sm:$0x1] %v5667_v58  ;;  %v5725_v25 = vsel %vm15972_vm10, 0, %v5724_v51 }
 0x343   : > { %v5721_v37 = vld [vmem:[#allocation2 + $0x14] sm:$0x1]  ;;  %v5264_v39 = vshll.u32 %v11665_v47, 16  ;;  %v5304_v28 = vshrl.u32 %v11670_v17, 16  ;;  %v5307_v3 = vshll.u32 %v11670_v17, 16  ;;  %v5280_v50 = vrot.slane %v5278_v38, 7 }
 0x344   : > { %5726 = vst [vmem:[#allocation2 + $0x20] sm:$0x1] %v5725_v25  ;;  %v5722_v55 = vsel %vm15972_vm10, 0, %v5721_v37  ;;  %v5263_v63 = vrot.slane %v5261_v42, 7  ;;  %v5287_v45 = vshrl.u32 %v11668_v1, 16  ;;  %v12539_v61 = vpop.f32.mrb[12].mxu0 }
 0x345   : > { %5723 = vst [vmem:[#allocation2 + $0x14] sm:$0x1] %v5722_v55  ;;  %v16044_v57 = vrot.slane %v5304_v28, 7  ;;  %v5290_v62 = vshll.u32 %v11668_v1, 16  ;;  %v5098_v40 = vmax.f32 %v5066_v16, 0.0  ;;  %v4937_v15 = vpop.f32.mrb[13].mxu0  ;;  %v5283_v14 = vor.u32 %v5281_v53, %v5280_v50 }
 0x346   : > { %v5285_v7 = vrot.slane %v5280_v50, 4  ;;  %v5266_v21 = vor.u32 %v5264_v39, %v5263_v63  ;;  %v5268_v48 = vrot.slane %v5263_v63, 4  ;;  %v12540_v5 = vpop.f32.mrb[14].mxu0  ;;  %v16049_v10 = vrot.slane %v5287_v45, 7  ;;  %v5583_v38 = vld [vmem:[#allocation2 + $0x50] sm:$0x1] }
 0x347   : > { %v5309_v29 = vor.u32 %v5307_v3, %v16044_v57  ;;  %v5310_v35 = vrot.slane %v16044_v57, 4  ;;  %v11671_v43 = vpack.c.bf16 %v5098_v40, %v5098_v40  ;;  %v4940_v56 = vpop.f32.mrb[15].mxu0  ;;  %v5675_v6 = vld [vmem:[#allocation2 + $0x30] sm:$0x1]  ;;  %v5284_v23 = vsel %vm16003_vm14, %v5276_v36, %v5283_v14  ;;  %v5576_v63 = vld [vmem:[#allocation2 + $0x44] sm:$0x1] }
 0x348   : > { %v5570_v22 = vsel %vm15965_vm8, %v5285_v7, %v5569_v24  ;;  %v5267_v8 = vsel %vm16003_vm14, %v5259_v4, %v5266_v21  ;;  %v5563_v20 = vsel %vm15965_vm8, %v5268_v48, %v5562_v12  ;;  %v5676_v11 = vsel %vm15965_vm8, 0, %v5675_v6  ;;  %5568 = vst [vmem:[#allocation2 + $0x34] sm:$0xf] %v5284_v23 }
 0x349   : > { %v5672_v52 = vld [vmem:[#allocation2 + $0x24] sm:$0x1]  ;;  %5571 = vst [vmem:[#allocation2 + $0x38] sm:$0x1] %v5570_v22  ;;  %5561 = vst [vmem:[#allocation2 + $0x28] sm:$0xf] %v5267_v8  ;;  %v5580_v36 = vsel %vm15996_vm13, %v5309_v29, %v5579_v19  ;;  %v5292_v18 = vor.u32 %v5290_v62, %v16049_v10  ;;  %v5069_v47 = vadd.f32 %v12539_v61, %v15988_v30 }
 0x34a   : > { %5564 = vst [vmem:[#allocation2 + $0x2c] sm:$0x1] %v5563_v20  ;;  %v5293_v59 = vrot.slane %v16049_v10, 4  ;;  %5677 = vst [vmem:[#allocation2 + $0x30] sm:$0x1] %v5676_v11  ;;  %v5673_v4 = vsel %vm15965_vm8, 0, %v5672_v52  ;;  %v5067_v16 = vadd.f32 %v15988_v30, %v4937_v15  ;;  %v5070_v31 = vadd.f32 %v12540_v5, %v15988_v30 }
 0x34b   : > { %5581 = vst [vmem:[#allocation2 + $0x48] sm:$0xf] %v5580_v36  ;;  %v5312_v26 = vshrl.u32 %v11671_v43, 16  ;;  %v5315_v49 = vshll.u32 %v11671_v43, 16  ;;  %v5096_v9 = vmax.f32 %v5064_v27, 0.0  ;;  %v5573_v33 = vsel %vm15996_vm13, %v5292_v18, %v5572_v13  ;;  %v12543_v54 = vpop.f32.mrb[16].mxu0 }
 0x34c   : > { %5674 = vst [vmem:[#allocation2 + $0x24] sm:$0x1] %v5673_v4  ;;  %5574 = vst [vmem:[#allocation2 + $0x3c] sm:$0xf] %v5573_v33  ;;  %v5068_v1 = vadd.f32 %v15988_v30, %v4940_v56  ;;  %v5073_v58 = vadd.f32 %v12543_v54, %v15988_v30  ;;  %v4953_v51 = vpop.f32.mrb[17].mxu0  ;;  %v5101_v53 = vmax.f32 %v5069_v47, 0.0 }
 0x34d   : > { %v5314_v41 = vrot.slane %v5312_v26, 7  ;;  %v11669_v17 = vpack.c.bf16 %v5096_v9, %v5096_v9  ;;  %v5099_v42 = vmax.f32 %v5067_v16, 0.0  ;;  %v5102_v25 = vmax.f32 %v5070_v31, 0.0  ;;  %v16077_v24 = vpop.f32.mrb[18].mxu0  ;;  %v5593_v36 = vld [vmem:[#allocation2 + $0x60] sm:$0xf] }
 0x34e   : > { %v16075_v37 = vadd.f32 %v15988_v30, %v4953_v51  ;;  %v16079_v50 = vpop.f32.mrb[19].mxu0  ;;  %v11674_v45 = vpack.c.bf16 %v5101_v53, %v5101_v53  ;;  %v5100_v57 = vmax.f32 %v5068_v1, 0.0  ;;  %v5105_v7 = vmax.f32 %v5073_v58, 0.0  ;;  %v5586_v9 = vld [vmem:[#allocation2 + $0x54] sm:$0xf] }
 0x34f   : > { %v5317_v39 = vor.u32 %v5315_v49, %v5314_v41  ;;  %v5319_v28 = vrot.slane %v5314_v41, 4  ;;  %v5295_v3 = vshrl.u32 %v11669_v17, 16  ;;  %v5298_v55 = vshll.u32 %v11669_v17, 16  ;;  %v5597_v41 = vld [vmem:[#allocation2 + $0x68] sm:$0x1] }
 0x350   : > { %v11672_v61 = vpack.c.bf16 %v5099_v42, %v5099_v42  ;;  %v11675_v12 = vpack.c.bf16 %v5102_v25, %v5102_v25  ;;  %v5730_v62 = vld [vmem:[#allocation2 + $0x38] sm:$0x1]  ;;  %v5338_v5 = vshrl.u32 %v11674_v45, 16  ;;  %v5341_v29 = vshll.u32 %v11674_v45, 16 }
 0x351   : > { %v5727_v40 = vld [vmem:[#allocation2 + $0x2c] sm:$0x1]  ;;  %v5318_v27 = vsel %vm16003_vm14, %v5310_v35, %v5317_v39  ;;  %v5584_v15 = vsel %vm15965_vm8, %v5319_v28, %v5583_v38  ;;  %v5297_v14 = vrot.slane %v5295_v3, 7  ;;  %v5731_v21 = vsel %vm15972_vm10, 0, %v5730_v62 }
 0x352   : > { %v5728_v48 = vsel %vm15972_vm10, 0, %v5727_v40  ;;  %v5681_v19 = vld [vmem:[#allocation2 + $0x48] sm:$0x1]  ;;  %5582 = vst [vmem:[#allocation2 + $0x4c] sm:$0xf] %v5318_v27  ;;  %v5321_v43 = vshrl.u32 %v11672_v61, 16  ;;  %v11673_v47 = vpack.c.bf16 %v5100_v57, %v5100_v57  ;;  %v11678_v17 = vpack.c.bf16 %v5105_v7, %v5105_v7 }
 0x353   : > { %5585 = vst [vmem:[#allocation2 + $0x50] sm:$0x1] %v5584_v15  ;;  %5732 = vst [vmem:[#allocation2 + $0x38] sm:$0x1] %v5731_v21  ;;  %v5682_v35 = vsel %vm15965_vm8, 0, %v5681_v19  ;;  %v5300_v10 = vor.u32 %v5298_v55, %v5297_v14  ;;  %v5302_v13 = vrot.slane %v5297_v14, 4  ;;  %v5074_v40 = vadd.f32 %v16077_v24, %v15988_v30 }
 0x354   : > { %5729 = vst [vmem:[#allocation2 + $0x2c] sm:$0x1] %v5728_v48  ;;  %5683 = vst [vmem:[#allocation2 + $0x48] sm:$0x1] %v5682_v35  ;;  %v5678_v56 = vld [vmem:[#allocation2 + $0x3c] sm:$0x1]  ;;  %v5072_v27 = vadd.f32 %v15988_v30, %v16079_v50 }
 0x355   : > { %v5340_v6 = vrot.slane %v5338_v5, 7  ;;  %v5324_v23 = vshll.u32 %v11672_v61, 16  ;;  %v5346_v22 = vshrl.u32 %v11675_v12, 16  ;;  %v5349_v8 = vshll.u32 %v11675_v12, 16  ;;  %v12547_v4 = vpop.f32.mrb[20].mxu0 }
 0x356   : > { %v5679_v20 = vsel %vm15965_vm8, 0, %v5678_v56  ;;  %v5301_v11 = vsel %vm16003_vm14, %v5293_v59, %v5300_v10  ;;  %v5577_v52 = vsel %vm15965_vm8, %v5302_v13, %v5576_v63  ;;  %v5323_v18 = vrot.slane %v5321_v43, 7  ;;  %v4969_v16 = vpop.f32.mrb[21].mxu0  ;;  %v5590_v12 = vld [vmem:[#allocation2 + $0x5c] sm:$0x1] }
 0x357   : > { %5680 = vst [vmem:[#allocation2 + $0x3c] sm:$0x1] %v5679_v20  ;;  %5575 = vst [vmem:[#allocation2 + $0x40] sm:$0xf] %v5301_v11  ;;  %v5343_v26 = vor.u32 %v5341_v29, %v5340_v6  ;;  %v5344_v49 = vrot.slane %v5340_v6, 4  ;;  %v5348_v33 = vrot.slane %v5346_v22, 7  ;;  %v5077_v21 = vadd.f32 %v12547_v4, %v15988_v30 }
 0x358   : > { %5578 = vst [vmem:[#allocation2 + $0x44] sm:$0x1] %v5577_v52  ;;  %v5326_v31 = vor.u32 %v5324_v23, %v5323_v18  ;;  %v5327_v54 = vrot.slane %v5323_v18, 4  ;;  %v5103_v59 = vmax.f32 %v16075_v37, 0.0  ;;  %v12548_v1 = vpop.f32.mrb[22].mxu0  ;;  %v5329_v53 = vshrl.u32 %v11673_v47, 16 }
 0x359   : > { %v5594_v58 = vsel %vm15996_vm13, %v5343_v26, %v5593_v36  ;;  %v5351_v51 = vor.u32 %v5349_v8, %v5348_v33  ;;  %v5353_v38 = vrot.slane %v5348_v33, 4  ;;  %v4972_v42 = vpop.f32.mrb[23].mxu0  ;;  %v5332_v28 = vshll.u32 %v11673_v47, 16  ;;  %v5607_v7 = vld [vmem:[#allocation2 + $0x78] sm:$0xf] }
 0x35a   : > { %v5736_v25 = vld [vmem:[#allocation2 + $0x50] sm:$0x1]  ;;  %5595 = vst [vmem:[#allocation2 + $0x60] sm:$0xf] %v5594_v58  ;;  %v5587_v39 = vsel %vm15996_vm13, %v5326_v31, %v5586_v9  ;;  %v5372_v3 = vshrl.u32 %v11678_v17, 16  ;;  %v5375_v55 = vshll.u32 %v11678_v17, 16  ;;  %v11676_v62 = vpack.c.bf16 %v5103_v59, %v5103_v59 }
 0x35b   : > { %v5737_v63 = vsel %vm15972_vm10, 0, %v5736_v25  ;;  %5588 = vst [vmem:[#allocation2 + $0x54] sm:$0xf] %v5587_v39  ;;  %v5352_v37 = vsel %vm16003_vm14, %v5344_v49, %v5351_v51  ;;  %v5598_v45 = vsel %vm15965_vm8, %v5353_v38, %v5597_v41  ;;  %v5331_v61 = vrot.slane %v5329_v53, 7  ;;  %v16116_v19 = vpop.f32.mrb[24].mxu0 }
 0x35c   : > { %5738 = vst [vmem:[#allocation2 + $0x50] sm:$0x1] %v5737_v63  ;;  %5596 = vst [vmem:[#allocation2 + $0x64] sm:$0xf] %v5352_v37  ;;  %v16108_v57 = vrot.slane %v5372_v3, 7  ;;  %v5075_v48 = vadd.f32 %v15988_v30, %v4969_v16  ;;  %v5355_v35 = vshrl.u32 %v11676_v62, 16  ;;  %v16137_v49 = vadd.f32 %v12548_v1, %v15988_v30 }
 0x35d   : > { %5599 = vst [vmem:[#allocation2 + $0x68] sm:$0x1] %v5598_v45  ;;  %v5334_v15 = vor.u32 %v5332_v28, %v5331_v61  ;;  %v5336_v14 = vrot.slane %v5331_v61, 4  ;;  %v5358_v10 = vshll.u32 %v11676_v62, 16  ;;  %v16119_v13 = vpop.f32.mrb[25].mxu0  ;;  %v5106_v56 = vmax.f32 %v5074_v40, 0.0 }
 0x35e   : > { %v5377_v29 = vor.u32 %v5375_v55, %v16108_v57  ;;  %v16127_v6 = vpop.f32.mrb[26].mxu0  ;;  %v16131_v22 = vrot.slane %v5355_v35, 7  ;;  %v5104_v8 = vmax.f32 %v5072_v27, 0.0  ;;  %v5109_v20 = vmax.f32 %v5077_v21, 0.0  ;;  %v5600_v18 = vld [vmem:[#allocation2 + $0x6c] sm:$0xf] }
 0x35f   : > { %v5733_v5 = vld [vmem:[#allocation2 + $0x44] sm:$0x1]  ;;  %v5335_v50 = vsel %vm16003_vm14, %v5327_v54, %v5334_v15  ;;  %v5591_v43 = vsel %vm15965_vm8, %v5336_v14, %v5590_v12  ;;  %v16133_v11 = vpop.f32.mrb[27].mxu0  ;;  %v5378_v36 = vrot.slane %v16108_v57, 4  ;;  %v11679_v4 = vpack.c.bf16 %v5106_v56, %v5106_v56  ;;  %v5611_v53 = vld [vmem:[#allocation2 + $0x80] sm:$0x1] }
 0x360   : > { %v5734_v24 = vsel %vm15972_vm10, 0, %v5733_v5  ;;  %5589 = vst [vmem:[#allocation2 + $0x58] sm:$0xf] %v5335_v50  ;;  %5592 = vst [vmem:[#allocation2 + $0x5c] sm:$0x1] %v5591_v43  ;;  %v5608_v23 = vsel %vm15996_vm13, %v5377_v29, %v5607_v7  ;;  %v5107_v26 = vmax.f32 %v5075_v48, 0.0  ;;  %v5360_v47 = vor.u32 %v5358_v10, %v16131_v22 }
 0x361   : > { %5735 = vst [vmem:[#allocation2 + $0x44] sm:$0x1] %v5734_v24  ;;  %v5687_v52 = vld [vmem:[#allocation2 + $0x60] sm:$0x1]  ;;  %5609 = vst [vmem:[#allocation2 + $0x78] sm:$0xf] %v5608_v23  ;;  %v11677_v16 = vpack.c.bf16 %v5104_v8, %v5104_v8  ;;  %v5076_v31 = vadd.f32 %v15988_v30, %v4972_v42  ;;  %v11682_v58 = vpack.c.bf16 %v5109_v20, %v5109_v20 }
 0x362   : > { %v5688_v9 = vsel %vm15965_vm8, 0, %v5687_v52  ;;  %v5684_v33 = vld [vmem:[#allocation2 + $0x54] sm:$0x1]  ;;  %v5361_v17 = vrot.slane %v16131_v22, 4  ;;  %v5380_v59 = vshrl.u32 %v11679_v4, 16  ;;  %v5601_v51 = vsel %vm15996_vm13, %v5360_v47, %v5600_v18  ;;  %v16150_v37 = vpop.f32.mrb[28].mxu0 }
 0x363   : > { %5689 = vst [vmem:[#allocation2 + $0x60] sm:$0x1] %v5688_v9  ;;  %v5685_v54 = vsel %vm15965_vm8, 0, %v5684_v33  ;;  %v5383_v38 = vshll.u32 %v11679_v4, 16  ;;  %v5363_v25 = vshrl.u32 %v11677_v16, 16  ;;  %v5366_v39 = vshll.u32 %v11677_v16, 16 }
 0x364   : > { %v5742_v41 = vld [vmem:[#allocation2 + $0x68] sm:$0x1]  ;;  %5686 = vst [vmem:[#allocation2 + $0x54] sm:$0x1] %v5685_v54  ;;  %5602 = vst [vmem:[#allocation2 + $0x6c] sm:$0xf] %v5601_v51  ;;  %v11680_v55 = vpack.c.bf16 %v5107_v26, %v5107_v26 }
 0x365   : > { %v5743_v1 = vsel %vm15972_vm10, 0, %v5742_v41  ;;  %v5382_v42 = vrot.slane %v5380_v59, 7  ;;  %v5604_v28 = vld [vmem:[#allocation2 + $0x74] sm:$0x1]  ;;  %v5406_v3 = vshrl.u32 %v11682_v58, 16  ;;  %v5365_v45 = vrot.slane %v5363_v25, 7 }
 0x366   : > { %5744 = vst [vmem:[#allocation2 + $0x68] sm:$0x1] %v5743_v1  ;;  %v5774_v63 = vld [vmem:[#allocation2 + $0xc] sm:$0xf]  ;;  %v5409_v61 = vshll.u32 %v11682_v58, 16  ;;  %v5110_v57 = vmax.f32 %v16137_v49, 0.0 }
 0x367   : > { %v5621_v12 = vld [vmem:[#allocation2 + $0x90] sm:$0xf]  ;;  %v5108_v62 = vmax.f32 %v5076_v31, 0.0  ;;  %v16153_v40 = vpop.f32.mrb[29].mxu0  ;;  %v5739_v27 = vld [vmem:[#allocation2 + $0x5c] sm:$0x1]  ;;  %v5385_v15 = vor.u32 %v5383_v38, %v5382_v42  ;;  %v5368_v35 = vor.u32 %v5366_v39, %v5365_v45 }
 0x368   : > { %v5387_v14 = vrot.slane %v5382_v42, 4  ;;  %v16155_v7 = vrot.slane %v5406_v3, 7  ;;  %v5389_v21 = vshrl.u32 %v11680_v55, 16  ;;  %v16157_v48 = vpop.f32.mrb[30].mxu0  ;;  %v5740_v5 = vsel %vm15972_vm10, 0, %v5739_v27 }
 0x369   : > { %v5693_v29 = vld [vmem:[#allocation2 + $0x78] sm:$0x1]  ;;  %v5370_v10 = vrot.slane %v5365_v45, 4  ;;  %v5861_v24 = vshrl.u32 %v5774_v63, 16  ;;  %v16161_v50 = vpop.f32.mrb[31].mxu0  ;;  %v5386_v56 = vsel %vm16003_vm14, %v5378_v36, %v5385_v15  ;;  %v5369_v20 = vsel %vm16003_vm14, %v5361_v17, %v5368_v35 }
 0x36a   : > { %5741 = vst [vmem:[#allocation2 + $0x5c] sm:$0x1] %v5740_v5  ;;  %v5694_v43 = vsel %vm15965_vm8, 0, %v5693_v29  ;;  %v5612_v23 = vsel %vm15965_vm8, %v5387_v14, %v5611_v53  ;;  %v5411_v22 = vor.u32 %v5409_v61, %v16155_v7  ;;  %v5775_v8 = vld [vmem:[#allocation2 + $0x10] sm:$0xf]  ;;  %v5391_v18 = vrot.slane %v5389_v21, 7 }
 0x36b   : > { %5695 = vst [vmem:[#allocation2 + $0x78] sm:$0x1] %v5694_v43  ;;  %5610 = vst [vmem:[#allocation2 + $0x7c] sm:$0xf] %v5386_v56  ;;  %v5605_v52 = vsel %vm15965_vm8, %v5370_v10, %v5604_v28  ;;  %v5392_v4 = vshll.u32 %v11680_v55, 16  ;;  %v5412_v36 = vrot.slane %v16155_v7, 4  ;;  %v11683_v9 = vpack.c.bf16 %v5110_v57, %v5110_v57 }
 0x36c   : > { %5613 = vst [vmem:[#allocation2 + $0x80] sm:$0x1] %v5612_v23  ;;  %5603 = vst [vmem:[#allocation2 + $0x70] sm:$0xf] %v5369_v20  ;;  %v5622_v26 = vsel %vm15996_vm13, %v5411_v22, %v5621_v12  ;;  %v5614_v49 = vld [vmem:[#allocation2 + $0x84] sm:$0xf]  ;;  %v11681_v33 = vpack.c.bf16 %v5108_v62, %v5108_v62 }
 0x36d   : > { %5606 = vst [vmem:[#allocation2 + $0x74] sm:$0x1] %v5605_v52  ;;  %v5821_v47 = vld [vmem:[#allocation2 + $0x14] sm:$0x1]  ;;  %v5690_v16 = vld [vmem:[#allocation2 + $0x6c] sm:$0x1]  ;;  %v5394_v31 = vor.u32 %v5392_v4, %v5391_v18 }
 0x36e   : > { %5623 = vst [vmem:[#allocation2 + $0x90] sm:$0xf] %v5622_v26  ;;  %v5863_v54 = vrot.slane %v5861_v24, 4  ;;  %v5864_v41 = vshll.u32 %v5774_v63, 16  ;;  %v5870_v17 = vshll.u32 %v5775_v8, 16  ;;  %v5691_v59 = vsel %vm15965_vm8, 0, %v5690_v16 }
 0x36f   : > { %v5395_v58 = vrot.slane %v5391_v18, 4  ;;  %v5414_v1 = vshrl.u32 %v11683_v9, 16  ;;  %v5397_v51 = vshrl.u32 %v11681_v33, 16  ;;  %v5776_v38 = vld [vmem:[#allocation2 + $0x18] sm:$0xf]  ;;  %v5615_v53 = vsel %vm15996_vm13, %v5394_v31, %v5614_v49 }
 0x370   : > { %5692 = vst [vmem:[#allocation2 + $0x6c] sm:$0x1] %v5691_v59  ;;  %v5417_v25 = vshll.u32 %v11683_v9, 16  ;;  %v5400_v42 = vshll.u32 %v11681_v33, 16  ;;  %v5866_v39 = vrot.slane %v5864_v41, 5  ;;  %v5874_v63 = vshrl.u32 %v5775_v8, 16 }
 0x371   : > { %5616 = vst [vmem:[#allocation2 + $0x84] sm:$0xf] %v5615_v53  ;;  %v5416_v28 = vrot.slane %v5414_v1, 7  ;;  %v5625_v3 = vld [vmem:[#allocation2 + $0x98] sm:$0x1]  ;;  %v5399_v55 = vrot.slane %v5397_v51, 7  ;;  %v5079_v59 = vadd.f32 %v15988_v30, %v16119_v13  ;;  %v5082_v13 = vadd.f32 %v16127_v6, %v15988_v30 }
 0x372   : > { %v5880_v45 = vshll.u32 %v5821_v47, 16  ;;  %v5618_v61 = vld [vmem:[#allocation2 + $0x8c] sm:$0x1]  ;;  %v5867_v12 = vor.u32 %v5866_v39, %v5863_v54  ;;  %v5872_v57 = vrot.slane %v5870_v17, 5  ;;  %v5885_v62 = vshrl.u32 %v5776_v38, 16 }
 0x373   : > { %v5888_v27 = vshll.u32 %v5776_v38, 16  ;;  %v5748_v15 = vld [vmem:[#allocation2 + $0x80] sm:$0x1]  ;;  %v5419_v14 = vor.u32 %v5417_v25, %v5416_v28  ;;  %v5421_v7 = vrot.slane %v5416_v28, 4  ;;  %v5402_v21 = vor.u32 %v5400_v42, %v5399_v55  ;;  %v5777_v29 = vld [vmem:[#allocation2 + $0x1c] sm:$0xf] }
 0x374   : > { %v5404_v5 = vrot.slane %v5399_v55, 4  ;;  %v5749_v35 = vsel %vm15972_vm10, 0, %v5748_v15  ;;  %v5745_v10 = vld [vmem:[#allocation2 + $0x74] sm:$0x1]  ;;  %v5868_v24 = vrot.slane %v5867_v12, 4  ;;  %v5876_v43 = vrot.slane %v5874_v63, 4 }
 0x375   : > { %v5882_v56 = vrot.slane %v5880_v45, 5  ;;  %5750 = vst [vmem:[#allocation2 + $0x80] sm:$0x1] %v5749_v35  ;;  %v5746_v23 = vsel %vm15972_vm10, 0, %v5745_v10  ;;  %v5699_v22 = vld [vmem:[#allocation2 + $0x90] sm:$0x1]  ;;  %v5420_v8 = vsel %vm16003_vm14, %v5412_v36, %v5419_v14  ;;  %v5626_v20 = vsel %vm15965_vm8, %v5421_v7, %v5625_v3 }
 0x376   : > { %v5403_v52 = vsel %vm16003_vm14, %v5395_v58, %v5402_v21  ;;  %v5822_v18 = vld [vmem:[#allocation2 + $0x20] sm:$0x1]  ;;  %5747 = vst [vmem:[#allocation2 + $0x74] sm:$0x1] %v5746_v23  ;;  %v5700_v4 = vsel %vm15965_vm8, 0, %v5699_v22  ;;  %v5619_v26 = vsel %vm15965_vm8, %v5404_v5, %v5618_v61  ;;  %v5873_v36 = vsel %vm14119_vm2, %v5868_v24, %v5872_v57  ;;  %v13687_v23 = vld [vmem:[#allocation3 + $0x10] sm:$0xff]  }
 0x377   : > { %5624 = vst [vmem:[#allocation2 + $0x94] sm:$0xf] %v5420_v8  ;;  %5627 = vst [vmem:[#allocation2 + $0x98] sm:$0x1] %v5626_v20  ;;  %v5877_v49 = vor.u32 %v5876_v43, %v5872_v57  ;;  %v5887_v9 = vrot.slane %v5885_v62, 4  ;;  %v5890_v33 = vrot.slane %v5888_v27, 5  ;;  %v5081_v17 = vadd.f32 %v16116_v19, %v15988_v30 }
 0x378   : > { %5617 = vst [vmem:[#allocation2 + $0x88] sm:$0xf] %v5403_v52  ;;  %5701 = vst [vmem:[#allocation2 + $0x90] sm:$0x1] %v5700_v4  ;;  %v5894_v47 = vshll.u32 %v5777_v29, 16  ;;  %v5898_v16 = vshrl.u32 %v5777_v29, 16  ;;  %v5080_v12 = vadd.f32 %v15988_v30, %v16133_v11 }
 0x379   : > { %5620 = vst [vmem:[#allocation2 + $0x8c] sm:$0x1] %v5619_v26  ;;  %v5696_v31 = vld [vmem:[#allocation2 + $0x84] sm:$0x1]  ;;  %v5878_v54 = vrot.slane %v5877_v49, 4  ;;  %v5904_v41 = vshll.u32 %v5822_v18, 16  ;;  %v5891_v1 = vor.u32 %v5890_v33, %v5887_v9 }
 0x37a   : > { %v5697_v58 = vsel %vm15965_vm8, 0, %v5696_v31  ;;  %v5896_v51 = vrot.slane %v5894_v47, 5  ;;  %v5900_v38 = vrot.slane %v5898_v16, 4  ;;  %v16203_v53 = vld [vmem:[#allocation2 + $0x24] sm:$0xf]  ;;  %v5113_v39 = vmax.f32 %v5081_v17, 0.0 }
 0x37b   : > { %5698 = vst [vmem:[#allocation2 + $0x84] sm:$0x1] %v5697_v58  ;;  %v5883_v25 = vsel %vm14119_vm2, %v5878_v54, %v5882_v56  ;;  %v5906_v42 = vrot.slane %v5904_v41, 5  ;;  %v5111_v28 = vmax.f32 %v5079_v59, 0.0  ;;  %v5892_v19 = vrot.slane %v5891_v1, 4  ;;  %v13686_v63 = vld [vmem:[#allocation3 + $0x8] sm:$0xff]  }
 0x37c   : > { %v11391_v3 = vcombine.low %v5873_v36, %v5883_v25  ;;  %v5901_v55 = vor.u32 %v5900_v38, %v5896_v51  ;;  %v11686_v45 = vpack.c.bf16 %v5113_v39, %v5113_v39  ;;  %v5909_v57 = vshrl.u32 %v16203_v53, 16  ;;  %v5635_v10 = vld [vmem:[#allocation2 + $0xa8] sm:$0xf]  ;;  %v5628_v43 = vld [vmem:[#allocation2 + $0x9c] sm:$0xf]  ;;  %v13688_v9 = vld [vmem:[#allocation3 + $0x18] sm:$0xff]  }
 0x37d   : > { %v11684_v61 = vpack.c.bf16 %v5111_v28, %v5111_v28  ;;  %v5897_v27 = vsel %vm14119_vm2, %v5892_v19, %v5896_v51  ;;  %v5114_v14 = vmax.f32 %v5082_v13, 0.0  ;;  %v5912_v7 = vshll.u32 %v16203_v53, 16  ;;  %v16224_v52 = vld [vmem:[#allocation2 + $0x28] sm:$0xf]  ;;  %v5823_v26 = vld [vmem:[#allocation2 + $0x2c] sm:$0x1] }
 0x37e   : > { %v5754_v62 = vld [vmem:[#allocation2 + $0x98] sm:$0x1]  ;;  %12574 = vmatmul.mubr.bf16.vlgmr.msra.gmra.mrb[0].mxu1 %v11391_v3  ;;  %v5902_v15 = vrot.slane %v5901_v55, 4  ;;  %v5440_v5 = vshrl.u32 %v11686_v45, 16  ;;  %v5443_v29 = vshll.u32 %v11686_v45, 16  ;;  %v5112_v20 = vmax.f32 %v5080_v12, 0.0 }
 0x37f   : > { %v5755_v6 = vsel %vm15972_vm10, 0, %v5754_v62  ;;  %12606 = vmatpush3.bf16.msra.mxu1 %v15982_v34  ;;  %v5423_v30 = vshrl.u32 %v11684_v61, 16  ;;  %v5426_v24 = vshll.u32 %v11684_v61, 16  ;;  %v11687_v56 = vpack.c.bf16 %v5114_v14, %v5114_v14  ;;  %v5639_v54 = vld [vmem:[#allocation2 + $0xb0] sm:$0x1] }
 0x380   : > { %v5751_v21 = vld [vmem:[#allocation2 + $0x8c] sm:$0x1]  ;;  %5756 = vst [vmem:[#allocation2 + $0x98] sm:$0x1] %v5755_v6  ;;  %v5907_v35 = vsel %vm14119_vm2, %v5902_v15, %v5906_v42  ;;  %12607 = vmatprep.subr.bf16.mxu1 %v13686_v63  ;;  %v5442_v8 = vrot.slane %v5440_v5, 7  ;;  %v5911_v36 = vrot.slane %v5909_v57, 4  ;;  %v11685_v59 = vpack.c.bf16 %v5112_v20, %v5112_v20 }
 0x381   : > { %v5752_v11 = vsel %vm15972_vm10, 0, %v5751_v21  ;;  %v11392_v22 = vcombine.low %v5897_v27, %v5907_v35  ;;  %v16222_v34 = vrot.slane %v5423_v30, 7  ;;  %v5448_v18 = vshrl.u32 %v11687_v56, 16  ;;  %v16228_v41 = vld [vmem:[#allocation2 + $0x30] sm:$0xf] }
 0x382   : > { %5753 = vst [vmem:[#allocation2 + $0x8c] sm:$0x1] %v5752_v11  ;;  %v5451_v4 = vshll.u32 %v11687_v56, 16  ;;  %v5914_v49 = vrot.slane %v5912_v7, 5  ;;  %v5445_v33 = vor.u32 %v5443_v29, %v5442_v8  ;;  %v5446_v47 = vrot.slane %v5442_v8, 4  ;;  %v13689_v7 = vld [vmem:[#allocation3 + $0x20] sm:$0xff]  }
 0x383   : > { %12577 = vmatprep.mubr.bf16.mxu1 %v11392_v22  ;;  %v5428_v16 = vor.u32 %v5426_v24, %v16222_v34  ;;  %v5429_v31 = vrot.slane %v16222_v34, 4  ;;  %12608 = vmatpush3.bf16.msra.mxu1 %v13686_v63  ;;  %v5450_v17 = vrot.slane %v5448_v18, 7  ;;  %v5918_v1 = vshll.u32 %v16224_v52, 16  ;;  %v16231_v51 = vld [vmem:[#allocation2 + $0x34] sm:$0xf] }
 0x384   : > { %v5915_v58 = vor.u32 %v5914_v49, %v5911_v36  ;;  %12609 = vmatprep.subr.bf16.mxu1 %v13687_v23  ;;  %v5636_v38 = vsel %vm15996_vm13, %v5445_v33, %v5635_v10  ;;  %v5922_v42 = vshrl.u32 %v16224_v52, 16  ;;  %v5928_v39 = vshll.u32 %v5823_v26, 16  ;;  %v5632_v13 = vld [vmem:[#allocation2 + $0xa4] sm:$0x1]  ;;  %v5824_v15 = vld [vmem:[#allocation2 + $0x38] sm:$0x1] }
 0x385   : > { %v5629_v25 = vsel %vm15996_vm13, %v5428_v16, %v5628_v43  ;;  %5637 = vst [vmem:[#allocation2 + $0xa8] sm:$0xf] %v5636_v38  ;;  %v5453_v28 = vor.u32 %v5451_v4, %v5450_v17  ;;  %v5455_v3 = vrot.slane %v5450_v17, 4  ;;  %v5431_v19 = vshrl.u32 %v11685_v59, 16  ;;  %v16248_v22 = vld [vmem:[#allocation2 + $0x3c] sm:$0xf] }
 0x386   : > { %5630 = vst [vmem:[#allocation2 + $0x9c] sm:$0xf] %v5629_v25  ;;  %v5434_v55 = vshll.u32 %v11685_v59, 16  ;;  %v5916_v63 = vrot.slane %v5915_v58, 4  ;;  %v5920_v45 = vrot.slane %v5918_v1, 5  ;;  %v5924_v61 = vrot.slane %v5922_v42, 4 }
 0x387   : > { %v5930_v12 = vrot.slane %v5928_v39, 5  ;;  %12610 = vmatpush3.bf16.msra.mxu1 %v13687_v23  ;;  %v5454_v57 = vsel %vm16003_vm14, %v5446_v47, %v5453_v28  ;;  %v5640_v62 = vsel %vm15965_vm8, %v5455_v3, %v5639_v54  ;;  %v5433_v27 = vrot.slane %v5431_v19, 7  ;;  %v13809_v18 = vld [vmem:[%s17701_s2] ss:$0 sm:$0xff]  ;;  %v13691_v3 = vld [vmem:[#allocation3 + $0x30] sm:$0xff]  }
 0x388   : > { %v5933_v14 = vshrl.u32 %v16228_v41, 16  ;;  %12611 = vmatprep.subr.bf16.mxu1 %v13688_v9  ;;  %5638 = vst [vmem:[#allocation2 + $0xac] sm:$0xf] %v5454_v57  ;;  %5641 = vst [vmem:[#allocation2 + $0xb0] sm:$0x1] %v5640_v62  ;;  %v5921_v6 = vsel %vm14119_vm2, %v5916_v63, %v5920_v45  ;;  %v5925_v21 = vor.u32 %v5924_v61, %v5920_v45  ;;  %v5936_v5 = vshll.u32 %v16228_v41, 16 }
 0x389   : > { %v5942_v29 = vshll.u32 %v16231_v51, 16  ;;  %v5436_v30 = vor.u32 %v5434_v55, %v5433_v27  ;;  %v5438_v11 = vrot.slane %v5433_v27, 4  ;;  %v5946_v10 = vshrl.u32 %v16231_v51, 16  ;;  %v13690_v26 = vld [vmem:[#allocation3 + $0x28] sm:$0xff]  }
 0x38a   : > { %v5935_v35 = vrot.slane %v5933_v14, 4  ;;  %v5926_v24 = vrot.slane %v5925_v21, 4  ;;  %v5938_v43 = vrot.slane %v5936_v5, 5  ;;  %v5952_v23 = vshll.u32 %v5824_v15, 16  ;;  %v16273_v63 = vld [vmem:[#allocation2 + $0x40] sm:$0xf] }
 0x38b   : > { %v5944_v56 = vrot.slane %v5942_v29, 5  ;;  %12612 = vmatpush3.bf16.msra.mxu1 %v13688_v9  ;;  %v5437_v8 = vsel %vm16003_vm14, %v5429_v31, %v5436_v30  ;;  %v5633_v34 = vsel %vm15965_vm8, %v5438_v11, %v5632_v13  ;;  %v5948_v20 = vrot.slane %v5946_v10, 4  ;;  %v5642_v21 = vld [vmem:[#allocation2 + $0xb4] sm:$0xf] }
 0x38c   : > { %v5085_v4 = vadd.f32 %v13809_v18, %v16150_v37  ;;  %12613 = vmatprep.subr.bf16.mxu1 %v13689_v7  ;;  %v5705_v36 = vld [vmem:[#allocation2 + $0xa8] sm:$0x1]  ;;  %5631 = vst [vmem:[#allocation2 + $0xa0] sm:$0xf] %v5437_v8  ;;  %5634 = vst [vmem:[#allocation2 + $0xa4] sm:$0x1] %v5633_v34  ;;  %v5931_v9 = vsel %vm14119_vm2, %v5926_v24, %v5930_v12  ;;  %v5939_v33 = vor.u32 %v5938_v43, %v5935_v35 }
 0x38d   : > { %v5702_v49 = vld [vmem:[#allocation2 + $0x9c] sm:$0x1]  ;;  %v5954_v47 = vrot.slane %v5952_v23, 5  ;;  %v5083_v16 = vadd.f32 %v13809_v18, %v16153_v40  ;;  %v5706_v31 = vsel %vm15965_vm8, 0, %v5705_v36  ;;  %v11393_v37 = vcombine.low %v5921_v6, %v5931_v9  ;;  %v13692_v11 = vld [vmem:[#allocation3 + $0x38] sm:$0xff]  }
 0x38e   : > { %v5703_v54 = vsel %vm15965_vm8, 0, %v5702_v49  ;;  %v5949_v17 = vor.u32 %v5948_v20, %v5944_v56  ;;  %5707 = vst [vmem:[#allocation2 + $0xa8] sm:$0x1] %v5706_v31  ;;  %v5940_v59 = vrot.slane %v5939_v33, 4  ;;  %v5117_v58 = vmax.f32 %v5085_v4, 0.0 }
 0x38f   : > { %5704 = vst [vmem:[#allocation2 + $0x9c] sm:$0x1] %v5703_v54  ;;  %v5115_v1 = vmax.f32 %v5083_v16, 0.0  ;;  %v5086_v38 = vadd.f32 %v13809_v18, %v16157_v48  ;;  %12614 = vmatpush3.bf16.msra.mxu1 %v13689_v7  ;;  %v5760_v25 = vld [vmem:[#allocation2 + $0xb0] sm:$0x1]  ;;  %v5084_v40 = vadd.f32 %v13809_v18, %v16161_v50  ;;  %v5957_v39 = vshrl.u32 %v16248_v22, 16 }
 0x390   : > { %12578 = vmatmul.mubr.bf16.gmra.mrb[4].mxu1 %v11393_v37  ;;  %v5950_v42 = vrot.slane %v5949_v17, 4  ;;  %v5960_v28 = vshll.u32 %v16248_v22, 16  ;;  %12615 = vmatprep.subr.bf16.mxu1 %v13690_v26  ;;  %v5761_v19 = vsel %vm15972_vm10, 0, %v5760_v25  ;;  %v5945_v55 = vsel %vm14119_vm2, %v5940_v59, %v5944_v56  ;;  %v5649_v7 = vld [vmem:[#allocation2 + $0xc0] sm:$0xf]  ;;  %v16284_v37 = vld [vmem:[#allocation3 + $0x80] sm:$0xff]  }
 0x391   : > { %v11690_v13 = vpack.c.bf16 %v5117_v58, %v5117_v58  ;;  %v11688_v48 = vpack.c.bf16 %v5115_v1, %v5115_v1  ;;  %5762 = vst [vmem:[#allocation2 + $0xb0] sm:$0x1] %v5761_v19  ;;  %v5118_v45 = vmax.f32 %v5086_v38, 0.0  ;;  %v5116_v61 = vmax.f32 %v5084_v40, 0.0  ;;  %v16280_v20 = vld [vmem:[#allocation2 + $0x44] sm:$0x1] }
 0x392   : > { %v5955_v50 = vsel %vm14119_vm2, %v5950_v42, %v5954_v47  ;;  %v5959_v12 = vrot.slane %v5957_v39, 4  ;;  %v5962_v30 = vrot.slane %v5960_v28, 5  ;;  %v5966_v43 = vshll.u32 %v16273_v63, 16  ;;  %v5653_v49 = vld [vmem:[#allocation2 + $0xc8] sm:$0x1] }
 0x393   : > { %v11394_v57 = vcombine.low %v5945_v55, %v5955_v50  ;;  %v5474_v62 = vshrl.u32 %v11690_v13, 16  ;;  %v5477_v27 = vshll.u32 %v11690_v13, 16  ;;  %v5457_v15 = vshrl.u32 %v11688_v48, 16  ;;  %12616 = vmatpush3.bf16.msra.mxu1 %v13690_v26  ;;  %v5757_v14 = vld [vmem:[#allocation2 + $0xa4] sm:$0x1] }
 0x394   : > { %v5460_v6 = vshll.u32 %v11688_v48, 16  ;;  %v11691_v5 = vpack.c.bf16 %v5118_v45, %v5118_v45  ;;  %v11689_v29 = vpack.c.bf16 %v5116_v61, %v5116_v61  ;;  %12617 = vmatprep.subr.bf16.mxu1 %v13691_v3  ;;  %v5758_v35 = vsel %vm15972_vm10, 0, %v5757_v14  ;;  %v5646_v9 = vld [vmem:[#allocation2 + $0xbc] sm:$0x1]  ;;  %v16282_v33 = vld [vmem:[#allocation2 + $0x48] sm:$0xf] }
 0x395   : > { %12581 = vmatprep.mubr.bf16.mxu1 %v11394_v57  ;;  %v5476_v10 = vrot.slane %v5474_v62, 7  ;;  %v5459_v24 = vrot.slane %v5457_v15, 7  ;;  %5759 = vst [vmem:[#allocation2 + $0xa4] sm:$0x1] %v5758_v35  ;;  %v5963_v31 = vor.u32 %v5962_v30, %v5959_v12  ;;  %v5968_v54 = vrot.slane %v5966_v43, 5 }
 0x396   : > { %v5482_v56 = vshrl.u32 %v11691_v5, 16  ;;  %v5485_v23 = vshll.u32 %v11691_v5, 16  ;;  %v5465_v8 = vshrl.u32 %v11689_v29, 16  ;;  %v5468_v34 = vshll.u32 %v11689_v29, 16  ;;  %v16292_v38 = vld [vmem:[#allocation2 + $0x4c] sm:$0xf] }
 0x397   : > { %v5479_v18 = vor.u32 %v5477_v27, %v5476_v10  ;;  %v5480_v4 = vrot.slane %v5476_v10, 4  ;;  %v5462_v26 = vor.u32 %v5460_v6, %v5459_v24  ;;  %v5463_v36 = vrot.slane %v5459_v24, 4  ;;  %12618 = vmatpush3.bf16.msra.mxu1 %v13691_v3  ;;  %v16294_v25 = vld [vmem:[#allocation2 + $0x50] sm:$0x1]  ;;  %v16297_v13 = vld [vmem:[#allocation2 + $0x54] sm:$0xf] }
 0x398   : > { %v5484_v47 = vrot.slane %v5482_v56, 7  ;;  %v5467_v16 = vrot.slane %v5465_v8, 7  ;;  %12619 = vmatprep.subr.bf16.mxu1 %v13692_v11  ;;  %v5970_v58 = vshrl.u32 %v16273_v63, 16  ;;  %v5976_v1 = vshll.u32 %v16280_v20, 16  ;;  %v16307_v12 = vld [vmem:[#allocation2 + $0x58] sm:$0xf] }
 0x399   : > { %v5650_v17 = vsel %vm15996_vm13, %v5479_v18, %v5649_v7  ;;  %v5643_v59 = vsel %vm15996_vm13, %v5462_v26, %v5642_v21  ;;  %v5964_v3 = vrot.slane %v5963_v31, 4  ;;  %v5981_v32 = vshrl.u32 %v16282_v33, 16  ;;  %v16321_v43 = vld [vmem:[#allocation2 + $0x5c] sm:$0x1] }
 0x39a   : > { %5651 = vst [vmem:[#allocation2 + $0xc0] sm:$0xf] %v5650_v17  ;;  %5644 = vst [vmem:[#allocation2 + $0xb4] sm:$0xf] %v5643_v59  ;;  %v5487_v42 = vor.u32 %v5485_v23, %v5484_v47  ;;  %v5489_v40 = vrot.slane %v5484_v47, 4  ;;  %v5470_v39 = vor.u32 %v5468_v34, %v5467_v16  ;;  %v5472_v28 = vrot.slane %v5467_v16, 4 }
 0x39b   : > { %v5972_v19 = vrot.slane %v5970_v58, 4  ;;  %v5978_v55 = vrot.slane %v5976_v1, 5  ;;  %12620 = vmatpush3.bf16.msra.mxu1 %v13692_v11  ;;  %v5969_v57 = vsel %vm14119_vm2, %v5964_v3, %v5968_v54  ;;  %v5983_v27 = vrot.slane %v5981_v32, 4  ;;  %v16319_v11 = vld [vmem:[#allocation2 + $0x60] sm:$0xf] }
 0x39c   : > { %v5488_v48 = vsel %vm16003_vm14, %v5480_v4, %v5487_v42  ;;  %v5654_v50 = vsel %vm15965_vm8, %v5489_v40, %v5653_v49  ;;  %v5471_v45 = vsel %vm16003_vm14, %v5463_v36, %v5470_v39  ;;  %v5647_v61 = vsel %vm15965_vm8, %v5472_v28, %v5646_v9  ;;  %12653 = vmatprep.subr.bf16.mxu1 %v16284_v37  ;;  %v16329_v16 = vld [vmem:[#allocation2 + $0x64] sm:$0xf]  ;;  %v16333_v58 = vld [vmem:[#allocation2 + $0x68] sm:$0x1]  ;;  %v16336_v28 = vld [vmem:[#allocation2 + $0x70] sm:$0xf] }
 0x39d   : > { %5652 = vst [vmem:[#allocation2 + $0xc4] sm:$0xf] %v5488_v48  ;;  %5655 = vst [vmem:[#allocation2 + $0xc8] sm:$0x1] %v5654_v50  ;;  %v5973_v62 = vor.u32 %v5972_v19, %v5968_v54  ;;  %v5984_v15 = vshll.u32 %v16282_v33, 16  ;;  %v5990_v60 = vshll.u32 %v16292_v38, 16 }
 0x39e   : > { %5645 = vst [vmem:[#allocation2 + $0xb8] sm:$0xf] %v5471_v45  ;;  %5648 = vst [vmem:[#allocation2 + $0xbc] sm:$0x1] %v5647_v61  ;;  %v5994_v14 = vshrl.u32 %v16292_v38, 16  ;;  %v6000_v7 = vshll.u32 %v16294_v25, 16 }
 0x39f   : > { %v6005_v6 = vshrl.u32 %v16297_v13, 16  ;;  %v5974_v21 = vrot.slane %v5973_v62, 4  ;;  %v5986_v5 = vrot.slane %v5984_v15, 5  ;;  %v6008_v29 = vshll.u32 %v16297_v13, 16  ;;  %v16344_v48 = vld [vmem:[#allocation2 + $0x6c] sm:$0xf] }
 0x3a0   : > { %v6014_v30 = vshll.u32 %v16307_v12, 16  ;;  %v5992_v35 = vrot.slane %v5990_v60, 5  ;;  %v5996_v10 = vrot.slane %v5994_v14, 4  ;;  %v6002_v24 = vrot.slane %v6000_v7, 5 }
 0x3a1   : > { %v6007_v56 = vrot.slane %v6005_v6, 4  ;;  %v5711_v23 = vld [vmem:[#allocation2 + $0xc0] sm:$0x1]  ;;  %v5708_v8 = vld [vmem:[#allocation2 + $0xb4] sm:$0x1]  ;;  %v5979_v34 = vsel %vm14119_vm2, %v5974_v21, %v5978_v55  ;;  %v5987_v18 = vor.u32 %v5986_v5, %v5983_v27  ;;  %v6010_v4 = vrot.slane %v6008_v29, 5 }
 0x3a2   : > { %v6016_v26 = vrot.slane %v6014_v30, 5  ;;  %v5712_v36 = vsel %vm15965_vm8, 0, %v5711_v23  ;;  %v5709_v49 = vsel %vm15965_vm8, 0, %v5708_v8  ;;  %v11395_v9 = vcombine.low %v5969_v57, %v5979_v34  ;;  %v16355_v5 = vld [vmem:[#allocation2 + $0x78] sm:$0xf] }
 0x3a3   : > { %v5997_v47 = vor.u32 %v5996_v10, %v5992_v35  ;;  %5713 = vst [vmem:[#allocation2 + $0xc0] sm:$0x1] %v5712_v36  ;;  %5710 = vst [vmem:[#allocation2 + $0xb4] sm:$0x1] %v5709_v49  ;;  %v5988_v31 = vrot.slane %v5987_v18, 4  ;;  %v6011_v54 = vor.u32 %v6010_v4, %v6007_v56  ;;  %v6018_v17 = vshrl.u32 %v16307_v12, 16 }
 0x3a4   : > { %v6024_v59 = vshll.u32 %v16321_v43, 16  ;;  %v5766_v1 = vld [vmem:[#allocation2 + $0xc8] sm:$0x1]  ;;  %12582 = vmatmul.mubr.bf16.gmra.mrb[8].mxu1 %v11395_v9  ;;  %v6029_v39 = vshrl.u32 %v16319_v11, 16  ;;  %v6032_v15 = vshll.u32 %v16319_v11, 16  ;;  %v6038_v60 = vshll.u32 %v16329_v16, 16 }
 0x3a5   : > { %v5763_v42 = vld [vmem:[#allocation2 + $0xbc] sm:$0x1]  ;;  %v5998_v40 = vrot.slane %v5997_v47, 4  ;;  %v5767_v3 = vsel %vm15972_vm10, 0, %v5766_v1  ;;  %v5993_v55 = vsel %vm14119_vm2, %v5988_v31, %v5992_v35  ;;  %v6012_v32 = vrot.slane %v6011_v54, 4 }
 0x3a6   : > { %v5764_v19 = vsel %vm15972_vm10, 0, %v5763_v42  ;;  %5768 = vst [vmem:[#allocation2 + $0xc8] sm:$0x1] %v5767_v3  ;;  %v6020_v45 = vrot.slane %v6018_v17, 4  ;;  %v6026_v61 = vrot.slane %v6024_v59, 5  ;;  %v6031_v57 = vrot.slane %v6029_v39, 4 }
 0x3a7   : > { %5765 = vst [vmem:[#allocation2 + $0xbc] sm:$0x1] %v5764_v19  ;;  %v6003_v50 = vsel %vm14119_vm2, %v5998_v40, %v6002_v24  ;;  %v6017_v27 = vsel %vm14119_vm2, %v6012_v32, %v6016_v26  ;;  %v6042_v7 = vshrl.u32 %v16329_v16, 16  ;;  %v6048_v6 = vshll.u32 %v16333_v58, 16  ;;  %v16357_v35 = vld [vmem:[#allocation2 + $0x74] sm:$0x1] }
 0x3a8   : > { %v11396_v62 = vcombine.low %v5993_v55, %v6003_v50  ;;  %v6021_v14 = vor.u32 %v6020_v45, %v6016_v26  ;;  %v6053_v21 = vshrl.u32 %v16344_v48, 16  ;;  %v6034_v29 = vrot.slane %v6032_v15, 5  ;;  %v16365_v31 = vld [vmem:[#allocation2 + $0x7c] sm:$0xf]  ;;  %v16368_v40 = vld [vmem:[#allocation2 + $0x80] sm:$0x1] }
 0x3a9   : > { %v6040_v30 = vrot.slane %v6038_v60, 5  ;;  %v6056_v10 = vshll.u32 %v16344_v48, 16  ;;  %v6062_v24 = vshll.u32 %v16336_v28, 16  ;;  %v6044_v23 = vrot.slane %v6042_v7, 4 }
 0x3aa   : > { %12585 = vmatprep.mubr.bf16.mxu1 %v11396_v62  ;;  %v6022_v56 = vrot.slane %v6021_v14, 4  ;;  %v6050_v8 = vrot.slane %v6048_v6, 5  ;;  %v6055_v34 = vrot.slane %v6053_v21, 4  ;;  %v6035_v18 = vor.u32 %v6034_v29, %v6031_v57  ;;  %v16374_v57 = vld [vmem:[#allocation2 + $0x84] sm:$0xf] }
 0x3ab   : > { %v6058_v4 = vrot.slane %v6056_v10, 5  ;;  %v6064_v26 = vrot.slane %v6062_v24, 5  ;;  %v6066_v36 = vshrl.u32 %v16336_v28, 16  ;;  %v6045_v9 = vor.u32 %v6044_v23, %v6040_v30  ;;  %v16380_v14 = vld [vmem:[#allocation2 + $0x88] sm:$0xf] }
 0x3ac   : > { %v6027_v49 = vsel %vm14119_vm2, %v6022_v56, %v6026_v61  ;;  %v6072_v47 = vshll.u32 %v16357_v35, 16  ;;  %v6077_v54 = vshrl.u32 %v16355_v5, 16  ;;  %v6036_v59 = vrot.slane %v6035_v18, 4  ;;  %v16384_v56 = vld [vmem:[#allocation2 + $0x8c] sm:$0x1] }
 0x3ad   : > { %v11397_v17 = vcombine.low %v6017_v27, %v6027_v49  ;;  %v6059_v1 = vor.u32 %v6058_v4, %v6055_v34  ;;  %v6068_v42 = vrot.slane %v6066_v36, 4  ;;  %v6046_v39 = vrot.slane %v6045_v9, 4 }
 0x3ae   : > { %v6074_v3 = vrot.slane %v6072_v47, 5  ;;  %v6079_v19 = vrot.slane %v6077_v54, 4  ;;  %v6080_v55 = vshll.u32 %v16355_v5, 16  ;;  %v6041_v32 = vsel %vm14119_vm2, %v6036_v59, %v6040_v30  ;;  %v16394_v54 = vld [vmem:[#allocation2 + $0x94] sm:$0xf] }
 0x3af   : > { %12586 = vmatmul.mubr.bf16.gmra.mrb[12].mxu1 %v11397_v17  ;;  %v6060_v50 = vrot.slane %v6059_v1, 4  ;;  %v6069_v45 = vor.u32 %v6068_v42, %v6064_v26  ;;  %v6086_v61 = vshll.u32 %v16365_v31, 16  ;;  %v6051_v62 = vsel %vm14119_vm2, %v6046_v39, %v6050_v8 }
 0x3b0   : > { %v6082_v27 = vrot.slane %v6080_v55, 5  ;;  %v6090_v15 = vshrl.u32 %v16365_v31, 16  ;;  %v6096_v60 = vshll.u32 %v16368_v40, 16  ;;  %v11398_v7 = vcombine.low %v6041_v32, %v6051_v62 }
 0x3b1   : > { %v6065_v6 = vsel %vm14119_vm2, %v6060_v50, %v6064_v26  ;;  %v6070_v21 = vrot.slane %v6069_v45, 4  ;;  %v6088_v29 = vrot.slane %v6086_v61, 5  ;;  %v6101_v23 = vshrl.u32 %v16374_v57, 16  ;;  %v16392_v26 = vld [vmem:[#allocation2 + $0x90] sm:$0xf] }
 0x3b2   : > { %v6083_v30 = vor.u32 %v6082_v27, %v6079_v19  ;;  %v6092_v10 = vrot.slane %v6090_v15, 4  ;;  %v6098_v24 = vrot.slane %v6096_v60, 5  ;;  %12589 = vmatprep.mubr.bf16.mxu1 %v11398_v7  ;;  %v6104_v34 = vshll.u32 %v16374_v57, 16  ;;  %v16401_v61 = vld [vmem:[#allocation2 + $0x98] sm:$0x1] }
 0x3b3   : > { %v6075_v8 = vsel %vm14119_vm2, %v6070_v21, %v6074_v3  ;;  %v6110_v18 = vshll.u32 %v16380_v14, 16  ;;  %v6114_v4 = vshrl.u32 %v16380_v14, 16  ;;  %v6103_v47 = vrot.slane %v6101_v23, 4  ;;  %v16404_v27 = vld [vmem:[#allocation2 + $0x9c] sm:$0xf] }
 0x3b4   : > { %v11399_v36 = vcombine.low %v6065_v6, %v6075_v8  ;;  %v6084_v49 = vrot.slane %v6083_v30, 4  ;;  %v6093_v9 = vor.u32 %v6092_v10, %v6088_v29  ;;  %v6106_v17 = vrot.slane %v6104_v34, 5  ;;  %v16409_v21 = vld [vmem:[#allocation2 + $0xa0] sm:$0xf] }
 0x3b5   : > { %v6112_v59 = vrot.slane %v6110_v18, 5  ;;  %v6116_v1 = vrot.slane %v6114_v4, 4  ;;  %v6120_v42 = vshll.u32 %v16384_v56, 16  ;;  %v6125_v19 = vshrl.u32 %v16392_v26, 16 }
 0x3b6   : > { %v6089_v39 = vsel %vm14119_vm2, %v6084_v49, %v6088_v29  ;;  %v6094_v3 = vrot.slane %v6093_v9, 4  ;;  %v6128_v55 = vshll.u32 %v16392_v26, 16  ;;  %v6107_v32 = vor.u32 %v6106_v17, %v6103_v47  ;;  %v16417_v49 = vld [vmem:[#allocation2 + $0xa4] sm:$0x1]  ;;  %v16421_v17 = vld [vmem:[#allocation2 + $0xa8] sm:$0xf] }
 0x3b7   : > { %12590 = vmatmul.mubr.bf16.gmra.mrb[16].mxu1 %v11399_v36  ;;  %v6117_v50 = vor.u32 %v6116_v1, %v6112_v59  ;;  %v6122_v45 = vrot.slane %v6120_v42, 5  ;;  %v6134_v62 = vshll.u32 %v16394_v54, 16  ;;  %v6127_v60 = vrot.slane %v6125_v19, 4  ;;  %v16423_v19 = vld [vmem:[#allocation2 + $0xac] sm:$0xf] }
 0x3b8   : > { %v6099_v15 = vsel %vm14119_vm2, %v6094_v3, %v6098_v24  ;;  %v6130_v7 = vrot.slane %v6128_v55, 5  ;;  %v6138_v6 = vshrl.u32 %v16394_v54, 16  ;;  %v6108_v30 = vrot.slane %v6107_v32, 4 }
 0x3b9   : > { %v11400_v29 = vcombine.low %v6089_v39, %v6099_v15  ;;  %v6118_v10 = vrot.slane %v6117_v50, 4  ;;  %v6136_v23 = vrot.slane %v6134_v62, 5  ;;  %v6144_v18 = vshll.u32 %v16401_v61, 16 }
 0x3ba   : > { %v6131_v8 = vor.u32 %v6130_v7, %v6127_v60  ;;  %v6140_v34 = vrot.slane %v6138_v6, 4  ;;  %v6149_v4 = vshrl.u32 %v16404_v27, 16  ;;  %v6113_v24 = vsel %vm14119_vm2, %v6108_v30, %v6112_v59  ;;  %v16429_v60 = vld [vmem:[#allocation2 + $0xb0] sm:$0x1] }
 0x3bb   : > { %12593 = vmatprep.mubr.bf16.mxu1 %v11400_v29  ;;  %v6123_v36 = vsel %vm14119_vm2, %v6118_v10, %v6122_v45  ;;  %v6152_v9 = vshll.u32 %v16404_v27, 16  ;;  %v6158_v47 = vshll.u32 %v16409_v21, 16  ;;  %v6146_v3 = vrot.slane %v6144_v18, 5 }
 0x3bc   : > { %v11401_v1 = vcombine.low %v6113_v24, %v6123_v36  ;;  %v6132_v42 = vrot.slane %v6131_v8, 4  ;;  %v6141_v39 = vor.u32 %v6140_v34, %v6136_v23  ;;  %v6151_v55 = vrot.slane %v6149_v4, 4  ;;  %v16434_v8 = vld [vmem:[#allocation2 + $0xb4] sm:$0xf] }
 0x3bd   : > { %v6154_v32 = vrot.slane %v6152_v9, 5  ;;  %v6160_v59 = vrot.slane %v6158_v47, 5  ;;  %v6162_v50 = vshrl.u32 %v16409_v21, 16  ;;  %v6168_v15 = vshll.u32 %v16417_v49, 16 }
 0x3be   : > { %v6137_v45 = vsel %vm14119_vm2, %v6132_v42, %v6136_v23  ;;  %v6142_v62 = vrot.slane %v6141_v39, 4  ;;  %v6173_v7 = vshrl.u32 %v16421_v17, 16  ;;  %v6176_v30 = vshll.u32 %v16421_v17, 16 }
 0x3bf   : > { %12594 = vmatmul.mubr.bf16.gmra.mrb[20].mxu1 %v11401_v1  ;;  %v6155_v6 = vor.u32 %v6154_v32, %v6151_v55  ;;  %v6164_v29 = vrot.slane %v6162_v50, 4  ;;  %v6182_v10 = vshll.u32 %v16423_v19, 16  ;;  %v6170_v23 = vrot.slane %v6168_v15, 5  ;;  %v16439_v1 = vld [vmem:[#allocation2 + $0xb8] sm:$0xf] }
 0x3c0   : > { %v6147_v34 = vsel %vm14119_vm2, %v6142_v62, %v6146_v3  ;;  %v6175_v18 = vrot.slane %v6173_v7, 4  ;;  %v6186_v4 = vshrl.u32 %v16423_v19, 16  ;;  %v6178_v47 = vrot.slane %v6176_v30, 5  ;;  %v16445_v15 = vld [vmem:[#allocation2 + $0xbc] sm:$0x1] }
 0x3c1   : > { %v11402_v24 = vcombine.low %v6137_v45, %v6147_v34  ;;  %v6156_v36 = vrot.slane %v6155_v6, 4  ;;  %v6165_v9 = vor.u32 %v6164_v29, %v6160_v59  ;;  %v6184_v42 = vrot.slane %v6182_v10, 5 }
 0x3c2   : > { %v6188_v39 = vrot.slane %v6186_v4, 4  ;;  %v6192_v55 = vshll.u32 %v16429_v60, 16  ;;  %v6197_v32 = vshrl.u32 %v16434_v8, 16  ;;  %v6179_v62 = vor.u32 %v6178_v47, %v6175_v18 }
 0x3c3   : > { %12597 = vmatprep.mubr.bf16.mxu1 %v11402_v24  ;;  %v6161_v3 = vsel %vm14119_vm2, %v6156_v36, %v6160_v59  ;;  %v6166_v50 = vrot.slane %v6165_v9, 4  ;;  %v6200_v45 = vshll.u32 %v16434_v8, 16  ;;  %v6206_v30 = vshll.u32 %v16439_v1, 16 }
 0x3c4   : > { %v6189_v7 = vor.u32 %v6188_v39, %v6184_v42  ;;  %v6194_v6 = vrot.slane %v6192_v55, 5  ;;  %v6199_v29 = vrot.slane %v6197_v32, 4  ;;  %v6180_v34 = vrot.slane %v6179_v62, 4 }
 0x3c5   : > { %v6171_v10 = vsel %vm14119_vm2, %v6166_v50, %v6170_v23  ;;  %v6202_v4 = vrot.slane %v6200_v45, 5  ;;  %v6210_v24 = vshrl.u32 %v16439_v1, 16  ;;  %v6208_v36 = vrot.slane %v6206_v30, 5  ;;  %v13814_v30 = vld [vmem:[#allocation2 + $0x18] sm:$0xf] }
 0x3c6   : > { %v11403_v2 = vcombine.low %v6161_v3, %v6171_v10  ;;  %v6190_v59 = vrot.slane %v6189_v7, 4  ;;  %v6216_v18 = vshll.u32 %v16445_v15, 16  ;;  %v6185_v9 = vsel %vm14119_vm2, %v6180_v34, %v6184_v42  ;;  %v13698_v34 = vld [vmem:[#allocation3 + $0x88] sm:$0xff]   ;;  %v6824_v42 = vld [vmem:[#allocation2 + $0x6c] sm:$0xe] }
 0x3c7   : > { %v6203_v47 = vor.u32 %v6202_v4, %v6199_v29  ;;  %v6212_v39 = vrot.slane %v6210_v24, 4  ;;  %v13812_v4 = vld [vmem:[#allocation2 + $0xc] sm:$0xf]  ;;  %v16486_v24 = vld [vmem:[#allocation2 + $0x10] sm:$0xf]  ;;  %v6914_v45 = vrot.slane %v16307_v12, 5 }
 0x3c8   : > { %12598 = vmatmul.mubr.bf16.gmra.mrb[24].mxu1 %v11403_v2  ;;  %v6195_v55 = vsel %vm14119_vm2, %v6190_v59, %v6194_v6  ;;  %v6218_v32 = vrot.slane %v6216_v18, 5  ;;  %v13810_v18 = vld [vmem:[#allocation2] sm:$0xf]  ;;  %v11415_v59 = vcombine.low %v13812_v4, %v16486_v24  ;;  %v11418_v4 = vcombine.low %v16228_v41, %v16231_v51 }
 0x3c9   : > { %v11404_v23 = vcombine.low %v6185_v9, %v6195_v55  ;;  %v6204_v50 = vrot.slane %v6203_v47, 4  ;;  %v6213_v62 = vor.u32 %v6212_v39, %v6208_v36  ;;  %v16483_v9 = vld [vmem:[#allocation2 + $0x4] sm:$0xf]  ;;  %v6820_v55 = vld [vmem:[#allocation2 + $0x3c] sm:$0xe]  ;;  %v6921_v51 = vrot.slane %v16329_v16, 5 }
 0x3ca   : > { %v11414_v47 = vcombine.low %v13810_v18, %v16483_v9  ;;  %v11443_v10 = vrot.slane %v6820_v55, 9  ;;  %v16491_v18 = vld [vmem:[#allocation2 + $0x1c] sm:$0xf] }
 0x3cb   : > { %12601 = vmatprep.mubr.bf16.mxu1 %v11404_v23  ;;  %v6209_v6 = vsel %vm14119_vm2, %v6204_v50, %v6208_v36  ;;  %v6214_v29 = vrot.slane %v6213_v62, 4  ;;  %v6821_v23 = vld [vmem:[#allocation2 + $0x48] sm:$0xe]  ;;  %v6822_v50 = vld [vmem:[#allocation2 + $0x54] sm:$0xe] }
 0x3cc   : > { %v6823_v62 = vld [vmem:[#allocation2 + $0x60] sm:$0xe]  ;;  %v11444_v2 = vrot.slane %v6821_v23, 9  ;;  %v6916_v23 = vrot.slane %v6914_v45, 4 }
 0x3cd   : > { %v6219_v36 = vsel %vm14119_vm2, %v6214_v29, %v6218_v32  ;;  %v6900_v32 = vrot.slane %v16273_v63, 5  ;;  %v6903_v29 = vrot.slane %v16280_v20, 5  ;;  %v11446_v41 = vrot.slane %v6823_v62, 9 }
 0x3ce   : > { %v11405_v39 = vcombine.low %v6209_v6, %v6219_v36  ;;  %v11416_v6 = vcombine.low %v13814_v30, %v16491_v18  ;;  %v11417_v36 = vcombine.low %v16203_v53, %v16224_v52  ;;  %v11445_v30 = vrot.slane %v6822_v50, 9 }
 0x3cf   : > { %v16502_v55 = vsel %vm14449_vm5, %v11443_v10, %v6900_v32  ;;  %v6902_v20 = vrot.slane %v6900_v32, 4  ;;  %v6917_v53 = vrot.slane %v16321_v43, 5  ;;  %v13701_v10 = vld [vmem:[#allocation3 + $0x90] sm:$0xff]   ;;  %v16531_v62 = vsel %vm14449_vm5, %v11446_v41, %v6921_v51 }
 0x3d0   : > { %12602 = vmatmul.mubr.bf16.gmra.mrb[28].mxu1 %v11405_v39  ;;  %v6910_v39 = vrot.slane %v16294_v25, 5  ;;  %v6924_v25 = vrot.slane %v16333_v58, 5  ;;  %v16527_v58 = vsel %vm14449_vm5, %v11445_v30, %v6914_v45  ;;  %v6923_v32 = vrot.slane %v6921_v51, 4 }
 0x3d1   : > { %12621 = vmatprep.mubr.bf16.mxu1 %v11414_v47  ;;  %v6907_v47 = vrot.slane %v16292_v38, 5  ;;  %v16509_v52 = vsel %vm14449_vm5, %v6902_v20, %v6903_v29  ;;  %v6825_v29 = vld [vmem:[#allocation2 + $0x78] sm:$0xe]  ;;  %v6826_v20 = vld [vmem:[#allocation2 + $0x84] sm:$0xe]  ;;  %v6935_v41 = vrot.slane %v16365_v31, 5 }
 0x3d2   : > { %v16543_v30 = vsel %vm14449_vm5, %v6923_v32, %v6924_v25  ;;  %v6938_v51 = vrot.slane %v16368_v40, 5  ;;  %v11449_v50 = vrot.slane %v6826_v20, 9  ;;  %v6942_v25 = vrot.slane %v16380_v14, 5  ;;  %v13707_v20 = vld [vmem:[#allocation3 + $0xa0] sm:$0xff]  }
 0x3d3   : > { %v6909_v7 = vrot.slane %v6907_v47, 4  ;;  %v16517_v43 = vsel %vm14449_vm5, %v11444_v2, %v6907_v47  ;;  %v13704_v2 = vld [vmem:[#allocation3 + $0x98] sm:$0xff]   ;;  %v6928_v47 = vrot.slane %v16336_v28, 5  ;;  %v6937_v45 = vrot.slane %v6935_v41, 4 }
 0x3d4   : > { %v6945_v32 = vrot.slane %v16384_v56, 5 }
 0x3d5   : > { %v16569_v56 = vsel %vm14449_vm5, %v6937_v45, %v6938_v51  ;;  %v6956_v51 = vrot.slane %v16409_v21, 5 }
 0x3d8   : > { %12622 = vmatmul.mubr.bf16.vlgmr.msra.gmra.mrb[0].mxu1 %v11415_v59 }
 0x3d9   : > { %12625 = vmatprep.mubr.bf16.mxu1 %v11416_v6  ;;  %12654 = vmatpush3.bf16.msra.mxu1 %v16284_v37  ;;  %v16521_v37 = vsel %vm14449_vm5, %v6909_v7, %v6910_v39  ;;  %v16535_v6 = vsel %vm14449_vm5, %v6916_v23, %v6917_v53  ;;  %v11447_v7 = vrot.slane %v6824_v42, 9  ;;  %v6931_v39 = vrot.slane %v16357_v35, 5  ;;  %v6827_v53 = vld [vmem:[#allocation2 + $0x90] sm:$0xe] }
 0x3da   : > { %12655 = vmatprep.subr.bf16.mxu1 %v13698_v34  ;;  %v11448_v23 = vrot.slane %v6825_v29, 9  ;;  %v6958_v29 = vrot.slane %v6956_v51, 4 }
 0x3db   : > { %v16551_v35 = vsel %vm14449_vm5, %v11447_v7, %v6928_v47  ;;  %v6949_v7 = vrot.slane %v16394_v54, 5 }
 0x3dc   : > { %v16561_v42 = vsel %vm14449_vm5, %v11448_v23, %v6935_v41  ;;  %v6829_v23 = vld [vmem:[#allocation2 + $0xa8] sm:$0xe]  ;;  %v6970_v41 = vrot.slane %v16439_v1, 5 }
 0x3dd   : > { %12656 = vmatpush3.bf16.msra.mxu1 %v13698_v34  ;;  %v6930_v34 = vrot.slane %v6928_v47, 4  ;;  %v6952_v47 = vrot.slane %v16401_v61, 5  ;;  %v6951_v61 = vrot.slane %v6949_v7, 4  ;;  %v11452_v59 = vrot.slane %v6829_v23, 9 }
 0x3de   : > { %12657 = vmatprep.subr.bf16.mxu1 %v13701_v10 }
 0x3df   : > { %v16557_v40 = vsel %vm14449_vm5, %v6930_v34, %v6931_v39  ;;  %v11450_v39 = vrot.slane %v6827_v53, 9  ;;  %v16575_v34 = vsel %vm14449_vm5, %v11449_v50, %v6942_v25  ;;  %v6959_v53 = vrot.slane %v16417_v49, 5  ;;  %v13710_v49 = vld [vmem:[#allocation3 + $0xa8] sm:$0xff]  }
 0x3e0   : > { %12626 = vmatmul.mubr.bf16.gmra.mrb[4].mxu1 %v11417_v36  ;;  %v6944_v36 = vrot.slane %v6942_v25, 4  ;;  %v16591_v50 = vsel %vm14449_vm5, %v6951_v61, %v6952_v47  ;;  %v6963_v25 = vrot.slane %v16423_v19, 5  ;;  %v6973_v47 = vrot.slane %v16445_v15, 5 }
 0x3e1   : > { %12629 = vmatprep.mubr.bf16.mxu1 %v11418_v4  ;;  %12658 = vmatpush3.bf16.msra.mxu1 %v13701_v10  ;;  %v6828_v4 = vld [vmem:[#allocation2 + $0x9c] sm:$0xe]  ;;  %v16583_v45 = vsel %vm14449_vm5, %v11450_v39, %v6949_v7 }
 0x3e2   : > { %12659 = vmatprep.subr.bf16.mxu1 %v13704_v2  ;;  %v16579_v10 = vsel %vm14449_vm5, %v6944_v36, %v6945_v32  ;;  %v6966_v32 = vrot.slane %v16429_v60, 5  ;;  %v6830_v36 = vld [vmem:[#allocation2 + $0xb4] sm:$0xe]  ;;  %v11451_v39 = vrot.slane %v6828_v4, 9  ;;  %v6965_v3 = vrot.slane %v6963_v25, 4 }
 0x3e3   : > { %v16605_v60 = vsel %vm14449_vm5, %v6958_v29, %v6959_v53  ;;  %v17966_v4 = vcombine.low %v16248_v22, %v16273_v63  ;;  %v16614_v7 = vsel %vm14449_vm5, %v11452_v59, %v6963_v25  ;;  %v17967_v29 = vcombine.low %v16282_v33, %v16292_v38  ;;  %v13713_v63 = vld [vmem:[#allocation3 + $0xb0] sm:$0xff]   ;;  %v13716_v33 = vld [vmem:[#allocation3 + $0xb8] sm:$0xff]  }
 0x3e4   : > { %v16601_v61 = vsel %vm14449_vm5, %v11451_v39, %v6956_v51  ;;  %v16618_v15 = vsel %vm14449_vm5, %v6965_v3, %v6966_v32  ;;  %v6972_v51 = vrot.slane %v6970_v41, 4  ;;  %v17968_v38 = vcombine.low %v16297_v13, %v16307_v12  ;;  %v7721_v3 = vld [vmem:[#allocation2 + $0xa4] sm:$0x1] }
 0x3e5   : > { %12660 = vmatpush3.bf16.msra.mxu1 %v13704_v2  ;;  %v11453_v2 = vrot.slane %v6830_v36, 9  ;;  %v17970_v25 = vcombine.low %v16344_v48, %v16336_v28  ;;  %v17971_v32 = vcombine.low %v16355_v5, %v16365_v31  ;;  %v17972_v13 = vcombine.low %v16374_v57, %v16380_v14  ;;  %v13816_v36 = vld [vmem:[#allocation2 + $0x8] sm:$0x1] }
 0x3e6   : > { %12661 = vmatprep.subr.bf16.mxu1 %v13707_v20  ;;  %v16631_v59 = vsel %vm14449_vm5, %v6972_v51, %v6973_v47  ;;  %v17973_v12 = vcombine.low %v16392_v26, %v16394_v54  ;;  %v6868_v39 = vrot.slane %v13816_v36, 5  ;;  %v17974_v48 = vcombine.low %v16404_v27, %v16409_v21  ;;  %v6816_v21 = vld [vmem:[#allocation2 + $0xc] sm:$0xe]  ;;  %v6818_v36 = vld [vmem:[#allocation2 + $0x24] sm:$0xe] }
 0x3e7   : > { %v16627_v53 = vsel %vm14449_vm5, %v11453_v2, %v6970_v41  ;;  %v13717_v41 = vld [vmem:[#allocation3 + $0xc0] sm:$0xff]   ;;  %v17975_v5 = vcombine.low %v16421_v17, %v16423_v19  ;;  %v6872_v26 = vrot.slane %v16486_v24, 5  ;;  %v6879_v54 = vrot.slane %v16491_v18, 5  ;;  %v13818_v17 = vld [vmem:[#allocation2 + $0x20] sm:$0x1] }
 0x3e8   : > { %12630 = vmatmul.mubr.bf16.gmra.mrb[8].mxu1 %v17966_v4  ;;  %v17976_v27 = vcombine.low %v16434_v8, %v16439_v1  ;;  %v6882_v19 = vrot.slane %v13818_v17, 5  ;;  %v6817_v4 = vld [vmem:[#allocation2 + $0x18] sm:$0xe]  ;;  %v13819_v8 = vld [vmem:[#allocation2 + $0x28] sm:$0xf] }
 0x3e9   : > { %12633 = vmatprep.mubr.bf16.mxu1 %v17967_v29  ;;  %12662 = vmatpush3.bf16.msra.mxu1 %v13707_v20  ;;  %v17969_v20 = vcombine.low %v16319_v11, %v16329_v16  ;;  %v6865_v11 = vrot.slane %v16483_v9, 5  ;;  %v6815_v16 = vld [vmem:[#allocation2] sm:$0xe]  ;;  %v13817_v9 = vld [vmem:[#allocation2 + $0x14] sm:$0x1]  ;;  %v6874_v2 = vrot.slane %v6872_v26, 4 }
 0x3ea   : > { %12663 = vmatprep.subr.bf16.mxu1 %v13710_v49  ;;  %v6875_v47 = vrot.slane %v13817_v9, 5  ;;  %v6881_v51 = vrot.slane %v6879_v54, 4  ;;  %v11439_v29 = vrot.slane %v6816_v21, 9  ;;  %v11440_v24 = vrot.slane %v6817_v4, 9  ;;  %v13721_v17 = vld [vmem:[#allocation3 + $0xe0] sm:$0xff]  }
 0x3eb   : > { %v6867_v28 = vrot.slane %v6865_v11, 4  ;;  %v6886_v1 = vrot.slane %v13819_v8, 5  ;;  %v17978_v4 = vcombine.low %v16517_v43, %v16521_v37  ;;  %v8440_v37 = vld [vmem:[#allocation2 + $0x30] sm:$0xe]  ;;  %v16702_v8 = vld [vmem:[#allocation2 + $0x44] sm:$0x1] }
 0x3ec   : > { %v6883_v18 = vsel %vm14449_vm5, %v6881_v51, %v6882_v19  ;;  %v13722_v19 = vld [vmem:[#allocation3 + $0xe8] sm:$0xff]   ;;  %v13723_v51 = vld [vmem:[#allocation3 + $0xf0] sm:$0xff]  }
 0x3ed   : > { %12664 = vmatpush3.bf16.msra.mxu1 %v13710_v49  ;;  %v11438_v49 = vrot.slane %v6815_v16, 9  ;;  %v6869_v57 = vsel %vm14449_vm5, %v6867_v28, %v6868_v39  ;;  %v13822_v39 = vld [vmem:[#allocation2 + $0x38] sm:$0x1]  ;;  %v6888_v28 = vrot.slane %v6886_v1, 4 }
 0x3ee   : > { %12665 = vmatprep.subr.bf16.mxu1 %v13713_v63 }
 0x3ef   : > { %v6866_v31 = vsel %vm14449_vm5, %v11438_v49, %v6865_v11  ;;  %v13821_v11 = vld [vmem:[#allocation2 + $0x2c] sm:$0x1]  ;;  %v6896_v49 = vrot.slane %v13822_v39, 5 }
 0x3f0   : > { %12634 = vmatmul.mubr.bf16.gmra.mrb[12].mxu1 %v17968_v38  ;;  %v11454_v14 = vcombine.low %v6866_v31, %v6869_v57  ;;  %v6889_v16 = vrot.slane %v13821_v11, 5  ;;  %v13719_v31 = vld [vmem:[#allocation3 + $0xd0] sm:$0xff]   ;;  %v11441_v57 = vrot.slane %v6818_v36, 9  ;;  %v17980_v11 = vcombine.low %v16531_v62, %v16543_v30 }
 0x3f1   : > { %12637 = vmatprep.mubr.bf16.mxu1 %v17969_v20  ;;  %12666 = vmatpush3.bf16.msra.mxu1 %v13713_v63  ;;  %v6876_v63 = vsel %vm14449_vm5, %v6874_v2, %v6875_v47  ;;  %v6880_v20 = vsel %vm14449_vm5, %v11440_v24, %v6879_v54  ;;  %v17977_v2 = vcombine.low %v16502_v55, %v16509_v52  ;;  %v16695_v24 = vld [vmem:[#allocation2 + $0x34] sm:$0xf]  ;;  %v16699_v52 = vld [vmem:[#allocation2 + $0x40] sm:$0xf]  ;;  %v11529_v36 = vrot.slane %v8440_v37, 9 }
 0x3f2   : > { %12667 = vmatprep.subr.bf16.mxu1 %v13716_v33  ;;  %v6887_v9 = vsel %vm14449_vm5, %v11441_v57, %v6886_v1  ;;  %v13724_v55 = vld [vmem:[#allocation3 + $0xf8] sm:$0xff]   ;;  %v8524_v39 = vrot.slane %v16695_v24, 5  ;;  %v16820_v57 = vld [vmem:[#allocation2 + $0xa0] sm:$0xf] }
 0x3f5   : > { %12668 = vmatpush3.bf16.msra.mxu1 %v13716_v33  ;;  %v6873_v33 = vsel %vm14449_vm5, %v11439_v29, %v6872_v26  ;;  %v16691_v29 = vld [vmem:[#allocation2 + $0x28] sm:$0xf] }
 0x3f6   : > { %12701 = vmatprep.subr.bf16.mxu1 %v13717_v41  ;;  %v11455_v38 = vcombine.low %v6873_v33, %v6876_v63  ;;  %v16693_v63 = vld [vmem:[#allocation2 + $0x2c] sm:$0x1]  ;;  %v8439_v33 = vld [vmem:[#allocation2 + $0x24] sm:$0xe]  ;;  %v8517_v43 = vrot.slane %v16691_v29, 5 }
 0x3f7   : > { %v8520_v1 = vrot.slane %v16693_v63, 5 }
 0x3f8   : > { %12638 = vmatmul.mubr.bf16.gmra.mrb[16].mxu1 %v17970_v25  ;;  %v13718_v25 = vld [vmem:[#allocation3 + $0xc8] sm:$0xff]  }
 0x3f9   : > { %12641 = vmatprep.mubr.bf16.mxu1 %v17971_v32  ;;  %v13820_v32 = vld [vmem:[#allocation2 + $0x34] sm:$0xf] }
 0x400   : > { %12642 = vmatmul.mubr.bf16.gmra.mrb[20].mxu1 %v17972_v13  ;;  %v6893_v13 = vrot.slane %v13820_v32, 5  ;;  %v16710_v32 = vld [vmem:[#allocation2 + $0x50] sm:$0x1] }
 0x401   : > { %12645 = vmatprep.mubr.bf16.mxu1 %v17973_v12  ;;  %v11456_v12 = vcombine.low %v6880_v20, %v6883_v18  ;;  %v16697_v18 = vld [vmem:[#allocation2 + $0x38] sm:$0x1]  ;;  %v17979_v20 = vcombine.low %v16527_v58, %v16535_v6 }
 0x402   : > { %v16718_v58 = vld [vmem:[#allocation3 + $0x100] sm:$0xff]   ;;  %v8527_v62 = vrot.slane %v16697_v18, 5 }
 0x408   : > { %12646 = vmatmul.mubr.bf16.gmra.mrb[24].mxu1 %v17974_v48  ;;  %v6819_v48 = vld [vmem:[#allocation2 + $0x30] sm:$0xe] }
 0x409   : > { %12649 = vmatprep.mubr.bf16.mxu1 %v17975_v5  ;;  %v6895_v5 = vrot.slane %v6893_v13, 4  ;;  %v11442_v26 = vrot.slane %v6819_v48, 9  ;;  %v8443_v48 = vld [vmem:[#allocation2 + $0x54] sm:$0xe] }
 0x40b   : > { %v6897_v54 = vsel %vm14449_vm5, %v6895_v5, %v6896_v49  ;;  %v8442_v49 = vld [vmem:[#allocation2 + $0x48] sm:$0xe]  ;;  %v16729_v5 = vld [vmem:[#allocation2 + $0x5c] sm:$0x1] }
 0x410   : > { %12650 = vmatmul.mubr.bf16.gmra.mrb[28].mxu1 %v17976_v27  ;;  %v13720_v27 = vld [vmem:[#allocation3 + $0xd8] sm:$0xff]  }
 0x411   : > { %12669 = vmatprep.mubr.bf16.mxu1 %v11454_v14  ;;  %v6890_v14 = vsel %vm14449_vm5, %v6888_v28, %v6889_v16  ;;  %v16715_v16 = vld [vmem:[#allocation2 + $0x58] sm:$0xf] }
 0x412   : > { %v11457_v47 = vcombine.low %v6887_v9, %v6890_v14  ;;  %v16737_v14 = vsel %vm14449_vm5, %v11529_v36, %v8524_v39  ;;  %v8534_v9 = vrot.slane %v16702_v8, 5  ;;  %v8445_v36 = vld [vmem:[#allocation2 + $0x6c] sm:$0xe] }
 0x413   : > { %17982 = vst [vmem:[#allocation25_spill] sm:$0xff] %v16737_v14 }
 0x418   : > { %12670 = vmatmul.mubr.bf16.vlgmr.msra.gmra.mrb[0].mxu1 %v11455_v38  ;;  %v8441_v38 = vld [vmem:[#allocation2 + $0x3c] sm:$0xe] }
 0x419   : > { %12673 = vmatprep.mubr.bf16.mxu1 %v11456_v12  ;;  %12702 = vmatpush3.bf16.msra.mxu1 %v13717_v41  ;;  %v6894_v41 = vsel %vm14449_vm5, %v11442_v26, %v6893_v13  ;;  %v11528_v13 = vrot.slane %v8439_v33, 9  ;;  %v8519_v12 = vrot.slane %v8517_v43, 4  ;;  %v11530_v30 = vrot.slane %v8441_v38, 9  ;;  %v16754_v33 = vld [vmem:[#allocation2 + $0x70] sm:$0xf] }
 0x41a   : > { %12703 = vmatprep.subr.bf16.mxu1 %v13718_v25  ;;  %v11458_v21 = vcombine.low %v6894_v41, %v6897_v54  ;;  %v8526_v26 = vrot.slane %v8524_v39, 4  ;;  %v8531_v54 = vrot.slane %v16699_v52, 5  ;;  %v8545_v38 = vrot.slane %v16715_v16, 5 }
 0x41b   : > { %v16722_v6 = vsel %vm14449_vm5, %v11528_v13, %v8517_v43  ;;  %v16726_v28 = vsel %vm14449_vm5, %v8519_v12, %v8520_v1  ;;  %v16756_v43 = vld [vmem:[#allocation2 + $0x74] sm:$0x1]  ;;  %v8548_v13 = vrot.slane %v16729_v5, 5  ;;  %v17987_v39 = vcombine.low %v16551_v35, %v16557_v40  ;;  %v16789_v35 = vld [vmem:[#allocation2 + $0x80] sm:$0x1] }
 0x41c   : > { %17981 = vst [vmem:[#allocation24_spill] sm:$0xff] %v16726_v28  ;;  %v16791_v40 = vld [vmem:[#allocation2 + $0x88] sm:$0xf]  ;;  %v10084_v28 = vld [vmem:[#allocation2 + $0x78] sm:$0xe] }
 0x41d   : > { %12704 = vmatpush3.bf16.msra.mxu1 %v13718_v25  ;;  %v16708_v25 = vld [vmem:[#allocation2 + $0x4c] sm:$0xf] }
 0x41e   : > { %12705 = vmatprep.subr.bf16.mxu1 %v13719_v31  ;;  %v8538_v41 = vrot.slane %v16708_v25, 5 }
 0x420   : > { %12674 = vmatmul.mubr.bf16.gmra.mrb[4].mxu1 %v11457_v47  ;;  %v11531_v47 = vrot.slane %v8442_v49, 9  ;;  %v8540_v1 = vrot.slane %v8538_v41, 4  ;;  %v16774_v49 = vld [vmem:[#allocation2 + $0x7c] sm:$0xf] }
 0x421   : > { %12677 = vmatprep.mubr.bf16.mxu1 %v11458_v21  ;;  %12706 = vmatpush3.bf16.msra.mxu1 %v13719_v31  ;;  %v16731_v31 = vld [vmem:[#allocation2 + $0x64] sm:$0xf]  ;;  %v8444_v21 = vld [vmem:[#allocation2 + $0x60] sm:$0xe] }
 0x422   : > { %12707 = vmatprep.subr.bf16.mxu1 %v13720_v27  ;;  %v16762_v37 = vsel %vm14449_vm5, %v11531_v47, %v8538_v41  ;;  %v11533_v12 = vrot.slane %v8444_v21, 9  ;;  %v8447_v47 = vld [vmem:[#allocation2 + $0x84] sm:$0xe] }
 0x423   : > { %17985 = vst [vmem:[#allocation13_spill] sm:$0xff] %v16762_v37  ;;  %v11536_v22 = vrot.slane %v8447_v47, 9  ;;  %v7724_v47 = vld [vmem:[#allocation2 + $0xb0] sm:$0x1] }
 0x425   : > { %12708 = vmatpush3.bf16.msra.mxu1 %v13720_v27  ;;  %v8541_v27 = vrot.slane %v16710_v32, 5 }
 0x426   : > { %12709 = vmatprep.subr.bf16.mxu1 %v13721_v17 }
 0x428   : > { %12678 = vmatmul.mubr.bf16.gmra.mrb[8].mxu1 %v17977_v2  ;;  %v16751_v2 = vsel %vm14449_vm5, %v11530_v30, %v8531_v54  ;;  %v16780_v30 = vsel %vm14449_vm5, %v8540_v1, %v8541_v27  ;;  %v8562_v1 = vrot.slane %v16756_v43, 5 }
 0x429   : > { %12681 = vmatprep.mubr.bf16.mxu1 %v17978_v4  ;;  %12710 = vmatpush3.bf16.msra.mxu1 %v13721_v17  ;;  %v16743_v17 = vld [vmem:[#allocation2 + $0x68] sm:$0x1]  ;;  %17984 = vst [vmem:[#allocation15_spill] sm:$0xff] %v16751_v2  ;;  %v8533_v4 = vrot.slane %v8531_v54, 4  ;;  %17988 = vst [vmem:[#allocation16_spill] sm:$0xff] %v16780_v30 }
 0x42a   : > { %12711 = vmatprep.subr.bf16.mxu1 %v13722_v19  ;;  %v8446_v54 = vld [vmem:[#allocation2 + $0x78] sm:$0xe]  ;;  %v8555_v21 = vrot.slane %v16743_v17, 5  ;;  %v10081_v2 = vld [vmem:[#allocation2 + $0x54] sm:$0xe] }
 0x42d   : > { %12712 = vmatpush3.bf16.msra.mxu1 %v13722_v19  ;;  %v16747_v19 = vsel %vm14449_vm5, %v8526_v26, %v8527_v62  ;;  %v8547_v26 = vrot.slane %v8545_v38, 4  ;;  %v8448_v62 = vld [vmem:[#allocation2 + $0x90] sm:$0xe] }
 0x42e   : > { %12713 = vmatprep.subr.bf16.mxu1 %v13723_v51  ;;  %17983 = vst [vmem:[#allocation12_spill] sm:$0xff] %v16747_v19 }
 0x430   : > { %12682 = vmatmul.mubr.bf16.gmra.mrb[12].mxu1 %v17979_v20  ;;  %v16767_v20 = vsel %vm14449_vm5, %v8533_v4, %v8534_v9  ;;  %v17990_v9 = vcombine.low %v16561_v42, %v16569_v56  ;;  %v16800_v4 = vld [vmem:[#allocation2 + $0x8c] sm:$0x1]  ;;  %v16804_v42 = vsel %vm14449_vm5, %v8547_v26, %v8548_v13  ;;  %v11534_v56 = vrot.slane %v8445_v36, 9 }
 0x431   : > { %12685 = vmatprep.mubr.bf16.mxu1 %v17980_v11  ;;  %12714 = vmatpush3.bf16.msra.mxu1 %v13723_v51  ;;  %v11532_v51 = vrot.slane %v8443_v48, 9  ;;  %17986 = vst [vmem:[#allocation14_spill] sm:$0xff] %v16767_v20  ;;  %v8552_v11 = vrot.slane %v16731_v31, 5  ;;  %17992 = vst [vmem:[#allocation9_spill] sm:$0xff] %v16804_v42  ;;  %v8569_v26 = vrot.slane %v16789_v35, 5  ;;  %v8576_v23 = vrot.slane %v16800_v4, 5 }
 0x432   : > { %12715 = vmatprep.subr.bf16.mxu1 %v13724_v55  ;;  %v8449_v42 = vld [vmem:[#allocation2 + $0x9c] sm:$0xe]  ;;  %v10080_v20 = vld [vmem:[#allocation2 + $0x48] sm:$0xe] }
 0x433   : > { %v16784_v48 = vsel %vm14449_vm5, %v11532_v51, %v8545_v38  ;;  %v16797_v41 = vsel %vm14449_vm5, %v11533_v12, %v8552_v11  ;;  %v8554_v27 = vrot.slane %v8552_v11, 4  ;;  %v8559_v51 = vrot.slane %v16754_v33, 5  ;;  %v16808_v38 = vld [vmem:[#allocation2 + $0x94] sm:$0xf] }
 0x434   : > { %17989 = vst [vmem:[#allocation17_spill] sm:$0xff] %v16784_v48  ;;  %17991 = vst [vmem:[#allocation11_spill] sm:$0xff] %v16797_v41  ;;  %v7723_v41 = vld [vmem:[#allocation2 + $0xac] sm:$0xf] }
 0x435   : > { %12716 = vmatpush3.bf16.msra.mxu1 %v13724_v55  ;;  %v16814_v11 = vsel %vm14449_vm5, %v8554_v27, %v8555_v21  ;;  %v8561_v36 = vrot.slane %v8559_v51, 4  ;;  %v7718_v55 = vld [vmem:[#allocation2 + $0x98] sm:$0x1]  ;;  %v16824_v12 = vsel %vm14449_vm5, %v11534_v56, %v8559_v51  ;;  %v8573_v21 = vrot.slane %v16791_v40, 5 }
 0x436   : > { %12749 = vmatprep.subr.bf16.mxu1 %v16718_v58  ;;  %17993 = vst [vmem:[#allocation18_spill] sm:$0xff] %v16814_v11  ;;  %17994 = vst [vmem:[#allocation19_spill] sm:$0xff] %v16824_v12  ;;  %v8580_v11 = vrot.slane %v16808_v38, 5  ;;  %v8450_v12 = vld [vmem:[#allocation2 + $0xa8] sm:$0xe] }
 0x437   : > { %v16833_v13 = vsel %vm14449_vm5, %v8561_v36, %v8562_v1  ;;  %v17998_v1 = vcombine.low %v16575_v34, %v16579_v10  ;;  %v16850_v48 = vsel %vm14449_vm5, %v11536_v22, %v8573_v21  ;;  %v8590_v22 = vrot.slane %v7721_v3, 5  ;;  %v8451_v36 = vld [vmem:[#allocation2 + $0xb4] sm:$0xe] }
 0x438   : > { %12686 = vmatmul.mubr.bf16.gmra.mrb[16].mxu1 %v17987_v39  ;;  %v11535_v39 = vrot.slane %v8446_v54, 9  ;;  %17996 = vst [vmem:[#allocation21_spill] sm:$0xff] %v16833_v13  ;;  %17999 = vst [vmem:[#allocation23_spill] sm:$0xff] %v16850_v48  ;;  %v8582_v56 = vrot.slane %v8580_v11, 4  ;;  %v8583_v13 = vrot.slane %v7718_v55, 5 }
 0x439   : > { %12689 = vmatprep.mubr.bf16.mxu1 %v17990_v9  ;;  %v8566_v9 = vrot.slane %v16774_v49, 5 }
 0x43b   : > { %v16828_v54 = vsel %vm14449_vm5, %v11535_v39, %v8566_v9  ;;  %v8568_v27 = vrot.slane %v8566_v9, 4  ;;  %v8575_v39 = vrot.slane %v8573_v21, 4  ;;  %v11537_v9 = vrot.slane %v8448_v62, 9  ;;  %v7726_v62 = vld [vmem:[#allocation2 + $0xb8] sm:$0xf] }
 0x43c   : > { %17995 = vst [vmem:[#allocation20_spill] sm:$0xff] %v16828_v54  ;;  %v7727_v21 = vld [vmem:[#allocation2 + $0xbc] sm:$0x1]  ;;  %v8601_v55 = vrot.slane %v7726_v62, 5 }
 0x43d   : > { %v16841_v51 = vsel %vm14449_vm5, %v8568_v27, %v8569_v26  ;;  %v18000_v26 = vcombine.low %v16583_v45, %v16591_v50  ;;  %v16857_v34 = vsel %vm14449_vm5, %v8575_v39, %v8576_v23  ;;  %v16861_v10 = vsel %vm14449_vm5, %v11537_v9, %v8580_v11 }
 0x43e   : > { %17997 = vst [vmem:[#allocation22_spill] sm:$0xff] %v16841_v51  ;;  %18001 = vst [vmem:[#allocation26_spill] sm:$0xff] %v16857_v34  ;;  %v8587_v27 = vrot.slane %v16820_v57, 5  ;;  %v16868_v45 = vsel %vm14449_vm5, %v8582_v56, %v8583_v13  ;;  %v11538_v50 = vrot.slane %v8449_v42, 9  ;;  %v11539_v11 = vrot.slane %v8450_v12, 9 }
 0x43f   : > { %18002 = vst [vmem:[#allocation27_spill] sm:$0xff] %v16861_v10  ;;  %18003 = vst [vmem:[#allocation28_spill] sm:$0xff] %v16868_v45  ;;  %v8597_v9 = vrot.slane %v7724_v47, 5  ;;  %v7730_v51 = vld [vmem:[#allocation2 + $0xc8] sm:$0x1]  ;;  %v8604_v42 = vrot.slane %v7727_v21, 5 }
 0x440   : > { %12690 = vmatmul.mubr.bf16.gmra.mrb[20].mxu1 %v17998_v1  ;;  %v7729_v1 = vld [vmem:[#allocation2 + $0xc4] sm:$0xf]  ;;  %v8589_v39 = vrot.slane %v8587_v27, 4  ;;  %v16874_v3 = vsel %vm14449_vm5, %v11538_v50, %v8587_v27  ;;  %v8452_v34 = vld [vmem:[#allocation2 + $0xc0] sm:$0xe]  ;;  %v11540_v27 = vrot.slane %v8451_v36, 9  ;;  %v18011_v36 = vcombine.low %v16614_v7, %v16618_v15 }
 0x441   : > { %12693 = vmatprep.mubr.bf16.mxu1 %v18000_v26  ;;  %v8594_v26 = vrot.slane %v7723_v41, 5  ;;  %18004 = vst [vmem:[#allocation29_spill] sm:$0xff] %v16874_v3  ;;  %v8608_v12 = vrot.slane %v7729_v1, 5  ;;  %v8603_v62 = vrot.slane %v8601_v55, 4  ;;  %v8611_v23 = vrot.slane %v7730_v51, 5  ;;  %v13725_v1 = vld [vmem:[#allocation2 + $0xc] sm:$0xff]  }
 0x442   : > { %v16878_v13 = vsel %vm14449_vm5, %v8589_v39, %v8590_v22  ;;  %v11541_v22 = vrot.slane %v8452_v34, 9  ;;  %v16897_v21 = vsel %vm14449_vm5, %v11540_v27, %v8601_v55  ;;  %v18014_v55 = vcombine.low %v16627_v53, %v16631_v59  ;;  %v13726_v7 = vld [vmem:[#allocation2 + $0x18] sm:$0xff]   ;;  %v13730_v15 = vld [vmem:[#allocation3 + $0x108] sm:$0xff]   ;;  %v13729_v27 = vld [vmem:[#allocation2 + $0x30] sm:$0xff]  }
 0x443   : > { %v8596_v54 = vrot.slane %v8594_v26, 4  ;;  %18005 = vst [vmem:[#allocation30_spill] sm:$0xff] %v16878_v13  ;;  %v16882_v41 = vsel %vm14449_vm5, %v11539_v11, %v8594_v26  ;;  %v8610_v39 = vrot.slane %v8608_v12, 4  ;;  %v18008_v26 = vcombine.low %v16601_v61, %v16605_v60  ;;  %18009 = vst [vmem:[#allocation33_spill] sm:$0xff] %v16897_v21  ;;  %v13728_v11 = vld [vmem:[#allocation2 + $0x24] sm:$0xff]   ;;  %v13731_v53 = vld [vmem:[#allocation2 + $0x3c] sm:$0xff]  }
 0x444   : > { %18006 = vst [vmem:[#allocation31_spill] sm:$0xff] %v16882_v41  ;;  %v16910_v51 = vsel %vm14449_vm5, %v11541_v22, %v8608_v12  ;;  %v16922_v22 = vld [vmem:[#allocation2 + $0x10] sm:$0xf]  ;;  %v7686_v59 = vld [vmem:[#allocation2 + $0x18] sm:$0xf]  ;;  %v13735_v41 = vld [vmem:[#allocation2 + $0x60] sm:$0xff]  }
 0x445   : > { %v16888_v47 = vsel %vm14449_vm5, %v8596_v54, %v8597_v9  ;;  %v16901_v54 = vsel %vm14449_vm5, %v8603_v62, %v8604_v42  ;;  %18012 = vst [vmem:[#allocation35_spill] sm:$0xff] %v16910_v51  ;;  %v16914_v61 = vsel %vm14449_vm5, %v8610_v39, %v8611_v23  ;;  %v7683_v9 = vld [vmem:[#allocation2 + $0xc] sm:$0xf]  ;;  %v13736_v62 = vld [vmem:[#allocation3 + $0x118] sm:$0xff]   ;;  %v7689_v51 = vld [vmem:[#allocation2 + $0x24] sm:$0xf] }
 0x446   : > { %18007 = vst [vmem:[#allocation32_spill] sm:$0xff] %v16888_v47  ;;  %18010 = vst [vmem:[#allocation34_spill] sm:$0xff] %v16901_v54  ;;  %v13733_v23 = vld [vmem:[#allocation3 + $0x110] sm:$0xff]   ;;  %v7732_v42 = vshrl.u32 %v7683_v9, 16  ;;  %v7735_v12 = vshll.u32 %v7683_v9, 16  ;;  %v7780_v21 = vshrl.u32 %v7689_v51, 16 }
 0x447   : > { %18013 = vst [vmem:[#allocation36_spill] sm:$0xff] %v16914_v61  ;;  %v16926_v9 = vld [vmem:[#allocation2 + $0x14] sm:$0x1] }
 0x448   : > { %12694 = vmatmul.mubr.bf16.gmra.mrb[24].mxu1 %v18008_v26  ;;  %v7734_v39 = vrot.slane %v7732_v42, 4  ;;  %v7737_v26 = vrot.slane %v7735_v12, 5  ;;  %v13732_v12 = vld [vmem:[#allocation2 + $0x48] sm:$0xff]   ;;  %v13734_v61 = vld [vmem:[#allocation2 + $0x54] sm:$0xff]  }
 0x449   : > { %12697 = vmatprep.mubr.bf16.mxu1 %v18011_v36  ;;  %v7745_v36 = vshrl.u32 %v16922_v22, 16 }
 0x44b   : > { %v7747_v34 = vrot.slane %v7745_v36, 4  ;;  %v13745_v36 = vld [vmem:[#allocation3 + $0x130] sm:$0xff]  }
 0x450   : > { %12698 = vmatmul.mubr.bf16.gmra.mrb[28].mxu1 %v18014_v55  ;;  %v7687_v55 = vld [vmem:[#allocation2 + $0x1c] sm:$0xf] }
 0x451   : > { %12717 = vmatprep.mubr.bf16.mxu1 %v13725_v1  ;;  %v13739_v1 = vld [vmem:[#allocation3 + $0x120] sm:$0xff]   ;;  %v7769_v42 = vshrl.u32 %v7687_v55, 16 }
 0x458   : > { %12718 = vmatmul.mubr.bf16.vlgmr.msra.gmra.mrb[0].mxu1 %v13726_v7  ;;  %v7756_v7 = vshrl.u32 %v7686_v59, 16 }
 0x459   : > { %12721 = vmatprep.mubr.bf16.mxu1 %v13728_v11  ;;  %12750 = vmatpush3.bf16.msra.mxu1 %v16718_v58  ;;  %v7741_v58 = vshll.u32 %v16922_v22, 16  ;;  %v7738_v11 = vor.u32 %v7737_v26, %v7734_v39  ;;  %v7771_v26 = vrot.slane %v7769_v42, 4  ;;  %v7698_v42 = vld [vmem:[#allocation2 + $0x48] sm:$0xf] }
 0x45a   : > { %12751 = vmatprep.subr.bf16.mxu1 %v13730_v15  ;;  %v7758_v50 = vrot.slane %v7756_v7, 4  ;;  %v7783_v7 = vshll.u32 %v7689_v51, 16  ;;  %v7782_v51 = vrot.slane %v7780_v21, 4 }
 0x45b   : > { %v7743_v60 = vrot.slane %v7741_v58, 5  ;;  %v7739_v54 = vrot.slane %v7738_v11, 4 }
 0x45c   : > { %v7785_v13 = vrot.slane %v7783_v7, 5  ;;  %v7855_v7 = vshll.u32 %v7698_v42, 16 }
 0x45d   : > { %12752 = vmatpush3.bf16.msra.mxu1 %v13730_v15  ;;  %v7759_v15 = vshll.u32 %v7686_v59, 16  ;;  %v7751_v59 = vshll.u32 %v16926_v9, 16 }
 0x45e   : > { %12753 = vmatprep.subr.bf16.mxu1 %v13733_v23  ;;  %v7857_v30 = vrot.slane %v7855_v7, 5 }
 0x45f   : > { %v7761_v56 = vrot.slane %v7759_v15, 5  ;;  %v7789_v15 = vshll.u32 %v16691_v29, 16  ;;  %v7753_v47 = vrot.slane %v7751_v59, 5  ;;  %v7793_v59 = vshrl.u32 %v16691_v29, 16 }
 0x460   : > { %12722 = vmatmul.mubr.bf16.gmra.mrb[4].mxu1 %v13729_v27  ;;  %v7765_v27 = vshll.u32 %v7687_v55, 16 }
 0x461   : > { %12725 = vmatprep.mubr.bf16.mxu1 %v13731_v53  ;;  %12754 = vmatpush3.bf16.msra.mxu1 %v13733_v23  ;;  %v13742_v23 = vld [vmem:[#allocation3 + $0x128] sm:$0xff]   ;;  %v7762_v55 = vor.u32 %v7761_v56, %v7758_v50  ;;  %v13748_v56 = vld [vmem:[#allocation3 + $0x138] sm:$0xff]   ;;  %v16943_v3 = vrot.slane %v7789_v15, 5 }
 0x462   : > { %12755 = vmatprep.subr.bf16.mxu1 %v13736_v62  ;;  %v16928_v53 = vld [vmem:[#allocation2 + $0x20] sm:$0x1]  ;;  %v16931_v39 = vrot.slane %v7765_v27, 5  ;;  %v7695_v27 = vld [vmem:[#allocation2 + $0x3c] sm:$0xf] }
 0x463   : > { %v7775_v58 = vshll.u32 %v16928_v53, 16  ;;  %v16940_v50 = vrot.slane %v7762_v55, 4  ;;  %v7828_v45 = vshrl.u32 %v7695_v27, 16  ;;  %v7831_v10 = vshll.u32 %v7695_v27, 16 }
 0x464   : > { %v7852_v55 = vshrl.u32 %v7698_v42, 16 }
 0x465   : > { %12756 = vmatpush3.bf16.msra.mxu1 %v13736_v62  ;;  %v7748_v62 = vor.u32 %v7747_v34, %v7743_v60  ;;  %v7772_v34 = vor.u32 %v7771_v26, %v16931_v39  ;;  %v16938_v11 = vrot.slane %v7775_v58, 5  ;;  %v7813_v26 = vshll.u32 %v16695_v24, 16 }
 0x466   : > { %12757 = vmatprep.subr.bf16.mxu1 %v13739_v1  ;;  %v7817_v58 = vshrl.u32 %v16695_v24, 16  ;;  %v7786_v24 = vor.u32 %v7785_v13, %v7782_v51  ;;  %v7830_v42 = vrot.slane %v7828_v45, 4  ;;  %v7854_v48 = vrot.slane %v7852_v55, 4  ;;  %v13740_v45 = vld [vmem:[#allocation2 + $0x84] sm:$0xff]  }
 0x467   : > { %v7773_v29 = vrot.slane %v7772_v34, 4  ;;  %v16960_v34 = vrot.slane %v7813_v26, 5  ;;  %v7865_v13 = vshrl.u32 %v16708_v25, 16 }
 0x468   : > { %12726 = vmatmul.mubr.bf16.gmra.mrb[8].mxu1 %v13732_v12  ;;  %v7692_v12 = vld [vmem:[#allocation2 + $0x30] sm:$0xf]  ;;  %v7858_v55 = vor.u32 %v7857_v30, %v7854_v48 }
 0x469   : > { %12729 = vmatprep.mubr.bf16.mxu1 %v13734_v61  ;;  %12758 = vmatpush3.bf16.msra.mxu1 %v13739_v1  ;;  %v7744_v61 = vsel %vm14119_vm2, %v7739_v54, %v7743_v60  ;;  %v7749_v1 = vrot.slane %v7748_v62, 4  ;;  %v7799_v54 = vshll.u32 %v16693_v63, 16  ;;  %v7804_v60 = vshrl.u32 %v7692_v12, 16 }
 0x46a   : > { %12759 = vmatprep.subr.bf16.mxu1 %v13742_v23  ;;  %v7807_v62 = vshll.u32 %v7692_v12, 16  ;;  %v7768_v63 = vsel %vm14119_vm2, %v16940_v50, %v16931_v39  ;;  %v7795_v12 = vrot.slane %v7793_v59, 4  ;;  %v7861_v39 = vshll.u32 %v16708_v25, 16  ;;  %v13738_v50 = vld [vmem:[#allocation2 + $0x78] sm:$0xff]  }
 0x46b   : > { %v7754_v21 = vsel %vm14119_vm2, %v7749_v1, %v7753_v47  ;;  %v7806_v27 = vrot.slane %v7804_v60, 4  ;;  %v7841_v47 = vshrl.u32 %v16699_v52, 16  ;;  %v7701_v1 = vld [vmem:[#allocation2 + $0x54] sm:$0xf]  ;;  %v7778_v51 = vsel %vm14119_vm2, %v7773_v29, %v16938_v11 }
 0x46c   : > { %v16950_v15 = vcombine.low %v7744_v61, %v7754_v21  ;;  %v7819_v61 = vrot.slane %v7817_v58, 4  ;;  %v7833_v21 = vrot.slane %v7831_v10, 5  ;;  %v7876_v59 = vshrl.u32 %v7701_v1, 16 }
 0x46d   : > { %12760 = vmatpush3.bf16.msra.mxu1 %v13742_v23  ;;  %v13737_v23 = vld [vmem:[#allocation2 + $0x6c] sm:$0xff]   ;;  %v7879_v60 = vshll.u32 %v7701_v1, 16  ;;  %v16970_v10 = vrot.slane %v7786_v24, 4  ;;  %v7843_v26 = vrot.slane %v7841_v47, 4  ;;  %v7823_v11 = vshll.u32 %v16697_v18, 16 }
 0x46e   : > { %12761 = vmatprep.subr.bf16.mxu1 %v13745_v36  ;;  %v7820_v58 = vor.u32 %v7819_v61, %v16960_v34  ;;  %v7847_v29 = vshll.u32 %v16702_v8, 16  ;;  %v7863_v7 = vrot.slane %v7861_v39, 5  ;;  %v7867_v1 = vrot.slane %v7865_v13, 4 }
 0x46f   : > { %v7878_v24 = vrot.slane %v7876_v59, 4  ;;  %v7881_v37 = vrot.slane %v7879_v60, 5  ;;  %v16980_v47 = vcombine.low %v7768_v63, %v7778_v51  ;;  %v7792_v18 = vsel %vm14119_vm2, %v16970_v10, %v16943_v3  ;;  %v13741_v63 = vld [vmem:[#allocation2 + $0x90] sm:$0xff]  }
 0x470   : > { %12730 = vmatmul.mubr.bf16.gmra.mrb[12].mxu1 %v13735_v41  ;;  %v16956_v41 = vld [vmem:[#allocation3 + $0x140] sm:$0xff]   ;;  %v7821_v48 = vrot.slane %v7820_v58, 4  ;;  %v7825_v61 = vrot.slane %v7823_v11, 5  ;;  %v7849_v39 = vrot.slane %v7847_v29, 5  ;;  %v7859_v13 = vrot.slane %v7858_v55, 4 }
 0x471   : > { %12733 = vmatprep.mubr.bf16.mxu1 %v13737_v23  ;;  %12762 = vmatpush3.bf16.msra.mxu1 %v13745_v36  ;;  %v7809_v36 = vrot.slane %v7807_v62, 5  ;;  %v7837_v23 = vshll.u32 %v16699_v52, 16  ;;  %v16968_v52 = vrot.slane %v7799_v54, 5  ;;  %v7834_v54 = vor.u32 %v7833_v21, %v7830_v42  ;;  %v7707_v11 = vld [vmem:[#allocation2 + $0x6c] sm:$0xf] }
 0x472   : > { %12763 = vmatprep.subr.bf16.mxu1 %v13748_v56  ;;  %v7871_v42 = vshll.u32 %v16710_v32, 16 }
 0x473   : > { %v16973_v62 = vrot.slane %v7837_v23, 5  ;;  %v7810_v25 = vor.u32 %v7809_v36, %v7806_v27  ;;  %v7889_v23 = vshrl.u32 %v16715_v16, 16  ;;  %v7704_v36 = vld [vmem:[#allocation2 + $0x60] sm:$0xf]  ;;  %v7835_v21 = vrot.slane %v7834_v54, 4 }
 0x474   : > { %v7900_v60 = vshrl.u32 %v7704_v36, 16  ;;  %v7903_v10 = vshll.u32 %v7704_v36, 16  ;;  %v7873_v58 = vrot.slane %v7871_v42, 5  ;;  %v7895_v54 = vshll.u32 %v16729_v5, 16  ;;  %v17021_v36 = vld [vmem:[#allocation2 + $0x20] sm:$0x1] }
 0x475   : > { %12764 = vmatpush3.bf16.msra.mxu1 %v13748_v56  ;;  %v7796_v56 = vor.u32 %v7795_v12, %v16943_v3  ;;  %v7885_v12 = vshll.u32 %v16715_v16, 16  ;;  %v7844_v8 = vor.u32 %v7843_v26, %v16973_v62  ;;  %v7811_v30 = vrot.slane %v7810_v25, 4  ;;  %v13743_v3 = vld [vmem:[#allocation2 + $0x9c] sm:$0xff]   ;;  %18016 = vst [vmem:[#allocation38_spill] sm:$0xff] %v17021_v36  ;;  %v17033_v42 = vld [vmem:[#allocation2 + $0x2c] sm:$0x1] }
 0x476   : > { %12797 = vmatprep.subr.bf16.mxu1 %v16956_v41  ;;  %v7868_v16 = vor.u32 %v7867_v1, %v7863_v7  ;;  %v7891_v59 = vrot.slane %v7889_v23, 4  ;;  %v7913_v26 = vshrl.u32 %v16731_v31, 16  ;;  %v7826_v25 = vsel %vm14119_vm2, %v7821_v48, %v7825_v61  ;;  %v17031_v61 = vld [vmem:[#allocation2 + $0x28] sm:$0xf]  ;;  %18018 = vst [vmem:[#allocation40_spill] sm:$0xff] %v17033_v42 }
 0x477   : > { %v7797_v27 = vrot.slane %v7796_v56, 4  ;;  %v16988_v51 = vrot.slane %v7885_v12, 5  ;;  %v7909_v56 = vshll.u32 %v16731_v31, 16  ;;  %v7840_v29 = vsel %vm14119_vm2, %v7835_v21, %v16973_v62  ;;  %v17013_v12 = vld [vmem:[#allocation2 + $0x1c] sm:$0xf]  ;;  %18017 = vst [vmem:[#allocation39_spill] sm:$0xff] %v17031_v61 }
 0x478   : > { %12734 = vmatmul.mubr.bf16.gmra.mrb[16].mxu1 %v13738_v50  ;;  %v7882_v50 = vor.u32 %v7881_v37, %v7878_v24  ;;  %v7816_v37 = vsel %vm14119_vm2, %v7811_v30, %v16960_v34  ;;  %v7869_v55 = vrot.slane %v7868_v16, 4  ;;  %v17011_v24 = vrot.slane %v7900_v60, 4  ;;  %18015 = vst [vmem:[#allocation37_spill] sm:$0xff] %v17013_v12  ;;  %v10076_v21 = vld [vmem:[#allocation2 + $0x18] sm:$0xe] }
 0x479   : > { %12737 = vmatprep.mubr.bf16.mxu1 %v13740_v45  ;;  %v7845_v45 = vrot.slane %v7844_v8, 4  ;;  %v7802_v32 = vsel %vm14119_vm2, %v7797_v27, %v16968_v52  ;;  %v7864_v52 = vsel %vm14119_vm2, %v7859_v13, %v7863_v7  ;;  %v7892_v1 = vor.u32 %v7891_v59, %v16988_v51 }
 0x47a   : > { %v17008_v34 = vrot.slane %v7882_v50, 4  ;;  %v17015_v23 = vrot.slane %v7903_v10, 5  ;;  %v17017_v62 = vrot.slane %v7909_v56, 5  ;;  %v17019_v27 = vrot.slane %v7913_v26, 4  ;;  %v10077_v50 = vld [vmem:[#allocation2 + $0x24] sm:$0xe] }
 0x47b   : > { %v7850_v31 = vsel %vm14119_vm2, %v7845_v45, %v7849_v39  ;;  %v7924_v8 = vshrl.u32 %v7707_v11, 16  ;;  %v17023_v7 = vcombine.low %v7792_v18, %v7802_v32  ;;  %v17025_v5 = vcombine.low %v7816_v37, %v7826_v25  ;;  %v13744_v39 = vld [vmem:[#allocation2 + $0xa8] sm:$0xff]   ;;  %v17045_v45 = vld [vmem:[#allocation2 + $0x38] sm:$0x1]  ;;  %v10079_v37 = vld [vmem:[#allocation2 + $0x3c] sm:$0xe] }
 0x47c   : > { %v17027_v30 = vcombine.low %v7840_v29, %v7850_v31  ;;  %v7874_v48 = vsel %vm14119_vm2, %v7869_v55, %v7873_v58  ;;  %v17037_v16 = vrot.slane %v7895_v54, 5  ;;  %v7933_v18 = vshll.u32 %v16754_v33, 16  ;;  %18020 = vst [vmem:[#allocation42_spill] sm:$0xff] %v17045_v45  ;;  %v13746_v26 = vld [vmem:[#allocation2 + $0xb4] sm:$0xff]   ;;  %v9333_v29 = vld [vmem:[#allocation2 + $0x44] sm:$0x1] }
 0x47d   : > { %v17035_v13 = vcombine.low %v7864_v52, %v7874_v48  ;;  %v17040_v59 = vrot.slane %v7892_v1, 4  ;;  %v10142_v10 = vrot.slane %v17013_v12, 5  ;;  %v10145_v56 = vrot.slane %v17021_v36, 5  ;;  %v17061_v31 = vld [vmem:[#allocation2 + $0x78] sm:$0xf] }
 0x47e   : > { %v17057_v58 = vrot.slane %v7924_v8, 4  ;;  %v11614_v52 = vrot.slane %v10076_v21, 9  ;;  %v11615_v55 = vrot.slane %v10077_v50, 9  ;;  %v10149_v1 = vrot.slane %v17031_v61, 5  ;;  %v10078_v48 = vld [vmem:[#allocation2 + $0x30] sm:$0xe] }
 0x47f   : > { %v10144_v54 = vrot.slane %v10142_v10, 4  ;;  %v17066_v60 = vrot.slane %v7933_v18, 5  ;;  %v10152_v25 = vrot.slane %v17033_v42, 5  ;;  %v17070_v36 = vld [vmem:[#allocation2 + $0x4c] sm:$0xf]  ;;  %v11616_v61 = vrot.slane %v10078_v48, 9 }
 0x480   : > { %12738 = vmatmul.mubr.bf16.gmra.mrb[20].mxu1 %v13741_v63  ;;  %v7927_v63 = vshll.u32 %v7707_v11, 16  ;;  %v17059_v11 = vld [vmem:[#allocation2 + $0x40] sm:$0xf]  ;;  %18022 = vst [vmem:[#allocation44_spill] sm:$0xff] %v17070_v36  ;;  %v17074_v21 = vsel %vm14449_vm5, %v11614_v52, %v10142_v10  ;;  %v10151_v18 = vrot.slane %v10149_v1, 4  ;;  %v10159_v10 = vrot.slane %v17045_v45, 5 }
 0x481   : > { %12741 = vmatprep.mubr.bf16.mxu1 %v13743_v3  ;;  %v17043_v3 = vld [vmem:[#allocation2 + $0x34] sm:$0xf]  ;;  %18021 = vst [vmem:[#allocation43_spill] sm:$0xff] %v17059_v11  ;;  %18023 = vst [vmem:[#allocation45_spill] sm:$0xff] %v17074_v21  ;;  %v17078_v50 = vsel %vm14449_vm5, %v10144_v54, %v10145_v56  ;;  %v9339_v8 = vld [vmem:[#allocation2 + $0x5c] sm:$0x1] }
 0x482   : > { %18019 = vst [vmem:[#allocation41_spill] sm:$0xff] %v17043_v3  ;;  %v17064_v32 = vrot.slane %v7927_v63, 5  ;;  %18024 = vst [vmem:[#allocation46_spill] sm:$0xff] %v17078_v50  ;;  %v17082_v63 = vsel %vm14449_vm5, %v11615_v55, %v10149_v1  ;;  %v10156_v12 = vrot.slane %v17043_v3, 5  ;;  %v17090_v52 = vsel %vm14449_vm5, %v10151_v18, %v10152_v25  ;;  %v13747_v1 = vld [vmem:[#allocation2 + $0xc0] sm:$0xff]  }
 0x483   : > { %18025 = vst [vmem:[#allocation47_spill] sm:$0xff] %v17082_v63  ;;  %18026 = vst [vmem:[#allocation48_spill] sm:$0xff] %v17090_v52  ;;  %v11617_v56 = vrot.slane %v10079_v37, 9  ;;  %v10163_v54 = vrot.slane %v17059_v11, 5  ;;  %v10166_v55 = vrot.slane %v9333_v29, 5  ;;  %v11618_v11 = vrot.slane %v10080_v20, 9 }
 0x484   : > { %v9341_v42 = vld [vmem:[#allocation2 + $0x64] sm:$0xf]  ;;  %v9342_v48 = vld [vmem:[#allocation2 + $0x68] sm:$0x1]  ;;  %v10158_v21 = vrot.slane %v10156_v12, 4  ;;  %v17100_v37 = vsel %vm14449_vm5, %v11616_v61, %v10156_v12  ;;  %v10170_v50 = vrot.slane %v17070_v36, 5 }
 0x485   : > { %v9344_v25 = vld [vmem:[#allocation2 + $0x70] sm:$0xf]  ;;  %18027 = vst [vmem:[#allocation49_spill] sm:$0xff] %v17100_v37  ;;  %v17104_v29 = vsel %vm14449_vm5, %v11617_v56, %v10163_v54  ;;  %v10165_v18 = vrot.slane %v10163_v54, 4  ;;  %v10082_v45 = vld [vmem:[#allocation2 + $0x60] sm:$0xe] }
 0x486   : > { %v17108_v19 = vsel %vm14449_vm5, %v10158_v21, %v10159_v10  ;;  %v9345_v63 = vld [vmem:[#allocation2 + $0x74] sm:$0x1]  ;;  %v10180_v54 = vrot.slane %v9339_v8, 5  ;;  %v10083_v3 = vld [vmem:[#allocation2 + $0x6c] sm:$0xe]  ;;  %v17122_v10 = vsel %vm14449_vm5, %v11618_v11, %v10170_v50  ;;  %v11619_v12 = vrot.slane %v10081_v2, 9 }
 0x487   : > { %18028 = vst [vmem:[#allocation50_spill] sm:$0xff] %v17108_v19  ;;  %v17115_v61 = vsel %vm14449_vm5, %v10165_v18, %v10166_v55  ;;  %v9347_v21 = vld [vmem:[#allocation2 + $0x7c] sm:$0xf]  ;;  %v9348_v20 = vld [vmem:[#allocation2 + $0x80] sm:$0x1]  ;;  %v11620_v55 = vrot.slane %v10082_v45, 9 }
 0x488   : > { %12742 = vmatmul.mubr.bf16.gmra.mrb[24].mxu1 %v13744_v39  ;;  %v9336_v39 = vld [vmem:[#allocation2 + $0x50] sm:$0x1]  ;;  %18029 = vst [vmem:[#allocation51_spill] sm:$0xff] %v17115_v61  ;;  %v9350_v19 = vld [vmem:[#allocation2 + $0x88] sm:$0xf]  ;;  %v10184_v18 = vrot.slane %v9341_v42, 5 }
 0x489   : > { %12745 = vmatprep.mubr.bf16.mxu1 %v13746_v26  ;;  %v9338_v26 = vld [vmem:[#allocation2 + $0x58] sm:$0xf]  ;;  %v10173_v52 = vrot.slane %v9336_v39, 5  ;;  %v10191_v36 = vrot.slane %v9344_v25, 5  ;;  %v10194_v14 = vrot.slane %v9345_v63, 5 }
 0x48a   : > { %v10177_v56 = vrot.slane %v9338_v26, 5  ;;  %v10187_v26 = vrot.slane %v9342_v48, 5  ;;  %v9351_v39 = vld [vmem:[#allocation2 + $0x8c] sm:$0x1]  ;;  %v9353_v61 = vld [vmem:[#allocation2 + $0x94] sm:$0xf]  ;;  %v17142_v63 = vsel %vm14449_vm5, %v11620_v55, %v10184_v18 }
 0x48b   : > { %v10186_v45 = vrot.slane %v10184_v18, 4  ;;  %v10193_v48 = vrot.slane %v10191_v36, 4  ;;  %v10085_v25 = vld [vmem:[#allocation2 + $0x84] sm:$0xe]  ;;  %v10086_v11 = vld [vmem:[#allocation2 + $0x90] sm:$0xe] }
 0x48c   : > { %v10179_v37 = vrot.slane %v10177_v56, 4  ;;  %v17132_v2 = vsel %vm14449_vm5, %v11619_v12, %v10177_v56  ;;  %v13750_v12 = vld [vmem:[#allocation3 + $0x148] sm:$0xff]   ;;  %v11622_v56 = vrot.slane %v10084_v28, 9 }
 0x48d   : > { %v17156_v18 = vsel %vm14449_vm5, %v10193_v48, %v10194_v14  ;;  %v9359_v14 = vld [vmem:[#allocation2 + $0xac] sm:$0xf] }
 0x48e   : > { %v17136_v42 = vsel %vm14449_vm5, %v10179_v37, %v10180_v54  ;;  %v17150_v37 = vsel %vm14449_vm5, %v10186_v45, %v10187_v26  ;;  %v10198_v54 = vrot.slane %v9347_v21, 5  ;;  %18032 = vst [vmem:[#allocation54_spill] sm:$0xff] %v17156_v18  ;;  %v10087_v45 = vld [vmem:[#allocation2 + $0x9c] sm:$0xe] }
 0x48f   : > { %18030 = vst [vmem:[#allocation52_spill] sm:$0xff] %v17136_v42  ;;  %18031 = vst [vmem:[#allocation53_spill] sm:$0xff] %v17150_v37  ;;  %v9357_v42 = vld [vmem:[#allocation2 + $0xa4] sm:$0x1]  ;;  %v9360_v37 = vld [vmem:[#allocation2 + $0xb0] sm:$0x1] }
 0x490   : > { %12746 = vmatmul.mubr.bf16.gmra.mrb[28].mxu1 %v13747_v1  ;;  %v10172_v1 = vrot.slane %v10170_v50, 4  ;;  %v9354_v50 = vld [vmem:[#allocation2 + $0x98] sm:$0x1]  ;;  %v17163_v28 = vsel %vm14449_vm5, %v11622_v56, %v10198_v54  ;;  %v10200_v21 = vrot.slane %v10198_v54, 4  ;;  %v11625_v18 = vrot.slane %v10087_v45, 9 }
 0x491   : > { %12765 = vmatprep.mubr.bf16.mxu1 %v16950_v15  ;;  %v11621_v15 = vrot.slane %v10083_v3, 9  ;;  %v9356_v3 = vld [vmem:[#allocation2 + $0xa0] sm:$0xf]  ;;  %v10215_v55 = vrot.slane %v9354_v50, 5  ;;  %v9362_v54 = vld [vmem:[#allocation2 + $0xb8] sm:$0xf] }
 0x492   : > { %v17126_v8 = vsel %vm14449_vm5, %v10172_v1, %v10173_v52  ;;  %v10201_v1 = vrot.slane %v9348_v20, 5  ;;  %v11623_v20 = vrot.slane %v10085_v25, 9  ;;  %v10219_v56 = vrot.slane %v9356_v3, 5 }
 0x493   : > { %v17146_v52 = vsel %vm14449_vm5, %v11621_v15, %v10191_v36  ;;  %v10205_v36 = vrot.slane %v9350_v19, 5  ;;  %v10208_v15 = vrot.slane %v9351_v39, 5  ;;  %v11624_v19 = vrot.slane %v10086_v11, 9  ;;  %v9366_v11 = vld [vmem:[#allocation2 + $0xc8] sm:$0x1] }
 0x494   : > { %v10212_v39 = vrot.slane %v9353_v61, 5  ;;  %v17169_v26 = vsel %vm14449_vm5, %v10200_v21, %v10201_v1  ;;  %v7930_v1 = vor.u32 %v17064_v32, %v17057_v58  ;;  %v9365_v21 = vld [vmem:[#allocation2 + $0xc4] sm:$0xf]  ;;  %v10221_v3 = vrot.slane %v10219_v56, 4 }
 0x495   : > { %v10207_v48 = vrot.slane %v10205_v36, 4  ;;  %18033 = vst [vmem:[#allocation55_spill] sm:$0xff] %v17169_v26  ;;  %v17173_v25 = vsel %vm14449_vm5, %v11623_v20, %v10205_v36  ;;  %v10088_v20 = vld [vmem:[#allocation2 + $0xa8] sm:$0xe]  ;;  %v17195_v45 = vsel %vm14449_vm5, %v11625_v18, %v10219_v56  ;;  %v10226_v32 = vrot.slane %v9359_v14, 5  ;;  %v13752_v36 = vld [vmem:[#allocation3 + $0x158] sm:$0xff]  }
 0x496   : > { %18034 = vst [vmem:[#allocation56_spill] sm:$0xff] %v17173_v25  ;;  %v10214_v50 = vrot.slane %v10212_v39, 4  ;;  %v10229_v58 = vrot.slane %v9360_v37, 5  ;;  %v11626_v37 = vrot.slane %v10088_v20, 9  ;;  %v18038_v20 = vshrl.u32 %v17061_v31, 16 }
 0x497   : > { %v17179_v61 = vsel %vm14449_vm5, %v10207_v48, %v10208_v15  ;;  %v10089_v48 = vld [vmem:[#allocation2 + $0xb4] sm:$0xe]  ;;  %v10228_v14 = vrot.slane %v10226_v32, 4  ;;  %v18106_v46 = vcombine.low %v17122_v10, %v17126_v8 }
 0x498   : > { %12766 = vmatmul.mubr.bf16.vlgmr.msra.gmra.mrb[0].mxu1 %v16980_v47  ;;  %v13751_v47 = vld [vmem:[#allocation3 + $0x150] sm:$0xff]   ;;  %18035 = vst [vmem:[#allocation57_spill] sm:$0xff] %v17179_v61  ;;  %v17191_v15 = vsel %vm14449_vm5, %v10214_v50, %v10215_v55  ;;  %v10090_v55 = vld [vmem:[#allocation2 + $0xc0] sm:$0xe]  ;;  %v18037_v50 = vshrl.u32 %v16754_v33, 16  ;;  %v11627_v56 = vrot.slane %v10089_v48, 9  ;;  %v17212_v33 = vsel %vm14449_vm5, %v11626_v37, %v10226_v32 }
 0x499   : > { %12769 = vmatprep.mubr.bf16.mxu1 %v17023_v7  ;;  %12798 = vmatpush3.bf16.msra.mxu1 %v16956_v41  ;;  %v10222_v7 = vrot.slane %v9357_v42, 5  ;;  %v9363_v41 = vld [vmem:[#allocation2 + $0xbc] sm:$0x1]  ;;  %v17187_v42 = vsel %vm14449_vm5, %v11624_v19, %v10212_v39  ;;  %18036 = vst [vmem:[#allocation58_spill] sm:$0xff] %v17191_v15  ;;  %v10233_v39 = vrot.slane %v9362_v54, 5  ;;  %v10240_v19 = vrot.slane %v9365_v21, 5 }
 0x49a   : > { %12799 = vmatprep.subr.bf16.mxu1 %v13750_v12  ;;  %v10236_v61 = vrot.slane %v9363_v41, 5  ;;  %v7939_v25 = vrot.slane %v18037_v50, 4  ;;  %v10243_v15 = vrot.slane %v9366_v11, 5  ;;  %v7713_v54 = vld [vmem:[#allocation2 + $0x84] sm:$0xf]  ;;  %v17216_v41 = vsel %vm14449_vm5, %v10228_v14, %v10229_v58 }
 0x49b   : > { %v10235_v26 = vrot.slane %v10233_v39, 4  ;;  %v11642_v11 = vcombine.low %v17212_v33, %v17216_v41  ;;  %v10242_v21 = vrot.slane %v10240_v19, 4  ;;  %v7950_v32 = vrot.slane %v18038_v20, 4 }
 0x49c   : > { %v18039_v58 = vshll.u32 %v17061_v31, 16  ;;  %v7972_v37 = vshrl.u32 %v7713_v54, 16  ;;  %v7975_v14 = vshll.u32 %v7713_v54, 16  ;;  %v7898_v31 = vsel %vm14119_vm2, %v17040_v59, %v17037_v16 }
 0x49d   : > { %12800 = vmatpush3.bf16.msra.mxu1 %v13750_v12  ;;  %v17201_v12 = vsel %vm14449_vm5, %v10221_v3, %v10222_v7  ;;  %v7957_v7 = vshll.u32 %v16774_v49, 16  ;;  %v11628_v3 = vrot.slane %v10090_v55, 9  ;;  %v7961_v55 = vshrl.u32 %v16774_v49, 16 }
 0x49e   : > { %12801 = vmatprep.subr.bf16.mxu1 %v13751_v47  ;;  %v11641_v18 = vcombine.low %v17195_v45, %v17201_v12  ;;  %v7953_v48 = vrot.slane %v18039_v58, 5  ;;  %v18040_v49 = vor.u32 %v17015_v23, %v17011_v24  ;;  %v7981_v16 = vshll.u32 %v16791_v40, 16  ;;  %v7716_v23 = vld [vmem:[#allocation2 + $0x90] sm:$0xf] }
 0x49f   : > { %v7985_v24 = vshrl.u32 %v16791_v40, 16  ;;  %v18043_v59 = vor.u32 %v17019_v27, %v17017_v62  ;;  %v7931_v20 = vrot.slane %v7930_v1, 4  ;;  %v18044_v58 = vshll.u32 %v16756_v43, 16 }
 0x4a0   : > { %12770 = vmatmul.mubr.bf16.gmra.mrb[4].mxu1 %v17025_v5  ;;  %v13753_v5 = vld [vmem:[#allocation3 + $0x160] sm:$0xff]   ;;  %v7996_v43 = vshrl.u32 %v7716_v23, 16  ;;  %v7999_v1 = vshll.u32 %v7716_v23, 16  ;;  %v8009_v23 = vshrl.u32 %v16808_v38, 16  ;;  %v18118_v8 = vld [vmem:[#allocation58_spill] sm:$0xff] }
 0x4a1   : > { %12773 = vmatprep.mubr.bf16.mxu1 %v17027_v30  ;;  %12802 = vmatpush3.bf16.msra.mxu1 %v13751_v47  ;;  %v17222_v30 = vsel %vm14449_vm5, %v11627_v56, %v10233_v39  ;;  %v17226_v47 = vsel %vm14449_vm5, %v10235_v26, %v10236_v61  ;;  %v17237_v39 = vsel %vm14449_vm5, %v11628_v3, %v10240_v19  ;;  %v7907_v61 = vrot.slane %v18040_v49, 4 }
 0x4a2   : > { %12803 = vmatprep.subr.bf16.mxu1 %v13752_v36  ;;  %v11643_v50 = vcombine.low %v17222_v30, %v17226_v47  ;;  %v17241_v26 = vsel %vm14449_vm5, %v10242_v21, %v10243_v15  ;;  %v18041_v56 = vshll.u32 %v16743_v17, 16  ;;  %v18042_v15 = vsel %vm14119_vm2, %v17008_v34, %v16988_v51  ;;  %v13754_v17 = vld [vmem:[#allocation3 + $0x168] sm:$0xff]  }
 0x4a3   : > { %v11644_v19 = vcombine.low %v17237_v39, %v17241_v26  ;;  %v11508_v3 = vcombine.low %v18042_v15, %v7898_v31  ;;  %v7940_v21 = vor.u32 %v7939_v25, %v17066_v60  ;;  %v7945_v49 = vrot.slane %v18044_v58, 5  ;;  %v7719_v15 = vld [vmem:[#allocation2 + $0x9c] sm:$0xf]  ;;  %v13756_v58 = vld [vmem:[#allocation3 + $0x178] sm:$0xff]  }
 0x4a4   : > { %v7921_v54 = vrot.slane %v18041_v56, 5  ;;  %v7954_v56 = vor.u32 %v7953_v48, %v7950_v32  ;;  %v17268_v51 = vrot.slane %v7957_v7, 5  ;;  %v7963_v34 = vrot.slane %v7961_v55, 4  ;;  %v13755_v55 = vld [vmem:[#allocation3 + $0x170] sm:$0xff]  }
 0x4a5   : > { %12804 = vmatpush3.bf16.msra.mxu1 %v13752_v36  ;;  %v7917_v36 = vrot.slane %v18043_v59, 4  ;;  %v7974_v25 = vrot.slane %v7972_v37, 4  ;;  %v7977_v31 = vrot.slane %v7975_v14, 5  ;;  %v7912_v40 = vsel %vm14119_vm2, %v7907_v61, %v17017_v62 }
 0x4a6   : > { %12805 = vmatprep.subr.bf16.mxu1 %v13753_v5  ;;  %v7941_v32 = vrot.slane %v7940_v21, 4  ;;  %v17276_v7 = vrot.slane %v7981_v16, 5  ;;  %v7987_v48 = vrot.slane %v7985_v24, 4  ;;  %v7936_v37 = vsel %vm14119_vm2, %v7931_v20, %v17066_v60 }
 0x4a7   : > { %v7922_v27 = vsel %vm14119_vm2, %v7917_v36, %v7921_v54  ;;  %v7955_v14 = vrot.slane %v7954_v56, 4  ;;  %v8020_v62 = vshrl.u32 %v7719_v15, 16  ;;  %v8023_v61 = vshll.u32 %v7719_v15, 16 }
 0x4a8   : > { %12774 = vmatmul.mubr.bf16.gmra.mrb[8].mxu1 %v17035_v13  ;;  %v7967_v13 = vshll.u32 %v16789_v35, 16  ;;  %v7964_v54 = vor.u32 %v7963_v34, %v17268_v51  ;;  %v7991_v35 = vshll.u32 %v16800_v4, 16  ;;  %v7998_v21 = vrot.slane %v7996_v43, 4 }
 0x4a9   : > { %12777 = vmatprep.mubr.bf16.mxu1 %v11508_v3  ;;  %12806 = vmatpush3.bf16.msra.mxu1 %v13753_v5  ;;  %v7946_v5 = vsel %vm14119_vm2, %v7941_v32, %v7945_v49  ;;  %v7978_v3 = vor.u32 %v7977_v31, %v7974_v25  ;;  %v8001_v16 = vrot.slane %v7999_v1, 5  ;;  %v8005_v24 = vshll.u32 %v16808_v38, 16  ;;  %v7722_v25 = vld [vmem:[#allocation2 + $0xa8] sm:$0xf]  ;;  %v7725_v1 = vld [vmem:[#allocation2 + $0xb4] sm:$0xf] }
 0x4aa   : > { %12807 = vmatprep.subr.bf16.mxu1 %v13754_v17  ;;  %v11509_v59 = vcombine.low %v7912_v40, %v7922_v27  ;;  %v11510_v60 = vcombine.low %v7936_v37, %v7946_v5  ;;  %v7969_v36 = vrot.slane %v7967_v13, 5  ;;  %v7988_v20 = vor.u32 %v7987_v48, %v17276_v7  ;;  %v13823_v13 = vld [vmem:[#allocation2 + $0x98] sm:$0x1] }
 0x4ab   : > { %v8022_v49 = vrot.slane %v8020_v62, 4  ;;  %v8025_v56 = vrot.slane %v8023_v61, 5  ;;  %v8029_v34 = vshll.u32 %v16820_v57, 16  ;;  %v8033_v4 = vshrl.u32 %v16820_v57, 16  ;;  %v17295_v62 = vld [vmem:[#allocation3 + $0x180] sm:$0xff]  }
 0x4ac   : > { %v7960_v38 = vsel %vm14119_vm2, %v7955_v14, %v17268_v51  ;;  %v7979_v31 = vrot.slane %v7978_v3, 4  ;;  %v7993_v15 = vrot.slane %v7991_v35, 5  ;;  %v8002_v40 = vor.u32 %v8001_v16, %v7998_v21 }
 0x4ad   : > { %12808 = vmatpush3.bf16.msra.mxu1 %v13754_v17  ;;  %v7965_v17 = vrot.slane %v7964_v54, 4  ;;  %v8007_v27 = vrot.slane %v8005_v24, 5  ;;  %v8011_v43 = vrot.slane %v8009_v23, 4  ;;  %v8015_v57 = vshll.u32 %v13823_v13, 16  ;;  %v13824_v23 = vld [vmem:[#allocation2 + $0xa4] sm:$0x1] }
 0x4ae   : > { %12809 = vmatprep.subr.bf16.mxu1 %v13755_v55  ;;  %v8044_v48 = vshrl.u32 %v7722_v25, 16  ;;  %v8047_v37 = vshll.u32 %v7722_v25, 16  ;;  %v7989_v51 = vrot.slane %v7988_v20, 4  ;;  %v8026_v14 = vor.u32 %v8025_v56, %v8022_v49  ;;  %v13825_v20 = vld [vmem:[#allocation2 + $0xac] sm:$0xf] }
 0x4af   : > { %v7970_v32 = vsel %vm14119_vm2, %v7965_v17, %v7969_v36  ;;  %v8031_v61 = vrot.slane %v8029_v34, 5  ;;  %v8035_v5 = vrot.slane %v8033_v4, 4  ;;  %v7984_v3 = vsel %vm14119_vm2, %v7979_v31, %v17276_v7  ;;  %v13826_v31 = vld [vmem:[#allocation2 + $0xb8] sm:$0xf] }
 0x4b0   : > { %12778 = vmatmul.mubr.bf16.gmra.mrb[12].mxu1 %v11509_v59  ;;  %v11511_v54 = vcombine.low %v7960_v38, %v7970_v32  ;;  %v8071_v35 = vshll.u32 %v7725_v1, 16  ;;  %v7994_v21 = vsel %vm14119_vm2, %v7989_v51, %v7993_v15  ;;  %v8003_v16 = vrot.slane %v8002_v40, 4 }
 0x4b1   : > { %12781 = vmatprep.mubr.bf16.mxu1 %v11510_v60  ;;  %12810 = vmatpush3.bf16.msra.mxu1 %v13755_v55  ;;  %v8068_v55 = vshrl.u32 %v7725_v1, 16  ;;  %v8012_v24 = vor.u32 %v8011_v43, %v8007_v27  ;;  %v8039_v59 = vshll.u32 %v13824_v23, 16  ;;  %v8046_v60 = vrot.slane %v8044_v48, 4  ;;  %v7728_v43 = vld [vmem:[#allocation2 + $0xc0] sm:$0xf] }
 0x4b2   : > { %12811 = vmatprep.subr.bf16.mxu1 %v13756_v58  ;;  %v8049_v36 = vrot.slane %v8047_v37, 5  ;;  %v8053_v49 = vshll.u32 %v13825_v20, 16  ;;  %v8057_v56 = vshrl.u32 %v13825_v20, 16  ;;  %v11512_v34 = vcombine.low %v7984_v3, %v7994_v21 }
 0x4b3   : > { %v8017_v4 = vrot.slane %v8015_v57, 5  ;;  %v8027_v7 = vrot.slane %v8026_v14, 4  ;;  %v8036_v25 = vor.u32 %v8035_v5, %v8031_v61  ;;  %v8070_v38 = vrot.slane %v8068_v55, 4 }
 0x4b4   : > { %v8073_v17 = vrot.slane %v8071_v35, 5  ;;  %v8077_v15 = vshll.u32 %v13826_v31, 16  ;;  %v8081_v40 = vshrl.u32 %v13826_v31, 16  ;;  %v8041_v1 = vrot.slane %v8039_v59, 5 }
 0x4b5   : > { %12812 = vmatpush3.bf16.msra.mxu1 %v13756_v58  ;;  %v8013_v58 = vrot.slane %v8012_v24, 4  ;;  %v8008_v32 = vsel %vm14119_vm2, %v8003_v16, %v8007_v27  ;;  %v8050_v13 = vor.u32 %v8049_v36, %v8046_v60  ;;  %v8055_v48 = vrot.slane %v8053_v49, 5  ;;  %v13827_v27 = vld [vmem:[#allocation2 + $0xb0] sm:$0x1]  ;;  %v13828_v36 = vld [vmem:[#allocation2 + $0xbc] sm:$0x1] }
 0x4b6   : > { %12845 = vmatprep.subr.bf16.mxu1 %v17295_v62  ;;  %v8059_v37 = vrot.slane %v8057_v56, 4  ;;  %v8032_v57 = vsel %vm14119_vm2, %v8027_v7, %v8031_v61  ;;  %v8037_v51 = vrot.slane %v8036_v25, 4  ;;  %v8092_v14 = vshrl.u32 %v7728_v43, 16  ;;  %v13829_v56 = vld [vmem:[#allocation2 + $0xc4] sm:$0xf] }
 0x4b7   : > { %v8095_v5 = vshll.u32 %v7728_v43, 16  ;;  %v8074_v3 = vor.u32 %v8073_v17, %v8070_v38  ;;  %v8079_v55 = vrot.slane %v8077_v15, 5  ;;  %v8083_v35 = vrot.slane %v8081_v40, 4 }
 0x4b8   : > { %12782 = vmatmul.mubr.bf16.gmra.mrb[16].mxu1 %v11511_v54  ;;  %v8018_v54 = vsel %vm14119_vm2, %v8013_v58, %v8017_v4  ;;  %v8042_v24 = vsel %vm14119_vm2, %v8037_v51, %v8041_v1  ;;  %v8063_v16 = vshll.u32 %v13827_v27, 16  ;;  %v8051_v59 = vrot.slane %v8050_v13, 4 }
 0x4b9   : > { %12785 = vmatprep.mubr.bf16.mxu1 %v11512_v34  ;;  %v11513_v21 = vcombine.low %v8008_v32, %v8018_v54  ;;  %v11514_v23 = vcombine.low %v8032_v57, %v8042_v24  ;;  %v8060_v60 = vor.u32 %v8059_v37, %v8055_v48  ;;  %v8087_v61 = vshll.u32 %v13828_v36, 16  ;;  %v13830_v37 = vld [vmem:[#allocation2 + $0xc8] sm:$0x1]  ;;  %v5714_v24 = vld [vmem:[#allocation2 + $0xcc] sm:$0x1] }
 0x4ba   : > { %v8094_v20 = vrot.slane %v8092_v14, 4  ;;  %v8097_v49 = vrot.slane %v8095_v5, 5  ;;  %v8101_v34 = vshll.u32 %v13829_v56, 16  ;;  %v8105_v7 = vshrl.u32 %v13829_v56, 16  ;;  %v13831_v36 = vld [vmem:[#allocation2 + $0x1c] sm:$0xf] }
 0x4bb   : > { %v8075_v4 = vrot.slane %v8074_v3, 4  ;;  %v8084_v25 = vor.u32 %v8083_v35, %v8079_v55  ;;  %v8065_v38 = vrot.slane %v8063_v16, 5  ;;  %v8056_v17 = vsel %vm14119_vm2, %v8051_v59, %v8055_v48 }
 0x4bc   : > { %v8089_v31 = vrot.slane %v8087_v61, 5  ;;  %v8061_v15 = vrot.slane %v8060_v60, 4  ;;  %v8098_v40 = vor.u32 %v8097_v49, %v8094_v20  ;;  %v8103_v43 = vrot.slane %v8101_v34, 5  ;;  %v8438_v34 = vld [vmem:[#allocation2 + $0x18] sm:$0xe] }
 0x4bd   : > { %v8107_v58 = vrot.slane %v8105_v7, 4  ;;  %v8080_v1 = vsel %vm14119_vm2, %v8075_v4, %v8079_v55  ;;  %v8085_v32 = vrot.slane %v8084_v25, 4  ;;  %v8111_v57 = vshll.u32 %v13830_v37, 16  ;;  %v18051_v37 = vld [vmem:[#allocation14_spill] sm:$0xff] }
 0x4be   : > { %v8066_v13 = vsel %vm14119_vm2, %v8061_v15, %v8065_v38  ;;  %v8503_v48 = vrot.slane %v16922_v22, 5  ;;  %v8099_v54 = vrot.slane %v8098_v40, 4  ;;  %v8506_v35 = vrot.slane %v16926_v9, 5  ;;  %v18045_v15 = vld [vmem:[#allocation24_spill] sm:$0xff] }
 0x4bf   : > { %v11515_v51 = vcombine.low %v8056_v17, %v8066_v13  ;;  %v8090_v14 = vsel %vm14119_vm2, %v8085_v32, %v8089_v31  ;;  %v8108_v3 = vor.u32 %v8107_v58, %v8103_v43  ;;  %v8113_v55 = vrot.slane %v8111_v57, 5  ;;  %v13758_v31 = vld [vmem:[#allocation3 + $0x188] sm:$0xff]   ;;  %v18047_v58 = vld [vmem:[#allocation25_spill] sm:$0xff]  ;;  %v18050_v13 = vld [vmem:[#allocation15_spill] sm:$0xff] }
 0x4c0   : > { %12786 = vmatmul.mubr.bf16.gmra.mrb[20].mxu1 %v11513_v21  ;;  %v11516_v5 = vcombine.low %v8080_v1, %v8090_v14  ;;  %v8437_v21 = vld [vmem:[#allocation2 + $0xc] sm:$0xe]  ;;  %v8505_v27 = vrot.slane %v8503_v48, 4  ;;  %v5715_v16 = vsel %vm15965_vm8, 0, %v5714_v24  ;;  %v8510_v61 = vrot.slane %v13831_v36, 5  ;;  %v18048_v1 = vld [vmem:[#allocation12_spill] sm:$0xff] }
 0x4c1   : > { %12789 = vmatprep.mubr.bf16.mxu1 %v11514_v23  ;;  %v8104_v23 = vsel %vm14119_vm2, %v8099_v54, %v8103_v43  ;;  %v8109_v59 = vrot.slane %v8108_v3, 4  ;;  %5716 = vst [vmem:[#allocation2 + $0xcc] sm:$0x1] %v5715_v16  ;;  %v11526_v22 = vrot.slane %v8437_v21, 9  ;;  %v8513_v56 = vrot.slane %v16928_v53, 5  ;;  %v13759_v53 = vld [vmem:[#allocation3 + $0x190] sm:$0xff]  }
 0x4c2   : > { %v8507_v60 = vsel %vm14449_vm5, %v8505_v27, %v8506_v35  ;;  %v8512_v7 = vrot.slane %v8510_v61, 4  ;;  %v11527_v4 = vrot.slane %v8438_v34, 9  ;;  %v18046_v40 = vcombine.low %v16722_v6, %v18045_v15  ;;  %v13760_v43 = vld [vmem:[#allocation3 + $0x198] sm:$0xff]   ;;  %v13762_v6 = vld [vmem:[#allocation3 + $0x1a8] sm:$0xff]   ;;  %v18057_v54 = vld [vmem:[#allocation9_spill] sm:$0xff] }
 0x4c3   : > { %v8114_v9 = vsel %vm14119_vm2, %v8109_v59, %v8113_v55  ;;  %v8504_v49 = vsel %vm14449_vm5, %v11526_v22, %v8503_v48  ;;  %v18049_v32 = vcombine.low %v18047_v58, %v18048_v1  ;;  %v18052_v57 = vcombine.low %v18050_v13, %v18051_v37  ;;  %v18054_v14 = vld [vmem:[#allocation16_spill] sm:$0xff]  ;;  %v13763_v35 = vld [vmem:[#allocation3 + $0x1b0] sm:$0xff]   ;;  %v18060_v24 = vld [vmem:[#allocation18_spill] sm:$0xff] }
 0x4c4   : > { %v11517_v20 = vcombine.low %v8104_v23, %v8114_v9  ;;  %v11542_v44 = vcombine.low %v8504_v49, %v8507_v60  ;;  %v8514_v25 = vsel %vm14449_vm5, %v8512_v7, %v8513_v56  ;;  %v8511_v38 = vsel %vm14449_vm5, %v11527_v4, %v8510_v61  ;;  %v13764_v55 = vld [vmem:[#allocation3 + $0x1b8] sm:$0xff]   ;;  %v18059_v21 = vld [vmem:[#allocation11_spill] sm:$0xff]  ;;  %v18063_v23 = vld [vmem:[#allocation21_spill] sm:$0xff] }
 0x4c5   : > { %v11543_v17 = vcombine.low %v8511_v38, %v8514_v25  ;;  %v18061_v27 = vcombine.low %v18059_v21, %v18060_v24  ;;  %v18062_v16 = vld [vmem:[#allocation19_spill] sm:$0xff]  ;;  %v13767_v22 = vld [vmem:[#allocation3 + $0x1c0] sm:$0xff]   ;;  %v18065_v60 = vld [vmem:[#allocation20_spill] sm:$0xff] }
 0x4c6   : > { %v18064_v59 = vcombine.low %v18062_v16, %v18063_v23  ;;  %v18066_v9 = vld [vmem:[#allocation22_spill] sm:$0xff]  ;;  %v18068_v61 = vld [vmem:[#allocation23_spill] sm:$0xff]  ;;  %v18072_v56 = vld [vmem:[#allocation28_spill] sm:$0xff] }
 0x4c7   : > { %v18067_v36 = vcombine.low %v18065_v60, %v18066_v9  ;;  %v18074_v7 = vld [vmem:[#allocation29_spill] sm:$0xff]  ;;  %v18075_v4 = vld [vmem:[#allocation30_spill] sm:$0xff]  ;;  %v18077_v38 = vld [vmem:[#allocation31_spill] sm:$0xff] }
 0x4c8   : > { %12790 = vmatmul.mubr.bf16.gmra.mrb[24].mxu1 %v11515_v51  ;;  %v13761_v51 = vld [vmem:[#allocation3 + $0x1a0] sm:$0xff]   ;;  %v18076_v25 = vcombine.low %v18074_v7, %v18075_v4  ;;  %v18084_v13 = vld [vmem:[#allocation35_spill] sm:$0xff]  ;;  %v18085_v37 = vld [vmem:[#allocation36_spill] sm:$0xff] }
 0x4c9   : > { %12793 = vmatprep.mubr.bf16.mxu1 %v11516_v5  ;;  %v18056_v5 = vld [vmem:[#allocation17_spill] sm:$0xff]  ;;  %v13774_v21 = vld [vmem:[#allocation2 + $0x60] sm:$0xff]   ;;  %v13785_v24 = vld [vmem:[#allocation3 + $0x1f0] sm:$0xff]  }
 0x4ca   : > { %v18058_v3 = vcombine.low %v18056_v5, %v18057_v54  ;;  %v18080_v15 = vld [vmem:[#allocation33_spill] sm:$0xff]  ;;  %v13776_v5 = vld [vmem:[#allocation3 + $0x1d8] sm:$0xff]   ;;  %v13771_v54 = vld [vmem:[#allocation2 + $0x48] sm:$0xff]  }
 0x4cb   : > { %v13788_v16 = vld [vmem:[#allocation3 + $0x1f8] sm:$0xff]   ;;  %v13777_v23 = vld [vmem:[#allocation2 + $0x78] sm:$0xff]   ;;  %v18089_v58 = vld [vmem:[#allocation38_spill] sm:$0xff] }
 0x4d0   : > { %12794 = vmatmul.mubr.bf16.gmra.mrb[28].mxu1 %v11517_v20  ;;  %v18069_v20 = vld [vmem:[#allocation26_spill] sm:$0xff] }
 0x4d1   : > { %12813 = vmatprep.mubr.bf16.mxu1 %v11542_v44  ;;  %v18070_v49 = vcombine.low %v18068_v61, %v18069_v20  ;;  %v18071_v44 = vld [vmem:[#allocation27_spill] sm:$0xff]  ;;  %v13780_v61 = vld [vmem:[#allocation2 + $0x90] sm:$0xff]   ;;  %v9325_v20 = vld [vmem:[#allocation2 + $0x24] sm:$0xf] }
 0x4d2   : > { %v18073_v34 = vcombine.low %v18071_v44, %v18072_v56  ;;  %v9395_v4 = vshrl.u32 %v9325_v20, 16 }
 0x4d8   : > { %12814 = vmatmul.mubr.bf16.vlgmr.msra.gmra.mrb[0].mxu1 %v11543_v17  ;;  %v18078_v17 = vld [vmem:[#allocation32_spill] sm:$0xff] }
 0x4d9   : > { %12817 = vmatprep.mubr.bf16.mxu1 %v18046_v40  ;;  %12846 = vmatpush3.bf16.msra.mxu1 %v17295_v62  ;;  %v18053_v62 = vld [vmem:[#allocation13_spill] sm:$0xff]  ;;  %v18081_v40 = vld [vmem:[#allocation34_spill] sm:$0xff] }
 0x4da   : > { %12847 = vmatprep.subr.bf16.mxu1 %v13758_v31  ;;  %v18055_v48 = vcombine.low %v18053_v62, %v18054_v14  ;;  %v13768_v62 = vld [vmem:[#allocation2 + $0x30] sm:$0xff]   ;;  %v13773_v14 = vld [vmem:[#allocation3 + $0x1d0] sm:$0xff]  }
 0x4dd   : > { %12848 = vmatpush3.bf16.msra.mxu1 %v13758_v31  ;;  %v18079_v31 = vcombine.low %v18077_v38, %v18078_v17  ;;  %v18088_v38 = vld [vmem:[#allocation39_spill] sm:$0xff] }
 0x4de   : > { %12849 = vmatprep.subr.bf16.mxu1 %v13759_v53  ;;  %v9404_v17 = vshll.u32 %v18088_v38, 16 }
 0x4e0   : > { %12818 = vmatmul.mubr.bf16.gmra.mrb[4].mxu1 %v18049_v32  ;;  %v13765_v32 = vld [vmem:[#allocation2 + $0x18] sm:$0xff]  }
 0x4e1   : > { %12821 = vmatprep.mubr.bf16.mxu1 %v18052_v57  ;;  %12850 = vmatpush3.bf16.msra.mxu1 %v13759_v53  ;;  %v18082_v53 = vcombine.low %v18080_v15, %v18081_v40  ;;  %v18086_v57 = vcombine.low %v18084_v13, %v18085_v37  ;;  %v9328_v37 = vld [vmem:[#allocation2 + $0x30] sm:$0xf] }
 0x4e2   : > { %12851 = vmatprep.subr.bf16.mxu1 %v13760_v43 }
 0x4e5   : > { %12852 = vmatpush3.bf16.msra.mxu1 %v13760_v43  ;;  %v5769_v43 = vld [vmem:[#allocation2 + $0xd4] sm:$0x1] }
 0x4e6   : > { %12853 = vmatprep.subr.bf16.mxu1 %v13761_v51  ;;  %v5770_v1 = vsel %vm15972_vm10, 0, %v5769_v43  ;;  %v13781_v43 = vld [vmem:[#allocation2 + $0x9c] sm:$0xff]  }
 0x4e7   : > { %5771 = vst [vmem:[#allocation2 + $0xd4] sm:$0x1] %v5770_v1  ;;  %v9390_v1 = vshll.u32 %v18089_v58, 16  ;;  %v17402_v58 = vld [vmem:[#allocation2 + $0xd0] sm:$0xf] }
 0x4e8   : > { %12822 = vmatmul.mubr.bf16.gmra.mrb[8].mxu1 %v18055_v48  ;;  %v13769_v48 = vld [vmem:[#allocation2 + $0x3c] sm:$0xff]  }
 0x4e9   : > { %12825 = vmatprep.mubr.bf16.mxu1 %v18058_v3  ;;  %12854 = vmatpush3.bf16.msra.mxu1 %v13761_v51  ;;  %v13766_v51 = vld [vmem:[#allocation2 + $0x24] sm:$0xff]   ;;  %v13779_v3 = vld [vmem:[#allocation3 + $0x1e0] sm:$0xff]  }
 0x4ea   : > { %12855 = vmatprep.subr.bf16.mxu1 %v13762_v6 }
 0x4ed   : > { %12856 = vmatpush3.bf16.msra.mxu1 %v13762_v6  ;;  %v13770_v6 = vld [vmem:[#allocation3 + $0x1c8] sm:$0xff]  }
 0x4ee   : > { %12857 = vmatprep.subr.bf16.mxu1 %v13763_v35 }
 0x4f0   : > { %12826 = vmatmul.mubr.bf16.gmra.mrb[12].mxu1 %v18061_v27  ;;  %v13775_v27 = vld [vmem:[#allocation2 + $0x6c] sm:$0xff]  }
 0x4f1   : > { %12829 = vmatprep.mubr.bf16.mxu1 %v18064_v59  ;;  %12858 = vmatpush3.bf16.msra.mxu1 %v13763_v35  ;;  %v13772_v35 = vld [vmem:[#allocation2 + $0x54] sm:$0xff]  }
 0x4f2   : > { %12859 = vmatprep.subr.bf16.mxu1 %v13764_v55  ;;  %v9322_v59 = vld [vmem:[#allocation2 + $0x18] sm:$0xf] }
 0x4f3   : > { %v9371_v60 = vshrl.u32 %v9322_v59, 16  ;;  %v9374_v9 = vshll.u32 %v9322_v59, 16 }
 0x4f5   : > { %12860 = vmatpush3.bf16.msra.mxu1 %v13764_v55  ;;  %v13782_v55 = vld [vmem:[#allocation3 + $0x1e8] sm:$0xff]   ;;  %v9376_v7 = vrot.slane %v9374_v9, 5 }
 0x4f6   : > { %12893 = vmatprep.subr.bf16.mxu1 %v13767_v22 }
 0x4f8   : > { %12830 = vmatmul.mubr.bf16.gmra.mrb[16].mxu1 %v18067_v36  ;;  %v13778_v36 = vld [vmem:[#allocation2 + $0x84] sm:$0xff]  }
 0x4f9   : > { %12833 = vmatprep.mubr.bf16.mxu1 %v18070_v49  ;;  %v18087_v49 = vld [vmem:[#allocation37_spill] sm:$0xff] }
 0x4fa   : > { %v9380_v44 = vshll.u32 %v18087_v49, 16  ;;  %v9384_v56 = vshrl.u32 %v18087_v49, 16  ;;  %v13784_v49 = vld [vmem:[#allocation2 + $0xb4] sm:$0xff]  }
 0x4fc   : > { %v9382_v15 = vrot.slane %v9380_v44, 5  ;;  %v9386_v40 = vrot.slane %v9384_v56, 4 }
 0x500   : > { %12834 = vmatmul.mubr.bf16.gmra.mrb[20].mxu1 %v18073_v34  ;;  %v9373_v34 = vrot.slane %v9371_v60, 4  ;;  %v9334_v60 = vld [vmem:[#allocation2 + $0x48] sm:$0xf] }
 0x501   : > { %12837 = vmatprep.mubr.bf16.mxu1 %v18076_v25  ;;  %v9398_v25 = vshll.u32 %v9325_v20, 16 }
 0x503   : > { %v9400_v13 = vrot.slane %v9398_v25, 5 }
 0x508   : > { %12838 = vmatmul.mubr.bf16.gmra.mrb[24].mxu1 %v18079_v31  ;;  %v9408_v31 = vshrl.u32 %v18088_v38, 16  ;;  %v18092_v38 = vld [vmem:[#allocation42_spill] sm:$0xff] }
 0x509   : > { %12841 = vmatprep.mubr.bf16.mxu1 %v18082_v53  ;;  %v9377_v53 = vor.u32 %v9376_v7, %v9373_v34 }
 0x510   : > { %12842 = vmatmul.mubr.bf16.gmra.mrb[28].mxu1 %v18086_v57  ;;  %v13783_v57 = vld [vmem:[#allocation2 + $0xa8] sm:$0xff]  }
 0x511   : > { %12861 = vmatprep.mubr.bf16.mxu1 %v13765_v32  ;;  %v9397_v32 = vrot.slane %v9395_v4, 4  ;;  %v13786_v4 = vld [vmem:[#allocation2 + $0xc0] sm:$0xff]  }
 0x518   : > { %12862 = vmatmul.mubr.bf16.vlgmr.msra.gmra.mrb[0].mxu1 %v13766_v51  ;;  %v17389_v51 = vrot.slane %v9404_v17, 5  ;;  %v9438_v17 = vshll.u32 %v18092_v38, 16 }
 0x519   : > { %12865 = vmatprep.mubr.bf16.mxu1 %v13768_v62  ;;  %12894 = vmatpush3.bf16.msra.mxu1 %v13767_v22  ;;  %v17381_v22 = vld [vmem:[#allocation3 + $0x200] sm:$0xff]   ;;  %v9387_v62 = vor.u32 %v9386_v40, %v9382_v15  ;;  %v9470_v40 = vshll.u32 %v9334_v60, 16 }
 0x51a   : > { %12895 = vmatprep.subr.bf16.mxu1 %v13770_v6 }
 0x51d   : > { %12896 = vmatpush3.bf16.msra.mxu1 %v13770_v6  ;;  %v9410_v6 = vrot.slane %v9408_v31, 4  ;;  %v9467_v31 = vshrl.u32 %v9334_v60, 16  ;;  %v9337_v60 = vld [vmem:[#allocation2 + $0x54] sm:$0xf] }
 0x51e   : > { %12897 = vmatprep.subr.bf16.mxu1 %v13773_v14 }
 0x520   : > { %12866 = vmatmul.mubr.bf16.gmra.mrb[4].mxu1 %v13769_v48  ;;  %v18090_v48 = vld [vmem:[#allocation40_spill] sm:$0xff] }
 0x521   : > { %12869 = vmatprep.mubr.bf16.mxu1 %v13771_v54  ;;  %12898 = vmatpush3.bf16.msra.mxu1 %v13773_v14  ;;  %v9378_v14 = vrot.slane %v9377_v53, 4  ;;  %v9419_v54 = vshrl.u32 %v9328_v37, 16 }
 0x522   : > { %12899 = vmatprep.subr.bf16.mxu1 %v13776_v5 }
 0x523   : > { %v9383_v9 = vsel %vm14119_vm2, %v9378_v14, %v9382_v15 }
 0x525   : > { %12900 = vmatpush3.bf16.msra.mxu1 %v13776_v5  ;;  %v9414_v5 = vshll.u32 %v18090_v48, 16 }
 0x526   : > { %12901 = vmatprep.subr.bf16.mxu1 %v13779_v3 }
 0x528   : > { %12870 = vmatmul.mubr.bf16.gmra.mrb[8].mxu1 %v13772_v35  ;;  %v9392_v35 = vrot.slane %v9390_v1, 5  ;;  %v17404_v1 = vld [vmem:[#allocation2 + $0xd4] sm:$0x1] }
 0x529   : > { %12873 = vmatprep.mubr.bf16.mxu1 %v13774_v21  ;;  %12902 = vmatpush3.bf16.msra.mxu1 %v13779_v3  ;;  %v9422_v3 = vshll.u32 %v9328_v37, 16  ;;  %v9411_v21 = vor.u32 %v9410_v6, %v17389_v51  ;;  %v10247_v6 = vrot.slane %v17402_v58, 5 }
 0x52a   : > { %12903 = vmatprep.subr.bf16.mxu1 %v13782_v55 }
 0x52b   : > { %v9424_v20 = vrot.slane %v9422_v3, 5  ;;  %v9412_v25 = vrot.slane %v9411_v21, 4  ;;  %v10249_v21 = vrot.slane %v10247_v6, 4 }
 0x52d   : > { %12904 = vmatpush3.bf16.msra.mxu1 %v13782_v55  ;;  %v9401_v55 = vor.u32 %v9400_v13, %v9397_v32  ;;  %v18093_v13 = vld [vmem:[#allocation43_spill] sm:$0xff] }
 0x52e   : > { %12905 = vmatprep.subr.bf16.mxu1 %v13785_v24  ;;  %v9452_v37 = vshll.u32 %v18093_v13, 16 }
 0x52f   : > { %v9402_v56 = vrot.slane %v9401_v55, 4  ;;  %v9472_v55 = vrot.slane %v9470_v40, 5  ;;  %v9491_v40 = vshrl.u32 %v9337_v60, 16 }
 0x530   : > { %12874 = vmatmul.mubr.bf16.gmra.mrb[12].mxu1 %v13775_v27  ;;  %v9388_v27 = vrot.slane %v9387_v62, 4  ;;  %v10250_v62 = vrot.slane %v17404_v1, 5 }
 0x531   : > { %12877 = vmatprep.mubr.bf16.mxu1 %v13777_v23  ;;  %12906 = vmatpush3.bf16.msra.mxu1 %v13785_v24  ;;  %v9331_v24 = vld [vmem:[#allocation2 + $0x3c] sm:$0xf]  ;;  %v9407_v3 = vsel %vm14119_vm2, %v9402_v56, %v17389_v51  ;;  %v9440_v51 = vrot.slane %v9438_v17, 5  ;;  %v17426_v56 = vrot.slane %v9452_v37, 5 }
 0x532   : > { %12907 = vmatprep.subr.bf16.mxu1 %v13788_v16  ;;  %v9393_v44 = vsel %vm14119_vm2, %v9388_v27, %v9392_v35  ;;  %v9443_v34 = vshrl.u32 %v9331_v24, 16  ;;  %v9446_v7 = vshll.u32 %v9331_v24, 16  ;;  %v9469_v35 = vrot.slane %v9467_v31, 4  ;;  %v13787_v24 = vld [vmem:[#allocation2 + $0xcc] sm:$0xff]  }
 0x533   : > { %v11590_v53 = vcombine.low %v9383_v9, %v9393_v44 }
 0x534   : > { %v9445_v14 = vrot.slane %v9443_v34, 4  ;;  %v9448_v48 = vrot.slane %v9446_v7, 5  ;;  %v9340_v7 = vld [vmem:[#allocation2 + $0x60] sm:$0xf]  ;;  %v9473_v31 = vor.u32 %v9472_v55, %v9469_v35  ;;  %v13834_v35 = vld [vmem:[#allocation2 + $0x50] sm:$0x1] }
 0x535   : > { %12908 = vmatpush3.bf16.msra.mxu1 %v13788_v16  ;;  %v18091_v16 = vld [vmem:[#allocation41_spill] sm:$0xff]  ;;  %v9486_v55 = vshll.u32 %v13834_v35, 16 }
 0x536   : > { %12941 = vmatprep.subr.bf16.mxu1 %v17381_v22  ;;  %v9428_v23 = vshll.u32 %v18091_v16, 16  ;;  %v9432_v59 = vshrl.u32 %v18091_v16, 16  ;;  %v18094_v16 = vld [vmem:[#allocation44_spill] sm:$0xff]  ;;  %v9449_v44 = vor.u32 %v9448_v48, %v9445_v14 }
 0x538   : > { %12878 = vmatmul.mubr.bf16.gmra.mrb[16].mxu1 %v13778_v36  ;;  %v9416_v36 = vrot.slane %v9414_v5, 5  ;;  %v9434_v15 = vrot.slane %v9432_v59, 4  ;;  %v9456_v5 = vshrl.u32 %v18093_v13, 16  ;;  %v9480_v59 = vshrl.u32 %v18094_v16, 16  ;;  %v13833_v13 = vld [vmem:[#allocation2 + $0x58] sm:$0xf] }
 0x539   : > { %12881 = vmatprep.mubr.bf16.mxu1 %v13780_v61  ;;  %v9421_v61 = vrot.slane %v9419_v54, 4  ;;  %v9500_v37 = vshll.u32 %v13833_v13, 16 }
 0x53a   : > { %v9458_v34 = vrot.slane %v9456_v5, 4  ;;  %v9482_v0 = vrot.slane %v9480_v59, 4  ;;  %v9450_v5 = vrot.slane %v9449_v44, 4 }
 0x53b   : > { %v9425_v32 = vor.u32 %v9424_v20, %v9421_v61  ;;  %v9417_v61 = vsel %vm14119_vm2, %v9412_v25, %v9416_v36  ;;  %v13832_v25 = vld [vmem:[#allocation2 + $0x44] sm:$0x1] }
 0x53c   : > { %v11591_v38 = vcombine.low %v9407_v3, %v9417_v61  ;;  %v9462_v17 = vshll.u32 %v13832_v25, 16  ;;  %v9474_v3 = vrot.slane %v9473_v31, 4  ;;  %v17439_v61 = vrot.slane %v9500_v37, 5 }
 0x53d   : > { %v9426_v20 = vrot.slane %v9425_v32, 4  ;;  %v9488_v25 = vrot.slane %v9486_v55, 5 }
 0x540   : > { %12882 = vmatmul.mubr.bf16.gmra.mrb[20].mxu1 %v13781_v43  ;;  %v17400_v43 = vrot.slane %v9428_v23, 5  ;;  %v9476_v23 = vshll.u32 %v18094_v16, 16 }
 0x541   : > { %12885 = vmatprep.mubr.bf16.mxu1 %v13783_v57  ;;  %v10091_v57 = vld [vmem:[#allocation2 + $0xcc] sm:$0xe] }
 0x542   : > { %v11629_v54 = vrot.slane %v10091_v57, 9  ;;  %v9435_v27 = vor.u32 %v9434_v15, %v17400_v43  ;;  %v9494_v15 = vshll.u32 %v9337_v60, 16  ;;  %v17430_v32 = vrot.slane %v9476_v23, 5  ;;  %v13835_v23 = vld [vmem:[#allocation2 + $0x64] sm:$0xf] }
 0x543   : > { %v9504_v57 = vshrl.u32 %v13833_v13, 16  ;;  %v9431_v14 = vsel %vm14119_vm2, %v9426_v20, %v17400_v43  ;;  %v9524_v59 = vshll.u32 %v13835_v23, 16  ;;  %v9528_v60 = vshrl.u32 %v13835_v23, 16  ;;  %v13836_v13 = vld [vmem:[#allocation2 + $0x5c] sm:$0x1] }
 0x544   : > { %v17418_v9 = vsel %vm14449_vm5, %v11629_v54, %v10247_v6  ;;  %v9436_v36 = vrot.slane %v9435_v27, 4  ;;  %v9515_v6 = vshrl.u32 %v9340_v7, 16  ;;  %v9459_v54 = vor.u32 %v9458_v34, %v17426_v56  ;;  %v13790_v34 = vld [vmem:[#allocation3 + $0x208] sm:$0xff]  }
 0x545   : > { %v9464_v27 = vrot.slane %v9462_v17, 5  ;;  %v9483_v16 = vor.u32 %v9482_v0, %v17430_v32  ;;  %v9506_v43 = vrot.slane %v9504_v57, 4  ;;  %v9510_v37 = vshll.u32 %v13836_v13, 16  ;;  %v13792_v13 = vld [vmem:[#allocation3 + $0x218] sm:$0xff]  }
 0x546   : > { %v9441_v48 = vsel %vm14119_vm2, %v9436_v36, %v9440_v51  ;;  %v9517_v20 = vrot.slane %v9515_v6, 4  ;;  %v17447_v57 = vrot.slane %v9524_v59, 5  ;;  %v9530_v6 = vrot.slane %v9528_v60, 4 }
 0x547   : > { %v11592_v44 = vcombine.low %v9431_v14, %v9441_v48  ;;  %v9484_v0 = vrot.slane %v9483_v16, 4  ;;  %v9507_v14 = vor.u32 %v9506_v43, %v17439_v61  ;;  %v13837_v48 = vld [vmem:[#allocation2 + $0x70] sm:$0xf]  ;;  %v9512_v60 = vrot.slane %v9510_v37, 5 }
 0x548   : > { %12886 = vmatmul.mubr.bf16.gmra.mrb[24].mxu1 %v13784_v49  ;;  %v17424_v49 = vsel %vm14449_vm5, %v10249_v21, %v10250_v62  ;;  %v9518_v62 = vshll.u32 %v9340_v7, 16  ;;  %v9493_v21 = vrot.slane %v9491_v40, 4  ;;  %v9460_v7 = vrot.slane %v9459_v54, 4 }
 0x549   : > { %12889 = vmatprep.mubr.bf16.mxu1 %v13786_v4  ;;  %v11645_v4 = vcombine.low %v17418_v9, %v17424_v49  ;;  %v9455_v40 = vsel %vm14119_vm2, %v9450_v5, %v17426_v56  ;;  %v9548_v5 = vshll.u32 %v13837_v48, 16  ;;  %v9552_v54 = vshrl.u32 %v13837_v48, 16 }
 0x54a   : > { %v9520_v51 = vrot.slane %v9518_v62, 5  ;;  %v9346_v62 = vld [vmem:[#allocation2 + $0x78] sm:$0xf]  ;;  %v9531_v43 = vor.u32 %v9530_v6, %v17447_v57 }
 0x54b   : > { %v9566_v16 = vshll.u32 %v9346_v62, 16 }
 0x54c   : > { %v9521_v56 = vor.u32 %v9520_v51, %v9517_v20  ;;  %v9508_v20 = vrot.slane %v9507_v14, 4  ;;  %v17456_v51 = vrot.slane %v9548_v5, 5 }
 0x54d   : > { %v9568_v6 = vrot.slane %v9566_v16, 5 }
 0x54e   : > { %v9513_v14 = vsel %vm14119_vm2, %v9508_v20, %v9512_v60  ;;  %v13842_v60 = vld [vmem:[#allocation2 + $0x88] sm:$0xf] }
 0x54f   : > { %v9600_v20 = vshrl.u32 %v13842_v60, 16 }
 0x550   : > { %12890 = vmatmul.mubr.bf16.gmra.mrb[28].mxu1 %v13787_v24  ;;  %v9343_v24 = vld [vmem:[#allocation2 + $0x6c] sm:$0xf] }
 0x551   : > { %12909 = vmatprep.mubr.bf16.mxu1 %v11590_v53  ;;  %v9496_v53 = vrot.slane %v9494_v15, 5  ;;  %v9539_v31 = vshrl.u32 %v9343_v24, 16  ;;  %v9542_v36 = vshll.u32 %v9343_v24, 16  ;;  %v9479_v15 = vsel %vm14119_vm2, %v9474_v3, %v17430_v32  ;;  %v13838_v3 = vld [vmem:[#allocation2 + $0x68] sm:$0x1] }
 0x552   : > { %v9465_v32 = vsel %vm14119_vm2, %v9460_v7, %v9464_v27  ;;  %v9534_v35 = vshll.u32 %v13838_v3, 16  ;;  %v9522_v27 = vrot.slane %v9521_v56, 4  ;;  %v9349_v7 = vld [vmem:[#allocation2 + $0x84] sm:$0xf]  ;;  %v9532_v56 = vrot.slane %v9531_v43, 4 }
 0x553   : > { %v9497_v17 = vor.u32 %v9496_v53, %v9493_v21  ;;  %v9541_v55 = vrot.slane %v9539_v31, 4  ;;  %v9544_v21 = vrot.slane %v9542_v36, 5  ;;  %v9489_v53 = vsel %vm14119_vm2, %v9484_v0, %v9488_v25  ;;  %v13839_v25 = vld [vmem:[#allocation2 + $0x7c] sm:$0xf] }
 0x554   : > { %v11593_v23 = vcombine.low %v9455_v40, %v9465_v32  ;;  %v11594_v59 = vcombine.low %v9479_v15, %v9489_v53  ;;  %v9536_v31 = vrot.slane %v9534_v35, 5  ;;  %v9576_v0 = vshrl.u32 %v13839_v25, 16  ;;  %v13840_v15 = vld [vmem:[#allocation2 + $0x74] sm:$0x1] }
 0x555   : > { %v9498_v24 = vrot.slane %v9497_v17, 4  ;;  %v9545_v36 = vor.u32 %v9544_v21, %v9541_v55  ;;  %v9572_v17 = vshll.u32 %v13839_v25, 16  ;;  %v9587_v48 = vshrl.u32 %v9349_v7, 16 }
 0x556   : > { %v9590_v5 = vshll.u32 %v9349_v7, 16  ;;  %v9537_v35 = vsel %vm14119_vm2, %v9532_v56, %v9536_v31  ;;  %v9578_v53 = vrot.slane %v9576_v0, 4 }
 0x557   : > { %v9503_v40 = vsel %vm14119_vm2, %v9498_v24, %v17439_v61  ;;  %v9546_v55 = vrot.slane %v9545_v36, 4  ;;  %v17469_v21 = vrot.slane %v9572_v17, 5  ;;  %v13793_v24 = vld [vmem:[#allocation3 + $0x220] sm:$0xff]  }
 0x558   : > { %12910 = vmatmul.mubr.bf16.vlgmr.msra.gmra.mrb[0].mxu1 %v11591_v38  ;;  %v13791_v38 = vld [vmem:[#allocation3 + $0x210] sm:$0xff]   ;;  %v9592_v43 = vrot.slane %v9590_v5, 5  ;;  %v11595_v17 = vcombine.low %v9503_v40, %v9513_v14  ;;  %v9602_v40 = vrot.slane %v9600_v20, 4 }
 0x559   : > { %12913 = vmatprep.mubr.bf16.mxu1 %v11592_v44  ;;  %12942 = vmatpush3.bf16.msra.mxu1 %v17381_v22  ;;  %v9563_v22 = vshrl.u32 %v9346_v62, 16  ;;  %v9554_v44 = vrot.slane %v9552_v54, 4  ;;  %v9352_v62 = vld [vmem:[#allocation2 + $0x90] sm:$0xf]  ;;  %v9527_v54 = vsel %vm14119_vm2, %v9522_v27, %v17447_v57  ;;  %v9596_v57 = vshll.u32 %v13842_v60, 16 }
 0x55a   : > { %12943 = vmatprep.subr.bf16.mxu1 %v13790_v34  ;;  %v9611_v61 = vshrl.u32 %v9352_v62, 16  ;;  %v9614_v3 = vshll.u32 %v9352_v62, 16  ;;  %v13843_v27 = vld [vmem:[#allocation2 + $0x94] sm:$0xf]  ;;  %v11596_v62 = vcombine.low %v9527_v54, %v9537_v35  ;;  %v9579_v0 = vor.u32 %v9578_v53, %v17469_v21  ;;  %v9358_v54 = vld [vmem:[#allocation2 + $0xa8] sm:$0xf] }
 0x55b   : > { %v9565_v37 = vrot.slane %v9563_v22, 4  ;;  %v9555_v32 = vor.u32 %v9554_v44, %v17456_v51  ;;  %v9620_v44 = vshll.u32 %v13843_v27, 16  ;;  %v9624_v25 = vshrl.u32 %v13843_v27, 16  ;;  %v13844_v53 = vld [vmem:[#allocation2 + $0xa0] sm:$0xf] }
 0x55c   : > { %v9613_v31 = vrot.slane %v9611_v61, 4  ;;  %v9616_v36 = vrot.slane %v9614_v3, 5  ;;  %v17477_v5 = vrot.slane %v9596_v57, 5  ;;  %v13845_v60 = vld [vmem:[#allocation2 + $0x8c] sm:$0x1] }
 0x55d   : > { %12944 = vmatpush3.bf16.msra.mxu1 %v13790_v34  ;;  %v9558_v34 = vshll.u32 %v13840_v15, 16  ;;  %v9569_v16 = vor.u32 %v9568_v6, %v9565_v37  ;;  %v9556_v7 = vrot.slane %v9555_v32, 4  ;;  %v9355_v15 = vld [vmem:[#allocation2 + $0x9c] sm:$0xf]  ;;  %v9551_v37 = vsel %vm14119_vm2, %v9546_v55, %v17456_v51 }
 0x55e   : > { %12945 = vmatprep.subr.bf16.mxu1 %v13791_v38  ;;  %v17479_v14 = vrot.slane %v9620_v44, 5  ;;  %v9617_v32 = vor.u32 %v9616_v36, %v9613_v31  ;;  %v9626_v61 = vrot.slane %v9624_v25, 4  ;;  %v9635_v3 = vshrl.u32 %v9355_v15, 16  ;;  %v13846_v44 = vld [vmem:[#allocation2 + $0x98] sm:$0x1] }
 0x55f   : > { %v9560_v22 = vrot.slane %v9558_v34, 5  ;;  %v13794_v34 = vld [vmem:[#allocation3 + $0x228] sm:$0xff]   ;;  %v9570_v56 = vrot.slane %v9569_v16, 4  ;;  %v9638_v35 = vshll.u32 %v9355_v15, 16  ;;  %v9580_v55 = vrot.slane %v9579_v0, 4 }
 0x560   : > { %12914 = vmatmul.mubr.bf16.gmra.mrb[4].mxu1 %v11593_v23  ;;  %v13841_v23 = vld [vmem:[#allocation2 + $0x80] sm:$0x1]  ;;  %v9648_v16 = vshrl.u32 %v13844_v53, 16  ;;  %v9606_v57 = vshll.u32 %v13845_v60, 16  ;;  %v9603_v27 = vor.u32 %v9602_v40, %v17477_v5  ;;  %v9618_v31 = vrot.slane %v9617_v32, 4 }
 0x561   : > { %12917 = vmatprep.mubr.bf16.mxu1 %v11594_v59  ;;  %12946 = vmatpush3.bf16.msra.mxu1 %v13791_v38  ;;  %v9582_v59 = vshll.u32 %v13841_v23, 16  ;;  %v9589_v38 = vrot.slane %v9587_v48, 4  ;;  %v9561_v6 = vsel %vm14119_vm2, %v9556_v7, %v9560_v22  ;;  %v9644_v22 = vshll.u32 %v13844_v53, 16  ;;  %v13795_v23 = vld [vmem:[#allocation3 + $0x230] sm:$0xff]  }
 0x562   : > { %12947 = vmatprep.subr.bf16.mxu1 %v13792_v13  ;;  %v11597_v51 = vcombine.low %v9551_v37, %v9561_v6  ;;  %v9630_v7 = vshll.u32 %v13846_v44, 16  ;;  %v9627_v36 = vor.u32 %v9626_v61, %v17479_v14  ;;  %v9637_v25 = vrot.slane %v9635_v3, 4  ;;  %v13847_v0 = vld [vmem:[#allocation2 + $0xac] sm:$0xf]  ;;  %v13796_v6 = vld [vmem:[#allocation3 + $0x238] sm:$0xff]  }
 0x563   : > { %v9584_v48 = vrot.slane %v9582_v59, 5  ;;  %v9575_v59 = vsel %vm14119_vm2, %v9570_v56, %v17469_v21  ;;  %v9650_v21 = vrot.slane %v9648_v16, 4  ;;  %v9668_v15 = vshll.u32 %v13847_v0, 16  ;;  %v9361_v61 = vld [vmem:[#allocation2 + $0xb4] sm:$0xf] }
 0x564   : > { %v9672_v37 = vshrl.u32 %v13847_v0, 16  ;;  %v9632_v32 = vrot.slane %v9630_v7, 5  ;;  %v9623_v3 = vsel %vm14119_vm2, %v9618_v31, %v17479_v14  ;;  %v9628_v16 = vrot.slane %v9627_v36, 4 }
 0x565   : > { %12948 = vmatpush3.bf16.msra.mxu1 %v13792_v13  ;;  %v9593_v13 = vor.u32 %v9592_v43, %v9589_v38  ;;  %v9659_v38 = vshrl.u32 %v9358_v54, 16  ;;  %v9662_v43 = vshll.u32 %v9358_v54, 16  ;;  %v9608_v54 = vrot.slane %v9606_v57, 5 }
 0x566   : > { %12949 = vmatprep.subr.bf16.mxu1 %v13793_v24  ;;  %v9674_v60 = vrot.slane %v9672_v37, 4  ;;  %v9683_v57 = vshrl.u32 %v9361_v61, 16  ;;  %v9633_v14 = vsel %vm14119_vm2, %v9628_v16, %v9632_v32 }
 0x567   : > { %v9594_v20 = vrot.slane %v9593_v13, 4  ;;  %v9664_v13 = vrot.slane %v9662_v43, 5  ;;  %v11600_v44 = vcombine.low %v9623_v3, %v9633_v14 }
 0x568   : > { %12918 = vmatmul.mubr.bf16.gmra.mrb[8].mxu1 %v11595_v17  ;;  %v9640_v17 = vrot.slane %v9638_v35, 5 }
 0x569   : > { %12921 = vmatprep.mubr.bf16.mxu1 %v11596_v62  ;;  %12950 = vmatpush3.bf16.msra.mxu1 %v13793_v24  ;;  %v9585_v24 = vsel %vm14119_vm2, %v9580_v55, %v9584_v48  ;;  %v17488_v62 = vrot.slane %v9644_v22, 5  ;;  %v9661_v48 = vrot.slane %v9659_v38, 4  ;;  %v9599_v40 = vsel %vm14119_vm2, %v9594_v20, %v17477_v5  ;;  %v13848_v55 = vld [vmem:[#allocation2 + $0xa4] sm:$0x1]  ;;  %v9364_v22 = vld [vmem:[#allocation2 + $0xc0] sm:$0xf] }
 0x56a   : > { %12951 = vmatprep.subr.bf16.mxu1 %v13794_v34  ;;  %v11598_v56 = vcombine.low %v9575_v59, %v9585_v24  ;;  %v9641_v35 = vor.u32 %v9640_v17, %v9637_v25  ;;  %v9654_v53 = vshll.u32 %v13848_v55, 16  ;;  %v9670_v59 = vrot.slane %v9668_v15, 5  ;;  %v13849_v25 = vld [vmem:[#allocation2 + $0xb0] sm:$0x1]  ;;  %v9367_v15 = vld [vmem:[#allocation2 + $0xcc] sm:$0xf] }
 0x56b   : > { %v9665_v5 = vor.u32 %v9664_v13, %v9661_v48  ;;  %v9686_v38 = vshll.u32 %v9361_v61, 16  ;;  %v9707_v24 = vshrl.u32 %v9364_v22, 16  ;;  %v9710_v20 = vshll.u32 %v9364_v22, 16  ;;  %v13851_v61 = vld [vmem:[#allocation2 + $0xc4] sm:$0xf] }
 0x56c   : > { %v9656_v7 = vrot.slane %v9654_v53, 5  ;;  %v9675_v36 = vor.u32 %v9674_v60, %v9670_v59  ;;  %v9678_v17 = vshll.u32 %v13849_v25, 16  ;;  %v9731_v3 = vshrl.u32 %v9367_v15, 16 }
 0x56d   : > { %12952 = vmatpush3.bf16.msra.mxu1 %v13794_v34  ;;  %v9604_v34 = vrot.slane %v9603_v27, 4  ;;  %v9666_v37 = vrot.slane %v9665_v5, 4  ;;  %v9688_v48 = vrot.slane %v9686_v38, 5  ;;  %v9712_v32 = vrot.slane %v9710_v20, 5  ;;  %v13852_v38 = vld [vmem:[#allocation2 + $0xbc] sm:$0x1] }
 0x56e   : > { %12953 = vmatprep.subr.bf16.mxu1 %v13795_v23  ;;  %v9744_v55 = vshrl.u32 %v17402_v58, 16  ;;  %v9680_v16 = vrot.slane %v9678_v17, 5  ;;  %v9676_v60 = vrot.slane %v9675_v36, 4 }
 0x56f   : > { %v9609_v43 = vsel %vm14119_vm2, %v9604_v34, %v9608_v54  ;;  %v9709_v54 = vrot.slane %v9707_v24, 4  ;;  %v9720_v34 = vshrl.u32 %v13851_v61, 16  ;;  %v9671_v14 = vsel %vm14119_vm2, %v9666_v37, %v9670_v59 }
 0x570   : > { %12922 = vmatmul.mubr.bf16.gmra.mrb[12].mxu1 %v11597_v51  ;;  %v9651_v51 = vor.u32 %v9650_v21, %v17488_v62  ;;  %v11599_v27 = vcombine.low %v9599_v40, %v9609_v43  ;;  %v13850_v21 = vld [vmem:[#allocation2 + $0xb8] sm:$0xf]  ;;  %v9716_v40 = vshll.u32 %v13851_v61, 16  ;;  %v9702_v43 = vshll.u32 %v13852_v38, 16 }
 0x571   : > { %12925 = vmatprep.mubr.bf16.mxu1 %v11598_v56  ;;  %12954 = vmatpush3.bf16.msra.mxu1 %v13795_v23  ;;  %v9642_v23 = vrot.slane %v9641_v35, 4  ;;  %v9692_v0 = vshll.u32 %v13850_v21, 16  ;;  %v9685_v56 = vrot.slane %v9683_v57, 4  ;;  %v9696_v13 = vshrl.u32 %v13850_v21, 16 }
 0x572   : > { %12955 = vmatprep.subr.bf16.mxu1 %v13796_v6  ;;  %v9652_v31 = vrot.slane %v9651_v51, 4  ;;  %v9740_v35 = vshll.u32 %v17402_v58, 16  ;;  %v9713_v24 = vor.u32 %v9712_v32, %v9709_v54  ;;  %v9718_v20 = vrot.slane %v9716_v40, 5 }
 0x573   : > { %v9647_v53 = vsel %vm14119_vm2, %v9642_v23, %v17488_v62  ;;  %v9694_v51 = vrot.slane %v9692_v0, 5  ;;  %v9689_v5 = vor.u32 %v9688_v48, %v9685_v56  ;;  %v9698_v57 = vrot.slane %v9696_v13, 4 }
 0x574   : > { %v9657_v22 = vsel %vm14119_vm2, %v9652_v31, %v9656_v7  ;;  %v9722_v58 = vrot.slane %v9720_v34, 4  ;;  %v9742_v25 = vrot.slane %v9740_v35, 5  ;;  %v9746_v62 = vrot.slane %v9744_v55, 4  ;;  %v13853_v31 = vld [vmem:[#allocation2 + $0xc8] sm:$0x1] }
 0x575   : > { %12956 = vmatpush3.bf16.msra.mxu1 %v13796_v6  ;;  %v9734_v6 = vshll.u32 %v9367_v15, 16  ;;  %v11601_v23 = vcombine.low %v9647_v53, %v9657_v22  ;;  %v9681_v7 = vsel %vm14119_vm2, %v9676_v60, %v9680_v16  ;;  %v9726_v36 = vshll.u32 %v13853_v31, 16 }
 0x576   : > { %v11602_v17 = vcombine.low %v9671_v14, %v9681_v7  ;;  %v9690_v21 = vrot.slane %v9689_v5, 4  ;;  %v9699_v0 = vor.u32 %v9698_v57, %v9694_v51  ;;  %v9714_v15 = vrot.slane %v9713_v24, 4  ;;  %v18095_v5 = vld [vmem:[#allocation45_spill] sm:$0xff]  ;;  %v18096_v57 = vld [vmem:[#allocation46_spill] sm:$0xff]  ;;  %v18099_v14 = vld [vmem:[#allocation48_spill] sm:$0xff] }
 0x577   : > { %v9723_v56 = vor.u32 %v9722_v58, %v9718_v20  ;;  %v9704_v59 = vrot.slane %v9702_v43, 5  ;;  %v9747_v48 = vor.u32 %v9746_v62, %v9742_v25  ;;  %v9750_v13 = vshll.u32 %v17404_v1, 16  ;;  %v18098_v43 = vld [vmem:[#allocation47_spill] sm:$0xff]  ;;  %v18102_v58 = vld [vmem:[#allocation50_spill] sm:$0xff]  ;;  %v18107_v62 = vld [vmem:[#allocation52_spill] sm:$0xff] }
 0x578   : > { %12926 = vmatmul.mubr.bf16.gmra.mrb[16].mxu1 %v11599_v27  ;;  %v9733_v27 = vrot.slane %v9731_v3, 4  ;;  %v9728_v54 = vrot.slane %v9726_v36, 5  ;;  %v9695_v32 = vsel %vm14119_vm2, %v9690_v21, %v9694_v51  ;;  %v9700_v61 = vrot.slane %v9699_v0, 4  ;;  %v18109_v7 = vld [vmem:[#allocation53_spill] sm:$0xff]  ;;  %v18111_v36 = vld [vmem:[#allocation54_spill] sm:$0xff]  ;;  %v18115_v0 = vld [vmem:[#allocation56_spill] sm:$0xff] }
 0x579   : > { %12929 = vmatprep.mubr.bf16.mxu1 %v11600_v44  ;;  %v9736_v44 = vrot.slane %v9734_v6, 5  ;;  %v9719_v40 = vsel %vm14119_vm2, %v9714_v15, %v9718_v20  ;;  %v9724_v34 = vrot.slane %v9723_v56, 4  ;;  %v9748_v35 = vrot.slane %v9747_v48, 4  ;;  %v18101_v20 = vld [vmem:[#allocation49_spill] sm:$0xff] }
 0x57a   : > { %v9705_v3 = vsel %vm14119_vm2, %v9700_v61, %v9704_v59  ;;  %v9752_v55 = vrot.slane %v9750_v13, 5  ;;  %v18097_v38 = vcombine.low %v18095_v5, %v18096_v57  ;;  %v18100_v24 = vcombine.low %v18098_v43, %v18099_v14  ;;  %v18116_v15 = vld [vmem:[#allocation57_spill] sm:$0xff] }
 0x57b   : > { %v9737_v37 = vor.u32 %v9736_v44, %v9733_v27  ;;  %v11603_v53 = vcombine.low %v9695_v32, %v9705_v3  ;;  %v9729_v22 = vsel %vm14119_vm2, %v9724_v34, %v9728_v54  ;;  %v18103_v27 = vcombine.low %v18101_v20, %v18102_v58  ;;  %v18104_v44 = vld [vmem:[#allocation51_spill] sm:$0xff] }
 0x57c   : > { %v11604_v1 = vcombine.low %v9719_v40, %v9729_v22  ;;  %v9753_v51 = vsel %vm14119_vm2, %v9748_v35, %v9752_v55  ;;  %v18110_v31 = vcombine.low %v17142_v63, %v18109_v7  ;;  %v18117_v10 = vcombine.low %v18115_v0, %v18116_v15  ;;  %v17577_v63 = vld [vmem:[%s17703_s4] ss:$0 sm:$0xff] }
 0x57d   : > { %v9738_v6 = vrot.slane %v9737_v37, 4 }
 0x57f   : > { %v9743_v16 = vsel %vm14119_vm2, %v9738_v6, %v9742_v25  ;;  %v18105_v25 = vcombine.low %v17104_v29, %v18104_v44  ;;  %v18113_v29 = vld [vmem:[#allocation55_spill] sm:$0xff] }
 0x580   : > { %12930 = vmatmul.mubr.bf16.gmra.mrb[20].mxu1 %v11601_v23  ;;  %v11605_v60 = vcombine.low %v9743_v16, %v9753_v51  ;;  %v18108_v23 = vcombine.low %v17132_v2, %v18107_v62  ;;  %v18114_v21 = vcombine.low %v17163_v28, %v18113_v29  ;;  %v18119_v2 = vcombine.low %v17187_v42, %v18118_v8 }
 0x581   : > { %12933 = vmatprep.mubr.bf16.mxu1 %v11602_v17  ;;  %v18112_v17 = vcombine.low %v17146_v52, %v18111_v36 }
 0x588   : > { %12934 = vmatmul.mubr.bf16.gmra.mrb[24].mxu1 %v11603_v53 }
 0x589   : > { %12937 = vmatprep.mubr.bf16.mxu1 %v11604_v1 }
 0x590   : > { %12938 = vmatmul.mubr.bf16.gmra.mrb[28].mxu1 %v11605_v60 }
 0x591   : > { %12957 = vmatprep.mubr.bf16.mxu1 %v18097_v38 }
 0x598   : > { %12958 = vmatmul.mubr.bf16.vlgmr.msra.gmra.mrb[0].mxu1 %v18100_v24 }
 0x599   : > { %12961 = vmatprep.mubr.bf16.mxu1 %v18103_v27 }
 0x5a0   : > { %12962 = vmatmul.mubr.bf16.gmra.mrb[4].mxu1 %v18105_v25 }
 0x5a1   : > { %12965 = vmatprep.mubr.bf16.mxu1 %v18106_v46 }
 0x5a8   : > { %12966 = vmatmul.mubr.bf16.gmra.mrb[8].mxu1 %v18108_v23 }
 0x5a9   : > { %12969 = vmatprep.mubr.bf16.mxu1 %v18110_v31 }
 0x5b0   : > { %12970 = vmatmul.mubr.bf16.gmra.mrb[12].mxu1 %v18112_v17 }
 0x5b1   : > { %12973 = vmatprep.mubr.bf16.mxu1 %v18114_v21 }
 0x5b8   : > { %12974 = vmatmul.mubr.bf16.gmra.mrb[16].mxu1 %v18117_v10 }
 0x5b9   : > { %12977 = vmatprep.mubr.bf16.mxu1 %v18119_v2 }
 0x5c0   : > { %12978 = vmatmul.mubr.bf16.gmra.mrb[20].mxu1 %v11641_v18 }
 0x5c1   : > { %12981 = vmatprep.mubr.bf16.mxu1 %v11642_v11 }
 0x5c8   : > { %12982 = vmatmul.mubr.bf16.gmra.mrb[24].mxu1 %v11643_v50 }
 0x5c9   : > { %12985 = vmatprep.mubr.bf16.mxu1 %v11644_v19 }
 0x5d0   : > { %12986 = vmatmul.mubr.bf16.gmra.mrb[28].mxu1 %v11645_v4 }
 0x66b   : > { %v12959_v52 = vpop.f32.mrb[0].mxu1 }
 0x66c   : > { %v10583_v28 = vadd.f32 %v12959_v52, %v17577_v63  ;;  %v10415_v42 = vpop.f32.mrb[1].mxu1 }
 0x66d   : > { %v10581_v45 = vadd.f32 %v17577_v63, %v10415_v42  ;;  %v12960_v12 = vpop.f32.mrb[2].mxu1 }
 0x66e   : > { %v10615_v18 = vmax.f32 %v10583_v28, 0.0  ;;  %v10584_v33 = vadd.f32 %v12960_v12, %v17577_v63  ;;  %v10418_v41 = vpop.f32.mrb[3].mxu1 }
 0x66f   : > { %v10613_v11 = vmax.f32 %v10581_v45, 0.0  ;;  %v10582_v30 = vadd.f32 %v17577_v63, %v10418_v41 }
 0x670   : > { %10647 = vst [vmem:[%s17585_s30 + $0x10] sm:$0xff] %v10615_v18  ;;  %v10616_v47 = vmax.f32 %v10584_v33, 0.0 }
 0x671   : > { %10645 = vst [vmem:[%s17585_s30] sm:$0xff] %v10613_v11  ;;  %v10614_v50 = vmax.f32 %v10582_v30, 0.0 }
 0x672   : > { %10648 = vst [vmem:[%s17585_s30 + $0x18] sm:$0xff] %v10616_v47 }
 0x673   : > { %10646 = vst [vmem:[%s17585_s30 + $0x8] sm:$0xff] %v10614_v50  ;;  %v12963_v39 = vpop.f32.mrb[4].mxu1 }
 0x674   : > { %v10587_v26 = vadd.f32 %v12963_v39, %v17577_v63  ;;  %v10431_v19 = vpop.f32.mrb[5].mxu1 }
 0x675   : > { %v10585_v9 = vadd.f32 %v17577_v63, %v10431_v19  ;;  %v12964_v49 = vpop.f32.mrb[6].mxu1 }
 0x676   : > { %v10619_v4 = vmax.f32 %v10587_v26, 0.0  ;;  %v10588_v56 = vadd.f32 %v12964_v49, %v17577_v63  ;;  %v10434_v59 = vpop.f32.mrb[7].mxu1 }
 0x677   : > { %v10617_v37 = vmax.f32 %v10585_v9, 0.0  ;;  %v10586_v48 = vadd.f32 %v17577_v63, %v10434_v59 }
 0x678   : > { %10651 = vst [vmem:[%s17585_s30 + $0x30] sm:$0xff] %v10619_v4  ;;  %v10620_v13 = vmax.f32 %v10588_v56, 0.0 }
 0x679   : > { %10649 = vst [vmem:[%s17585_s30 + $0x20] sm:$0xff] %v10617_v37  ;;  %v10618_v54 = vmax.f32 %v10586_v48, 0.0 }
 0x67a   : > { %10652 = vst [vmem:[%s17585_s30 + $0x38] sm:$0xff] %v10620_v13 }
 0x67b   : > { %10650 = vst [vmem:[%s17585_s30 + $0x28] sm:$0xff] %v10618_v54  ;;  %v12967_v32 = vpop.f32.mrb[8].mxu1 }
 0x67c   : > { %v10591_v61 = vadd.f32 %v12967_v32, %v17577_v63  ;;  %v10447_v40 = vpop.f32.mrb[9].mxu1 }
 0x67d   : > { %v10589_v34 = vadd.f32 %v17577_v63, %v10447_v40  ;;  %v12968_v3 = vpop.f32.mrb[10].mxu1 }
 0x67e   : > { %v10623_v6 = vmax.f32 %v10591_v61, 0.0  ;;  %v10592_v35 = vadd.f32 %v12968_v3, %v17577_v63  ;;  %v10450_v55 = vpop.f32.mrb[11].mxu1 }
 0x67f   : > { %v10621_v53 = vmax.f32 %v10589_v34, 0.0  ;;  %v10590_v22 = vadd.f32 %v17577_v63, %v10450_v55 }
 0x680   : > { %10655 = vst [vmem:[%s17585_s30 + $0x50] sm:$0xff] %v10623_v6  ;;  %v10624_v1 = vmax.f32 %v10592_v35, 0.0 }
 0x681   : > { %10653 = vst [vmem:[%s17585_s30 + $0x40] sm:$0xff] %v10621_v53  ;;  %v10622_v16 = vmax.f32 %v10590_v22, 0.0 }
 0x682   : > { %10656 = vst [vmem:[%s17585_s30 + $0x58] sm:$0xff] %v10624_v1 }
 0x683   : > { %10654 = vst [vmem:[%s17585_s30 + $0x48] sm:$0xff] %v10622_v16  ;;  %v12971_v51 = vpop.f32.mrb[12].mxu1 }
 0x684   : > { %v10595_v60 = vadd.f32 %v12971_v51, %v17577_v63  ;;  %v10463_v5 = vpop.f32.mrb[13].mxu1 }
 0x685   : > { %v10593_v57 = vadd.f32 %v17577_v63, %v10463_v5  ;;  %v12972_v38 = vpop.f32.mrb[14].mxu1 }
 0x686   : > { %v10627_v43 = vmax.f32 %v10595_v60, 0.0  ;;  %v10596_v14 = vadd.f32 %v12972_v38, %v17577_v63  ;;  %v10466_v24 = vpop.f32.mrb[15].mxu1 }
 0x687   : > { %v10625_v20 = vmax.f32 %v10593_v57, 0.0  ;;  %v10594_v58 = vadd.f32 %v17577_v63, %v10466_v24 }
 0x688   : > { %10659 = vst [vmem:[%s17585_s30 + $0x70] sm:$0xff] %v10627_v43  ;;  %v10628_v27 = vmax.f32 %v10596_v14, 0.0 }
 0x689   : > { %10657 = vst [vmem:[%s17585_s30 + $0x60] sm:$0xff] %v10625_v20  ;;  %v10626_v44 = vmax.f32 %v10594_v58, 0.0 }
 0x68a   : > { %10660 = vst [vmem:[%s17585_s30 + $0x78] sm:$0xff] %v10628_v27 }
 0x68b   : > { %10658 = vst [vmem:[%s17585_s30 + $0x68] sm:$0xff] %v10626_v44  ;;  %v12975_v25 = vpop.f32.mrb[16].mxu1 }
 0x68c   : > { %v10599_v46 = vadd.f32 %v12975_v25, %v17577_v63  ;;  %v10479_v62 = vpop.f32.mrb[17].mxu1 }
 0x68d   : > { %v10597_v23 = vadd.f32 %v17577_v63, %v10479_v62  ;;  %v12976_v7 = vpop.f32.mrb[18].mxu1 }
 0x68e   : > { %v10631_v31 = vmax.f32 %v10599_v46, 0.0  ;;  %v10600_v36 = vadd.f32 %v12976_v7, %v17577_v63  ;;  %v10482_v17 = vpop.f32.mrb[19].mxu1 }
 0x68f   : > { %v10629_v29 = vmax.f32 %v10597_v23, 0.0  ;;  %v10598_v21 = vadd.f32 %v17577_v63, %v10482_v17 }
 0x690   : > { %10663 = vst [vmem:[%s17585_s30 + $0x90] sm:$0xff] %v10631_v31  ;;  %v10632_v0 = vmax.f32 %v10600_v36, 0.0 }
 0x691   : > { %10661 = vst [vmem:[%s17585_s30 + $0x80] sm:$0xff] %v10629_v29  ;;  %v10630_v15 = vmax.f32 %v10598_v21, 0.0 }
 0x692   : > { %10664 = vst [vmem:[%s17585_s30 + $0x98] sm:$0xff] %v10632_v0 }
 0x693   : > { %10662 = vst [vmem:[%s17585_s30 + $0x88] sm:$0xff] %v10630_v15  ;;  %v12979_v10 = vpop.f32.mrb[20].mxu1 }
 0x694   : > { %v10603_v8 = vadd.f32 %v12979_v10, %v17577_v63  ;;  %v10495_v2 = vpop.f32.mrb[21].mxu1 }
 0x695   : > { %v10601_v52 = vadd.f32 %v17577_v63, %v10495_v2  ;;  %v12980_v28 = vpop.f32.mrb[22].mxu1 }
 0x696   : > { %v10635_v42 = vmax.f32 %v10603_v8, 0.0  ;;  %v10604_v45 = vadd.f32 %v12980_v28, %v17577_v63  ;;  %v10498_v12 = vpop.f32.mrb[23].mxu1 }
 0x697   : > { %v10633_v18 = vmax.f32 %v10601_v52, 0.0  ;;  %v10602_v33 = vadd.f32 %v17577_v63, %v10498_v12 }
 0x698   : > { %10667 = vst [vmem:[%s17585_s30 + $0xb0] sm:$0xff] %v10635_v42  ;;  %v10636_v41 = vmax.f32 %v10604_v45, 0.0 }
 0x699   : > { %10665 = vst [vmem:[%s17585_s30 + $0xa0] sm:$0xff] %v10633_v18  ;;  %v10634_v11 = vmax.f32 %v10602_v33, 0.0 }
 0x69a   : > { %10668 = vst [vmem:[%s17585_s30 + $0xb8] sm:$0xff] %v10636_v41 }
 0x69b   : > { %10666 = vst [vmem:[%s17585_s30 + $0xa8] sm:$0xff] %v10634_v11  ;;  %v12983_v30 = vpop.f32.mrb[24].mxu1 }
 0x69c   : > { %v10607_v47 = vadd.f32 %v12983_v30, %v17577_v63  ;;  %v10511_v50 = vpop.f32.mrb[25].mxu1 }
 0x69d   : > { %v10605_v39 = vadd.f32 %v17577_v63, %v10511_v50  ;;  %v12984_v26 = vpop.f32.mrb[26].mxu1 }
 0x69e   : > { %v10639_v19 = vmax.f32 %v10607_v47, 0.0  ;;  %v10608_v9 = vadd.f32 %v12984_v26, %v17577_v63  ;;  %v10514_v49 = vpop.f32.mrb[27].mxu1 }
 0x69f   : > { %v10637_v4 = vmax.f32 %v10605_v39, 0.0  ;;  %v10606_v56 = vadd.f32 %v17577_v63, %v10514_v49 }
 0x6a0   : > { %10671 = vst [vmem:[%s17585_s30 + $0xd0] sm:$0xff] %v10639_v19  ;;  %v10640_v59 = vmax.f32 %v10608_v9, 0.0 }
 0x6a1   : > { %10669 = vst [vmem:[%s17585_s30 + $0xc0] sm:$0xff] %v10637_v4  ;;  %v10638_v37 = vmax.f32 %v10606_v56, 0.0 }
 0x6a2   : > { %10672 = vst [vmem:[%s17585_s30 + $0xd8] sm:$0xff] %v10640_v59 }
 0x6a3   : > { %10670 = vst [vmem:[%s17585_s30 + $0xc8] sm:$0xff] %v10638_v37  ;;  %v12987_v48 = vpop.f32.mrb[28].mxu1 }
 0x6a4   : > { %v10611_v13 = vadd.f32 %v12987_v48, %v17577_v63  ;;  %v10527_v54 = vpop.f32.mrb[29].mxu1 }
 0x6a5   : > { %v10609_v32 = vadd.f32 %v17577_v63, %v10527_v54  ;;  %v12988_v61 = vpop.f32.mrb[30].mxu1 }
 0x6a6   : > { %v10643_v40 = vmax.f32 %v10611_v13, 0.0  ;;  %v10612_v34 = vadd.f32 %v12988_v61, %v17577_v63  ;;  %v10530_v3 = vpop.f32.mrb[31].mxu1 }
 0x6a7   : > { %v10641_v6 = vmax.f32 %v10609_v32, 0.0  ;;  %v10610_v35 = vadd.f32 %v17577_v63, %v10530_v3 }
 0x6a8   : > { %10675 = vst [vmem:[%s17585_s30 + $0xf0] sm:$0xff] %v10643_v40  ;;  %v10644_v55 = vmax.f32 %v10612_v34, 0.0 }
 0x6a9   : > { %10673 = vst [vmem:[%s17585_s30 + $0xe0] sm:$0xff] %v10641_v6  ;;  %v10642_v53 = vmax.f32 %v10610_v35, 0.0 }
 0x6aa   : > { %10676 = vst [vmem:[%s17585_s30 + $0xf8] sm:$0xff] %v10644_v55 }
 0x6ab   : > { %10674 = vst [vmem:[%s17585_s30 + $0xe8] sm:$0xff] %v10642_v53 }
 0x6ac   : > { %13895 = shalt.err (!%p13892_p7)
}
 0x6ad   : > { %s13896_s26 = scalar_lea.hbm %s17649_s16, 4096  ;;  %s13900_s10 = scalar_lea.hbm %s17704_s5, 8192 }
 0x6ae   : > { %p13897_p8 = scmp.ne.s32.totalorder %s17649_s16, %s13896_s26  ;;  %p13901_p1 = scmp.lt.u32.totalorder %s17649_s16, %s17704_s5 }
 0x6af   : > { %p13902_p0 = scmp.lt.u32.totalorder %s13900_s10, %s13896_s26  ;;  %p13904_p6 = scmp.lt.u32.totalorder %s13896_s26, %s17649_s16 }
 0x6b0   : > { %p13898_p11 = pnand %p13897_p8, %p18120_p9 }
 0x6b1   : > { %p13903_p5 = por %p13902_p0, %p13901_p1 }
 0x6b2   : > { %p13899_p13 = pneg %p13898_p11 }
 0x6b3   : > { %p13905_p10 = por %p13904_p6, %p13903_p5 }
 0x6b5   : > { %p13906_p12 = pnand %p13905_p10, %p13899_p13 }
 0x6b7   : > { %13909 = shalt.err (!%p13906_p12)
}
 0x6b8   : > { %s13955_s30 = smov 128   ;;  %s13956_s7 = smov 8  }
 0x6b9   : > { %13506 = dma.vmem_to_hbm [thread:$0]  (%p18120_p9), %s17651_s12, 4096, %s17649_s16, %s17658_s22, %s13955_s30, %s13955_s30, %s13956_s7  }
 0x6ba PF: > { %p13518_p2 = scmp.ge.s32.totalorder %s13948_s21, 2  ;;  %s10706_s13 = sand.u32 1, %s13936_s18  }
 0x6bb   : > { %p18121_p3 = scmp.ne.s32.totalorder %s17812_s29, 0  ;;  %s10707_s14 = scalar_lea.sflag [#allocation5], %s10706_s13 }
 0x6bd   : > { %p13513_p4 = pnand %p13518_p2, %p18121_p3 }
 0x6bf   : > { %13931 = dma.done.wait (!%p13513_p4), %s10707_s14, 4096  }
 0x6c0   : > { %13933 = vsyncadd (!%p13513_p4), %s10707_s14, 4294963200  ;;  %p16_p7 = scmp.ge.s32.totalorder %s14012_s24, 4   ;;  %s18122_s18 = smov %s13940_s19 }
 0x6c1   : > { %s18123_s19 = smov %s13944_s20  ;;  %s18124_s20 = smov %s14023_s27 }
 0x6c2   : > { %s18125_s21 = smov %s14012_s24  ;;  %18 = sbr.rel (!%p16_p7) target bundleno = 4 (0x4), region = 101 }
 0x6c9   :  { %10712 = vsyncpa [#allocation4], 1 }
 0x6ca   :  { %10714 = vsyncpa [#allocation4 + $0x1], 1 }
 0x6cb   :  { %10715 = vsyncpa [#allocation5], 1 }
 0x6cc   :  { %10717 = vsyncpa [#allocation5 + $0x1], 1 }

</bundles_post_ra>
